<compile_context>
chip_gen: v5e
topology: v5e:2x2
jax: 0.10.0
libtpu: 0.0.40
codegen_flags: <defaults>
</compile_context>

<pallas_src>
import math

import jax
import jax.numpy as jnp
from jax.experimental import pallas as pl
from jax.experimental.pallas import tpu as pltpu

HIDDEN = 54 * 2                 # 108 real features (SPOTER hidden_dim)
D_PAD = 128                     # lane-dense padded feature width
N_HEADS = 9                     # nn.Transformer(hidden_dim, 9, ...)
HEAD_DIM = HIDDEN // N_HEADS    # 12
FFN = 2048                      # nn.Transformer default dim_feedforward
OUT_PAD = 128                   # lane-dense padded head-output width
EPS = 1e-5                      # LayerNorm eps


# ---------------------------------------------------------------------------
# In-kernel helpers (trace-time; operate on jnp values loaded from refs).
# ---------------------------------------------------------------------------
def _layernorm(x, gamma, beta):
    # x: (..., D_PAD) with zeros in lanes [HIDDEN:]; statistics over the real HIDDEN features.
    s = jnp.sum(x, axis=-1, keepdims=True)
    s2 = jnp.sum(x * x, axis=-1, keepdims=True)
    mu = s * (1.0 / HIDDEN)
    var = s2 * (1.0 / HIDDEN) - mu * mu
    # gamma/beta are zero in padded lanes -> padded lanes stay exactly zero after LN.
    return (x - mu) * jax.lax.rsqrt(var + EPS) * gamma + beta


def _softmax_last(x):
    m = jnp.max(x, axis=-1, keepdims=True)
    e = jnp.exp(x - m)
    return e * pl.reciprocal(jnp.sum(e, axis=-1, keepdims=True), approx=True)


def _proj(x, w, b):
    # x: (B, L, Din) f32; w: (Din, Dout) bf16/f32; b: (Dout,) or (1, Dout) f32.
    bb, ll, din = x.shape
    y = jnp.dot(x.reshape(bb * ll, din).astype(w.dtype), w,
                preferred_element_type=jnp.float32)
    return (y + b.reshape(1, -1)).reshape(bb, ll, w.shape[1])


def _ffn(x, w1, b1, w2, b2):
    return _proj(jnp.maximum(_proj(x, w1, b1), 0.0), w2, b2)


def _mha(q_in, kv_in, w, b, head_masks):
    """Multi-head attention. w: (4, D, D) = [Wq, Wk, Wv, Wo] (stored in->out); b: (4, D)."""
    q = _proj(q_in, w[0], b[0])           # (B, Lq, D) f32, zero in padded lanes
    k = _proj(kv_in, w[1], b[1])          # (B, Lk, D)
    v = _proj(kv_in, w[2], b[2])          # (B, Lk, D)
    scale = 1.0 / math.sqrt(HEAD_DIM)
    o = jnp.zeros_like(q)
    for h in range(N_HEADS):              # static unroll; per-head lane masks, no slices/concat
        m = head_masks[h].reshape(1, 1, D_PAD)
        s = jnp.einsum('bqd,bkd->bqk', q * m, k,
                       preferred_element_type=jnp.float32) * scale
        p = _softmax_last(s)
        o = o + m * jnp.einsum('bqk,bkd->bqd', p, v,
                               preferred_element_type=jnp.float32)
    return _proj(o, w[3], b[3])


# ---------------------------------------------------------------------------
# The single fused kernel: SPOTER backbone + incremental heads.
# ---------------------------------------------------------------------------
def linear_spoter_kernel(x_ref, pos_ref, cq_ref, hm_ref,
                         enc_aw_ref, enc_ab_ref, enc_ln_ref,
                         enc_w1_ref, enc_b1_ref, enc_w2_ref, enc_b2_ref,
                         dec_aw_ref, dec_ab_ref, dec_ln_ref,
                         dec_w1_ref, dec_b1_ref, dec_w2_ref, dec_b2_ref,
                         head_w_ref, head_b_ref,
                         out_ref):
    bb, tt, dd = x_ref.shape
    hm = hm_ref[...]                                   # (N_HEADS, D_PAD)

    # learned positional embedding
    h = x_ref[...] + pos_ref[...][None, :, :]          # (B, T, D)

    # ----- encoder layer (post-norm, eval mode: dropout = identity) -----
    enc_ln = enc_ln_ref[...]
    attn = _mha(h, h, enc_aw_ref[...], enc_ab_ref[...], hm)
    h = _layernorm(h + attn, enc_ln[0], enc_ln[1])
    ff = _ffn(h, enc_w1_ref[...], enc_b1_ref[...], enc_w2_ref[...], enc_b2_ref[...])
    memory = _layernorm(h + ff, enc_ln[2], enc_ln[3])

    # ----- decoder layer: class query cross-attends to encoder memory -----
    # (SPOTER's custom decoder layer removes target self-attention.)
    dec_ln = dec_ln_ref[...]
    tgt = jnp.broadcast_to(cq_ref[...][None, :, :], (bb, 1, dd))
    attn = _mha(tgt, memory, dec_aw_ref[...], dec_ab_ref[...], hm)
    t = _layernorm(tgt + attn, dec_ln[0], dec_ln[1])
    ff = _ffn(t, dec_w1_ref[...], dec_b1_ref[...], dec_w2_ref[...], dec_b2_ref[...])
    t = _layernorm(t + ff, dec_ln[2], dec_ln[3])       # (B, 1, D)

    # ----- fused incremental heads: (B, D) @ (D, OUT_PAD) + b, lane-dense output -----
    out_ref[...] = (jnp.dot(t.reshape(bb, dd), head_w_ref[...],
                            preferred_element_type=jnp.float32)
                    + head_b_ref[...])


def linear_spoter_call(x_pad, pos, cq, head_masks, backbone_weights, head_w, head_b):
    B = x_pad.shape[0]
    operands = [x_pad, pos, cq, head_masks] + list(backbone_weights) + [head_w, head_b]

    def const_spec(a):
        nd = a.ndim
        return pl.BlockSpec(a.shape, lambda i, nd=nd: (0,) * nd)

    return pl.pallas_call(
        linear_spoter_kernel,
        out_shape=jax.ShapeDtypeStruct((B, OUT_PAD), jnp.float32),
        grid=(1,),                      # whole (tiny) batch in one step
        in_specs=[const_spec(a) for a in operands],
        out_specs=pl.BlockSpec((B, OUT_PAD), lambda i: (0, 0)),
        compiler_params=pltpu.CompilerParams(
            dimension_semantics=("arbitrary",),
            vmem_limit_bytes=32 << 20),
    )(*operands)


def _head_masks():
    lane = jnp.arange(D_PAD)[None, :]
    head = jnp.arange(N_HEADS)[:, None]
    return ((lane >= head * HEAD_DIM) & (lane < (head + 1) * HEAD_DIM)).astype(jnp.float32)


def linear_spoter_forward(inputs, pos, cq, backbone_weights, head_w, head_b, n_heads_out):
    B, T = inputs.shape[0], inputs.shape[1]
    x = inputs.reshape(B, T, HIDDEN)                       # flatten keypoints (54*2 -> 108)
    x_pad = jnp.pad(x, ((0, 0), (0, 0), (0, D_PAD - HIDDEN)))
    out = linear_spoter_call(x_pad, pos, cq, _head_masks(), backbone_weights, head_w, head_b)
    return out[:, :n_heads_out].reshape(B, 1, n_heads_out)  # (B, 1, K)


# ---------------------------------------------------------------------------
# Deterministic parameter construction (PyTorch-Linear-style uniform init),
# pre-padded to lane-dense 128-wide layout; big matmul weights in bf16.
# ---------------------------------------------------------------------------
def _uinit(key, shape, fan_in):
    bound = 1.0 / math.sqrt(fan_in)
    return jax.random.uniform(key, shape, jnp.float32, -bound, bound)


def _pad_to(a, shape):
    return jnp.pad(a, [(0, s - d) for d, s in zip(a.shape, shape)])


def make_params(key, T, n_additional):
    keys = jax.random.split(key, 40)
    ki = iter(keys)

    def attn_block():
        w = jnp.stack([_pad_to(_uinit(next(ki), (HIDDEN, HIDDEN), HIDDEN), (D_PAD, D_PAD))
                       for _ in range(4)]).astype(jnp.bfloat16)
        b = jnp.stack([_pad_to(_uinit(next(ki), (HIDDEN,), HIDDEN), (D_PAD,))
                       for _ in range(4)])
        return w, b

    def ln_block():
        # rows: [gamma1, beta1, gamma2, beta2]; padded lanes are zero (keeps padding zero).
        g = _pad_to(jnp.ones((HIDDEN,), jnp.float32), (D_PAD,))
        z = jnp.zeros((D_PAD,), jnp.float32)
        return jnp.stack([g, z, g, z])

    def ffn_block():
        w1 = _pad_to(_uinit(next(ki), (HIDDEN, FFN), HIDDEN), (D_PAD, FFN)).astype(jnp.bfloat16)
        b1 = _uinit(next(ki), (1, FFN), HIDDEN)
        w2 = _pad_to(_uinit(next(ki), (FFN, HIDDEN), FFN), (FFN, D_PAD)).astype(jnp.bfloat16)
        b2 = _pad_to(_uinit(next(ki), (1, HIDDEN), FFN), (1, D_PAD))
        return w1, b1, w2, b2

    enc_aw, enc_ab = attn_block()
    enc_ln = ln_block()
    enc_w1, enc_b1, enc_w2, enc_b2 = ffn_block()
    dec_aw, dec_ab = attn_block()
    dec_ln = ln_block()
    dec_w1, dec_b1, dec_w2, dec_b2 = ffn_block()

    backbone_weights = [enc_aw, enc_ab, enc_ln, enc_w1, enc_b1, enc_w2, enc_b2,
                        dec_aw, dec_ab, dec_ln, dec_w1, dec_b1, dec_w2, dec_b2]

    pos = _pad_to(jax.random.uniform(next(ki), (T, HIDDEN), jnp.float32), (T, D_PAD))
    class_query = _pad_to(jax.random.uniform(next(ki), (1, HIDDEN), jnp.float32), (1, D_PAD))

    # incremental heads: n_additional x nn.Linear(HIDDEN, 1), fused into one padded matmul
    w_add = jnp.concatenate(
        [_uinit(next(ki), (HIDDEN, 1), HIDDEN) for _ in range(n_additional)], axis=1)
    b_add = jnp.concatenate(
        [_uinit(next(ki), (1, 1), HIDDEN) for _ in range(n_additional)], axis=1)
    w_add = _pad_to(w_add, (D_PAD, OUT_PAD))
    b_add = _pad_to(b_add, (1, OUT_PAD))

    return pos, class_query, backbone_weights, w_add, b_add


if __name__ == "__main__":
    key = jax.random.PRNGKey(0)
    B, T = 2, 8
    prev_num_classes = 30
    n_additional = int(prev_num_classes / 10) - 1             # 2 incremental heads

    k_in, k_par = jax.random.split(key)
    inputs = jax.random.normal(k_in, (B, T, 54, 2), jnp.float32)   # pose landmarks
    pos, class_query, backbone_weights, w_add, b_add = make_params(k_par, T, n_additional)

    fwd = jax.jit(linear_spoter_forward, static_argnums=(6,))
    out = fwd(inputs, pos, class_query, backbone_weights, w_add, b_add, n_additional)
    jax.block_until_ready(out)
    assert out.shape == (B, 1, n_additional)
    assert bool(jnp.all(jnp.isfinite(out)))
    print("KERNEL_OK")
</pallas_src>

<mosaic_0001>
module attributes {stable_mosaic.version = 11 : i64} {
  func.func @linear_spoter_kernel(%arg0: i32, %arg1: memref<2x8x128xf32, #tpu.memory_space<vmem>>, %arg2: memref<8x128xf32, #tpu.memory_space<vmem>>, %arg3: memref<1x128xf32, #tpu.memory_space<vmem>>, %arg4: memref<9x128xf32, #tpu.memory_space<vmem>>, %arg5: memref<4x128x128xbf16, #tpu.memory_space<vmem>>, %arg6: memref<4x128xf32, #tpu.memory_space<vmem>>, %arg7: memref<4x128xf32, #tpu.memory_space<vmem>>, %arg8: memref<128x2048xbf16, #tpu.memory_space<vmem>>, %arg9: memref<1x2048xf32, #tpu.memory_space<vmem>>, %arg10: memref<2048x128xbf16, #tpu.memory_space<vmem>>, %arg11: memref<1x128xf32, #tpu.memory_space<vmem>>, %arg12: memref<4x128x128xbf16, #tpu.memory_space<vmem>>, %arg13: memref<4x128xf32, #tpu.memory_space<vmem>>, %arg14: memref<4x128xf32, #tpu.memory_space<vmem>>, %arg15: memref<128x2048xbf16, #tpu.memory_space<vmem>>, %arg16: memref<1x2048xf32, #tpu.memory_space<vmem>>, %arg17: memref<2048x128xbf16, #tpu.memory_space<vmem>>, %arg18: memref<1x128xf32, #tpu.memory_space<vmem>>, %arg19: memref<128x128xf32, #tpu.memory_space<vmem>>, %arg20: memref<1x128xf32, #tpu.memory_space<vmem>>, %arg21: memref<2x128xf32, #tpu.memory_space<vmem>>) attributes {dimension_semantics = [#tpu.dimension_semantics<arbitrary>], iteration_bounds = array<i64: 1>, scalar_prefetch = 0 : i64, scratch_operands = 0 : i64, tpu.core_type = #tpu.core_type<tc>, window_params = [{pipeline_mode = #tpu.pipeline_mode<synchronous>, transform_indices = @transform_0, window_bounds = array<i64: 2, 8, 128>}, {pipeline_mode = #tpu.pipeline_mode<synchronous>, transform_indices = @transform_1, window_bounds = array<i64: 8, 128>}, {pipeline_mode = #tpu.pipeline_mode<synchronous>, transform_indices = @transform_2, window_bounds = array<i64: 1, 128>}, {pipeline_mode = #tpu.pipeline_mode<synchronous>, transform_indices = @transform_3, window_bounds = array<i64: 9, 128>}, {pipeline_mode = #tpu.pipeline_mode<synchronous>, transform_indices = @transform_4, window_bounds = array<i64: 4, 128, 128>}, {pipeline_mode = #tpu.pipeline_mode<synchronous>, transform_indices = @transform_5, window_bounds = array<i64: 4, 128>}, {pipeline_mode = #tpu.pipeline_mode<synchronous>, transform_indices = @transform_6, window_bounds = array<i64: 4, 128>}, {pipeline_mode = #tpu.pipeline_mode<synchronous>, transform_indices = @transform_7, window_bounds = array<i64: 128, 2048>}, {pipeline_mode = #tpu.pipeline_mode<synchronous>, transform_indices = @transform_8, window_bounds = array<i64: 1, 2048>}, {pipeline_mode = #tpu.pipeline_mode<synchronous>, transform_indices = @transform_9, window_bounds = array<i64: 2048, 128>}, {pipeline_mode = #tpu.pipeline_mode<synchronous>, transform_indices = @transform_10, window_bounds = array<i64: 1, 128>}, {pipeline_mode = #tpu.pipeline_mode<synchronous>, transform_indices = @transform_11, window_bounds = array<i64: 4, 128, 128>}, {pipeline_mode = #tpu.pipeline_mode<synchronous>, transform_indices = @transform_12, window_bounds = array<i64: 4, 128>}, {pipeline_mode = #tpu.pipeline_mode<synchronous>, transform_indices = @transform_13, window_bounds = array<i64: 4, 128>}, {pipeline_mode = #tpu.pipeline_mode<synchronous>, transform_indices = @transform_14, window_bounds = array<i64: 128, 2048>}, {pipeline_mode = #tpu.pipeline_mode<synchronous>, transform_indices = @transform_15, window_bounds = array<i64: 1, 2048>}, {pipeline_mode = #tpu.pipeline_mode<synchronous>, transform_indices = @transform_16, window_bounds = array<i64: 2048, 128>}, {pipeline_mode = #tpu.pipeline_mode<synchronous>, transform_indices = @transform_17, window_bounds = array<i64: 1, 128>}, {pipeline_mode = #tpu.pipeline_mode<synchronous>, transform_indices = @transform_18, window_bounds = array<i64: 128, 128>}, {pipeline_mode = #tpu.pipeline_mode<synchronous>, transform_indices = @transform_19, window_bounds = array<i64: 1, 128>}, {pipeline_mode = #tpu.pipeline_mode<synchronous>, transform_indices = @transform_20, window_bounds = array<i64: 2, 128>}]} {
    %c0 = arith.constant 0 : index
    %c0_0 = arith.constant 0 : index
    %0 = vector.load %arg4[%c0, %c0_0] : memref<9x128xf32, #tpu.memory_space<vmem>>, vector<9x128xf32>
    %c0_1 = arith.constant 0 : index
    %c0_2 = arith.constant 0 : index
    %c0_3 = arith.constant 0 : index
    %1 = vector.load %arg1[%c0_1, %c0_2, %c0_3] : memref<2x8x128xf32, #tpu.memory_space<vmem>>, vector<2x8x128xf32>
    %c0_4 = arith.constant 0 : index
    %c0_5 = arith.constant 0 : index
    %2 = vector.load %arg2[%c0_4, %c0_5] : memref<8x128xf32, #tpu.memory_space<vmem>>, vector<8x128xf32>
    %3 = vector.shape_cast %2 : vector<8x128xf32> to vector<1x8x128xf32>
    %4 = vector.broadcast %3 : vector<1x8x128xf32> to vector<2x8x128xf32>
    %5 = arith.addf %1, %4 : vector<2x8x128xf32>
    %c0_6 = arith.constant 0 : index
    %c0_7 = arith.constant 0 : index
    %6 = vector.load %arg7[%c0_6, %c0_7] : memref<4x128xf32, #tpu.memory_space<vmem>>, vector<4x128xf32>
    %c0_8 = arith.constant 0 : index
    %c0_9 = arith.constant 0 : index
    %c0_10 = arith.constant 0 : index
    %7 = vector.load %arg5[%c0_8, %c0_9, %c0_10] : memref<4x128x128xbf16, #tpu.memory_space<vmem>>, vector<4x128x128xbf16>
    %c0_11 = arith.constant 0 : index
    %c0_12 = arith.constant 0 : index
    %8 = vector.load %arg6[%c0_11, %c0_12] : memref<4x128xf32, #tpu.memory_space<vmem>>, vector<4x128xf32>
    %9 = vector.extract_strided_slice %7 {offsets = [0, 0, 0], sizes = [1, 128, 128], strides = [1, 1, 1]} : vector<4x128x128xbf16> to vector<1x128x128xbf16>
    %10 = vector.shape_cast %9 : vector<1x128x128xbf16> to vector<128x128xbf16>
    %11 = vector.extract_strided_slice %8 {offsets = [0, 0], sizes = [1, 128], strides = [1, 1]} : vector<4x128xf32> to vector<1x128xf32>
    %12 = vector.shape_cast %11 : vector<1x128xf32> to vector<128xf32>
    %13 = vector.shape_cast %5 : vector<2x8x128xf32> to vector<16x128xf32>
    %14 = arith.truncf %13 : vector<16x128xf32> to vector<16x128xbf16>
    %cst = arith.constant dense<0.000000e+00> : vector<16x128xf32>
    %15 = tpu.matmul %14, %10, %cst {dimension_numbers = #tpu.dot_dimension_numbers<[1], [0], [0], [1], [0, 0, 1, 1], [], []>} : vector<16x128xbf16>, vector<128x128xbf16>, vector<16x128xf32> -> vector<16x128xf32>
    %16 = vector.shape_cast %12 : vector<128xf32> to vector<1x128xf32>
    %17 = vector.broadcast %16 : vector<1x128xf32> to vector<16x128xf32>
    %18 = arith.addf %15, %17 : vector<16x128xf32>
    %19 = vector.shape_cast %18 : vector<16x128xf32> to vector<2x8x128xf32>
    %20 = vector.extract_strided_slice %7 {offsets = [1, 0, 0], sizes = [1, 128, 128], strides = [1, 1, 1]} : vector<4x128x128xbf16> to vector<1x128x128xbf16>
    %21 = vector.shape_cast %20 : vector<1x128x128xbf16> to vector<128x128xbf16>
    %22 = vector.extract_strided_slice %8 {offsets = [1, 0], sizes = [1, 128], strides = [1, 1]} : vector<4x128xf32> to vector<1x128xf32>
    %23 = vector.shape_cast %22 : vector<1x128xf32> to vector<128xf32>
    %24 = vector.shape_cast %5 : vector<2x8x128xf32> to vector<16x128xf32>
    %25 = arith.truncf %24 : vector<16x128xf32> to vector<16x128xbf16>
    %cst_13 = arith.constant dense<0.000000e+00> : vector<16x128xf32>
    %26 = tpu.matmul %25, %21, %cst_13 {dimension_numbers = #tpu.dot_dimension_numbers<[1], [0], [0], [1], [0, 0, 1, 1], [], []>} : vector<16x128xbf16>, vector<128x128xbf16>, vector<16x128xf32> -> vector<16x128xf32>
    %27 = vector.shape_cast %23 : vector<128xf32> to vector<1x128xf32>
    %28 = vector.broadcast %27 : vector<1x128xf32> to vector<16x128xf32>
    %29 = arith.addf %26, %28 : vector<16x128xf32>
    %30 = vector.shape_cast %29 : vector<16x128xf32> to vector<2x8x128xf32>
    %31 = vector.extract_strided_slice %7 {offsets = [2, 0, 0], sizes = [1, 128, 128], strides = [1, 1, 1]} : vector<4x128x128xbf16> to vector<1x128x128xbf16>
    %32 = vector.shape_cast %31 : vector<1x128x128xbf16> to vector<128x128xbf16>
    %33 = vector.extract_strided_slice %8 {offsets = [2, 0], sizes = [1, 128], strides = [1, 1]} : vector<4x128xf32> to vector<1x128xf32>
    %34 = vector.shape_cast %33 : vector<1x128xf32> to vector<128xf32>
    %35 = vector.shape_cast %5 : vector<2x8x128xf32> to vector<16x128xf32>
    %36 = arith.truncf %35 : vector<16x128xf32> to vector<16x128xbf16>
    %cst_14 = arith.constant dense<0.000000e+00> : vector<16x128xf32>
    %37 = tpu.matmul %36, %32, %cst_14 {dimension_numbers = #tpu.dot_dimension_numbers<[1], [0], [0], [1], [0, 0, 1, 1], [], []>} : vector<16x128xbf16>, vector<128x128xbf16>, vector<16x128xf32> -> vector<16x128xf32>
    %38 = vector.shape_cast %34 : vector<128xf32> to vector<1x128xf32>
    %39 = vector.broadcast %38 : vector<1x128xf32> to vector<16x128xf32>
    %40 = arith.addf %37, %39 : vector<16x128xf32>
    %41 = vector.shape_cast %40 : vector<16x128xf32> to vector<2x8x128xf32>
    %cst_15 = arith.constant 0.000000e+00 : f32
    %42 = vector.broadcast %cst_15 : f32 to vector<2x8x128xf32>
    %43 = vector.extract_strided_slice %0 {offsets = [0, 0], sizes = [1, 128], strides = [1, 1]} : vector<9x128xf32> to vector<1x128xf32>
    %44 = vector.shape_cast %43 : vector<1x128xf32> to vector<128xf32>
    %45 = vector.shape_cast %44 : vector<128xf32> to vector<1x1x128xf32>
    %46 = vector.broadcast %45 : vector<1x1x128xf32> to vector<2x8x128xf32>
    %47 = arith.mulf %19, %46 : vector<2x8x128xf32>
    "tpu.trace_start"() <{level = 10 : i32, message = "bqd,bkd->bqk"}> : () -> ()
    %cst_16 = arith.constant dense<0.000000e+00> : vector<2x8x8xf32>
    %48 = tpu.matmul %47, %30, %cst_16 {dimension_numbers = #tpu.dot_dimension_numbers<[2], [2], [1], [1], [0, 0, 0, 1, 1, 1], [0], [0]>} : vector<2x8x128xf32>, vector<2x8x128xf32>, vector<2x8x8xf32> -> vector<2x8x8xf32>
    "tpu.trace_stop"() : () -> ()
    %cst_17 = arith.constant 0.288675129 : f32
    %49 = vector.broadcast %cst_17 : f32 to vector<2x8x8xf32>
    %50 = arith.mulf %48, %49 : vector<2x8x8xf32>
    %cst_18 = arith.constant dense<0xFF800000> : vector<2x8xf32>
    %51 = vector.multi_reduction <maximumf>, %50, %cst_18 [2] : vector<2x8x8xf32> to vector<2x8xf32>
    %52 = vector.shape_cast %51 : vector<2x8xf32> to vector<2x8x1xf32>
    %53 = vector.broadcast %52 : vector<2x8x1xf32> to vector<2x8x8xf32>
    %54 = arith.subf %50, %53 : vector<2x8x8xf32>
    %55 = math.exp %54 : vector<2x8x8xf32>
    %cst_19 = arith.constant dense<0.000000e+00> : vector<2x8xf32>
    %56 = vector.multi_reduction <add>, %55, %cst_19 [2] : vector<2x8x8xf32> to vector<2x8xf32>
    %57 = vector.shape_cast %56 : vector<2x8xf32> to vector<2x8x1xf32>
    %58 = tpu.reciprocal %57 {approx = true} : vector<2x8x1xf32> -> vector<2x8x1xf32>
    %59 = vector.broadcast %58 : vector<2x8x1xf32> to vector<2x8x8xf32>
    %60 = arith.mulf %55, %59 : vector<2x8x8xf32>
    "tpu.trace_start"() <{level = 10 : i32, message = "bqk,bkd->bqd"}> : () -> ()
    %cst_20 = arith.constant dense<0.000000e+00> : vector<2x8x128xf32>
    %61 = tpu.matmul %60, %41, %cst_20 {dimension_numbers = #tpu.dot_dimension_numbers<[2], [1], [1], [2], [0, 0, 0, 1, 1, 2], [0], [0]>} : vector<2x8x8xf32>, vector<2x8x128xf32>, vector<2x8x128xf32> -> vector<2x8x128xf32>
    "tpu.trace_stop"() : () -> ()
    %62 = vector.broadcast %45 : vector<1x1x128xf32> to vector<2x8x128xf32>
    %63 = arith.mulf %62, %61 : vector<2x8x128xf32>
    %64 = arith.addf %42, %63 : vector<2x8x128xf32>
    %65 = vector.extract_strided_slice %0 {offsets = [1, 0], sizes = [1, 128], strides = [1, 1]} : vector<9x128xf32> to vector<1x128xf32>
    %66 = vector.shape_cast %65 : vector<1x128xf32> to vector<128xf32>
    %67 = vector.shape_cast %66 : vector<128xf32> to vector<1x1x128xf32>
    %68 = vector.broadcast %67 : vector<1x1x128xf32> to vector<2x8x128xf32>
    %69 = arith.mulf %19, %68 : vector<2x8x128xf32>
    "tpu.trace_start"() <{level = 10 : i32, message = "bqd,bkd->bqk"}> : () -> ()
    %cst_21 = arith.constant dense<0.000000e+00> : vector<2x8x8xf32>
    %70 = tpu.matmul %69, %30, %cst_21 {dimension_numbers = #tpu.dot_dimension_numbers<[2], [2], [1], [1], [0, 0, 0, 1, 1, 1], [0], [0]>} : vector<2x8x128xf32>, vector<2x8x128xf32>, vector<2x8x8xf32> -> vector<2x8x8xf32>
    "tpu.trace_stop"() : () -> ()
    %cst_22 = arith.constant 0.288675129 : f32
    %71 = vector.broadcast %cst_22 : f32 to vector<2x8x8xf32>
    %72 = arith.mulf %70, %71 : vector<2x8x8xf32>
    %cst_23 = arith.constant dense<0xFF800000> : vector<2x8xf32>
    %73 = vector.multi_reduction <maximumf>, %72, %cst_23 [2] : vector<2x8x8xf32> to vector<2x8xf32>
    %74 = vector.shape_cast %73 : vector<2x8xf32> to vector<2x8x1xf32>
    %75 = vector.broadcast %74 : vector<2x8x1xf32> to vector<2x8x8xf32>
    %76 = arith.subf %72, %75 : vector<2x8x8xf32>
    %77 = math.exp %76 : vector<2x8x8xf32>
    %cst_24 = arith.constant dense<0.000000e+00> : vector<2x8xf32>
    %78 = vector.multi_reduction <add>, %77, %cst_24 [2] : vector<2x8x8xf32> to vector<2x8xf32>
    %79 = vector.shape_cast %78 : vector<2x8xf32> to vector<2x8x1xf32>
    %80 = tpu.reciprocal %79 {approx = true} : vector<2x8x1xf32> -> vector<2x8x1xf32>
    %81 = vector.broadcast %80 : vector<2x8x1xf32> to vector<2x8x8xf32>
    %82 = arith.mulf %77, %81 : vector<2x8x8xf32>
    "tpu.trace_start"() <{level = 10 : i32, message = "bqk,bkd->bqd"}> : () -> ()
    %cst_25 = arith.constant dense<0.000000e+00> : vector<2x8x128xf32>
    %83 = tpu.matmul %82, %41, %cst_25 {dimension_numbers = #tpu.dot_dimension_numbers<[2], [1], [1], [2], [0, 0, 0, 1, 1, 2], [0], [0]>} : vector<2x8x8xf32>, vector<2x8x128xf32>, vector<2x8x128xf32> -> vector<2x8x128xf32>
    "tpu.trace_stop"() : () -> ()
    %84 = vector.broadcast %67 : vector<1x1x128xf32> to vector<2x8x128xf32>
    %85 = arith.mulf %84, %83 : vector<2x8x128xf32>
    %86 = arith.addf %64, %85 : vector<2x8x128xf32>
    %87 = vector.extract_strided_slice %0 {offsets = [2, 0], sizes = [1, 128], strides = [1, 1]} : vector<9x128xf32> to vector<1x128xf32>
    %88 = vector.shape_cast %87 : vector<1x128xf32> to vector<128xf32>
    %89 = vector.shape_cast %88 : vector<128xf32> to vector<1x1x128xf32>
    %90 = vector.broadcast %89 : vector<1x1x128xf32> to vector<2x8x128xf32>
    %91 = arith.mulf %19, %90 : vector<2x8x128xf32>
    "tpu.trace_start"() <{level = 10 : i32, message = "bqd,bkd->bqk"}> : () -> ()
    %cst_26 = arith.constant dense<0.000000e+00> : vector<2x8x8xf32>
    %92 = tpu.matmul %91, %30, %cst_26 {dimension_numbers = #tpu.dot_dimension_numbers<[2], [2], [1], [1], [0, 0, 0, 1, 1, 1], [0], [0]>} : vector<2x8x128xf32>, vector<2x8x128xf32>, vector<2x8x8xf32> -> vector<2x8x8xf32>
    "tpu.trace_stop"() : () -> ()
    %cst_27 = arith.constant 0.288675129 : f32
    %93 = vector.broadcast %cst_27 : f32 to vector<2x8x8xf32>
    %94 = arith.mulf %92, %93 : vector<2x8x8xf32>
    %cst_28 = arith.constant dense<0xFF800000> : vector<2x8xf32>
    %95 = vector.multi_reduction <maximumf>, %94, %cst_28 [2] : vector<2x8x8xf32> to vector<2x8xf32>
    %96 = vector.shape_cast %95 : vector<2x8xf32> to vector<2x8x1xf32>
    %97 = vector.broadcast %96 : vector<2x8x1xf32> to vector<2x8x8xf32>
    %98 = arith.subf %94, %97 : vector<2x8x8xf32>
    %99 = math.exp %98 : vector<2x8x8xf32>
    %cst_29 = arith.constant dense<0.000000e+00> : vector<2x8xf32>
    %100 = vector.multi_reduction <add>, %99, %cst_29 [2] : vector<2x8x8xf32> to vector<2x8xf32>
    %101 = vector.shape_cast %100 : vector<2x8xf32> to vector<2x8x1xf32>
    %102 = tpu.reciprocal %101 {approx = true} : vector<2x8x1xf32> -> vector<2x8x1xf32>
    %103 = vector.broadcast %102 : vector<2x8x1xf32> to vector<2x8x8xf32>
    %104 = arith.mulf %99, %103 : vector<2x8x8xf32>
    "tpu.trace_start"() <{level = 10 : i32, message = "bqk,bkd->bqd"}> : () -> ()
    %cst_30 = arith.constant dense<0.000000e+00> : vector<2x8x128xf32>
    %105 = tpu.matmul %104, %41, %cst_30 {dimension_numbers = #tpu.dot_dimension_numbers<[2], [1], [1], [2], [0, 0, 0, 1, 1, 2], [0], [0]>} : vector<2x8x8xf32>, vector<2x8x128xf32>, vector<2x8x128xf32> -> vector<2x8x128xf32>
    "tpu.trace_stop"() : () -> ()
    %106 = vector.broadcast %89 : vector<1x1x128xf32> to vector<2x8x128xf32>
    %107 = arith.mulf %106, %105 : vector<2x8x128xf32>
    %108 = arith.addf %86, %107 : vector<2x8x128xf32>
    %109 = vector.extract_strided_slice %0 {offsets = [3, 0], sizes = [1, 128], strides = [1, 1]} : vector<9x128xf32> to vector<1x128xf32>
    %110 = vector.shape_cast %109 : vector<1x128xf32> to vector<128xf32>
    %111 = vector.shape_cast %110 : vector<128xf32> to vector<1x1x128xf32>
    %112 = vector.broadcast %111 : vector<1x1x128xf32> to vector<2x8x128xf32>
    %113 = arith.mulf %19, %112 : vector<2x8x128xf32>
    "tpu.trace_start"() <{level = 10 : i32, message = "bqd,bkd->bqk"}> : () -> ()
    %cst_31 = arith.constant dense<0.000000e+00> : vector<2x8x8xf32>
    %114 = tpu.matmul %113, %30, %cst_31 {dimension_numbers = #tpu.dot_dimension_numbers<[2], [2], [1], [1], [0, 0, 0, 1, 1, 1], [0], [0]>} : vector<2x8x128xf32>, vector<2x8x128xf32>, vector<2x8x8xf32> -> vector<2x8x8xf32>
    "tpu.trace_stop"() : () -> ()
    %cst_32 = arith.constant 0.288675129 : f32
    %115 = vector.broadcast %cst_32 : f32 to vector<2x8x8xf32>
    %116 = arith.mulf %114, %115 : vector<2x8x8xf32>
    %cst_33 = arith.constant dense<0xFF800000> : vector<2x8xf32>
    %117 = vector.multi_reduction <maximumf>, %116, %cst_33 [2] : vector<2x8x8xf32> to vector<2x8xf32>
    %118 = vector.shape_cast %117 : vector<2x8xf32> to vector<2x8x1xf32>
    %119 = vector.broadcast %118 : vector<2x8x1xf32> to vector<2x8x8xf32>
    %120 = arith.subf %116, %119 : vector<2x8x8xf32>
    %121 = math.exp %120 : vector<2x8x8xf32>
    %cst_34 = arith.constant dense<0.000000e+00> : vector<2x8xf32>
    %122 = vector.multi_reduction <add>, %121, %cst_34 [2] : vector<2x8x8xf32> to vector<2x8xf32>
    %123 = vector.shape_cast %122 : vector<2x8xf32> to vector<2x8x1xf32>
    %124 = tpu.reciprocal %123 {approx = true} : vector<2x8x1xf32> -> vector<2x8x1xf32>
    %125 = vector.broadcast %124 : vector<2x8x1xf32> to vector<2x8x8xf32>
    %126 = arith.mulf %121, %125 : vector<2x8x8xf32>
    "tpu.trace_start"() <{level = 10 : i32, message = "bqk,bkd->bqd"}> : () -> ()
    %cst_35 = arith.constant dense<0.000000e+00> : vector<2x8x128xf32>
    %127 = tpu.matmul %126, %41, %cst_35 {dimension_numbers = #tpu.dot_dimension_numbers<[2], [1], [1], [2], [0, 0, 0, 1, 1, 2], [0], [0]>} : vector<2x8x8xf32>, vector<2x8x128xf32>, vector<2x8x128xf32> -> vector<2x8x128xf32>
    "tpu.trace_stop"() : () -> ()
    %128 = vector.broadcast %111 : vector<1x1x128xf32> to vector<2x8x128xf32>
    %129 = arith.mulf %128, %127 : vector<2x8x128xf32>
    %130 = arith.addf %108, %129 : vector<2x8x128xf32>
    %131 = vector.extract_strided_slice %0 {offsets = [4, 0], sizes = [1, 128], strides = [1, 1]} : vector<9x128xf32> to vector<1x128xf32>
    %132 = vector.shape_cast %131 : vector<1x128xf32> to vector<128xf32>
    %133 = vector.shape_cast %132 : vector<128xf32> to vector<1x1x128xf32>
    %134 = vector.broadcast %133 : vector<1x1x128xf32> to vector<2x8x128xf32>
    %135 = arith.mulf %19, %134 : vector<2x8x128xf32>
    "tpu.trace_start"() <{level = 10 : i32, message = "bqd,bkd->bqk"}> : () -> ()
    %cst_36 = arith.constant dense<0.000000e+00> : vector<2x8x8xf32>
    %136 = tpu.matmul %135, %30, %cst_36 {dimension_numbers = #tpu.dot_dimension_numbers<[2], [2], [1], [1], [0, 0, 0, 1, 1, 1], [0], [0]>} : vector<2x8x128xf32>, vector<2x8x128xf32>, vector<2x8x8xf32> -> vector<2x8x8xf32>
    "tpu.trace_stop"() : () -> ()
    %cst_37 = arith.constant 0.288675129 : f32
    %137 = vector.broadcast %cst_37 : f32 to vector<2x8x8xf32>
    %138 = arith.mulf %136, %137 : vector<2x8x8xf32>
    %cst_38 = arith.constant dense<0xFF800000> : vector<2x8xf32>
    %139 = vector.multi_reduction <maximumf>, %138, %cst_38 [2] : vector<2x8x8xf32> to vector<2x8xf32>
    %140 = vector.shape_cast %139 : vector<2x8xf32> to vector<2x8x1xf32>
    %141 = vector.broadcast %140 : vector<2x8x1xf32> to vector<2x8x8xf32>
    %142 = arith.subf %138, %141 : vector<2x8x8xf32>
    %143 = math.exp %142 : vector<2x8x8xf32>
    %cst_39 = arith.constant dense<0.000000e+00> : vector<2x8xf32>
    %144 = vector.multi_reduction <add>, %143, %cst_39 [2] : vector<2x8x8xf32> to vector<2x8xf32>
    %145 = vector.shape_cast %144 : vector<2x8xf32> to vector<2x8x1xf32>
    %146 = tpu.reciprocal %145 {approx = true} : vector<2x8x1xf32> -> vector<2x8x1xf32>
    %147 = vector.broadcast %146 : vector<2x8x1xf32> to vector<2x8x8xf32>
    %148 = arith.mulf %143, %147 : vector<2x8x8xf32>
    "tpu.trace_start"() <{level = 10 : i32, message = "bqk,bkd->bqd"}> : () -> ()
    %cst_40 = arith.constant dense<0.000000e+00> : vector<2x8x128xf32>
    %149 = tpu.matmul %148, %41, %cst_40 {dimension_numbers = #tpu.dot_dimension_numbers<[2], [1], [1], [2], [0, 0, 0, 1, 1, 2], [0], [0]>} : vector<2x8x8xf32>, vector<2x8x128xf32>, vector<2x8x128xf32> -> vector<2x8x128xf32>
    "tpu.trace_stop"() : () -> ()
    %150 = vector.broadcast %133 : vector<1x1x128xf32> to vector<2x8x128xf32>
    %151 = arith.mulf %150, %149 : vector<2x8x128xf32>
    %152 = arith.addf %130, %151 : vector<2x8x128xf32>
    %153 = vector.extract_strided_slice %0 {offsets = [5, 0], sizes = [1, 128], strides = [1, 1]} : vector<9x128xf32> to vector<1x128xf32>
    %154 = vector.shape_cast %153 : vector<1x128xf32> to vector<128xf32>
    %155 = vector.shape_cast %154 : vector<128xf32> to vector<1x1x128xf32>
    %156 = vector.broadcast %155 : vector<1x1x128xf32> to vector<2x8x128xf32>
    %157 = arith.mulf %19, %156 : vector<2x8x128xf32>
    "tpu.trace_start"() <{level = 10 : i32, message = "bqd,bkd->bqk"}> : () -> ()
    %cst_41 = arith.constant dense<0.000000e+00> : vector<2x8x8xf32>
    %158 = tpu.matmul %157, %30, %cst_41 {dimension_numbers = #tpu.dot_dimension_numbers<[2], [2], [1], [1], [0, 0, 0, 1, 1, 1], [0], [0]>} : vector<2x8x128xf32>, vector<2x8x128xf32>, vector<2x8x8xf32> -> vector<2x8x8xf32>
    "tpu.trace_stop"() : () -> ()
    %cst_42 = arith.constant 0.288675129 : f32
    %159 = vector.broadcast %cst_42 : f32 to vector<2x8x8xf32>
    %160 = arith.mulf %158, %159 : vector<2x8x8xf32>
    %cst_43 = arith.constant dense<0xFF800000> : vector<2x8xf32>
    %161 = vector.multi_reduction <maximumf>, %160, %cst_43 [2] : vector<2x8x8xf32> to vector<2x8xf32>
    %162 = vector.shape_cast %161 : vector<2x8xf32> to vector<2x8x1xf32>
    %163 = vector.broadcast %162 : vector<2x8x1xf32> to vector<2x8x8xf32>
    %164 = arith.subf %160, %163 : vector<2x8x8xf32>
    %165 = math.exp %164 : vector<2x8x8xf32>
    %cst_44 = arith.constant dense<0.000000e+00> : vector<2x8xf32>
    %166 = vector.multi_reduction <add>, %165, %cst_44 [2] : vector<2x8x8xf32> to vector<2x8xf32>
    %167 = vector.shape_cast %166 : vector<2x8xf32> to vector<2x8x1xf32>
    %168 = tpu.reciprocal %167 {approx = true} : vector<2x8x1xf32> -> vector<2x8x1xf32>
    %169 = vector.broadcast %168 : vector<2x8x1xf32> to vector<2x8x8xf32>
    %170 = arith.mulf %165, %169 : vector<2x8x8xf32>
    "tpu.trace_start"() <{level = 10 : i32, message = "bqk,bkd->bqd"}> : () -> ()
    %cst_45 = arith.constant dense<0.000000e+00> : vector<2x8x128xf32>
    %171 = tpu.matmul %170, %41, %cst_45 {dimension_numbers = #tpu.dot_dimension_numbers<[2], [1], [1], [2], [0, 0, 0, 1, 1, 2], [0], [0]>} : vector<2x8x8xf32>, vector<2x8x128xf32>, vector<2x8x128xf32> -> vector<2x8x128xf32>
    "tpu.trace_stop"() : () -> ()
    %172 = vector.broadcast %155 : vector<1x1x128xf32> to vector<2x8x128xf32>
    %173 = arith.mulf %172, %171 : vector<2x8x128xf32>
    %174 = arith.addf %152, %173 : vector<2x8x128xf32>
    %175 = vector.extract_strided_slice %0 {offsets = [6, 0], sizes = [1, 128], strides = [1, 1]} : vector<9x128xf32> to vector<1x128xf32>
    %176 = vector.shape_cast %175 : vector<1x128xf32> to vector<128xf32>
    %177 = vector.shape_cast %176 : vector<128xf32> to vector<1x1x128xf32>
    %178 = vector.broadcast %177 : vector<1x1x128xf32> to vector<2x8x128xf32>
    %179 = arith.mulf %19, %178 : vector<2x8x128xf32>
    "tpu.trace_start"() <{level = 10 : i32, message = "bqd,bkd->bqk"}> : () -> ()
    %cst_46 = arith.constant dense<0.000000e+00> : vector<2x8x8xf32>
    %180 = tpu.matmul %179, %30, %cst_46 {dimension_numbers = #tpu.dot_dimension_numbers<[2], [2], [1], [1], [0, 0, 0, 1, 1, 1], [0], [0]>} : vector<2x8x128xf32>, vector<2x8x128xf32>, vector<2x8x8xf32> -> vector<2x8x8xf32>
    "tpu.trace_stop"() : () -> ()
    %cst_47 = arith.constant 0.288675129 : f32
    %181 = vector.broadcast %cst_47 : f32 to vector<2x8x8xf32>
    %182 = arith.mulf %180, %181 : vector<2x8x8xf32>
    %cst_48 = arith.constant dense<0xFF800000> : vector<2x8xf32>
    %183 = vector.multi_reduction <maximumf>, %182, %cst_48 [2] : vector<2x8x8xf32> to vector<2x8xf32>
    %184 = vector.shape_cast %183 : vector<2x8xf32> to vector<2x8x1xf32>
    %185 = vector.broadcast %184 : vector<2x8x1xf32> to vector<2x8x8xf32>
    %186 = arith.subf %182, %185 : vector<2x8x8xf32>
    %187 = math.exp %186 : vector<2x8x8xf32>
    %cst_49 = arith.constant dense<0.000000e+00> : vector<2x8xf32>
    %188 = vector.multi_reduction <add>, %187, %cst_49 [2] : vector<2x8x8xf32> to vector<2x8xf32>
    %189 = vector.shape_cast %188 : vector<2x8xf32> to vector<2x8x1xf32>
    %190 = tpu.reciprocal %189 {approx = true} : vector<2x8x1xf32> -> vector<2x8x1xf32>
    %191 = vector.broadcast %190 : vector<2x8x1xf32> to vector<2x8x8xf32>
    %192 = arith.mulf %187, %191 : vector<2x8x8xf32>
    "tpu.trace_start"() <{level = 10 : i32, message = "bqk,bkd->bqd"}> : () -> ()
    %cst_50 = arith.constant dense<0.000000e+00> : vector<2x8x128xf32>
    %193 = tpu.matmul %192, %41, %cst_50 {dimension_numbers = #tpu.dot_dimension_numbers<[2], [1], [1], [2], [0, 0, 0, 1, 1, 2], [0], [0]>} : vector<2x8x8xf32>, vector<2x8x128xf32>, vector<2x8x128xf32> -> vector<2x8x128xf32>
    "tpu.trace_stop"() : () -> ()
    %194 = vector.broadcast %177 : vector<1x1x128xf32> to vector<2x8x128xf32>
    %195 = arith.mulf %194, %193 : vector<2x8x128xf32>
    %196 = arith.addf %174, %195 : vector<2x8x128xf32>
    %197 = vector.extract_strided_slice %0 {offsets = [7, 0], sizes = [1, 128], strides = [1, 1]} : vector<9x128xf32> to vector<1x128xf32>
    %198 = vector.shape_cast %197 : vector<1x128xf32> to vector<128xf32>
    %199 = vector.shape_cast %198 : vector<128xf32> to vector<1x1x128xf32>
    %200 = vector.broadcast %199 : vector<1x1x128xf32> to vector<2x8x128xf32>
    %201 = arith.mulf %19, %200 : vector<2x8x128xf32>
    "tpu.trace_start"() <{level = 10 : i32, message = "bqd,bkd->bqk"}> : () -> ()
    %cst_51 = arith.constant dense<0.000000e+00> : vector<2x8x8xf32>
    %202 = tpu.matmul %201, %30, %cst_51 {dimension_numbers = #tpu.dot_dimension_numbers<[2], [2], [1], [1], [0, 0, 0, 1, 1, 1], [0], [0]>} : vector<2x8x128xf32>, vector<2x8x128xf32>, vector<2x8x8xf32> -> vector<2x8x8xf32>
    "tpu.trace_stop"() : () -> ()
    %cst_52 = arith.constant 0.288675129 : f32
    %203 = vector.broadcast %cst_52 : f32 to vector<2x8x8xf32>
    %204 = arith.mulf %202, %203 : vector<2x8x8xf32>
    %cst_53 = arith.constant dense<0xFF800000> : vector<2x8xf32>
    %205 = vector.multi_reduction <maximumf>, %204, %cst_53 [2] : vector<2x8x8xf32> to vector<2x8xf32>
    %206 = vector.shape_cast %205 : vector<2x8xf32> to vector<2x8x1xf32>
    %207 = vector.broadcast %206 : vector<2x8x1xf32> to vector<2x8x8xf32>
    %208 = arith.subf %204, %207 : vector<2x8x8xf32>
    %209 = math.exp %208 : vector<2x8x8xf32>
    %cst_54 = arith.constant dense<0.000000e+00> : vector<2x8xf32>
    %210 = vector.multi_reduction <add>, %209, %cst_54 [2] : vector<2x8x8xf32> to vector<2x8xf32>
    %211 = vector.shape_cast %210 : vector<2x8xf32> to vector<2x8x1xf32>
    %212 = tpu.reciprocal %211 {approx = true} : vector<2x8x1xf32> -> vector<2x8x1xf32>
    %213 = vector.broadcast %212 : vector<2x8x1xf32> to vector<2x8x8xf32>
    %214 = arith.mulf %209, %213 : vector<2x8x8xf32>
    "tpu.trace_start"() <{level = 10 : i32, message = "bqk,bkd->bqd"}> : () -> ()
    %cst_55 = arith.constant dense<0.000000e+00> : vector<2x8x128xf32>
    %215 = tpu.matmul %214, %41, %cst_55 {dimension_numbers = #tpu.dot_dimension_numbers<[2], [1], [1], [2], [0, 0, 0, 1, 1, 2], [0], [0]>} : vector<2x8x8xf32>, vector<2x8x128xf32>, vector<2x8x128xf32> -> vector<2x8x128xf32>
    "tpu.trace_stop"() : () -> ()
    %216 = vector.broadcast %199 : vector<1x1x128xf32> to vector<2x8x128xf32>
    %217 = arith.mulf %216, %215 : vector<2x8x128xf32>
    %218 = arith.addf %196, %217 : vector<2x8x128xf32>
    %219 = vector.extract_strided_slice %0 {offsets = [8, 0], sizes = [1, 128], strides = [1, 1]} : vector<9x128xf32> to vector<1x128xf32>
    %220 = vector.shape_cast %219 : vector<1x128xf32> to vector<128xf32>
    %221 = vector.shape_cast %220 : vector<128xf32> to vector<1x1x128xf32>
    %222 = vector.broadcast %221 : vector<1x1x128xf32> to vector<2x8x128xf32>
    %223 = arith.mulf %19, %222 : vector<2x8x128xf32>
    "tpu.trace_start"() <{level = 10 : i32, message = "bqd,bkd->bqk"}> : () -> ()
    %cst_56 = arith.constant dense<0.000000e+00> : vector<2x8x8xf32>
    %224 = tpu.matmul %223, %30, %cst_56 {dimension_numbers = #tpu.dot_dimension_numbers<[2], [2], [1], [1], [0, 0, 0, 1, 1, 1], [0], [0]>} : vector<2x8x128xf32>, vector<2x8x128xf32>, vector<2x8x8xf32> -> vector<2x8x8xf32>
    "tpu.trace_stop"() : () -> ()
    %cst_57 = arith.constant 0.288675129 : f32
    %225 = vector.broadcast %cst_57 : f32 to vector<2x8x8xf32>
    %226 = arith.mulf %224, %225 : vector<2x8x8xf32>
    %cst_58 = arith.constant dense<0xFF800000> : vector<2x8xf32>
    %227 = vector.multi_reduction <maximumf>, %226, %cst_58 [2] : vector<2x8x8xf32> to vector<2x8xf32>
    %228 = vector.shape_cast %227 : vector<2x8xf32> to vector<2x8x1xf32>
    %229 = vector.broadcast %228 : vector<2x8x1xf32> to vector<2x8x8xf32>
    %230 = arith.subf %226, %229 : vector<2x8x8xf32>
    %231 = math.exp %230 : vector<2x8x8xf32>
    %cst_59 = arith.constant dense<0.000000e+00> : vector<2x8xf32>
    %232 = vector.multi_reduction <add>, %231, %cst_59 [2] : vector<2x8x8xf32> to vector<2x8xf32>
    %233 = vector.shape_cast %232 : vector<2x8xf32> to vector<2x8x1xf32>
    %234 = tpu.reciprocal %233 {approx = true} : vector<2x8x1xf32> -> vector<2x8x1xf32>
    %235 = vector.broadcast %234 : vector<2x8x1xf32> to vector<2x8x8xf32>
    %236 = arith.mulf %231, %235 : vector<2x8x8xf32>
    "tpu.trace_start"() <{level = 10 : i32, message = "bqk,bkd->bqd"}> : () -> ()
    %cst_60 = arith.constant dense<0.000000e+00> : vector<2x8x128xf32>
    %237 = tpu.matmul %236, %41, %cst_60 {dimension_numbers = #tpu.dot_dimension_numbers<[2], [1], [1], [2], [0, 0, 0, 1, 1, 2], [0], [0]>} : vector<2x8x8xf32>, vector<2x8x128xf32>, vector<2x8x128xf32> -> vector<2x8x128xf32>
    "tpu.trace_stop"() : () -> ()
    %238 = vector.broadcast %221 : vector<1x1x128xf32> to vector<2x8x128xf32>
    %239 = arith.mulf %238, %237 : vector<2x8x128xf32>
    %240 = arith.addf %218, %239 : vector<2x8x128xf32>
    %241 = vector.extract_strided_slice %7 {offsets = [3, 0, 0], sizes = [1, 128, 128], strides = [1, 1, 1]} : vector<4x128x128xbf16> to vector<1x128x128xbf16>
    %242 = vector.shape_cast %241 : vector<1x128x128xbf16> to vector<128x128xbf16>
    %243 = vector.extract_strided_slice %8 {offsets = [3, 0], sizes = [1, 128], strides = [1, 1]} : vector<4x128xf32> to vector<1x128xf32>
    %244 = vector.shape_cast %243 : vector<1x128xf32> to vector<128xf32>
    %245 = vector.shape_cast %240 : vector<2x8x128xf32> to vector<16x128xf32>
    %246 = arith.truncf %245 : vector<16x128xf32> to vector<16x128xbf16>
    %cst_61 = arith.constant dense<0.000000e+00> : vector<16x128xf32>
    %247 = tpu.matmul %246, %242, %cst_61 {dimension_numbers = #tpu.dot_dimension_numbers<[1], [0], [0], [1], [0, 0, 1, 1], [], []>} : vector<16x128xbf16>, vector<128x128xbf16>, vector<16x128xf32> -> vector<16x128xf32>
    %248 = vector.shape_cast %244 : vector<128xf32> to vector<1x128xf32>
    %249 = vector.broadcast %248 : vector<1x128xf32> to vector<16x128xf32>
    %250 = arith.addf %247, %249 : vector<16x128xf32>
    %251 = vector.shape_cast %250 : vector<16x128xf32> to vector<2x8x128xf32>
    %252 = arith.addf %5, %251 : vector<2x8x128xf32>
    %253 = vector.extract_strided_slice %6 {offsets = [0, 0], sizes = [1, 128], strides = [1, 1]} : vector<4x128xf32> to vector<1x128xf32>
    %254 = vector.shape_cast %253 : vector<1x128xf32> to vector<128xf32>
    %255 = vector.extract_strided_slice %6 {offsets = [1, 0], sizes = [1, 128], strides = [1, 1]} : vector<4x128xf32> to vector<1x128xf32>
    %256 = vector.shape_cast %255 : vector<1x128xf32> to vector<128xf32>
    %cst_62 = arith.constant dense<0.000000e+00> : vector<2x8xf32>
    %257 = vector.multi_reduction <add>, %252, %cst_62 [2] : vector<2x8x128xf32> to vector<2x8xf32>
    %258 = vector.shape_cast %257 : vector<2x8xf32> to vector<2x8x1xf32>
    %259 = arith.mulf %252, %252 : vector<2x8x128xf32>
    %cst_63 = arith.constant dense<0.000000e+00> : vector<2x8xf32>
    %260 = vector.multi_reduction <add>, %259, %cst_63 [2] : vector<2x8x128xf32> to vector<2x8xf32>
    %261 = vector.shape_cast %260 : vector<2x8xf32> to vector<2x8x1xf32>
    %cst_64 = arith.constant 0.00925925932 : f32
    %262 = vector.broadcast %cst_64 : f32 to vector<2x8x1xf32>
    %263 = arith.mulf %258, %262 : vector<2x8x1xf32>
    %cst_65 = arith.constant 0.00925925932 : f32
    %264 = vector.broadcast %cst_65 : f32 to vector<2x8x1xf32>
    %265 = arith.mulf %261, %264 : vector<2x8x1xf32>
    %266 = arith.mulf %263, %263 : vector<2x8x1xf32>
    %267 = arith.subf %265, %266 : vector<2x8x1xf32>
    %268 = vector.broadcast %263 : vector<2x8x1xf32> to vector<2x8x128xf32>
    %269 = arith.subf %252, %268 : vector<2x8x128xf32>
    %cst_66 = arith.constant 9.99999974E-6 : f32
    %270 = vector.broadcast %cst_66 : f32 to vector<2x8x1xf32>
    %271 = arith.addf %267, %270 : vector<2x8x1xf32>
    %272 = math.rsqrt %271 : vector<2x8x1xf32>
    %273 = vector.broadcast %272 : vector<2x8x1xf32> to vector<2x8x128xf32>
    %274 = arith.mulf %269, %273 : vector<2x8x128xf32>
    %275 = vector.shape_cast %254 : vector<128xf32> to vector<1x1x128xf32>
    %276 = vector.broadcast %275 : vector<1x1x128xf32> to vector<2x8x128xf32>
    %277 = arith.mulf %274, %276 : vector<2x8x128xf32>
    %278 = vector.shape_cast %256 : vector<128xf32> to vector<1x1x128xf32>
    %279 = vector.broadcast %278 : vector<1x1x128xf32> to vector<2x8x128xf32>
    %280 = arith.addf %277, %279 : vector<2x8x128xf32>
    %c0_67 = arith.constant 0 : index
    %c0_68 = arith.constant 0 : index
    %281 = vector.load %arg8[%c0_67, %c0_68] : memref<128x2048xbf16, #tpu.memory_space<vmem>>, vector<128x2048xbf16>
    %c0_69 = arith.constant 0 : index
    %c0_70 = arith.constant 0 : index
    %282 = vector.load %arg9[%c0_69, %c0_70] : memref<1x2048xf32, #tpu.memory_space<vmem>>, vector<1x2048xf32>
    %c0_71 = arith.constant 0 : index
    %c0_72 = arith.constant 0 : index
    %283 = vector.load %arg10[%c0_71, %c0_72] : memref<2048x128xbf16, #tpu.memory_space<vmem>>, vector<2048x128xbf16>
    %c0_73 = arith.constant 0 : index
    %c0_74 = arith.constant 0 : index
    %284 = vector.load %arg11[%c0_73, %c0_74] : memref<1x128xf32, #tpu.memory_space<vmem>>, vector<1x128xf32>
    %285 = vector.shape_cast %280 : vector<2x8x128xf32> to vector<16x128xf32>
    %286 = arith.truncf %285 : vector<16x128xf32> to vector<16x128xbf16>
    %cst_75 = arith.constant dense<0.000000e+00> : vector<16x2048xf32>
    %287 = tpu.matmul %286, %281, %cst_75 {dimension_numbers = #tpu.dot_dimension_numbers<[1], [0], [0], [1], [0, 0, 1, 1], [], []>} : vector<16x128xbf16>, vector<128x2048xbf16>, vector<16x2048xf32> -> vector<16x2048xf32>
    %288 = vector.broadcast %282 : vector<1x2048xf32> to vector<16x2048xf32>
    %289 = arith.addf %287, %288 : vector<16x2048xf32>
    %290 = vector.shape_cast %289 : vector<16x2048xf32> to vector<2x8x2048xf32>
    %cst_76 = arith.constant 0.000000e+00 : f32
    %291 = vector.broadcast %cst_76 : f32 to vector<2x8x2048xf32>
    %292 = arith.maximumf %290, %291 : vector<2x8x2048xf32>
    %293 = vector.shape_cast %292 : vector<2x8x2048xf32> to vector<16x2048xf32>
    %294 = arith.truncf %293 : vector<16x2048xf32> to vector<16x2048xbf16>
    %cst_77 = arith.constant dense<0.000000e+00> : vector<16x128xf32>
    %295 = tpu.matmul %294, %283, %cst_77 {dimension_numbers = #tpu.dot_dimension_numbers<[1], [0], [0], [1], [0, 0, 1, 1], [], []>} : vector<16x2048xbf16>, vector<2048x128xbf16>, vector<16x128xf32> -> vector<16x128xf32>
    %296 = vector.broadcast %284 : vector<1x128xf32> to vector<16x128xf32>
    %297 = arith.addf %295, %296 : vector<16x128xf32>
    %298 = vector.shape_cast %297 : vector<16x128xf32> to vector<2x8x128xf32>
    %299 = arith.addf %280, %298 : vector<2x8x128xf32>
    %300 = vector.extract_strided_slice %6 {offsets = [2, 0], sizes = [1, 128], strides = [1, 1]} : vector<4x128xf32> to vector<1x128xf32>
    %301 = vector.shape_cast %300 : vector<1x128xf32> to vector<128xf32>
    %302 = vector.extract_strided_slice %6 {offsets = [3, 0], sizes = [1, 128], strides = [1, 1]} : vector<4x128xf32> to vector<1x128xf32>
    %303 = vector.shape_cast %302 : vector<1x128xf32> to vector<128xf32>
    %cst_78 = arith.constant dense<0.000000e+00> : vector<2x8xf32>
    %304 = vector.multi_reduction <add>, %299, %cst_78 [2] : vector<2x8x128xf32> to vector<2x8xf32>
    %305 = vector.shape_cast %304 : vector<2x8xf32> to vector<2x8x1xf32>
    %306 = arith.mulf %299, %299 : vector<2x8x128xf32>
    %cst_79 = arith.constant dense<0.000000e+00> : vector<2x8xf32>
    %307 = vector.multi_reduction <add>, %306, %cst_79 [2] : vector<2x8x128xf32> to vector<2x8xf32>
    %308 = vector.shape_cast %307 : vector<2x8xf32> to vector<2x8x1xf32>
    %cst_80 = arith.constant 0.00925925932 : f32
    %309 = vector.broadcast %cst_80 : f32 to vector<2x8x1xf32>
    %310 = arith.mulf %305, %309 : vector<2x8x1xf32>
    %cst_81 = arith.constant 0.00925925932 : f32
    %311 = vector.broadcast %cst_81 : f32 to vector<2x8x1xf32>
    %312 = arith.mulf %308, %311 : vector<2x8x1xf32>
    %313 = arith.mulf %310, %310 : vector<2x8x1xf32>
    %314 = arith.subf %312, %313 : vector<2x8x1xf32>
    %315 = vector.broadcast %310 : vector<2x8x1xf32> to vector<2x8x128xf32>
    %316 = arith.subf %299, %315 : vector<2x8x128xf32>
    %cst_82 = arith.constant 9.99999974E-6 : f32
    %317 = vector.broadcast %cst_82 : f32 to vector<2x8x1xf32>
    %318 = arith.addf %314, %317 : vector<2x8x1xf32>
    %319 = math.rsqrt %318 : vector<2x8x1xf32>
    %320 = vector.broadcast %319 : vector<2x8x1xf32> to vector<2x8x128xf32>
    %321 = arith.mulf %316, %320 : vector<2x8x128xf32>
    %322 = vector.shape_cast %301 : vector<128xf32> to vector<1x1x128xf32>
    %323 = vector.broadcast %322 : vector<1x1x128xf32> to vector<2x8x128xf32>
    %324 = arith.mulf %321, %323 : vector<2x8x128xf32>
    %325 = vector.shape_cast %303 : vector<128xf32> to vector<1x1x128xf32>
    %326 = vector.broadcast %325 : vector<1x1x128xf32> to vector<2x8x128xf32>
    %327 = arith.addf %324, %326 : vector<2x8x128xf32>
    %c0_83 = arith.constant 0 : index
    %c0_84 = arith.constant 0 : index
    %328 = vector.load %arg14[%c0_83, %c0_84] : memref<4x128xf32, #tpu.memory_space<vmem>>, vector<4x128xf32>
    %c0_85 = arith.constant 0 : index
    %c0_86 = arith.constant 0 : index
    %329 = vector.load %arg3[%c0_85, %c0_86] : memref<1x128xf32, #tpu.memory_space<vmem>>, vector<1x128xf32>
    %330 = vector.shape_cast %329 : vector<1x128xf32> to vector<1x1x128xf32>
    %331 = vector.shape_cast %330 : vector<1x1x128xf32> to vector<1x1x128xf32>
    %332 = vector.broadcast %331 : vector<1x1x128xf32> to vector<2x1x128xf32>
    %c0_87 = arith.constant 0 : index
    %c0_88 = arith.constant 0 : index
    %c0_89 = arith.constant 0 : index
    %333 = vector.load %arg12[%c0_87, %c0_88, %c0_89] : memref<4x128x128xbf16, #tpu.memory_space<vmem>>, vector<4x128x128xbf16>
    %c0_90 = arith.constant 0 : index
    %c0_91 = arith.constant 0 : index
    %334 = vector.load %arg13[%c0_90, %c0_91] : memref<4x128xf32, #tpu.memory_space<vmem>>, vector<4x128xf32>
    %335 = vector.extract_strided_slice %333 {offsets = [0, 0, 0], sizes = [1, 128, 128], strides = [1, 1, 1]} : vector<4x128x128xbf16> to vector<1x128x128xbf16>
    %336 = vector.shape_cast %335 : vector<1x128x128xbf16> to vector<128x128xbf16>
    %337 = vector.extract_strided_slice %334 {offsets = [0, 0], sizes = [1, 128], strides = [1, 1]} : vector<4x128xf32> to vector<1x128xf32>
    %338 = vector.shape_cast %337 : vector<1x128xf32> to vector<128xf32>
    %339 = vector.shape_cast %332 : vector<2x1x128xf32> to vector<2x128xf32>
    %340 = arith.truncf %339 : vector<2x128xf32> to vector<2x128xbf16>
    %cst_92 = arith.constant dense<0.000000e+00> : vector<2x128xf32>
    %341 = tpu.matmul %340, %336, %cst_92 {dimension_numbers = #tpu.dot_dimension_numbers<[1], [0], [0], [1], [0, 0, 1, 1], [], []>} : vector<2x128xbf16>, vector<128x128xbf16>, vector<2x128xf32> -> vector<2x128xf32>
    %342 = vector.shape_cast %338 : vector<128xf32> to vector<1x128xf32>
    %343 = vector.broadcast %342 : vector<1x128xf32> to vector<2x128xf32>
    %344 = arith.addf %341, %343 : vector<2x128xf32>
    %345 = vector.shape_cast %344 : vector<2x128xf32> to vector<2x1x128xf32>
    %346 = vector.extract_strided_slice %333 {offsets = [1, 0, 0], sizes = [1, 128, 128], strides = [1, 1, 1]} : vector<4x128x128xbf16> to vector<1x128x128xbf16>
    %347 = vector.shape_cast %346 : vector<1x128x128xbf16> to vector<128x128xbf16>
    %348 = vector.extract_strided_slice %334 {offsets = [1, 0], sizes = [1, 128], strides = [1, 1]} : vector<4x128xf32> to vector<1x128xf32>
    %349 = vector.shape_cast %348 : vector<1x128xf32> to vector<128xf32>
    %350 = vector.shape_cast %327 : vector<2x8x128xf32> to vector<16x128xf32>
    %351 = arith.truncf %350 : vector<16x128xf32> to vector<16x128xbf16>
    %cst_93 = arith.constant dense<0.000000e+00> : vector<16x128xf32>
    %352 = tpu.matmul %351, %347, %cst_93 {dimension_numbers = #tpu.dot_dimension_numbers<[1], [0], [0], [1], [0, 0, 1, 1], [], []>} : vector<16x128xbf16>, vector<128x128xbf16>, vector<16x128xf32> -> vector<16x128xf32>
    %353 = vector.shape_cast %349 : vector<128xf32> to vector<1x128xf32>
    %354 = vector.broadcast %353 : vector<1x128xf32> to vector<16x128xf32>
    %355 = arith.addf %352, %354 : vector<16x128xf32>
    %356 = vector.shape_cast %355 : vector<16x128xf32> to vector<2x8x128xf32>
    %357 = vector.extract_strided_slice %333 {offsets = [2, 0, 0], sizes = [1, 128, 128], strides = [1, 1, 1]} : vector<4x128x128xbf16> to vector<1x128x128xbf16>
    %358 = vector.shape_cast %357 : vector<1x128x128xbf16> to vector<128x128xbf16>
    %359 = vector.extract_strided_slice %334 {offsets = [2, 0], sizes = [1, 128], strides = [1, 1]} : vector<4x128xf32> to vector<1x128xf32>
    %360 = vector.shape_cast %359 : vector<1x128xf32> to vector<128xf32>
    %361 = vector.shape_cast %327 : vector<2x8x128xf32> to vector<16x128xf32>
    %362 = arith.truncf %361 : vector<16x128xf32> to vector<16x128xbf16>
    %cst_94 = arith.constant dense<0.000000e+00> : vector<16x128xf32>
    %363 = tpu.matmul %362, %358, %cst_94 {dimension_numbers = #tpu.dot_dimension_numbers<[1], [0], [0], [1], [0, 0, 1, 1], [], []>} : vector<16x128xbf16>, vector<128x128xbf16>, vector<16x128xf32> -> vector<16x128xf32>
    %364 = vector.shape_cast %360 : vector<128xf32> to vector<1x128xf32>
    %365 = vector.broadcast %364 : vector<1x128xf32> to vector<16x128xf32>
    %366 = arith.addf %363, %365 : vector<16x128xf32>
    %367 = vector.shape_cast %366 : vector<16x128xf32> to vector<2x8x128xf32>
    %cst_95 = arith.constant 0.000000e+00 : f32
    %368 = vector.broadcast %cst_95 : f32 to vector<2x1x128xf32>
    %369 = vector.extract_strided_slice %0 {offsets = [0, 0], sizes = [1, 128], strides = [1, 1]} : vector<9x128xf32> to vector<1x128xf32>
    %370 = vector.shape_cast %369 : vector<1x128xf32> to vector<128xf32>
    %371 = vector.shape_cast %370 : vector<128xf32> to vector<1x1x128xf32>
    %372 = vector.broadcast %371 : vector<1x1x128xf32> to vector<2x1x128xf32>
    %373 = arith.mulf %345, %372 : vector<2x1x128xf32>
    "tpu.trace_start"() <{level = 10 : i32, message = "bqd,bkd->bqk"}> : () -> ()
    %cst_96 = arith.constant dense<0.000000e+00> : vector<2x1x8xf32>
    %374 = tpu.matmul %373, %356, %cst_96 {dimension_numbers = #tpu.dot_dimension_numbers<[2], [2], [1], [1], [0, 0, 0, 1, 1, 1], [0], [0]>} : vector<2x1x128xf32>, vector<2x8x128xf32>, vector<2x1x8xf32> -> vector<2x1x8xf32>
    "tpu.trace_stop"() : () -> ()
    %cst_97 = arith.constant 0.288675129 : f32
    %375 = vector.broadcast %cst_97 : f32 to vector<2x1x8xf32>
    %376 = arith.mulf %374, %375 : vector<2x1x8xf32>
    %cst_98 = arith.constant dense<0xFF800000> : vector<2x1xf32>
    %377 = vector.multi_reduction <maximumf>, %376, %cst_98 [2] : vector<2x1x8xf32> to vector<2x1xf32>
    %378 = vector.shape_cast %377 : vector<2x1xf32> to vector<2x1x1xf32>
    %379 = vector.broadcast %378 : vector<2x1x1xf32> to vector<2x1x8xf32>
    %380 = arith.subf %376, %379 : vector<2x1x8xf32>
    %381 = math.exp %380 : vector<2x1x8xf32>
    %cst_99 = arith.constant dense<0.000000e+00> : vector<2x1xf32>
    %382 = vector.multi_reduction <add>, %381, %cst_99 [2] : vector<2x1x8xf32> to vector<2x1xf32>
    %383 = vector.shape_cast %382 : vector<2x1xf32> to vector<2x1x1xf32>
    %384 = tpu.reciprocal %383 {approx = true} : vector<2x1x1xf32> -> vector<2x1x1xf32>
    %385 = vector.broadcast %384 : vector<2x1x1xf32> to vector<2x1x8xf32>
    %386 = arith.mulf %381, %385 : vector<2x1x8xf32>
    "tpu.trace_start"() <{level = 10 : i32, message = "bqk,bkd->bqd"}> : () -> ()
    %cst_100 = arith.constant dense<0.000000e+00> : vector<2x1x128xf32>
    %387 = tpu.matmul %386, %367, %cst_100 {dimension_numbers = #tpu.dot_dimension_numbers<[2], [1], [1], [2], [0, 0, 0, 1, 1, 2], [0], [0]>} : vector<2x1x8xf32>, vector<2x8x128xf32>, vector<2x1x128xf32> -> vector<2x1x128xf32>
    "tpu.trace_stop"() : () -> ()
    %388 = vector.broadcast %371 : vector<1x1x128xf32> to vector<2x1x128xf32>
    %389 = arith.mulf %388, %387 : vector<2x1x128xf32>
    %390 = arith.addf %368, %389 : vector<2x1x128xf32>
    %391 = vector.extract_strided_slice %0 {offsets = [1, 0], sizes = [1, 128], strides = [1, 1]} : vector<9x128xf32> to vector<1x128xf32>
    %392 = vector.shape_cast %391 : vector<1x128xf32> to vector<128xf32>
    %393 = vector.shape_cast %392 : vector<128xf32> to vector<1x1x128xf32>
    %394 = vector.broadcast %393 : vector<1x1x128xf32> to vector<2x1x128xf32>
    %395 = arith.mulf %345, %394 : vector<2x1x128xf32>
    "tpu.trace_start"() <{level = 10 : i32, message = "bqd,bkd->bqk"}> : () -> ()
    %cst_101 = arith.constant dense<0.000000e+00> : vector<2x1x8xf32>
    %396 = tpu.matmul %395, %356, %cst_101 {dimension_numbers = #tpu.dot_dimension_numbers<[2], [2], [1], [1], [0, 0, 0, 1, 1, 1], [0], [0]>} : vector<2x1x128xf32>, vector<2x8x128xf32>, vector<2x1x8xf32> -> vector<2x1x8xf32>
    "tpu.trace_stop"() : () -> ()
    %cst_102 = arith.constant 0.288675129 : f32
    %397 = vector.broadcast %cst_102 : f32 to vector<2x1x8xf32>
    %398 = arith.mulf %396, %397 : vector<2x1x8xf32>
    %cst_103 = arith.constant dense<0xFF800000> : vector<2x1xf32>
    %399 = vector.multi_reduction <maximumf>, %398, %cst_103 [2] : vector<2x1x8xf32> to vector<2x1xf32>
    %400 = vector.shape_cast %399 : vector<2x1xf32> to vector<2x1x1xf32>
    %401 = vector.broadcast %400 : vector<2x1x1xf32> to vector<2x1x8xf32>
    %402 = arith.subf %398, %401 : vector<2x1x8xf32>
    %403 = math.exp %402 : vector<2x1x8xf32>
    %cst_104 = arith.constant dense<0.000000e+00> : vector<2x1xf32>
    %404 = vector.multi_reduction <add>, %403, %cst_104 [2] : vector<2x1x8xf32> to vector<2x1xf32>
    %405 = vector.shape_cast %404 : vector<2x1xf32> to vector<2x1x1xf32>
    %406 = tpu.reciprocal %405 {approx = true} : vector<2x1x1xf32> -> vector<2x1x1xf32>
    %407 = vector.broadcast %406 : vector<2x1x1xf32> to vector<2x1x8xf32>
    %408 = arith.mulf %403, %407 : vector<2x1x8xf32>
    "tpu.trace_start"() <{level = 10 : i32, message = "bqk,bkd->bqd"}> : () -> ()
    %cst_105 = arith.constant dense<0.000000e+00> : vector<2x1x128xf32>
    %409 = tpu.matmul %408, %367, %cst_105 {dimension_numbers = #tpu.dot_dimension_numbers<[2], [1], [1], [2], [0, 0, 0, 1, 1, 2], [0], [0]>} : vector<2x1x8xf32>, vector<2x8x128xf32>, vector<2x1x128xf32> -> vector<2x1x128xf32>
    "tpu.trace_stop"() : () -> ()
    %410 = vector.broadcast %393 : vector<1x1x128xf32> to vector<2x1x128xf32>
    %411 = arith.mulf %410, %409 : vector<2x1x128xf32>
    %412 = arith.addf %390, %411 : vector<2x1x128xf32>
    %413 = vector.extract_strided_slice %0 {offsets = [2, 0], sizes = [1, 128], strides = [1, 1]} : vector<9x128xf32> to vector<1x128xf32>
    %414 = vector.shape_cast %413 : vector<1x128xf32> to vector<128xf32>
    %415 = vector.shape_cast %414 : vector<128xf32> to vector<1x1x128xf32>
    %416 = vector.broadcast %415 : vector<1x1x128xf32> to vector<2x1x128xf32>
    %417 = arith.mulf %345, %416 : vector<2x1x128xf32>
    "tpu.trace_start"() <{level = 10 : i32, message = "bqd,bkd->bqk"}> : () -> ()
    %cst_106 = arith.constant dense<0.000000e+00> : vector<2x1x8xf32>
    %418 = tpu.matmul %417, %356, %cst_106 {dimension_numbers = #tpu.dot_dimension_numbers<[2], [2], [1], [1], [0, 0, 0, 1, 1, 1], [0], [0]>} : vector<2x1x128xf32>, vector<2x8x128xf32>, vector<2x1x8xf32> -> vector<2x1x8xf32>
    "tpu.trace_stop"() : () -> ()
    %cst_107 = arith.constant 0.288675129 : f32
    %419 = vector.broadcast %cst_107 : f32 to vector<2x1x8xf32>
    %420 = arith.mulf %418, %419 : vector<2x1x8xf32>
    %cst_108 = arith.constant dense<0xFF800000> : vector<2x1xf32>
    %421 = vector.multi_reduction <maximumf>, %420, %cst_108 [2] : vector<2x1x8xf32> to vector<2x1xf32>
    %422 = vector.shape_cast %421 : vector<2x1xf32> to vector<2x1x1xf32>
    %423 = vector.broadcast %422 : vector<2x1x1xf32> to vector<2x1x8xf32>
    %424 = arith.subf %420, %423 : vector<2x1x8xf32>
    %425 = math.exp %424 : vector<2x1x8xf32>
    %cst_109 = arith.constant dense<0.000000e+00> : vector<2x1xf32>
    %426 = vector.multi_reduction <add>, %425, %cst_109 [2] : vector<2x1x8xf32> to vector<2x1xf32>
    %427 = vector.shape_cast %426 : vector<2x1xf32> to vector<2x1x1xf32>
    %428 = tpu.reciprocal %427 {approx = true} : vector<2x1x1xf32> -> vector<2x1x1xf32>
    %429 = vector.broadcast %428 : vector<2x1x1xf32> to vector<2x1x8xf32>
    %430 = arith.mulf %425, %429 : vector<2x1x8xf32>
    "tpu.trace_start"() <{level = 10 : i32, message = "bqk,bkd->bqd"}> : () -> ()
    %cst_110 = arith.constant dense<0.000000e+00> : vector<2x1x128xf32>
    %431 = tpu.matmul %430, %367, %cst_110 {dimension_numbers = #tpu.dot_dimension_numbers<[2], [1], [1], [2], [0, 0, 0, 1, 1, 2], [0], [0]>} : vector<2x1x8xf32>, vector<2x8x128xf32>, vector<2x1x128xf32> -> vector<2x1x128xf32>
    "tpu.trace_stop"() : () -> ()
    %432 = vector.broadcast %415 : vector<1x1x128xf32> to vector<2x1x128xf32>
    %433 = arith.mulf %432, %431 : vector<2x1x128xf32>
    %434 = arith.addf %412, %433 : vector<2x1x128xf32>
    %435 = vector.extract_strided_slice %0 {offsets = [3, 0], sizes = [1, 128], strides = [1, 1]} : vector<9x128xf32> to vector<1x128xf32>
    %436 = vector.shape_cast %435 : vector<1x128xf32> to vector<128xf32>
    %437 = vector.shape_cast %436 : vector<128xf32> to vector<1x1x128xf32>
    %438 = vector.broadcast %437 : vector<1x1x128xf32> to vector<2x1x128xf32>
    %439 = arith.mulf %345, %438 : vector<2x1x128xf32>
    "tpu.trace_start"() <{level = 10 : i32, message = "bqd,bkd->bqk"}> : () -> ()
    %cst_111 = arith.constant dense<0.000000e+00> : vector<2x1x8xf32>
    %440 = tpu.matmul %439, %356, %cst_111 {dimension_numbers = #tpu.dot_dimension_numbers<[2], [2], [1], [1], [0, 0, 0, 1, 1, 1], [0], [0]>} : vector<2x1x128xf32>, vector<2x8x128xf32>, vector<2x1x8xf32> -> vector<2x1x8xf32>
    "tpu.trace_stop"() : () -> ()
    %cst_112 = arith.constant 0.288675129 : f32
    %441 = vector.broadcast %cst_112 : f32 to vector<2x1x8xf32>
    %442 = arith.mulf %440, %441 : vector<2x1x8xf32>
    %cst_113 = arith.constant dense<0xFF800000> : vector<2x1xf32>
    %443 = vector.multi_reduction <maximumf>, %442, %cst_113 [2] : vector<2x1x8xf32> to vector<2x1xf32>
    %444 = vector.shape_cast %443 : vector<2x1xf32> to vector<2x1x1xf32>
    %445 = vector.broadcast %444 : vector<2x1x1xf32> to vector<2x1x8xf32>
    %446 = arith.subf %442, %445 : vector<2x1x8xf32>
    %447 = math.exp %446 : vector<2x1x8xf32>
    %cst_114 = arith.constant dense<0.000000e+00> : vector<2x1xf32>
    %448 = vector.multi_reduction <add>, %447, %cst_114 [2] : vector<2x1x8xf32> to vector<2x1xf32>
    %449 = vector.shape_cast %448 : vector<2x1xf32> to vector<2x1x1xf32>
    %450 = tpu.reciprocal %449 {approx = true} : vector<2x1x1xf32> -> vector<2x1x1xf32>
    %451 = vector.broadcast %450 : vector<2x1x1xf32> to vector<2x1x8xf32>
    %452 = arith.mulf %447, %451 : vector<2x1x8xf32>
    "tpu.trace_start"() <{level = 10 : i32, message = "bqk,bkd->bqd"}> : () -> ()
    %cst_115 = arith.constant dense<0.000000e+00> : vector<2x1x128xf32>
    %453 = tpu.matmul %452, %367, %cst_115 {dimension_numbers = #tpu.dot_dimension_numbers<[2], [1], [1], [2], [0, 0, 0, 1, 1, 2], [0], [0]>} : vector<2x1x8xf32>, vector<2x8x128xf32>, vector<2x1x128xf32> -> vector<2x1x128xf32>
    "tpu.trace_stop"() : () -> ()
    %454 = vector.broadcast %437 : vector<1x1x128xf32> to vector<2x1x128xf32>
    %455 = arith.mulf %454, %453 : vector<2x1x128xf32>
    %456 = arith.addf %434, %455 : vector<2x1x128xf32>
    %457 = vector.extract_strided_slice %0 {offsets = [4, 0], sizes = [1, 128], strides = [1, 1]} : vector<9x128xf32> to vector<1x128xf32>
    %458 = vector.shape_cast %457 : vector<1x128xf32> to vector<128xf32>
    %459 = vector.shape_cast %458 : vector<128xf32> to vector<1x1x128xf32>
    %460 = vector.broadcast %459 : vector<1x1x128xf32> to vector<2x1x128xf32>
    %461 = arith.mulf %345, %460 : vector<2x1x128xf32>
    "tpu.trace_start"() <{level = 10 : i32, message = "bqd,bkd->bqk"}> : () -> ()
    %cst_116 = arith.constant dense<0.000000e+00> : vector<2x1x8xf32>
    %462 = tpu.matmul %461, %356, %cst_116 {dimension_numbers = #tpu.dot_dimension_numbers<[2], [2], [1], [1], [0, 0, 0, 1, 1, 1], [0], [0]>} : vector<2x1x128xf32>, vector<2x8x128xf32>, vector<2x1x8xf32> -> vector<2x1x8xf32>
    "tpu.trace_stop"() : () -> ()
    %cst_117 = arith.constant 0.288675129 : f32
    %463 = vector.broadcast %cst_117 : f32 to vector<2x1x8xf32>
    %464 = arith.mulf %462, %463 : vector<2x1x8xf32>
    %cst_118 = arith.constant dense<0xFF800000> : vector<2x1xf32>
    %465 = vector.multi_reduction <maximumf>, %464, %cst_118 [2] : vector<2x1x8xf32> to vector<2x1xf32>
    %466 = vector.shape_cast %465 : vector<2x1xf32> to vector<2x1x1xf32>
    %467 = vector.broadcast %466 : vector<2x1x1xf32> to vector<2x1x8xf32>
    %468 = arith.subf %464, %467 : vector<2x1x8xf32>
    %469 = math.exp %468 : vector<2x1x8xf32>
    %cst_119 = arith.constant dense<0.000000e+00> : vector<2x1xf32>
    %470 = vector.multi_reduction <add>, %469, %cst_119 [2] : vector<2x1x8xf32> to vector<2x1xf32>
    %471 = vector.shape_cast %470 : vector<2x1xf32> to vector<2x1x1xf32>
    %472 = tpu.reciprocal %471 {approx = true} : vector<2x1x1xf32> -> vector<2x1x1xf32>
    %473 = vector.broadcast %472 : vector<2x1x1xf32> to vector<2x1x8xf32>
    %474 = arith.mulf %469, %473 : vector<2x1x8xf32>
    "tpu.trace_start"() <{level = 10 : i32, message = "bqk,bkd->bqd"}> : () -> ()
    %cst_120 = arith.constant dense<0.000000e+00> : vector<2x1x128xf32>
    %475 = tpu.matmul %474, %367, %cst_120 {dimension_numbers = #tpu.dot_dimension_numbers<[2], [1], [1], [2], [0, 0, 0, 1, 1, 2], [0], [0]>} : vector<2x1x8xf32>, vector<2x8x128xf32>, vector<2x1x128xf32> -> vector<2x1x128xf32>
    "tpu.trace_stop"() : () -> ()
    %476 = vector.broadcast %459 : vector<1x1x128xf32> to vector<2x1x128xf32>
    %477 = arith.mulf %476, %475 : vector<2x1x128xf32>
    %478 = arith.addf %456, %477 : vector<2x1x128xf32>
    %479 = vector.extract_strided_slice %0 {offsets = [5, 0], sizes = [1, 128], strides = [1, 1]} : vector<9x128xf32> to vector<1x128xf32>
    %480 = vector.shape_cast %479 : vector<1x128xf32> to vector<128xf32>
    %481 = vector.shape_cast %480 : vector<128xf32> to vector<1x1x128xf32>
    %482 = vector.broadcast %481 : vector<1x1x128xf32> to vector<2x1x128xf32>
    %483 = arith.mulf %345, %482 : vector<2x1x128xf32>
    "tpu.trace_start"() <{level = 10 : i32, message = "bqd,bkd->bqk"}> : () -> ()
    %cst_121 = arith.constant dense<0.000000e+00> : vector<2x1x8xf32>
    %484 = tpu.matmul %483, %356, %cst_121 {dimension_numbers = #tpu.dot_dimension_numbers<[2], [2], [1], [1], [0, 0, 0, 1, 1, 1], [0], [0]>} : vector<2x1x128xf32>, vector<2x8x128xf32>, vector<2x1x8xf32> -> vector<2x1x8xf32>
    "tpu.trace_stop"() : () -> ()
    %cst_122 = arith.constant 0.288675129 : f32
    %485 = vector.broadcast %cst_122 : f32 to vector<2x1x8xf32>
    %486 = arith.mulf %484, %485 : vector<2x1x8xf32>
    %cst_123 = arith.constant dense<0xFF800000> : vector<2x1xf32>
    %487 = vector.multi_reduction <maximumf>, %486, %cst_123 [2] : vector<2x1x8xf32> to vector<2x1xf32>
    %488 = vector.shape_cast %487 : vector<2x1xf32> to vector<2x1x1xf32>
    %489 = vector.broadcast %488 : vector<2x1x1xf32> to vector<2x1x8xf32>
    %490 = arith.subf %486, %489 : vector<2x1x8xf32>
    %491 = math.exp %490 : vector<2x1x8xf32>
    %cst_124 = arith.constant dense<0.000000e+00> : vector<2x1xf32>
    %492 = vector.multi_reduction <add>, %491, %cst_124 [2] : vector<2x1x8xf32> to vector<2x1xf32>
    %493 = vector.shape_cast %492 : vector<2x1xf32> to vector<2x1x1xf32>
    %494 = tpu.reciprocal %493 {approx = true} : vector<2x1x1xf32> -> vector<2x1x1xf32>
    %495 = vector.broadcast %494 : vector<2x1x1xf32> to vector<2x1x8xf32>
    %496 = arith.mulf %491, %495 : vector<2x1x8xf32>
    "tpu.trace_start"() <{level = 10 : i32, message = "bqk,bkd->bqd"}> : () -> ()
    %cst_125 = arith.constant dense<0.000000e+00> : vector<2x1x128xf32>
    %497 = tpu.matmul %496, %367, %cst_125 {dimension_numbers = #tpu.dot_dimension_numbers<[2], [1], [1], [2], [0, 0, 0, 1, 1, 2], [0], [0]>} : vector<2x1x8xf32>, vector<2x8x128xf32>, vector<2x1x128xf32> -> vector<2x1x128xf32>
    "tpu.trace_stop"() : () -> ()
    %498 = vector.broadcast %481 : vector<1x1x128xf32> to vector<2x1x128xf32>
    %499 = arith.mulf %498, %497 : vector<2x1x128xf32>
    %500 = arith.addf %478, %499 : vector<2x1x128xf32>
    %501 = vector.extract_strided_slice %0 {offsets = [6, 0], sizes = [1, 128], strides = [1, 1]} : vector<9x128xf32> to vector<1x128xf32>
    %502 = vector.shape_cast %501 : vector<1x128xf32> to vector<128xf32>
    %503 = vector.shape_cast %502 : vector<128xf32> to vector<1x1x128xf32>
    %504 = vector.broadcast %503 : vector<1x1x128xf32> to vector<2x1x128xf32>
    %505 = arith.mulf %345, %504 : vector<2x1x128xf32>
    "tpu.trace_start"() <{level = 10 : i32, message = "bqd,bkd->bqk"}> : () -> ()
    %cst_126 = arith.constant dense<0.000000e+00> : vector<2x1x8xf32>
    %506 = tpu.matmul %505, %356, %cst_126 {dimension_numbers = #tpu.dot_dimension_numbers<[2], [2], [1], [1], [0, 0, 0, 1, 1, 1], [0], [0]>} : vector<2x1x128xf32>, vector<2x8x128xf32>, vector<2x1x8xf32> -> vector<2x1x8xf32>
    "tpu.trace_stop"() : () -> ()
    %cst_127 = arith.constant 0.288675129 : f32
    %507 = vector.broadcast %cst_127 : f32 to vector<2x1x8xf32>
    %508 = arith.mulf %506, %507 : vector<2x1x8xf32>
    %cst_128 = arith.constant dense<0xFF800000> : vector<2x1xf32>
    %509 = vector.multi_reduction <maximumf>, %508, %cst_128 [2] : vector<2x1x8xf32> to vector<2x1xf32>
    %510 = vector.shape_cast %509 : vector<2x1xf32> to vector<2x1x1xf32>
    %511 = vector.broadcast %510 : vector<2x1x1xf32> to vector<2x1x8xf32>
    %512 = arith.subf %508, %511 : vector<2x1x8xf32>
    %513 = math.exp %512 : vector<2x1x8xf32>
    %cst_129 = arith.constant dense<0.000000e+00> : vector<2x1xf32>
    %514 = vector.multi_reduction <add>, %513, %cst_129 [2] : vector<2x1x8xf32> to vector<2x1xf32>
    %515 = vector.shape_cast %514 : vector<2x1xf32> to vector<2x1x1xf32>
    %516 = tpu.reciprocal %515 {approx = true} : vector<2x1x1xf32> -> vector<2x1x1xf32>
    %517 = vector.broadcast %516 : vector<2x1x1xf32> to vector<2x1x8xf32>
    %518 = arith.mulf %513, %517 : vector<2x1x8xf32>
    "tpu.trace_start"() <{level = 10 : i32, message = "bqk,bkd->bqd"}> : () -> ()
    %cst_130 = arith.constant dense<0.000000e+00> : vector<2x1x128xf32>
    %519 = tpu.matmul %518, %367, %cst_130 {dimension_numbers = #tpu.dot_dimension_numbers<[2], [1], [1], [2], [0, 0, 0, 1, 1, 2], [0], [0]>} : vector<2x1x8xf32>, vector<2x8x128xf32>, vector<2x1x128xf32> -> vector<2x1x128xf32>
    "tpu.trace_stop"() : () -> ()
    %520 = vector.broadcast %503 : vector<1x1x128xf32> to vector<2x1x128xf32>
    %521 = arith.mulf %520, %519 : vector<2x1x128xf32>
    %522 = arith.addf %500, %521 : vector<2x1x128xf32>
    %523 = vector.extract_strided_slice %0 {offsets = [7, 0], sizes = [1, 128], strides = [1, 1]} : vector<9x128xf32> to vector<1x128xf32>
    %524 = vector.shape_cast %523 : vector<1x128xf32> to vector<128xf32>
    %525 = vector.shape_cast %524 : vector<128xf32> to vector<1x1x128xf32>
    %526 = vector.broadcast %525 : vector<1x1x128xf32> to vector<2x1x128xf32>
    %527 = arith.mulf %345, %526 : vector<2x1x128xf32>
    "tpu.trace_start"() <{level = 10 : i32, message = "bqd,bkd->bqk"}> : () -> ()
    %cst_131 = arith.constant dense<0.000000e+00> : vector<2x1x8xf32>
    %528 = tpu.matmul %527, %356, %cst_131 {dimension_numbers = #tpu.dot_dimension_numbers<[2], [2], [1], [1], [0, 0, 0, 1, 1, 1], [0], [0]>} : vector<2x1x128xf32>, vector<2x8x128xf32>, vector<2x1x8xf32> -> vector<2x1x8xf32>
    "tpu.trace_stop"() : () -> ()
    %cst_132 = arith.constant 0.288675129 : f32
    %529 = vector.broadcast %cst_132 : f32 to vector<2x1x8xf32>
    %530 = arith.mulf %528, %529 : vector<2x1x8xf32>
    %cst_133 = arith.constant dense<0xFF800000> : vector<2x1xf32>
    %531 = vector.multi_reduction <maximumf>, %530, %cst_133 [2] : vector<2x1x8xf32> to vector<2x1xf32>
    %532 = vector.shape_cast %531 : vector<2x1xf32> to vector<2x1x1xf32>
    %533 = vector.broadcast %532 : vector<2x1x1xf32> to vector<2x1x8xf32>
    %534 = arith.subf %530, %533 : vector<2x1x8xf32>
    %535 = math.exp %534 : vector<2x1x8xf32>
    %cst_134 = arith.constant dense<0.000000e+00> : vector<2x1xf32>
    %536 = vector.multi_reduction <add>, %535, %cst_134 [2] : vector<2x1x8xf32> to vector<2x1xf32>
    %537 = vector.shape_cast %536 : vector<2x1xf32> to vector<2x1x1xf32>
    %538 = tpu.reciprocal %537 {approx = true} : vector<2x1x1xf32> -> vector<2x1x1xf32>
    %539 = vector.broadcast %538 : vector<2x1x1xf32> to vector<2x1x8xf32>
    %540 = arith.mulf %535, %539 : vector<2x1x8xf32>
    "tpu.trace_start"() <{level = 10 : i32, message = "bqk,bkd->bqd"}> : () -> ()
    %cst_135 = arith.constant dense<0.000000e+00> : vector<2x1x128xf32>
    %541 = tpu.matmul %540, %367, %cst_135 {dimension_numbers = #tpu.dot_dimension_numbers<[2], [1], [1], [2], [0, 0, 0, 1, 1, 2], [0], [0]>} : vector<2x1x8xf32>, vector<2x8x128xf32>, vector<2x1x128xf32> -> vector<2x1x128xf32>
    "tpu.trace_stop"() : () -> ()
    %542 = vector.broadcast %525 : vector<1x1x128xf32> to vector<2x1x128xf32>
    %543 = arith.mulf %542, %541 : vector<2x1x128xf32>
    %544 = arith.addf %522, %543 : vector<2x1x128xf32>
    %545 = vector.extract_strided_slice %0 {offsets = [8, 0], sizes = [1, 128], strides = [1, 1]} : vector<9x128xf32> to vector<1x128xf32>
    %546 = vector.shape_cast %545 : vector<1x128xf32> to vector<128xf32>
    %547 = vector.shape_cast %546 : vector<128xf32> to vector<1x1x128xf32>
    %548 = vector.broadcast %547 : vector<1x1x128xf32> to vector<2x1x128xf32>
    %549 = arith.mulf %345, %548 : vector<2x1x128xf32>
    "tpu.trace_start"() <{level = 10 : i32, message = "bqd,bkd->bqk"}> : () -> ()
    %cst_136 = arith.constant dense<0.000000e+00> : vector<2x1x8xf32>
    %550 = tpu.matmul %549, %356, %cst_136 {dimension_numbers = #tpu.dot_dimension_numbers<[2], [2], [1], [1], [0, 0, 0, 1, 1, 1], [0], [0]>} : vector<2x1x128xf32>, vector<2x8x128xf32>, vector<2x1x8xf32> -> vector<2x1x8xf32>
    "tpu.trace_stop"() : () -> ()
    %cst_137 = arith.constant 0.288675129 : f32
    %551 = vector.broadcast %cst_137 : f32 to vector<2x1x8xf32>
    %552 = arith.mulf %550, %551 : vector<2x1x8xf32>
    %cst_138 = arith.constant dense<0xFF800000> : vector<2x1xf32>
    %553 = vector.multi_reduction <maximumf>, %552, %cst_138 [2] : vector<2x1x8xf32> to vector<2x1xf32>
    %554 = vector.shape_cast %553 : vector<2x1xf32> to vector<2x1x1xf32>
    %555 = vector.broadcast %554 : vector<2x1x1xf32> to vector<2x1x8xf32>
    %556 = arith.subf %552, %555 : vector<2x1x8xf32>
    %557 = math.exp %556 : vector<2x1x8xf32>
    %cst_139 = arith.constant dense<0.000000e+00> : vector<2x1xf32>
    %558 = vector.multi_reduction <add>, %557, %cst_139 [2] : vector<2x1x8xf32> to vector<2x1xf32>
    %559 = vector.shape_cast %558 : vector<2x1xf32> to vector<2x1x1xf32>
    %560 = tpu.reciprocal %559 {approx = true} : vector<2x1x1xf32> -> vector<2x1x1xf32>
    %561 = vector.broadcast %560 : vector<2x1x1xf32> to vector<2x1x8xf32>
    %562 = arith.mulf %557, %561 : vector<2x1x8xf32>
    "tpu.trace_start"() <{level = 10 : i32, message = "bqk,bkd->bqd"}> : () -> ()
    %cst_140 = arith.constant dense<0.000000e+00> : vector<2x1x128xf32>
    %563 = tpu.matmul %562, %367, %cst_140 {dimension_numbers = #tpu.dot_dimension_numbers<[2], [1], [1], [2], [0, 0, 0, 1, 1, 2], [0], [0]>} : vector<2x1x8xf32>, vector<2x8x128xf32>, vector<2x1x128xf32> -> vector<2x1x128xf32>
    "tpu.trace_stop"() : () -> ()
    %564 = vector.broadcast %547 : vector<1x1x128xf32> to vector<2x1x128xf32>
    %565 = arith.mulf %564, %563 : vector<2x1x128xf32>
    %566 = arith.addf %544, %565 : vector<2x1x128xf32>
    %567 = vector.extract_strided_slice %333 {offsets = [3, 0, 0], sizes = [1, 128, 128], strides = [1, 1, 1]} : vector<4x128x128xbf16> to vector<1x128x128xbf16>
    %568 = vector.shape_cast %567 : vector<1x128x128xbf16> to vector<128x128xbf16>
    %569 = vector.extract_strided_slice %334 {offsets = [3, 0], sizes = [1, 128], strides = [1, 1]} : vector<4x128xf32> to vector<1x128xf32>
    %570 = vector.shape_cast %569 : vector<1x128xf32> to vector<128xf32>
    %571 = vector.shape_cast %566 : vector<2x1x128xf32> to vector<2x128xf32>
    %572 = arith.truncf %571 : vector<2x128xf32> to vector<2x128xbf16>
    %cst_141 = arith.constant dense<0.000000e+00> : vector<2x128xf32>
    %573 = tpu.matmul %572, %568, %cst_141 {dimension_numbers = #tpu.dot_dimension_numbers<[1], [0], [0], [1], [0, 0, 1, 1], [], []>} : vector<2x128xbf16>, vector<128x128xbf16>, vector<2x128xf32> -> vector<2x128xf32>
    %574 = vector.shape_cast %570 : vector<128xf32> to vector<1x128xf32>
    %575 = vector.broadcast %574 : vector<1x128xf32> to vector<2x128xf32>
    %576 = arith.addf %573, %575 : vector<2x128xf32>
    %577 = vector.shape_cast %576 : vector<2x128xf32> to vector<2x1x128xf32>
    %578 = arith.addf %332, %577 : vector<2x1x128xf32>
    %579 = vector.extract_strided_slice %328 {offsets = [0, 0], sizes = [1, 128], strides = [1, 1]} : vector<4x128xf32> to vector<1x128xf32>
    %580 = vector.shape_cast %579 : vector<1x128xf32> to vector<128xf32>
    %581 = vector.extract_strided_slice %328 {offsets = [1, 0], sizes = [1, 128], strides = [1, 1]} : vector<4x128xf32> to vector<1x128xf32>
    %582 = vector.shape_cast %581 : vector<1x128xf32> to vector<128xf32>
    %cst_142 = arith.constant dense<0.000000e+00> : vector<2x1xf32>
    %583 = vector.multi_reduction <add>, %578, %cst_142 [2] : vector<2x1x128xf32> to vector<2x1xf32>
    %584 = vector.shape_cast %583 : vector<2x1xf32> to vector<2x1x1xf32>
    %585 = arith.mulf %578, %578 : vector<2x1x128xf32>
    %cst_143 = arith.constant dense<0.000000e+00> : vector<2x1xf32>
    %586 = vector.multi_reduction <add>, %585, %cst_143 [2] : vector<2x1x128xf32> to vector<2x1xf32>
    %587 = vector.shape_cast %586 : vector<2x1xf32> to vector<2x1x1xf32>
    %cst_144 = arith.constant 0.00925925932 : f32
    %588 = vector.broadcast %cst_144 : f32 to vector<2x1x1xf32>
    %589 = arith.mulf %584, %588 : vector<2x1x1xf32>
    %cst_145 = arith.constant 0.00925925932 : f32
    %590 = vector.broadcast %cst_145 : f32 to vector<2x1x1xf32>
    %591 = arith.mulf %587, %590 : vector<2x1x1xf32>
    %592 = arith.mulf %589, %589 : vector<2x1x1xf32>
    %593 = arith.subf %591, %592 : vector<2x1x1xf32>
    %594 = vector.broadcast %589 : vector<2x1x1xf32> to vector<2x1x128xf32>
    %595 = arith.subf %578, %594 : vector<2x1x128xf32>
    %cst_146 = arith.constant 9.99999974E-6 : f32
    %596 = vector.broadcast %cst_146 : f32 to vector<2x1x1xf32>
    %597 = arith.addf %593, %596 : vector<2x1x1xf32>
    %598 = math.rsqrt %597 : vector<2x1x1xf32>
    %599 = vector.broadcast %598 : vector<2x1x1xf32> to vector<2x1x128xf32>
    %600 = arith.mulf %595, %599 : vector<2x1x128xf32>
    %601 = vector.shape_cast %580 : vector<128xf32> to vector<1x1x128xf32>
    %602 = vector.broadcast %601 : vector<1x1x128xf32> to vector<2x1x128xf32>
    %603 = arith.mulf %600, %602 : vector<2x1x128xf32>
    %604 = vector.shape_cast %582 : vector<128xf32> to vector<1x1x128xf32>
    %605 = vector.broadcast %604 : vector<1x1x128xf32> to vector<2x1x128xf32>
    %606 = arith.addf %603, %605 : vector<2x1x128xf32>
    %c0_147 = arith.constant 0 : index
    %c0_148 = arith.constant 0 : index
    %607 = vector.load %arg15[%c0_147, %c0_148] : memref<128x2048xbf16, #tpu.memory_space<vmem>>, vector<128x2048xbf16>
    %c0_149 = arith.constant 0 : index
    %c0_150 = arith.constant 0 : index
    %608 = vector.load %arg16[%c0_149, %c0_150] : memref<1x2048xf32, #tpu.memory_space<vmem>>, vector<1x2048xf32>
    %c0_151 = arith.constant 0 : index
    %c0_152 = arith.constant 0 : index
    %609 = vector.load %arg17[%c0_151, %c0_152] : memref<2048x128xbf16, #tpu.memory_space<vmem>>, vector<2048x128xbf16>
    %c0_153 = arith.constant 0 : index
    %c0_154 = arith.constant 0 : index
    %610 = vector.load %arg18[%c0_153, %c0_154] : memref<1x128xf32, #tpu.memory_space<vmem>>, vector<1x128xf32>
    %611 = vector.shape_cast %606 : vector<2x1x128xf32> to vector<2x128xf32>
    %612 = arith.truncf %611 : vector<2x128xf32> to vector<2x128xbf16>
    %cst_155 = arith.constant dense<0.000000e+00> : vector<2x2048xf32>
    %613 = tpu.matmul %612, %607, %cst_155 {dimension_numbers = #tpu.dot_dimension_numbers<[1], [0], [0], [1], [0, 0, 1, 1], [], []>} : vector<2x128xbf16>, vector<128x2048xbf16>, vector<2x2048xf32> -> vector<2x2048xf32>
    %614 = vector.broadcast %608 : vector<1x2048xf32> to vector<2x2048xf32>
    %615 = arith.addf %613, %614 : vector<2x2048xf32>
    %616 = vector.shape_cast %615 : vector<2x2048xf32> to vector<2x1x2048xf32>
    %cst_156 = arith.constant 0.000000e+00 : f32
    %617 = vector.broadcast %cst_156 : f32 to vector<2x1x2048xf32>
    %618 = arith.maximumf %616, %617 : vector<2x1x2048xf32>
    %619 = vector.shape_cast %618 : vector<2x1x2048xf32> to vector<2x2048xf32>
    %620 = arith.truncf %619 : vector<2x2048xf32> to vector<2x2048xbf16>
    %cst_157 = arith.constant dense<0.000000e+00> : vector<2x128xf32>
    %621 = tpu.matmul %620, %609, %cst_157 {dimension_numbers = #tpu.dot_dimension_numbers<[1], [0], [0], [1], [0, 0, 1, 1], [], []>} : vector<2x2048xbf16>, vector<2048x128xbf16>, vector<2x128xf32> -> vector<2x128xf32>
    %622 = vector.broadcast %610 : vector<1x128xf32> to vector<2x128xf32>
    %623 = arith.addf %621, %622 : vector<2x128xf32>
    %624 = vector.shape_cast %623 : vector<2x128xf32> to vector<2x1x128xf32>
    %625 = arith.addf %606, %624 : vector<2x1x128xf32>
    %626 = vector.extract_strided_slice %328 {offsets = [2, 0], sizes = [1, 128], strides = [1, 1]} : vector<4x128xf32> to vector<1x128xf32>
    %627 = vector.shape_cast %626 : vector<1x128xf32> to vector<128xf32>
    %628 = vector.extract_strided_slice %328 {offsets = [3, 0], sizes = [1, 128], strides = [1, 1]} : vector<4x128xf32> to vector<1x128xf32>
    %629 = vector.shape_cast %628 : vector<1x128xf32> to vector<128xf32>
    %cst_158 = arith.constant dense<0.000000e+00> : vector<2x1xf32>
    %630 = vector.multi_reduction <add>, %625, %cst_158 [2] : vector<2x1x128xf32> to vector<2x1xf32>
    %631 = vector.shape_cast %630 : vector<2x1xf32> to vector<2x1x1xf32>
    %632 = arith.mulf %625, %625 : vector<2x1x128xf32>
    %cst_159 = arith.constant dense<0.000000e+00> : vector<2x1xf32>
    %633 = vector.multi_reduction <add>, %632, %cst_159 [2] : vector<2x1x128xf32> to vector<2x1xf32>
    %634 = vector.shape_cast %633 : vector<2x1xf32> to vector<2x1x1xf32>
    %cst_160 = arith.constant 0.00925925932 : f32
    %635 = vector.broadcast %cst_160 : f32 to vector<2x1x1xf32>
    %636 = arith.mulf %631, %635 : vector<2x1x1xf32>
    %cst_161 = arith.constant 0.00925925932 : f32
    %637 = vector.broadcast %cst_161 : f32 to vector<2x1x1xf32>
    %638 = arith.mulf %634, %637 : vector<2x1x1xf32>
    %639 = arith.mulf %636, %636 : vector<2x1x1xf32>
    %640 = arith.subf %638, %639 : vector<2x1x1xf32>
    %641 = vector.broadcast %636 : vector<2x1x1xf32> to vector<2x1x128xf32>
    %642 = arith.subf %625, %641 : vector<2x1x128xf32>
    %cst_162 = arith.constant 9.99999974E-6 : f32
    %643 = vector.broadcast %cst_162 : f32 to vector<2x1x1xf32>
    %644 = arith.addf %640, %643 : vector<2x1x1xf32>
    %645 = math.rsqrt %644 : vector<2x1x1xf32>
    %646 = vector.broadcast %645 : vector<2x1x1xf32> to vector<2x1x128xf32>
    %647 = arith.mulf %642, %646 : vector<2x1x128xf32>
    %648 = vector.shape_cast %627 : vector<128xf32> to vector<1x1x128xf32>
    %649 = vector.broadcast %648 : vector<1x1x128xf32> to vector<2x1x128xf32>
    %650 = arith.mulf %647, %649 : vector<2x1x128xf32>
    %651 = vector.shape_cast %629 : vector<128xf32> to vector<1x1x128xf32>
    %652 = vector.broadcast %651 : vector<1x1x128xf32> to vector<2x1x128xf32>
    %653 = arith.addf %650, %652 : vector<2x1x128xf32>
    %654 = vector.shape_cast %653 : vector<2x1x128xf32> to vector<2x128xf32>
    %c0_163 = arith.constant 0 : index
    %c0_164 = arith.constant 0 : index
    %655 = vector.load %arg19[%c0_163, %c0_164] : memref<128x128xf32, #tpu.memory_space<vmem>>, vector<128x128xf32>
    %cst_165 = arith.constant dense<0.000000e+00> : vector<2x128xf32>
    %656 = tpu.matmul %654, %655, %cst_165 {dimension_numbers = #tpu.dot_dimension_numbers<[1], [0], [0], [1], [0, 0, 1, 1], [], []>} : vector<2x128xf32>, vector<128x128xf32>, vector<2x128xf32> -> vector<2x128xf32>
    %c0_166 = arith.constant 0 : index
    %c0_167 = arith.constant 0 : index
    %657 = vector.load %arg20[%c0_166, %c0_167] : memref<1x128xf32, #tpu.memory_space<vmem>>, vector<1x128xf32>
    %658 = vector.broadcast %657 : vector<1x128xf32> to vector<2x128xf32>
    %659 = arith.addf %656, %658 : vector<2x128xf32>
    %c0_168 = arith.constant 0 : index
    %c0_169 = arith.constant 0 : index
    %660 = vector.load %arg21[%c0_168, %c0_169] : memref<2x128xf32, #tpu.memory_space<vmem>>, vector<2x128xf32>
    tpu.vector_store %arg21[%c0_168, %c0_169], %659 {strides = array<i32>} : memref<2x128xf32, #tpu.memory_space<vmem>>, vector<2x128xf32>,
    return
  }
  func.func @transform_0(%arg0: i32) -> (i32, i32, i32) {
    %c0_i32 = arith.constant 0 : i32
    %c0_i32_0 = arith.constant 0 : i32
    %c0_i32_1 = arith.constant 0 : i32
    %c0_i32_2 = arith.constant 0 : i32
    return %c0_i32, %c0_i32_0, %c0_i32_1 : i32, i32, i32
  }
  func.func @transform_1(%arg0: i32) -> (i32, i32) {
    %c0_i32 = arith.constant 0 : i32
    %c0_i32_0 = arith.constant 0 : i32
    %c0_i32_1 = arith.constant 0 : i32
    return %c0_i32, %c0_i32_0 : i32, i32
  }
  func.func @transform_2(%arg0: i32) -> (i32, i32) {
    %c0_i32 = arith.constant 0 : i32
    %c0_i32_0 = arith.constant 0 : i32
    %c0_i32_1 = arith.constant 0 : i32
    return %c0_i32, %c0_i32_0 : i32, i32
  }
  func.func @transform_3(%arg0: i32) -> (i32, i32) {
    %c0_i32 = arith.constant 0 : i32
    %c0_i32_0 = arith.constant 0 : i32
    %c0_i32_1 = arith.constant 0 : i32
    return %c0_i32, %c0_i32_0 : i32, i32
  }
  func.func @transform_4(%arg0: i32) -> (i32, i32, i32) {
    %c0_i32 = arith.constant 0 : i32
    %c0_i32_0 = arith.constant 0 : i32
    %c0_i32_1 = arith.constant 0 : i32
    %c0_i32_2 = arith.constant 0 : i32
    return %c0_i32, %c0_i32_0, %c0_i32_1 : i32, i32, i32
  }
  func.func @transform_5(%arg0: i32) -> (i32, i32) {
    %c0_i32 = arith.constant 0 : i32
    %c0_i32_0 = arith.constant 0 : i32
    %c0_i32_1 = arith.constant 0 : i32
    return %c0_i32, %c0_i32_0 : i32, i32
  }
  func.func @transform_6(%arg0: i32) -> (i32, i32) {
    %c0_i32 = arith.constant 0 : i32
    %c0_i32_0 = arith.constant 0 : i32
    %c0_i32_1 = arith.constant 0 : i32
    return %c0_i32, %c0_i32_0 : i32, i32
  }
  func.func @transform_7(%arg0: i32) -> (i32, i32) {
    %c0_i32 = arith.constant 0 : i32
    %c0_i32_0 = arith.constant 0 : i32
    %c0_i32_1 = arith.constant 0 : i32
    return %c0_i32, %c0_i32_0 : i32, i32
  }
  func.func @transform_8(%arg0: i32) -> (i32, i32) {
    %c0_i32 = arith.constant 0 : i32
    %c0_i32_0 = arith.constant 0 : i32
    %c0_i32_1 = arith.constant 0 : i32
    return %c0_i32, %c0_i32_0 : i32, i32
  }
  func.func @transform_9(%arg0: i32) -> (i32, i32) {
    %c0_i32 = arith.constant 0 : i32
    %c0_i32_0 = arith.constant 0 : i32
    %c0_i32_1 = arith.constant 0 : i32
    return %c0_i32, %c0_i32_0 : i32, i32
  }
  func.func @transform_10(%arg0: i32) -> (i32, i32) {
    %c0_i32 = arith.constant 0 : i32
    %c0_i32_0 = arith.constant 0 : i32
    %c0_i32_1 = arith.constant 0 : i32
    return %c0_i32, %c0_i32_0 : i32, i32
  }
  func.func @transform_11(%arg0: i32) -> (i32, i32, i32) {
    %c0_i32 = arith.constant 0 : i32
    %c0_i32_0 = arith.constant 0 : i32
    %c0_i32_1 = arith.constant 0 : i32
    %c0_i32_2 = arith.constant 0 : i32
    return %c0_i32, %c0_i32_0, %c0_i32_1 : i32, i32, i32
  }
  func.func @transform_12(%arg0: i32) -> (i32, i32) {
    %c0_i32 = arith.constant 0 : i32
    %c0_i32_0 = arith.constant 0 : i32
    %c0_i32_1 = arith.constant 0 : i32
    return %c0_i32, %c0_i32_0 : i32, i32
  }
  func.func @transform_13(%arg0: i32) -> (i32, i32) {
    %c0_i32 = arith.constant 0 : i32
    %c0_i32_0 = arith.constant 0 : i32
    %c0_i32_1 = arith.constant 0 : i32
    return %c0_i32, %c0_i32_0 : i32, i32
  }
  func.func @transform_14(%arg0: i32) -> (i32, i32) {
    %c0_i32 = arith.constant 0 : i32
    %c0_i32_0 = arith.constant 0 : i32
    %c0_i32_1 = arith.constant 0 : i32
    return %c0_i32, %c0_i32_0 : i32, i32
  }
  func.func @transform_15(%arg0: i32) -> (i32, i32) {
    %c0_i32 = arith.constant 0 : i32
    %c0_i32_0 = arith.constant 0 : i32
    %c0_i32_1 = arith.constant 0 : i32
    return %c0_i32, %c0_i32_0 : i32, i32
  }
  func.func @transform_16(%arg0: i32) -> (i32, i32) {
    %c0_i32 = arith.constant 0 : i32
    %c0_i32_0 = arith.constant 0 : i32
    %c0_i32_1 = arith.constant 0 : i32
    return %c0_i32, %c0_i32_0 : i32, i32
  }
  func.func @transform_17(%arg0: i32) -> (i32, i32) {
    %c0_i32 = arith.constant 0 : i32
    %c0_i32_0 = arith.constant 0 : i32
    %c0_i32_1 = arith.constant 0 : i32
    return %c0_i32, %c0_i32_0 : i32, i32
  }
  func.func @transform_18(%arg0: i32) -> (i32, i32) {
    %c0_i32 = arith.constant 0 : i32
    %c0_i32_0 = arith.constant 0 : i32
    %c0_i32_1 = arith.constant 0 : i32
    return %c0_i32, %c0_i32_0 : i32, i32
  }
  func.func @transform_19(%arg0: i32) -> (i32, i32) {
    %c0_i32 = arith.constant 0 : i32
    %c0_i32_0 = arith.constant 0 : i32
    %c0_i32_1 = arith.constant 0 : i32
    return %c0_i32, %c0_i32_0 : i32, i32
  }
  func.func @transform_20(%arg0: i32) -> (i32, i32) {
    %c0_i32 = arith.constant 0 : i32
    %c0_i32_0 = arith.constant 0 : i32
    %c0_i32_1 = arith.constant 0 : i32
    return %c0_i32, %c0_i32_0 : i32, i32
  }
}

</mosaic_0001>

<bundles_post_ra>
// kernel: linear_spoter_forward.1
= control target key start
LH: loop header
LB: loop body
LE: loop exit
PB: predicated region body
PF: predicated region fallthrough
CT: control target
= control target key end

     0   :  { %s13035_s0 = inlined_call_operand.vmem [shape: f32[2,8,128], index: 0, kind: input, shape index: {}]   ;;  %s13036_s1 = inlined_call_operand.hbm [shape: f32[8,128], index: 1, kind: input, shape index: {}]   ;;  %s13037_s2 = inlined_call_operand.vmem [shape: f32[1,128], index: 2, kind: input, shape index: {}]   ;;  %s13038_s3 = inlined_call_operand.vmem [shape: f32[9,128], index: 3, kind: input, shape index: {}]   ;;  %s13039_s4 = inlined_call_operand.vmem [shape: bf16[4,128,128], index: 4, kind: input, shape index: {}]   ;;  %s13040_s5 = inlined_call_operand.hbm [shape: f32[4,128], index: 5, kind: input, shape index: {}]   ;;  %s13041_s6 = inlined_call_operand.hbm [shape: f32[4,128], index: 6, kind: input, shape index: {}]   ;;  %s13042_s7 = inlined_call_operand.hbm [shape: bf16[128,2048], index: 7, kind: input, shape index: {}]   ;;  %s13043_s8 = inlined_call_operand.vmem [shape: f32[1,2048], index: 8, kind: input, shape index: {}]   ;;  %s13044_s9 = inlined_call_operand.hbm [shape: bf16[2048,128], index: 9, kind: input, shape index: {}]   ;;  %s13045_s10 = inlined_call_operand.hbm [shape: f32[1,128], index: 10, kind: input, shape index: {}]   ;;  %s13046_s11 = inlined_call_operand.vmem [shape: bf16[4,128,128], index: 11, kind: input, shape index: {}]   ;;  %s13047_s12 = inlined_call_operand.hbm [shape: f32[4,128], index: 12, kind: input, shape index: {}]   ;;  %s13048_s13 = inlined_call_operand.hbm [shape: f32[4,128], index: 13, kind: input, shape index: {}]   ;;  %s13049_s14 = inlined_call_operand.hbm [shape: bf16[128,2048], index: 14, kind: input, shape index: {}]   ;;  %s13050_s15 = inlined_call_operand.vmem [shape: f32[1,2048], index: 15, kind: input, shape index: {}]   ;;  %s13051_s16 = inlined_call_operand.hbm [shape: bf16[2048,128], index: 16, kind: input, shape index: {}]   ;;  %s13052_s17 = inlined_call_operand.hbm [shape: f32[1,128], index: 17, kind: input, shape index: {}]   ;;  %s13053_s18 = inlined_call_operand.hbm [shape: f32[128,128], index: 18, kind: input, shape index: {}]   ;;  %s13054_s19 = inlined_call_operand.hbm [shape: f32[1,128], index: 19, kind: input, shape index: {}]   ;;  %s13055_s20 = inlined_call_operand.hbm [shape: f32[2,128], index: 20, kind: output, shape index: {}]  }
   0x1   :  { %13060 = sst [smem:[#allocation32_spill]] %s13035_s0 }
   0x2   :  { %13061 = sst [smem:[#allocation33_spill]] %s13036_s1 }
   0x3   :  { %13062 = sst [smem:[#allocation34_spill]] %s13037_s2 }
   0x4   :  { %13063 = sst [smem:[#allocation35_spill]] %s13038_s3 }
   0x5   :  { %13064 = sst [smem:[#allocation36_spill]] %s13039_s4 }
   0x6   :  { %25 = vsyncpa [#allocation3], 0 }
   0x7   :  { %26 = vsyncpa [#allocation6], 0 }
   0x8   :  { %27 = vsyncpa [#allocation9], 0 }
   0x9   :  { %28 = vsyncpa [#allocation12], 0 }
   0xa   :  { %29 = vsyncpa [#allocation15], 0 }
   0xb   :  { %30 = vsyncpa [#allocation18], 0 }
   0xc   :  { %31 = vsyncpa [#allocation21], 0  ;;  %s57_s23 = sshll.u32 %s13040_s5, 4  ;;  %s58_s23 = int_to_ptr.hbm [resolvable:$true] %s57_s23 }
   0xd   :  { %32 = vsyncpa [#allocation4], 0  ;;  %s11813_s24 = smov [#allocation5]   ;;  %s78_s26 = sshll.u32 %s13042_s7, 4  ;;  %s79_s26 = int_to_ptr.hbm [resolvable:$true] %s78_s26 }
   0xe   :  { %s59_s2 = sshll.u32 %s11813_s24, 4  ;;  %s11814_s27 = smov [#allocation8]   ;;  %s60_s2 = int_to_ptr.vmem [resolvable:$true] %s59_s2 }
   0xf   :  { %62 = dma.hbm_to_vmem [thread:$0]  %s58_s23, 64, %s60_s2, [#allocation6]  }
  0x10   :  { %s80_s28 = sshll.u32 %s11814_s27, 4  ;;  %s11815_s4 = smov 1024   ;;  %s81_s28 = int_to_ptr.vmem [resolvable:$true] %s80_s28 }
  0x11   :  { %s11816_s29 = smov 64   ;;  %s107_s0 = sshll.u32 %s13045_s10, 4  ;;  %s108_s0 = int_to_ptr.hbm [resolvable:$true] %s107_s0 }
  0x12   :  { %86 = dma.hbm_to_vmem [thread:$0]  %s79_s26, 16384, %s81_s28, [#allocation9], %s11815_s4, %s11815_s4, %s11816_s29  }
  0x13   :  { %s11817_s21 = smov [#allocation11]   ;;  %s131_s23 = sshll.u32 %s13048_s13, 4  ;;  %s132_s23 = int_to_ptr.hbm [resolvable:$true] %s131_s23 }
  0x14   :  { %s109_s1 = sshll.u32 %s11817_s21, 4  ;;  %s11818_s24 = smov [#allocation14]   ;;  %s110_s1 = int_to_ptr.vmem [resolvable:$true] %s109_s1 }
  0x15   :  { %112 = dma.hbm_to_vmem [thread:$0]  %s108_s0, 16, %s110_s1, [#allocation12]  }
  0x16   :  { %s133_s2 = sshll.u32 %s11818_s24, 4  ;;  %s156_s26 = sshll.u32 %s13051_s16, 4  ;;  %s134_s2 = int_to_ptr.vmem [resolvable:$true] %s133_s2  ;;  %s157_s26 = int_to_ptr.hbm [resolvable:$true] %s156_s26 }
  0x17   :  { %136 = dma.hbm_to_vmem [thread:$0]  %s132_s23, 64, %s134_s2, [#allocation15]  }
  0x18   :  { %s11819_s10 = smov [#allocation17]   ;;  %s180_s30 = sshll.u32 %s13053_s18, 4  ;;  %s181_s30 = int_to_ptr.hbm [resolvable:$true] %s180_s30 }
  0x19   :  { %s158_s27 = sshll.u32 %s11819_s10, 4  ;;  %s11820_s13 = smov 4   ;;  %s159_s27 = int_to_ptr.vmem [resolvable:$true] %s158_s27 }
  0x1a   :  { %164 = dma.hbm_to_vmem [thread:$0]  %s157_s26, 16384, %s159_s27, [#allocation18], %s11816_s29, %s11816_s29, %s11820_s13  }
  0x1b   :  { %s11821_s0 = smov [#allocation20]   ;;  %s13065_s7 = sld [smem:[#allocation33_spill]] }
  0x1c   :  { %s182_s21 = sshll.u32 %s11821_s0, 4  ;;  %s11822_s23 = smov 128   ;;  %s183_s21 = int_to_ptr.vmem [resolvable:$true] %s182_s21 }
  0x1d   :  { %s11823_s24 = smov 8   ;;  %s11824_s2 = smov [#allocation2]  }
  0x1e   :  { %188 = dma.hbm_to_vmem [thread:$0]  %s181_s30, 2048, %s183_s21, [#allocation21], %s11822_s23, %s11822_s23, %s11823_s24  }
  0x1f   :  { %s42_s18 = sshll.u32 %s11824_s2, 4  ;;  %s68_s10 = sshll.u32 %s13041_s6, 4  ;;  %s43_s18 = int_to_ptr.vmem [resolvable:$true] %s42_s18  ;;  %s69_s10 = int_to_ptr.hbm [resolvable:$true] %s68_s10 }
  0x20   :  { %s93_s28 = sshll.u32 %s13044_s9, 4  ;;  %s11825_s5 = smov [#allocation7]   ;;  %s94_s28 = int_to_ptr.hbm [resolvable:$true] %s93_s28 }
  0x21   :  { %s40_s22 = sshll.u32 %s13065_s7, 4  ;;  %s70_s0 = sshll.u32 %s11825_s5, 4  ;;  %s41_s22 = int_to_ptr.hbm [resolvable:$true] %s40_s22  ;;  %s71_s0 = int_to_ptr.vmem [resolvable:$true] %s70_s0 }
  0x22   :  { %45 = dma.hbm_to_vmem [thread:$0]  %s41_s22, 128, %s43_s18, [#allocation3]  }
  0x23   :  { %73 = dma.hbm_to_vmem [thread:$0]  %s69_s10, 64, %s71_s0, [#allocation6]  }
  0x24   :  { %s11826_s30 = smov [#allocation10]   ;;  %s120_s7 = sshll.u32 %s13047_s12, 4  ;;  %s121_s7 = int_to_ptr.hbm [resolvable:$true] %s120_s7 }
  0x25   :  { %s95_s21 = sshll.u32 %s11826_s30, 4  ;;  %s141_s9 = sshll.u32 %s13049_s14, 4  ;;  %s96_s21 = int_to_ptr.vmem [resolvable:$true] %s95_s21  ;;  %s142_s9 = int_to_ptr.hbm [resolvable:$true] %s141_s9 }
  0x26   :  { %101 = dma.hbm_to_vmem [thread:$0]  %s94_s28, 16384, %s96_s21, [#allocation9], %s11816_s29, %s11816_s29, %s11820_s13  }
  0x27   :  { %s11827_s23 = smov [#allocation13]   ;;  %s11828_s2 = smov [#allocation16]  }
  0x28   :  { %s122_s24 = sshll.u32 %s11827_s23, 4  ;;  %s143_s18 = sshll.u32 %s11828_s2, 4  ;;  %s123_s24 = int_to_ptr.vmem [resolvable:$true] %s122_s24  ;;  %s144_s18 = int_to_ptr.vmem [resolvable:$true] %s143_s18 }
  0x29   :  { %125 = dma.hbm_to_vmem [thread:$0]  %s121_s7, 64, %s123_s24, [#allocation12]  }
  0x2a   :  { %s170_s12 = sshll.u32 %s13052_s17, 4  ;;  %s194_s14 = sshll.u32 %s13054_s19, 4  ;;  %s171_s12 = int_to_ptr.hbm [resolvable:$true] %s170_s12  ;;  %s195_s14 = int_to_ptr.hbm [resolvable:$true] %s194_s14 }
  0x2b   :  { %149 = dma.hbm_to_vmem [thread:$0]  %s142_s9, 16384, %s144_s18, [#allocation15], %s11815_s4, %s11815_s4, %s11816_s29  }
  0x2c   :  { %s11829_s26 = smov [#allocation19]   ;;  %s11830_s28 = smov [#allocation22]  }
  0x2d   :  { %s172_s27 = sshll.u32 %s11829_s26, 4  ;;  %s196_s5 = sshll.u32 %s11830_s28, 4  ;;  %s173_s27 = int_to_ptr.vmem [resolvable:$true] %s172_s27  ;;  %s197_s5 = int_to_ptr.vmem [resolvable:$true] %s196_s5 }
  0x2e   :  { %175 = dma.hbm_to_vmem [thread:$0]  %s171_s12, 16, %s173_s27, [#allocation18]  }
  0x2f   :  { %199 = dma.hbm_to_vmem [thread:$0]  %s195_s14, 16, %s197_s5, [#allocation21]  }
  0x30   :  { %11797 = dma.done.wait [#allocation3], 128  }
  0x31   :  { %11798 = vsyncadd [#allocation3], 4294967168 }
  0x32   :  { %11799 = dma.done.wait [#allocation6], 128  }
  0x33   :  { %11800 = vsyncadd [#allocation6], 4294967168 }
  0x34   :  { %11801 = dma.done.wait [#allocation9], 32768  }
  0x35   :  { %11802 = vsyncadd [#allocation9], 4294934528 }
  0x36   :  { %11803 = dma.done.wait [#allocation12], 80  }
  0x37   :  { %11804 = vsyncadd [#allocation12], 4294967216 }
  0x38   :  { %11805 = dma.done.wait [#allocation15], 16448  }
  0x39   :  { %11806 = vsyncadd [#allocation15], 4294950848 }
  0x3a   :  { %11807 = dma.done.wait [#allocation18], 16400  }
  0x3b   :  { %11808 = vsyncadd [#allocation18], 4294950896 }
  0x3c   :  { %11809 = dma.done.wait [#allocation21], 2064  }
  0x3d   :  { %11810 = vsyncadd [#allocation21], 4294965232  ;;  %s13066_s4 = sld [smem:[#allocation36_spill]]  ;;  %v256_v22 = vld [vmem:[#allocation2] sm:$0xff]  ;;  %v324_v31 = vld [vmem:[#allocation5] sm:$0xf] }
  0x3e   :  { %s13067_s25 = sld [smem:[#allocation32_spill]]  ;;  %v326_v32 = vperm.slane %v324_v31, 0  ;;  %v389_v33 = vperm.slane %v324_v31, 1  ;;  %v452_v42 = vperm.slane %v324_v31, 2  ;;  %vm560_vm0 = vcmask 64512   ;;  %s8342_s14 = sshll.u32 %s13055_s20, 4  ;;  %s8343_s14 = int_to_ptr.hbm [resolvable:$true] %s8342_s14 }
  0x3f   :  { %s13068_s0 = sld [smem:[#allocation35_spill]]  ;;  %vm4138_vm7 = vcmask 1041409   ;;  %vm4377_vm14 = vcmask 57344   ;;  %vm5589_vm15 = vcmask 1040384  }
  0x40   :  { %s13069_s1 = sld [smem:[#allocation34_spill]] }
  0x43   :  { %v10705_v0 = vld [vmem:[%s13066_s4 + $0x38] sm:$0xff]  ;;  %v10704_v3 = vld [vmem:[%s13066_s4 + $0x30] sm:$0xff]  ;;  %v10703_v6 = vld [vmem:[%s13066_s4 + $0x28] sm:$0xff] }
  0x44   :  { %v10713_v1 = vld [vmem:[%s13066_s4 + $0x78] sm:$0xff]  ;;  %375 = vmatpush.bf16.msra.mxu0 %v10705_v0  ;;  %v10712_v4 = vld [vmem:[%s13066_s4 + $0x70] sm:$0xff]  ;;  %v10711_v7 = vld [vmem:[%s13066_s4 + $0x68] sm:$0xff] }
  0x45   :  { %v10721_v2 = vld [vmem:[%s13066_s4 + $0xb8] sm:$0xff]  ;;  %438 = vmatpush.bf16.msra.mxu1 %v10713_v1  ;;  %v10720_v5 = vld [vmem:[%s13066_s4 + $0xb0] sm:$0xff]  ;;  %v10719_v8 = vld [vmem:[%s13066_s4 + $0xa8] sm:$0xff] }
  0x46   :  { %501 = vmatpush.bf16.msra.mxu2 %v10721_v2  ;;  %v10702_v9 = vld [vmem:[%s13066_s4 + $0x20] sm:$0xff]  ;;  %v10701_v12 = vld [vmem:[%s13066_s4 + $0x18] sm:$0xff]  ;;  %v10700_v15 = vld [vmem:[%s13066_s4 + $0x10] sm:$0xff] }
  0x47   :  { %v10710_v10 = vld [vmem:[%s13066_s4 + $0x60] sm:$0xff]  ;;  %v10709_v13 = vld [vmem:[%s13066_s4 + $0x58] sm:$0xff]  ;;  %v10708_v16 = vld [vmem:[%s13066_s4 + $0x50] sm:$0xff] }
  0x48   :  { %376 = vmatpush.bf16.msra.mxu0 %v10704_v3  ;;  %v10718_v11 = vld [vmem:[%s13066_s4 + $0xa0] sm:$0xff]  ;;  %v10717_v14 = vld [vmem:[%s13066_s4 + $0x98] sm:$0xff]  ;;  %v10716_v17 = vld [vmem:[%s13066_s4 + $0x90] sm:$0xff] }
  0x49   :  { %439 = vmatpush.bf16.msra.mxu1 %v10712_v4  ;;  %v10699_v18 = vld [vmem:[%s13066_s4 + $0x8] sm:$0xff]  ;;  %v254_v20 = vld [vmem:[%s13067_s25] sm:$0xff] }
  0x4a   :  { %502 = vmatpush.bf16.msra.mxu2 %v10720_v5  ;;  %v10707_v19 = vld [vmem:[%s13066_s4 + $0x48] sm:$0xff]  ;;  %v12057_v24 = vadd.f32 %v256_v22, %v254_v20  ;;  %v10698_v26 = vld [vmem:[%s13066_s4] sm:$0xff] }
  0x4b   :  { %v255_v21 = vld [vmem:[%s13067_s25 + $0x8] sm:$0xff]  ;;  %v10706_v27 = vld [vmem:[%s13066_s4 + $0x40] sm:$0xff] }
  0x4c   :  { %377 = vmatpush.bf16.msra.mxu0 %v10703_v6  ;;  %v10715_v23 = vld [vmem:[%s13066_s4 + $0x88] sm:$0xff]  ;;  %v12059_v25 = vadd.f32 %v256_v22, %v255_v21  ;;  %v10714_v28 = vld [vmem:[%s13066_s4 + $0x80] sm:$0xff] }
  0x4d   :  { %440 = vmatpush.bf16.msra.mxu1 %v10711_v7  ;;  %v12075_v30 = vld [vmem:[%s13068_s0] sm:$0xff]  ;;  %v12139_v60 = vld [vmem:[%s13068_s0 + $0x8] ss:$0 sm:$0xff] }
  0x4e   :  { %503 = vmatpush.bf16.msra.mxu2 %v10719_v8  ;;  %v325_v29 = vpack.c.bf16 %v12059_v25, %v12057_v24  ;;  %4451 = vst [vmem:[#allocation1] sm:$0xff] %v12075_v30  ;;  %v12079_v34 = vperm.slane %v12075_v30, 0  ;;  %v12082_v35 = vperm.slane %v12075_v30, 3  ;;  %v12099_v47 = vperm.slane %v12075_v30, 4 }
  0x4f   :  { %v12115_v53 = vperm.slane %v12075_v30, 5  ;;  %v12126_v56 = vperm.slane %v12075_v30, 6  ;;  %v12132_v58 = vperm.slane %v12075_v30, 7  ;;  %v12152_v20 = vperm.slane %v12075_v30, 1 }
  0x50   :  { %378 = vmatpush.bf16.msra.mxu0 %v10702_v9 }
  0x51   :  { %441 = vmatpush.bf16.msra.mxu1 %v10710_v10 }
  0x52   :  { %504 = vmatpush.bf16.msra.mxu2 %v10718_v11 }
  0x54   :  { %379 = vmatpush.bf16.msra.mxu0 %v10701_v12 }
  0x55   :  { %442 = vmatpush.bf16.msra.mxu1 %v10709_v13 }
  0x56   :  { %505 = vmatpush.bf16.msra.mxu2 %v10717_v14 }
  0x58   :  { %380 = vmatpush.bf16.msra.mxu0 %v10700_v15 }
  0x59   :  { %443 = vmatpush.bf16.msra.mxu1 %v10708_v16 }
  0x5a   :  { %506 = vmatpush.bf16.msra.mxu2 %v10716_v17 }
  0x5c   :  { %381 = vmatpush.bf16.msra.mxu0 %v10699_v18 }
  0x5d   :  { %444 = vmatpush.bf16.msra.mxu1 %v10707_v19 }
  0x5e   :  { %507 = vmatpush.bf16.msra.mxu2 %v10715_v23  ;;  %v12161_v23 = vperm.slane %v12075_v30, 2 }
  0x60   :  { %382 = vmatpush.bf16.msra.mxu0 %v10698_v26 }
  0x61   :  { %445 = vmatpush.bf16.msra.mxu1 %v10706_v27 }
  0x62   :  { %508 = vmatpush.bf16.msra.mxu2 %v10714_v28 }
  0x63   :  { %383 = vmatmul.bf16.vlgmr.msra.gmra.mxu0 %v325_v29 }
  0x64   :  { %446 = vmatmul.bf16.vlgmr.msra.gmra.mxu1 %v325_v29 }
  0x65   :  { %509 = vmatmul.bf16.vlgmr.msra.gmra.mxu2 %v325_v29 }
  0xe0   :  { %v384_v36 = vpop.f32.mrf.mxu0 }
  0xe1   :  { %v447_v37 = vpop.f32.mrf.mxu1  ;;  %v12084_v38 = vadd.f32 %v384_v36, %v326_v32 }
  0xe2   :  { %v12086_v39 = vadd.f32 %v447_v37, %v389_v33 }
  0xe3   :  { %v516_v40 = vmul.f32 %v12079_v34, %v12084_v38  ;;  %v868_v41 = vmul.f32 %v12082_v35, %v12084_v38  ;;  %v985_v51 = vmul.f32 %v12099_v47, %v12084_v38  ;;  %v1102_v55 = vmul.f32 %v12115_v53, %v12084_v38 }
  0xe4   :  { %533 = vmatpush.xpose.msrb.mxu1 %v12086_v39  ;;  %885 = vmatpush.xpose.msrb.mxu2 %v12086_v39  ;;  %v1219_v57 = vmul.f32 %v12126_v56, %v12084_v38  ;;  %v1336_v59 = vmul.f32 %v12132_v58, %v12084_v38  ;;  %v1453_v61 = vmul.f32 %v12139_v60, %v12084_v38 }
  0xe5   :  { %v634_v21 = vmul.f32 %v12152_v20, %v12084_v38 }
  0xe7   :  { %534 = vmatmul.f32.vlgmr.msrb.gmra.mxu1 %v516_v40  ;;  %886 = vmatmul.f32.vlgmr.msrb.gmra.mxu2 %v868_v41 }
  0xe8   :  { %1002 = vmatpush.xpose.msra.mxu2 %v12086_v39  ;;  %v510_v43 = vpop.f32.mrf.mxu2  ;;  %v386_v45 = vpop.f32.mrf.mxu0 }
  0xe9   :  { %v12096_v44 = vadd.f32 %v510_v43, %v452_v42  ;;  %v449_v46 = vpop.f32.mrf.mxu1  ;;  %v12101_v48 = vadd.f32 %v386_v45, %v326_v32 }
  0xea   :  { %v12103_v49 = vadd.f32 %v449_v46, %v389_v33 }
  0xeb   :  { %718 = vmatpush.msrb.mxu0 %v12096_v44  ;;  %v517_v50 = vmul.f32 %v12079_v34, %v12101_v48  ;;  %v635_v22 = vmul.f32 %v12152_v20, %v12101_v48  ;;  %v752_v26 = vmul.f32 %v12161_v23, %v12101_v48  ;;  %v869_v27 = vmul.f32 %v12082_v35, %v12101_v48 }
  0xec   :  { %1119 = vmatpush.xpose.msrb.mxu2 %v12086_v39  ;;  %553 = vmatpush.xpose.msra.mxu3 %v12103_v49  ;;  %v986_v28 = vmul.f32 %v12099_v47, %v12101_v48  ;;  %v1103_v29 = vmul.f32 %v12115_v53, %v12101_v48  ;;  %v1220_v31 = vmul.f32 %v12126_v56, %v12101_v48 }
  0xed   :  { %768 = vmatpush.xpose.msra.mxu0 %v12086_v39  ;;  %v1337_v32 = vmul.f32 %v12132_v58, %v12101_v48  ;;  %v1454_v33 = vmul.f32 %v12139_v60, %v12101_v48 }
  0xef   :  { %554 = vmatmul.f32.vlgmr.msra.gmra.mxu3 %v517_v50  ;;  %1003 = vmatmul.f32.vlgmr.msra.gmra.mxu2 %v985_v51 }
  0xf0   :  { %601 = vmatpush.msrb.mxu3 %v12096_v44  ;;  %1236 = vmatpush.xpose.msra.mxu2 %v12086_v39  ;;  %v512_v52 = vpop.f32.mrf.mxu2 }
  0xf1   :  { %v12117_v54 = vadd.f32 %v512_v52, %v452_v42 }
  0xf3   :  { %624 = vmatpush.msra.mxu3 %v12117_v54  ;;  %741 = vmatpush.msra.mxu1 %v12117_v54 }
  0xf5   :  { %858 = vmatpush.msrb.mxu1 %v12117_v54 }
  0xf7   :  { %1120 = vmatmul.f32.vlgmr.msrb.gmra.mxu2 %v1102_v55 }
  0xf8   :  { %1353 = vmatpush.xpose.msrb.mxu2 %v12086_v39 }
  0xff   :  { %1237 = vmatmul.f32.vlgmr.msra.gmra.mxu2 %v1219_v57 }
 0x100   :  { %1470 = vmatpush.xpose.msra.mxu2 %v12086_v39 }
 0x107   :  { %1354 = vmatmul.f32.vlgmr.msrb.gmra.mxu2 %v1336_v59 }
 0x10f   :  { %1471 = vmatmul.f32.vlgmr.msra.gmra.mxu2 %v1453_v61 }
 0x164   :  { %v535_v62 = vpop.f32.mrf.mxu1 }
 0x165   :  { %v558_v63 = vmul.f32 0.28867513, %v535_v62 }
 0x167   :  { %v561_v0 = vsel %vm560_vm0, %v558_v63, -inf }
 0x168   :  { %562 = vmax.xlane.f32.xlu0 %v561_v0 }
 0x16a   :  { %v887_v42 = vpop.f32.mrf.mxu2 }
 0x172   :  { %v555_v1 = vpop.f32.mrf.mxu3  ;;  %v1004_v48 = vpop.f32.mrf.mxu2 }
 0x173   :  { %v559_v2 = vmul.f32 0.28867513, %v555_v1 }
 0x175   :  { %v564_v3 = vsel %vm560_vm0, %v559_v2, -inf }
 0x176   :  { %565 = vmax.xlane.f32.xlu0 %v564_v3 }
 0x17a   :  { %v12194_v55 = vpop.f32.mrf.mxu2 }
 0x182   :  { %v1238_v62 = vpop.f32.mrf.mxu2 }
 0x1db   :  { %v563_v4 = vpop.xlane.xlu0 %562 }
 0x1dc   :  { %v567_v5 = vsub.f32 %v558_v63, %v563_v4  ;;  %v1261_v63 = vmul.f32 0.28867513, %v1238_v62 }
 0x1de   :  { %v569_v6 = vmul.f32 1.442695, %v567_v5  ;;  %v1263_v1 = vsel %vm560_vm0, %v1261_v63, -inf }
 0x1e0   :  { %11297 = vpow2.f32 %v569_v6 }
 0x1e6   :  { %v11298_v7 = vpop.eup %11297 }
 0x1e7   :  { %v573_v8 = vsel %vm560_vm0, %v11298_v7, 0.0 }
 0x1e8   :  { %574 = vadd.xlane.f32.xlu1 %v573_v8 }
 0x1e9   :  { %v566_v9 = vpop.xlane.xlu0 %565 }
 0x1ea   :  { %v568_v10 = vsub.f32 %v559_v2, %v566_v9 }
 0x1ec   :  { %v571_v11 = vmul.f32 1.442695, %v568_v10 }
 0x1ee   :  { %11299 = vpow2.f32 %v571_v11 }
 0x1f4   :  { %v11300_v12 = vpop.eup %11299 }
 0x1f5   :  { %v576_v13 = vsel %vm560_vm0, %v11300_v12, 0.0 }
 0x1f6   :  { %577 = vadd.xlane.f32.xlu1 %v576_v13 }
 0x25b   :  { %v575_v14 = vpop.xlane.xlu1 %574 }
 0x25c   :  { %11301 = vrcp.f32 %v575_v14 }
 0x262   :  { %v11302_v15 = vpop.eup %11301 }
 0x263   :  { %v581_v16 = vmul.f32 %v11302_v15, %v11298_v7 }
 0x265   :  { %8454 = vmatmul.msk.f32.vlgmr.msrb.gmra.mxu3 %vm560_vm0, %v581_v16 }
 0x266   :  { %651 = vmatpush.xpose.msrb.mxu3 %v12086_v39 }
 0x269   :  { %v578_v17 = vpop.xlane.xlu1 %577 }
 0x26a   :  { %11303 = vrcp.f32 %v578_v17 }
 0x270   :  { %v11304_v18 = vpop.eup %11303 }
 0x271   :  { %v582_v19 = vmul.f32 %v11304_v18, %v11300_v12 }
 0x273   :  { %8455 = vmatmul.msk.f32.vlgmr.msra.gmra.mxu3 %vm560_vm0, %v582_v19 }
 0x274   :  { %671 = vmatpush.xpose.msra.mxu3 %v12103_v49 }
 0x27b   :  { %652 = vmatmul.f32.vlgmr.msrb.gmra.mxu3 %v634_v21  ;;  %v1027_v21 = vmul.f32 0.28867513, %v1004_v48 }
 0x27c   :  { %788 = vmatpush.xpose.msrb.mxu3 %v12103_v49 }
 0x283   :  { %672 = vmatmul.f32.vlgmr.msra.gmra.mxu3 %v635_v22 }
 0x284   :  { %905 = vmatpush.xpose.msra.mxu3 %v12103_v49 }
 0x28b   :  { %789 = vmatmul.f32.vlgmr.msrb.gmra.mxu3 %v752_v26  ;;  %v1029_v26 = vsel %vm560_vm0, %v1027_v21, -inf }
 0x28c   :  { %1022 = vmatpush.xpose.msrb.mxu3 %v12103_v49 }
 0x293   :  { %906 = vmatmul.f32.vlgmr.msra.gmra.mxu3 %v869_v27 }
 0x294   :  { %1139 = vmatpush.xpose.msra.mxu3 %v12103_v49 }
 0x29b   :  { %1023 = vmatmul.f32.vlgmr.msrb.gmra.mxu3 %v986_v28 }
 0x29c   :  { %1256 = vmatpush.xpose.msrb.mxu3 %v12103_v49 }
 0x2a3   :  { %1140 = vmatmul.f32.vlgmr.msra.gmra.mxu3 %v1103_v29 }
 0x2a4   :  { %1373 = vmatpush.xpose.msra.mxu3 %v12103_v49 }
 0x2ab   :  { %1257 = vmatmul.f32.vlgmr.msrb.gmra.mxu3 %v1220_v31 }
 0x2ac   :  { %1490 = vmatpush.xpose.msrb.mxu3 %v12103_v49  ;;  %v910_v49 = vmul.f32 0.28867513, %v887_v42 }
 0x2ae   :  { %v912_v51 = vsel %vm560_vm0, %v910_v49, -inf }
 0x2b3   :  { %1374 = vmatmul.f32.vlgmr.msra.gmra.mxu3 %v1337_v32  ;;  %v1355_v32 = vpop.f32.mrf.mxu2 }
 0x2bb   :  { %1491 = vmatmul.f32.vlgmr.msrb.gmra.mxu3 %v1454_v33 }
 0x2e8   :  { %v12182_v36 = vpop.f32.mrf.mxu3 }
 0x2f6   :  { %v12184_v37 = vpop.f32.mrf.mxu3 }
 0x2fe   :  { %v653_v39 = vpop.f32.mrf.mxu3 }
 0x2ff   :  { %v676_v40 = vmul.f32 0.28867513, %v653_v39 }
 0x301   :  { %v678_v41 = vsel %vm560_vm0, %v676_v40, -inf }
 0x302   :  { %679 = vmax.xlane.f32.xlu2 %v678_v41 }
 0x306   :  { %v673_v43 = vpop.f32.mrf.mxu3 }
 0x307   :  { %v12187_v45 = vmul.f32 0.28867513, %v673_v43 }
 0x309   :  { %v681_v46 = vsel %vm560_vm0, %v12187_v45, -inf }
 0x30a   :  { %682 = vmax.xlane.f32.xlu0 %v681_v46 }
 0x30e   :  { %v790_v50 = vpop.f32.mrf.mxu3 }
 0x30f   :  { %v794_v15 = vmul.f32 0.28867513, %v790_v50  ;;  %v1472_v50 = vpop.f32.mrf.mxu2 }
 0x311   :  { %v798_v19 = vsel %vm560_vm0, %v794_v15, -inf }
 0x312   :  { %913 = vmax.xlane.f32.xlu0 %v912_v51  ;;  %v12220_v51 = vmul.f32 0.28867513, %v1472_v50 }
 0x316   :  { %v12192_v52 = vpop.f32.mrf.mxu3 }
 0x31e   :  { %v1024_v57 = vpop.f32.mrf.mxu3 }
 0x31f   :  { %v1028_v59 = vmul.f32 0.28867513, %v1024_v57 }
 0x321   :  { %v1032_v61 = vsel %vm560_vm0, %v1028_v59, -inf }
 0x322   :  { %1033 = vmax.xlane.f32.xlu0 %v1032_v61 }
 0x326   :  { %v1141_v0 = vpop.f32.mrf.mxu3 }
 0x327   :  { %v1145_v28 = vmul.f32 0.28867513, %v1141_v0 }
 0x329   :  { %v1149_v39 = vsel %vm560_vm0, %v1145_v28, -inf }
 0x32a   :  { %1264 = vmax.xlane.f32.xlu0 %v1263_v1 }
 0x32e   :  { %v12198_v2 = vpop.f32.mrf.mxu3 }
 0x336   :  { %v1375_v3 = vpop.f32.mrf.mxu3 }
 0x337   :  { %v1379_v4 = vmul.f32 0.28867513, %v1375_v3 }
 0x339   :  { %v1383_v5 = vsel %vm560_vm0, %v1379_v4, -inf }
 0x33a   :  { %1384 = vmax.xlane.f32.xlu0 %v1383_v5 }
 0x33e   :  { %v1492_v6 = vpop.f32.mrf.mxu3 }
 0x33f   :  { %v12201_v7 = vmul.f32 0.28867513, %v1492_v6 }
 0x341   :  { %v1500_v8 = vsel %vm560_vm0, %v12201_v7, -inf }
 0x342   :  { %1501 = vmax.xlane.f32.xlu0 %v1500_v8 }
 0x375   :  { %v680_v9 = vpop.xlane.xlu2 %679 }
 0x376   :  { %v684_v10 = vsub.f32 %v676_v40, %v680_v9  ;;  %v1378_v40 = vmul.f32 0.28867513, %v1355_v32 }
 0x378   :  { %v686_v11 = vmul.f32 1.442695, %v684_v10 }
 0x37a   :  { %11305 = vpow2.f32 %v686_v11 }
 0x37d   :  { %v12205_v12 = vpop.xlane.xlu0 %682 }
 0x380   :  { %v11306_v13 = vpop.eup %11305 }
 0x381   :  { %v690_v14 = vsel %vm560_vm0, %v11306_v13, 0.0 }
 0x382   :  { %691 = vadd.xlane.f32.xlu2 %v690_v14  ;;  %v751_v14 = vmul.f32 %v12161_v23, %v12084_v38 }
 0x385   :  { %v914_v16 = vpop.xlane.xlu0 %913 }
 0x386   :  { %v918_v17 = vsub.f32 %v910_v49, %v914_v16  ;;  %v1380_v49 = vsel %vm560_vm0, %v1378_v40, -inf }
 0x388   :  { %v920_v18 = vmul.f32 1.442695, %v918_v17 }
 0x38a   :  { %11307 = vpow2.f32 %v920_v18  ;;  %799 = vmax.xlane.f32.xlu2 %v798_v19 }
 0x390   :  { %v12209_v22 = vpop.eup %11307 }
 0x391   :  { %v924_v27 = vsel %vm560_vm0, %v12209_v22, 0.0 }
 0x392   :  { %1030 = vmax.xlane.f32.xlu2 %v1029_v26  ;;  %925 = vadd.xlane.f32.xlu0 %v924_v27 }
 0x395   :  { %v1034_v29 = vpop.xlane.xlu0 %1033 }
 0x396   :  { %v1036_v31 = vsub.f32 %v1028_v59, %v1034_v29  ;;  %v1497_v59 = vsel %vm560_vm0, %v12220_v51, -inf }
 0x398   :  { %v1039_v33 = vmul.f32 1.442695, %v1036_v31 }
 0x39a   :  { %11309 = vpow2.f32 %v1039_v33  ;;  %1150 = vmax.xlane.f32.xlu2 %v1149_v39 }
 0x39d   :  { %v1265_v41 = vpop.xlane.xlu0 %1264 }
 0x39e   :  { %v1269_v42 = vsub.f32 %v1261_v63, %v1265_v41 }
 0x3a0   :  { %v12215_v43 = vpop.eup %11309  ;;  %v1271_v46 = vmul.f32 1.442695, %v1269_v42 }
 0x3a1   :  { %v1044_v48 = vsel %vm560_vm0, %v12215_v43, 0.0 }
 0x3a2   :  { %11311 = vpow2.f32 %v1271_v46  ;;  %1381 = vmax.xlane.f32.xlu2 %v1380_v49  ;;  %1045 = vadd.xlane.f32.xlu0 %v1044_v48 }
 0x3a8   :  { %v12222_v57 = vpop.eup %11311 }
 0x3a9   :  { %v1275_v61 = vsel %vm560_vm0, %v12222_v57, 0.0 }
 0x3aa   :  { %1498 = vmax.xlane.f32.xlu2 %v1497_v59  ;;  %1276 = vadd.xlane.f32.xlu0 %v1275_v61  ;;  %v911_v61 = vmul.f32 0.28867513, %v12192_v52 }
 0x3ad   :  { %v1385_v62 = vpop.xlane.xlu0 %1384 }
 0x3ae   :  { %v1387_v63 = vsub.f32 %v1379_v4, %v1385_v62  ;;  %v915_v62 = vsel %vm560_vm0, %v911_v61, -inf }
 0x3b0   :  { %v1390_v0 = vmul.f32 1.442695, %v1387_v63  ;;  %v1144_v63 = vmul.f32 0.28867513, %v12194_v55 }
 0x3b2   :  { %11313 = vpow2.f32 %v1390_v0  ;;  %v685_v0 = vsub.f32 %v12187_v45, %v12205_v12 }
 0x3b8   :  { %v12228_v1 = vpop.eup %11313 }
 0x3b9   :  { %v1395_v3 = vsel %vm560_vm0, %v12228_v1, 0.0 }
 0x3ba   :  { %1396 = vadd.xlane.f32.xlu0 %v1395_v3  ;;  %v1146_v3 = vsel %vm560_vm0, %v1144_v63, -inf }
 0x3f5   :  { %v692_v5 = vpop.xlane.xlu2 %691 }
 0x3f6   :  { %11315 = vrcp.f32 %v692_v5  ;;  %v688_v5 = vmul.f32 1.442695, %v685_v0 }
 0x3fc   :  { %v11316_v6 = vpop.eup %11315 }
 0x3fd   :  { %v800_v8 = vpop.xlane.xlu2 %799  ;;  %v698_v9 = vmul.f32 %v11316_v6, %v11306_v13  ;;  %v1262_v6 = vmul.f32 0.28867513, %v12198_v2 }
 0x3fe   :  { %v802_v10 = vsub.f32 %v794_v15, %v800_v8 }
 0x3ff   :  { %8456 = vmatmul.msk.f32.vlgmr.msrb.gmra.mxu0 %vm560_vm0, %v698_v9  ;;  %v1266_v8 = vsel %vm560_vm0, %v1262_v6, -inf }
 0x400   :  { %v805_v11 = vmul.f32 1.442695, %v802_v10  ;;  %835 = vmatpush.msrb.mxu0 %v12096_v44 }
 0x402   :  { %11317 = vpow2.f32 %v805_v11 }
 0x405   :  { %v1031_v4 = vpop.xlane.xlu2 %1030 }
 0x406   :  { %v1035_v16 = vsub.f32 %v1027_v21, %v1031_v4  ;;  %v1502_v21 = vpop.xlane.xlu0 %1501 }
 0x407   :  { %769 = vmatmul.f32.vlgmr.msra.gmra.mxu0 %v751_v14  ;;  %v1504_v33 = vsub.f32 %v12201_v7, %v1502_v21 }
 0x408   :  { %v12236_v17 = vpop.eup %11317  ;;  %v1037_v18 = vmul.f32 1.442695, %v1035_v16  ;;  %952 = vmatpush.msra.mxu0 %v12096_v44 }
 0x409   :  { %v810_v13 = vsel %vm560_vm0, %v12236_v17, 0.0 }
 0x40a   :  { %11319 = vpow2.f32 %v1037_v18  ;;  %811 = vadd.xlane.f32.xlu2 %v810_v13 }
 0x40d   :  { %v1151_v15 = vpop.xlane.xlu2 %1150 }
 0x40e   :  { %v1153_v19 = vsub.f32 %v1145_v28, %v1151_v15  ;;  %v1507_v28 = vmul.f32 1.442695, %v1504_v33 }
 0x410   :  { %v12241_v26 = vpop.eup %11319  ;;  %v1156_v27 = vmul.f32 1.442695, %v1153_v19 }
 0x411   :  { %v1041_v38 = vsel %vm560_vm0, %v12241_v26, 0.0 }
 0x412   :  { %11321 = vpow2.f32 %v1156_v27  ;;  %1042 = vadd.xlane.f32.xlu2 %v1041_v38 }
 0x415   :  { %v1382_v29 = vpop.xlane.xlu2 %1381 }
 0x416   :  { %v1386_v31 = vsub.f32 %v1378_v40, %v1382_v29 }
 0x418   :  { %v12245_v32 = vpop.eup %11321  ;;  %v1388_v39 = vmul.f32 1.442695, %v1386_v31 }
 0x419   :  { %v1161_v41 = vsel %vm560_vm0, %v12245_v32, 0.0 }
 0x41a   :  { %11323 = vpow2.f32 %v1388_v39  ;;  %1162 = vadd.xlane.f32.xlu2 %v1161_v41 }
 0x41b   :  { %11325 = vpow2.f32 %v1507_v28 }
 0x41c   :  { %11327 = vpow2.f32 %v688_v5 }
 0x41d   :  { %v1499_v27 = vpop.xlane.xlu2 %1498 }
 0x41e   :  { %v1503_v31 = vsub.f32 %v12220_v51, %v1499_v27 }
 0x420   :  { %v12250_v42 = vpop.eup %11323  ;;  %v1505_v41 = vmul.f32 1.442695, %v1503_v31 }
 0x421   :  { %v1392_v46 = vsel %vm560_vm0, %v12250_v42, 0.0  ;;  %v12254_v49 = vpop.eup %11325 }
 0x422   :  { %1393 = vadd.xlane.f32.xlu2 %v1392_v46  ;;  %v1512_v40 = vsel %vm560_vm0, %v12254_v49, 0.0  ;;  %v11328_v9 = vpop.eup %11327 }
 0x423   :  { %v693_v52 = vsel %vm560_vm0, %v11328_v9, 0.0 }
 0x42a   :  { %1513 = vadd.xlane.f32.xlu2 %v1512_v40 }
 0x47c   :  { %v12258_v7 = vpop.f32.mrf.mxu0 }
 0x47d   :  { %v812_v40 = vpop.xlane.xlu2 %811 }
 0x484   :  { %v770_v48 = vpop.f32.mrf.mxu0 }
 0x485   :  { %v793_v50 = vmul.f32 0.28867513, %v770_v48 }
 0x487   :  { %v795_v59 = vsel %vm560_vm0, %v793_v50, -inf }
 0x488   :  { %796 = vmax.xlane.f32.xlu1 %v795_v59 }
 0x490   :  { %916 = vmax.xlane.f32.xlu1 %v915_v62 }
 0x498   :  { %1147 = vmax.xlane.f32.xlu1 %v1146_v3  ;;  %v926_v3 = vpop.xlane.xlu0 %925 }
 0x4a0   :  { %1267 = vmax.xlane.f32.xlu1 %v1266_v8 }
 0x4a8   :  { %694 = vadd.xlane.f32.xlu1 %v693_v52  ;;  %v1046_v52 = vpop.xlane.xlu0 %1045 }
 0x4fb   :  { %v797_v10 = vpop.xlane.xlu1 %796 }
 0x4fc   :  { %v801_v11 = vsub.f32 %v793_v50, %v797_v10 }
 0x4fe   :  { %v803_v55 = vmul.f32 1.442695, %v801_v11 }
 0x500   :  { %11329 = vpow2.f32 %v803_v55 }
 0x503   :  { %v917_v4 = vpop.xlane.xlu1 %916 }
 0x504   :  { %v919_v45 = vsub.f32 %v911_v61, %v917_v4 }
 0x506   :  { %v11330_v12 = vpop.eup %11329  ;;  %v922_v14 = vmul.f32 1.442695, %v919_v45 }
 0x507   :  { %v807_v16 = vsel %vm560_vm0, %v11330_v12, 0.0 }
 0x508   :  { %11331 = vpow2.f32 %v922_v14  ;;  %808 = vadd.xlane.f32.xlu1 %v807_v16 }
 0x50b   :  { %v1148_v2 = vpop.xlane.xlu1 %1147 }
 0x50c   :  { %v1152_v18 = vsub.f32 %v1144_v63, %v1148_v2 }
 0x50e   :  { %v11332_v13 = vpop.eup %11331  ;;  %v1154_v15 = vmul.f32 1.442695, %v1152_v18 }
 0x50f   :  { %v927_v19 = vsel %vm560_vm0, %v11332_v13, 0.0 }
 0x510   :  { %11333 = vpow2.f32 %v1154_v15  ;;  %928 = vadd.xlane.f32.xlu1 %v927_v19 }
 0x513   :  { %v1268_v38 = vpop.xlane.xlu1 %1267 }
 0x514   :  { %v1270_v21 = vsub.f32 %v1262_v6, %v1268_v38 }
 0x516   :  { %v12272_v29 = vpop.eup %11333  ;;  %v1273_v33 = vmul.f32 1.442695, %v1270_v21 }
 0x517   :  { %v1158_v39 = vsel %vm560_vm0, %v12272_v29, 0.0 }
 0x518   :  { %11335 = vpow2.f32 %v1273_v33  ;;  %1159 = vadd.xlane.f32.xlu1 %v1158_v39 }
 0x51b   :  { %v695_v28 = vpop.xlane.xlu1 %694 }
 0x51c   :  { %11337 = vrcp.f32 %v695_v28 }
 0x51d   :  { %11339 = vpow2.f32 %v1505_v41 }
 0x51e   :  { %v12277_v46 = vpop.eup %11335  ;;  %11341 = vrcp.f32 %v812_v40 }
 0x51f   :  { %v1278_v48 = vsel %vm560_vm0, %v12277_v46, 0.0 }
 0x520   :  { %1279 = vadd.xlane.f32.xlu1 %v1278_v48 }
 0x522   :  { %v11338_v50 = vpop.eup %11337 }
 0x523   :  { %v699_v51 = vmul.f32 %v11338_v50, %v11328_v9  ;;  %v12281_v59 = vpop.eup %11339  ;;  %v1043_v9 = vpop.xlane.xlu2 %1042 }
 0x524   :  { %v1509_v61 = vsel %vm560_vm0, %v12281_v59, 0.0  ;;  %v11342_v62 = vpop.eup %11341 }
 0x525   :  { %8457 = vmatmul.msk.f32.vlgmr.msra.gmra.mxu1 %vm560_vm0, %v699_v51  ;;  %v816_v63 = vmul.f32 %v11342_v62, %v12236_v17 }
 0x526   :  { %975 = vmatpush.msra.mxu1 %v12117_v54 }
 0x528   :  { %1510 = vadd.xlane.f32.xlu1 %v1509_v61 }
 0x52b   :  { %v1163_v45 = vpop.xlane.xlu2 %1162 }
 0x52d   :  { %8459 = vmatmul.msk.f32.vlgmr.msrb.gmra.mxu1 %vm560_vm0, %v816_v63  ;;  %v10725_v63 = vld [vmem:[%s13066_s4 + $0xd8] sm:$0xff] }
 0x52e   :  { %1092 = vmatpush.msrb.mxu1 %v12117_v54 }
 0x533   :  { %v1394_v27 = vpop.xlane.xlu2 %1393 }
 0x57b   :  { %v809_v0 = vpop.xlane.xlu1 %808 }
 0x57c   :  { %11343 = vrcp.f32 %v809_v0  ;;  %v10724_v0 = vld [vmem:[%s13066_s4 + $0xd0] sm:$0xff] }
 0x57d   :  { %11345 = vrcp.f32 %v926_v3 }
 0x582   :  { %v11344_v5 = vpop.eup %11343 }
 0x583   :  { %v815_v6 = vmul.f32 %v11344_v5, %v11330_v12  ;;  %v929_v8 = vpop.xlane.xlu1 %928  ;;  %v11346_v10 = vpop.eup %11345 }
 0x584   :  { %11347 = vrcp.f32 %v929_v8  ;;  %v932_v11 = vmul.f32 %v11346_v10, %v12209_v22  ;;  %v1277_v22 = vpop.xlane.xlu0 %1276  ;;  %v10722_v8 = vld [vmem:[%s13066_s4 + $0xc0] sm:$0xff] }
 0x585   :  { %8458 = vmatmul.msk.f32.vlgmr.msrb.gmra.mxu0 %vm560_vm0, %v815_v6  ;;  %11349 = vrcp.f32 %v1046_v52  ;;  %v10723_v6 = vld [vmem:[%s13066_s4 + $0xc8] sm:$0xff] }
 0x586   :  { %1069 = vmatpush.msrb.mxu0 %v12096_v44  ;;  %11351 = vrcp.f32 %v1043_v9 }
 0x587   :  { %11353 = vrcp.f32 %v1163_v45  ;;  %v630_v45 = vmul.f32 %v12184_v37, %v12079_v34 }
 0x58a   :  { %v11348_v17 = vpop.eup %11347 }
 0x58b   :  { %v933_v55 = vmul.f32 %v11348_v17, %v11332_v13  ;;  %v1160_v4 = vpop.xlane.xlu1 %1159  ;;  %v11350_v12 = vpop.eup %11349 }
 0x58c   :  { %v11352_v14 = vpop.eup %11351  ;;  %11355 = vrcp.f32 %v1160_v4  ;;  %v1050_v16 = vmul.f32 %v11350_v12, %v12215_v43  ;;  %v629_v4 = vmul.f32 %v12182_v36, %v12079_v34 }
 0x58d   :  { %8460 = vmatmul.msk.f32.vlgmr.msra.gmra.mxu0 %vm560_vm0, %v932_v11  ;;  %8461 = vmatmul.msk.f32.vlgmr.msra.gmra.mxu1 %vm560_vm0, %v933_v55  ;;  %v1049_v2 = vmul.f32 %v11352_v14, %v12241_v26  ;;  %v11354_v18 = vpop.eup %11353  ;;  %11357 = vrcp.f32 %v1277_v22  ;;  %v1397_v26 = vpop.xlane.xlu0 %1396  ;;  %v746_v11 = vmul.f32 %v12258_v7, %v12152_v20 }
 0x58e   :  { %1186 = vmatpush.msra.mxu0 %v12096_v44  ;;  %1209 = vmatpush.msra.mxu1 %v12117_v54  ;;  %v1167_v19 = vmul.f32 %v11354_v18, %v12245_v32 }
 0x592   :  { %v11356_v15 = vpop.eup %11355 }
 0x593   :  { %v1280_v13 = vpop.xlane.xlu1 %1279  ;;  %v1166_v43 = vmul.f32 %v11356_v15, %v12272_v29  ;;  %v11358_v38 = vpop.eup %11357 }
 0x594   :  { %11359 = vrcp.f32 %v1280_v13  ;;  %v1283_v31 = vmul.f32 %v11358_v38, %v12222_v57  ;;  %v1514_v29 = vpop.xlane.xlu2 %1513 }
 0x595   :  { %8462 = vmatmul.msk.f32.vlgmr.msrb.gmra.mxu0 %vm560_vm0, %v1049_v2  ;;  %8463 = vmatmul.msk.f32.vlgmr.msrb.gmra.mxu1 %vm560_vm0, %v1050_v16  ;;  %11361 = vrcp.f32 %v1397_v26  ;;  %v748_v16 = vadd.f32 %v746_v11, %v629_v4  ;;  %v8900_v11 = vld [vmem:[#allocation8 + $0x348] sm:$0xf0]  ;;  %v10818_v4 = vld [vmem:[#allocation8 + $0x2bc] sm:$0xf0] }
 0x596   :  { %1303 = vmatpush.msrb.mxu0 %v12096_v44  ;;  %1326 = vmatpush.msrb.mxu1 %v12117_v54  ;;  %11363 = vrcp.f32 %v1394_v27 }
 0x597   :  { %11365 = vrcp.f32 %v1514_v29 }
 0x59a   :  { %v11360_v21 = vpop.eup %11359 }
 0x59b   :  { %v1284_v32 = vmul.f32 %v11360_v21, %v12277_v46  ;;  %v11362_v33 = vpop.eup %11361  ;;  %v1511_v39 = vpop.xlane.xlu1 %1510 }
 0x59c   :  { %v11364_v41 = vpop.eup %11363  ;;  %11367 = vrcp.f32 %v1511_v39  ;;  %v1401_v28 = vmul.f32 %v11362_v33, %v12228_v1  ;;  %v10729_v1 = vld [vmem:[%s13066_s4 + $0xf8] sm:$0xff] }
 0x59d   :  { %8464 = vmatmul.msk.f32.vlgmr.msra.gmra.mxu0 %vm560_vm0, %v1166_v43  ;;  %8465 = vmatmul.msk.f32.vlgmr.msra.gmra.mxu1 %vm560_vm0, %v1167_v19  ;;  %v1400_v57 = vmul.f32 %v11364_v41, %v12250_v42  ;;  %v11366_v46 = vpop.eup %11365  ;;  %v10728_v42 = vld [vmem:[%s13066_s4 + $0xf0] sm:$0xff] }
 0x59e   :  { %1420 = vmatpush.msra.mxu0 %v12096_v44  ;;  %1443 = vmatpush.msra.mxu1 %v12117_v54  ;;  %v1518_v48 = vmul.f32 %v11366_v46, %v12254_v49  ;;  %v10727_v49 = vld [vmem:[%s13066_s4 + $0xe8] sm:$0xff] }
 0x59f   :  { %1619 = vmatpush.bf16.msrb.mxu2 %v10729_v1  ;;  %v10842_v1 = vld [vmem:[#allocation8 + $0x384] sm:$0xf] }
 0x5a2   :  { %v11368_v40 = vpop.eup %11367 }
 0x5a3   :  { %1620 = vmatpush.bf16.msrb.mxu2 %v10728_v42 }
 0x5a5   :  { %8466 = vmatmul.msk.f32.vlgmr.msrb.gmra.mxu0 %vm560_vm0, %v1283_v31  ;;  %8467 = vmatmul.msk.f32.vlgmr.msrb.gmra.mxu1 %vm560_vm0, %v1284_v32 }
 0x5a6   :  { %1537 = vmatpush.msrb.mxu0 %v12096_v44  ;;  %1560 = vmatpush.msrb.mxu1 %v12117_v54  ;;  %v1517_v44 = vmul.f32 %v11368_v40, %v12281_v59  ;;  %v743_v54 = vpop.f32.mrf.mxu1  ;;  %v10726_v59 = vld [vmem:[%s13066_s4 + $0xe0] sm:$0xff] }
 0x5a7   :  { %1621 = vmatpush.bf16.msrb.mxu2 %v10727_v49  ;;  %v747_v55 = vmul.f32 %v743_v54, %v12152_v20  ;;  %v10850_v54 = vld [vmem:[#allocation8 + $0x3bc] sm:$0xf0] }
 0x5a9   :  { %v749_v2 = vadd.f32 %v747_v55, %v630_v45  ;;  %v8826_v55 = vld [vmem:[#allocation8 + $0x280] sm:$0xf] }
 0x5ab   :  { %1622 = vmatpush.bf16.msrb.mxu2 %v10726_v59 }
 0x5ad   :  { %8468 = vmatmul.msk.f32.vlgmr.msra.gmra.mxu0 %vm560_vm0, %v1400_v57  ;;  %8469 = vmatmul.msk.f32.vlgmr.msra.gmra.mxu1 %vm560_vm0, %v1401_v28 }
 0x5ae   :  { %v860_v50 = vpop.f32.mrf.mxu1 }
 0x5af   :  { %1623 = vmatpush.bf16.msrb.mxu2 %v10725_v63  ;;  %v864_v12 = vmul.f32 %v860_v50, %v12161_v23  ;;  %v8956_v50 = vld [vmem:[#allocation8 + $0x3c0] sm:$0xf0]  ;;  %v8890_v63 = vld [vmem:[#allocation8 + $0x300] sm:$0xf] }
 0x5b0   :  { %v8959_v49 = vor.u32 %v10842_v1, %v8956_v50  ;;  %v10787_v1 = vld [vmem:[#allocation8 + $0x1c4] sm:$0xf0] }
 0x5b1   :  { %v866_v13 = vadd.f32 %v864_v12, %v749_v2  ;;  %v10810_v12 = vld [vmem:[#allocation8 + $0x284] sm:$0xf]  ;;  %v8827_v2 = vor.u32 %v10818_v4, %v8826_v55  ;;  %v8578_v4 = vld [vmem:[#allocation8 + $0x88] sm:$0xf] }
 0x5b2   :  { %2761 = vmatpush.bf16.msra.mxu0 %v8959_v49  ;;  %v8634_v49 = vld [vmem:[#allocation8 + $0x100] sm:$0xf]  ;;  %v8572_v55 = vld [vmem:[#allocation8 + $0xc0] sm:$0xf0] }
 0x5b3   :  { %1624 = vmatpush.bf16.msrb.mxu2 %v10724_v0 }
 0x5b5   :  { %8470 = vmatmul.msk.f32.vlgmr.msrb.gmra.mxu0 %vm560_vm0, %v1517_v44  ;;  %8471 = vmatmul.msk.f32.vlgmr.msrb.gmra.mxu1 %vm560_vm0, %v1518_v48 }
 0x5b7   :  { %1625 = vmatpush.bf16.msrb.mxu2 %v10723_v6 }
 0x5bb   :  { %1626 = vmatpush.bf16.msrb.mxu2 %v10722_v8 }
 0x602   :  { %v837_v51 = vpop.f32.mrf.mxu0 }
 0x603   :  { %v863_v14 = vmul.f32 %v837_v51, %v12161_v23  ;;  %v10851_v51 = vld [vmem:[#allocation8 + $0x3c4] sm:$0xf0] }
 0x605   :  { %v865_v7 = vadd.f32 %v863_v14, %v748_v16  ;;  %v8828_v14 = vld [vmem:[#allocation8 + $0x2c0] sm:$0xf0]  ;;  %v8834_v16 = vld [vmem:[#allocation8 + $0x288] sm:$0xf] }
 0x60a   :  { %v954_v61 = vpop.f32.mrf.mxu0  ;;  %v977_v62 = vpop.f32.mrf.mxu1 }
 0x60b   :  { %v980_v22 = vmul.f32 %v954_v61, %v12082_v35  ;;  %v981_v18 = vmul.f32 %v977_v62, %v12082_v35  ;;  %v10843_v61 = vld [vmem:[#allocation8 + $0x38c] sm:$0xf] }
 0x60c   :  { %v8964_v62 = vld [vmem:[#allocation8 + $0x3c8] sm:$0xf0] }
 0x60d   :  { %v982_v43 = vadd.f32 %v980_v22, %v865_v7  ;;  %v983_v34 = vadd.f32 %v981_v18, %v866_v13  ;;  %v8967_v0 = vor.u32 %v10843_v61, %v8964_v62  ;;  %v10819_v22 = vld [vmem:[#allocation8 + $0x2c4] sm:$0xf0]  ;;  %v10811_v18 = vld [vmem:[#allocation8 + $0x28c] sm:$0xf]  ;;  %v8831_v7 = vor.u32 %v10810_v12, %v8828_v14  ;;  %v10762_v62 = vld [vmem:[#allocation8 + $0x104] sm:$0xf] }
 0x60e   :  { %v8836_v13 = vld [vmem:[#allocation8 + $0x2c8] sm:$0xf0] }
 0x60f   :  { %2789 = vmatpush.bf16.msra.mxu2 %v8967_v0  ;;  %v8642_v0 = vld [vmem:[#allocation8 + $0x108] sm:$0xf] }
 0x612   :  { %v1071_v3 = vpop.f32.mrf.mxu0  ;;  %v1094_v5 = vpop.f32.mrf.mxu1 }
 0x613   :  { %v1097_v20 = vmul.f32 %v1071_v3, %v12099_v47  ;;  %v1098_v15 = vmul.f32 %v1094_v5, %v12099_v47  ;;  %v10834_v3 = vld [vmem:[#allocation8 + $0x33c] sm:$0xf0]  ;;  %v8892_v5 = vld [vmem:[#allocation8 + $0x340] sm:$0xf0] }
 0x614   :  { %v8891_v6 = vor.u32 %v10834_v3, %v8890_v63  ;;  %v8636_v63 = vld [vmem:[#allocation8 + $0x140] sm:$0xf0] }
 0x615   :  { %v1099_v27 = vadd.f32 %v1097_v20, %v982_v43  ;;  %v1100_v26 = vadd.f32 %v1098_v15, %v983_v34  ;;  %v8835_v20 = vor.u32 %v10819_v22, %v8834_v16  ;;  %v8762_v15 = vld [vmem:[#allocation8 + $0x200] sm:$0xf]  ;;  %v8839_v43 = vor.u32 %v10811_v18, %v8836_v13  ;;  %v8764_v34 = vld [vmem:[#allocation8 + $0x240] sm:$0xf0]  ;;  %v10747_v16 = vld [vmem:[#allocation8 + $0x8c] sm:$0xf] }
 0x616   :  { %v8639_v3 = vor.u32 %v10762_v62, %v8636_v63  ;;  %v8506_v18 = vld [vmem:[#allocation8] sm:$0xf]  ;;  %v8844_v62 = vld [vmem:[#allocation8 + $0x2d0] sm:$0xf0]  ;;  %v8850_v63 = vld [vmem:[#allocation8 + $0x298] sm:$0xf] }
 0x617   :  { %v10738_v13 = vld [vmem:[#allocation8 + $0x3c] sm:$0xf0] }
 0x61a   :  { %v1188_v9 = vpop.f32.mrf.mxu0  ;;  %v1211_v52 = vpop.f32.mrf.mxu1 }
 0x61b   :  { %v1214_v37 = vmul.f32 %v1188_v9, %v12115_v53  ;;  %v1215_v23 = vmul.f32 %v1211_v52, %v12115_v53  ;;  %v8898_v9 = vld [vmem:[#allocation8 + $0x308] sm:$0xf] }
 0x61c   :  { %v10835_v52 = vld [vmem:[#allocation8 + $0x344] sm:$0xf0] }
 0x61d   :  { %v1216_v21 = vadd.f32 %v1214_v37, %v1099_v27  ;;  %v1217_v31 = vadd.f32 %v1215_v23, %v1100_v26  ;;  %v8770_v37 = vld [vmem:[#allocation8 + $0x208] sm:$0xf]  ;;  %v10795_v27 = vld [vmem:[#allocation8 + $0x20c] sm:$0xf] }
 0x61e   :  { %v10803_v23 = vld [vmem:[#allocation8 + $0x244] sm:$0xf0]  ;;  %v8772_v26 = vld [vmem:[#allocation8 + $0x248] sm:$0xf0] }
 0x622   :  { %v1305_v10 = vpop.f32.mrf.mxu0  ;;  %v1328_v17 = vpop.f32.mrf.mxu1 }
 0x623   :  { %v1331_v38 = vmul.f32 %v1305_v10, %v12126_v56  ;;  %v1332_v35 = vmul.f32 %v1328_v17, %v12126_v56  ;;  %v8954_v56 = vld [vmem:[#allocation8 + $0x380] sm:$0xf]  ;;  %v10827_v10 = vld [vmem:[#allocation8 + $0x30c] sm:$0xf]  ;;  %v8899_v17 = vor.u32 %v10835_v52, %v8898_v9 }
 0x624   :  { %v8955_v42 = vor.u32 %v10850_v54, %v8954_v56  ;;  %v8903_v45 = vor.u32 %v10827_v10, %v8900_v11  ;;  %v8700_v56 = vld [vmem:[#allocation8 + $0x1c0] sm:$0xf0]  ;;  %v8706_v54 = vld [vmem:[#allocation8 + $0x188] sm:$0xf]  ;;  %v8570_v52 = vld [vmem:[#allocation8 + $0x80] sm:$0xf] }
 0x625   :  { %v1333_v29 = vadd.f32 %v1331_v38, %v1216_v21  ;;  %v1334_v33 = vadd.f32 %v1332_v35, %v1217_v31  ;;  %v8771_v21 = vor.u32 %v10803_v23, %v8770_v37  ;;  %v8775_v31 = vor.u32 %v10795_v27, %v8772_v26  ;;  %v10754_v10 = vld [vmem:[#allocation8 + $0xbc] sm:$0xf0]  ;;  %v10731_v37 = vld [vmem:[#allocation8 + $0xc] sm:$0xf]  ;;  %v8970_v27 = vld [vmem:[#allocation8 + $0x390] sm:$0xf] }
 0x626   :  { %2747 = vmatpush.bf16.msra.mxu3 %v8955_v42  ;;  %2790 = vmatpush.bf16.msra.mxu2 %v8903_v45  ;;  %v8707_v50 = vor.u32 %v10787_v1, %v8706_v54  ;;  %v8571_v11 = vor.u32 %v10754_v10, %v8570_v52  ;;  %v10755_v45 = vld [vmem:[#allocation8 + $0xc4] sm:$0xf0]  ;;  %v8516_v23 = vld [vmem:[#allocation8 + $0x48] sm:$0xf0]  ;;  %v10837_v1 = vld [vmem:[#allocation8 + $0x354] sm:$0xf0] }
 0x627   :  { %v8579_v14 = vor.u32 %v10755_v45, %v8578_v4  ;;  %v8519_v26 = vor.u32 %v10731_v37, %v8516_v23  ;;  %v10804_v52 = vld [vmem:[#allocation8 + $0x24c] sm:$0xf0]  ;;  %v10796_v10 = vld [vmem:[#allocation8 + $0x214] sm:$0xf]  ;;  %v10805_v4 = vld [vmem:[#allocation8 + $0x254] sm:$0xf0] }
 0x628   :  { %v8724_v37 = vld [vmem:[#allocation8 + $0x1d8] sm:$0xf0] }
 0x62a   :  { %v1422_v36 = vpop.f32.mrf.mxu0  ;;  %v1445_v19 = vpop.f32.mrf.mxu1  ;;  %2748 = vmatpush.bf16.msra.mxu3 %v8891_v6  ;;  %2791 = vmatpush.bf16.msra.mxu2 %v8839_v43  ;;  %v8644_v6 = vld [vmem:[#allocation8 + $0x148] sm:$0xf0] }
 0x62b   :  { %v1448_v32 = vmul.f32 %v1422_v36, %v12132_v58  ;;  %v1449_v47 = vmul.f32 %v1445_v19, %v12132_v58  ;;  %v8962_v58 = vld [vmem:[#allocation8 + $0x388] sm:$0xf]  ;;  %v10802_v36 = vld [vmem:[#allocation8 + $0x23c] sm:$0xf0]  ;;  %v10794_v19 = vld [vmem:[#allocation8 + $0x204] sm:$0xf] }
 0x62c   :  { %v8963_v59 = vor.u32 %v10851_v51, %v8962_v58  ;;  %v8763_v38 = vor.u32 %v10802_v36, %v8762_v15  ;;  %v8767_v35 = vor.u32 %v10794_v19, %v8764_v34  ;;  %v10779_v58 = vld [vmem:[#allocation8 + $0x18c] sm:$0xf]  ;;  %v8508_v15 = vld [vmem:[#allocation8 + $0x40] sm:$0xf0]  ;;  %v8514_v36 = vld [vmem:[#allocation8 + $0x8] sm:$0xf] }
 0x62d   :  { %v1450_v28 = vadd.f32 %v1448_v32, %v1333_v29  ;;  %v1451_v57 = vadd.f32 %v1449_v47, %v1334_v33  ;;  %v11457_v32 = vld [vmem:[#allocation5] sm:$0xf]  ;;  %v8708_v51 = vld [vmem:[#allocation8 + $0x1c8] sm:$0xf0]  ;;  %v10739_v19 = vld [vmem:[#allocation8 + $0x44] sm:$0xf0] }
 0x62e   :  { %2775 = vmatpush.bf16.msra.mxu1 %v8963_v59  ;;  %2749 = vmatpush.bf16.msra.mxu3 %v8827_v2  ;;  %v1570_v47 = vperm.slane %v11457_v32, 3  ;;  %v10770_v59 = vld [vmem:[#allocation8 + $0x13c] sm:$0xf0]  ;;  %v8580_v2 = vld [vmem:[#allocation8 + $0xc8] sm:$0xf0]  ;;  %v8515_v34 = vor.u32 %v10739_v19, %v8514_v36 }
 0x62f   :  { %2792 = vmatpush.bf16.msra.mxu2 %v8775_v31  ;;  %v8635_v61 = vor.u32 %v10770_v59, %v8634_v49  ;;  %v8583_v22 = vor.u32 %v10747_v16, %v8580_v2  ;;  %v10820_v49 = vld [vmem:[#allocation8 + $0x2cc] sm:$0xf0]  ;;  %v10812_v59 = vld [vmem:[#allocation8 + $0x294] sm:$0xf]  ;;  %v8788_v16 = vld [vmem:[#allocation8 + $0x258] sm:$0xf0] }
 0x630   :  { %v10789_v36 = vld [vmem:[#allocation8 + $0x1d4] sm:$0xf0] }
 0x632   :  { %v1539_v39 = vpop.f32.mrf.mxu0  ;;  %v1562_v41 = vpop.f32.mrf.mxu1  ;;  %2776 = vmatpush.bf16.msra.mxu1 %v8899_v17  ;;  %2750 = vmatpush.bf16.msra.mxu3 %v8763_v38  ;;  %v10746_v17 = vld [vmem:[#allocation8 + $0x84] sm:$0xf]  ;;  %v10852_v38 = vld [vmem:[#allocation8 + $0x3cc] sm:$0xf0] }
 0x633   :  { %v1565_v53 = vmul.f32 %v12139_v60, %v1539_v39  ;;  %v1566_v46 = vmul.f32 %v12139_v60, %v1562_v41  ;;  %v10826_v60 = vld [vmem:[#allocation8 + $0x304] sm:$0xf]  ;;  %v8575_v12 = vor.u32 %v10746_v17, %v8572_v55  ;;  %v8971_v31 = vor.u32 %v10852_v38, %v8970_v27  ;;  %v8786_v55 = vld [vmem:[#allocation8 + $0x218] sm:$0xf]  ;;  %v8650_v38 = vld [vmem:[#allocation8 + $0x110] sm:$0xf] }
 0x634   :  { %v8895_v8 = vor.u32 %v10826_v60, %v8892_v5  ;;  %v10771_v60 = vld [vmem:[#allocation8 + $0x144] sm:$0xf0]  ;;  %v10763_v5 = vld [vmem:[#allocation8 + $0x10c] sm:$0xf] }
 0x635   :  { %v1567_v40 = vadd.f32 %v1565_v53, %v1450_v28  ;;  %v1568_v48 = vadd.f32 %v1566_v46, %v1451_v57  ;;  %v8647_v9 = vor.u32 %v10763_v5, %v8644_v6  ;;  %v10813_v5 = vld [vmem:[#allocation8 + $0x29c] sm:$0xf] }
 0x636   :  { %2762 = vmatpush.bf16.msra.mxu0 %v8895_v8  ;;  %2777 = vmatpush.bf16.msra.mxu1 %v8835_v20  ;;  %v8643_v8 = vor.u32 %v10771_v60, %v8642_v0  ;;  %v8507_v20 = vor.u32 %v10738_v13, %v8506_v18  ;;  %v10821_v0 = vld [vmem:[#allocation8 + $0x2d4] sm:$0xf0]  ;;  %v8852_v6 = vld [vmem:[#allocation8 + $0x2d8] sm:$0xf0]  ;;  %v10788_v18 = vld [vmem:[#allocation8 + $0x1cc] sm:$0xf0] }
 0x637   :  { %v1569_v44 = vpack.c.bf16 %v1568_v48, %v1567_v40  ;;  %v8698_v40 = vld [vmem:[#allocation8 + $0x180] sm:$0xf]  ;;  %v10778_v48 = vld [vmem:[#allocation8 + $0x184] sm:$0xf]  ;;  %v8851_v60 = vor.u32 %v10821_v0, %v8850_v63  ;;  %v10780_v13 = vld [vmem:[#allocation8 + $0x194] sm:$0xf] }
 0x638   :  { %v8703_v42 = vor.u32 %v10778_v48, %v8700_v56  ;;  %v10828_v48 = vld [vmem:[#allocation8 + $0x314] sm:$0xf]  ;;  %v8914_v56 = vld [vmem:[#allocation8 + $0x318] sm:$0xf] }
 0x639   :  { %1627 = vmatmul.bf16.vlgmr.msrb.gmra.mxu2 %v1569_v44 }
 0x63a   :  { %2763 = vmatpush.bf16.msra.mxu0 %v8831_v7  ;;  %2778 = vmatpush.bf16.msra.mxu1 %v8771_v21  ;;  %v10730_v7 = vld [vmem:[#allocation8 + $0x4] sm:$0xf]  ;;  %v8972_v21 = vld [vmem:[#allocation8 + $0x3d0] sm:$0xf0] }
 0x63b   :  { %v8511_v43 = vor.u32 %v10730_v7, %v8508_v15  ;;  %v8722_v15 = vld [vmem:[#allocation8 + $0x198] sm:$0xf] }
 0x63e   :  { %2764 = vmatpush.bf16.msra.mxu0 %v8767_v35  ;;  %2779 = vmatpush.bf16.msra.mxu1 %v8707_v50  ;;  %v10844_v35 = vld [vmem:[#allocation8 + $0x394] sm:$0xf]  ;;  %v8916_v50 = vld [vmem:[#allocation8 + $0x358] sm:$0xf0] }
 0x63f   :  { %v8975_v32 = vor.u32 %v10844_v35, %v8972_v21  ;;  %v10772_v35 = vld [vmem:[#allocation8 + $0x14c] sm:$0xf0] }
 0x642   :  { %2765 = vmatpush.bf16.msra.mxu0 %v8703_v42  ;;  %2780 = vmatpush.bf16.msra.mxu1 %v8643_v8  ;;  %v10829_v42 = vld [vmem:[#allocation8 + $0x31c] sm:$0xf]  ;;  %v8855_v8 = vor.u32 %v10813_v5, %v8852_v6  ;;  %v10740_v5 = vld [vmem:[#allocation8 + $0x4c] sm:$0xf0] }
 0x646   :  { %2766 = vmatpush.bf16.msra.mxu0 %v8639_v3  ;;  %2781 = vmatpush.bf16.msra.mxu1 %v8579_v14  ;;  %v8847_v3 = vor.u32 %v10812_v59, %v8844_v62  ;;  %v10797_v14 = vld [vmem:[#allocation8 + $0x21c] sm:$0xf] }
 0x647   :  { %v8791_v2 = vor.u32 %v10797_v14, %v8788_v16  ;;  %v8596_v62 = vld [vmem:[#allocation8 + $0xd8] sm:$0xf0] }
 0x648   :  { %v8532_v14 = vld [vmem:[#allocation8 + $0x58] sm:$0xf0] }
 0x64a   :  { %2767 = vmatpush.bf16.msra.mxu0 %v8575_v12  ;;  %2782 = vmatpush.bf16.msra.mxu1 %v8515_v34  ;;  %v8787_v12 = vor.u32 %v10805_v4, %v8786_v55  ;;  %v10781_v34 = vld [vmem:[#allocation8 + $0x19c] sm:$0xf]  ;;  %v10741_v4 = vld [vmem:[#allocation8 + $0x54] sm:$0xf0] }
 0x64b   :  { %v8727_v27 = vor.u32 %v10781_v34, %v8724_v37  ;;  %v259_v37 = vld [vmem:[#allocation7] sm:$0xf] }
 0x64e   :  { %2768 = vmatpush.bf16.msra.mxu0 %v8511_v43  ;;  %v8723_v43 = vor.u32 %v10789_v36, %v8722_v15 }
 0x652   :  { %2817 = vmatpush.bf16.msrb.mxu0 %v8975_v32  ;;  %v10764_v32 = vld [vmem:[#allocation8 + $0x114] sm:$0xf] }
 0x6bc   :  { %v1628_v29 = vpop.f32.mrf.mxu2 }
 0x6bd   :  { %v1629_v33 = vadd.f32 %v1628_v29, %v1570_v47  ;;  %v10853_v29 = vld [vmem:[#allocation8 + $0x3d4] sm:$0xf0] }
 0x6bf   :  { %v12369_v39 = vadd.f32 %v1629_v33, %v12057_v24  ;;  %v10786_v24 = vld [vmem:[#allocation8 + $0x1bc] sm:$0xf0]  ;;  %v10845_v33 = vld [vmem:[#allocation8 + $0x39c] sm:$0xf] }
 0x6c0   :  { %v8699_v44 = vor.u32 %v10786_v24, %v8698_v40 }
 0x6c1   :  { %1635 = vadd.xlane.f32.xlu0 %v12369_v39  ;;  %v1639_v41 = vmul.f32 %v12369_v39, %v12369_v39 }
 0x6c2   :  { %2751 = vmatpush.bf16.msra.mxu3 %v8699_v44  ;;  %v8908_v44 = vld [vmem:[#allocation8 + $0x350] sm:$0xf0] }
 0x6c3   :  { %1641 = vadd.xlane.f32.xlu2 %v1639_v41  ;;  %v8911_v54 = vor.u32 %v10828_v48, %v8908_v44 }
 0x6c4   :  { %v1630_v28 = vpop.f32.mrf.mxu2 }
 0x6c5   :  { %v1631_v57 = vadd.f32 %v1630_v28, %v1570_v47  ;;  %v8978_v47 = vld [vmem:[#allocation8 + $0x398] sm:$0xf]  ;;  %v8980_v28 = vld [vmem:[#allocation8 + $0x3d8] sm:$0xf0]  ;;  %2818 = vmatpush.bf16.msrb.mxu0 %v8911_v54  ;;  %v10756_v54 = vld [vmem:[#allocation8 + $0xcc] sm:$0xf0] }
 0x6c6   :  { %2752 = vmatpush.bf16.msra.mxu3 %v8635_v61  ;;  %v8979_v41 = vor.u32 %v10853_v29, %v8978_v47  ;;  %v8983_v40 = vor.u32 %v10845_v33, %v8980_v28  ;;  %v8652_v47 = vld [vmem:[#allocation8 + $0x150] sm:$0xf0]  ;;  %v8658_v29 = vld [vmem:[#allocation8 + $0x118] sm:$0xf] }
 0x6c7   :  { %v12375_v53 = vadd.f32 %v1631_v57, %v12059_v25  ;;  %v8711_v25 = vor.u32 %v10779_v58, %v8708_v51  ;;  %v8906_v57 = vld [vmem:[#allocation8 + $0x310] sm:$0xf]  ;;  %v8915_v58 = vor.u32 %v10837_v1, %v8914_v56  ;;  %v8919_v51 = vor.u32 %v10829_v42, %v8916_v50  ;;  %v10748_v1 = vld [vmem:[#allocation8 + $0x94] sm:$0xf] }
 0x6c8   :  { %2831 = vmatpush.bf16.msrb.mxu1 %v8979_v41  ;;  %v8655_v28 = vor.u32 %v10764_v32, %v8652_v47  ;;  %v8586_v56 = vld [vmem:[#allocation8 + $0x90] sm:$0xf]  ;;  %v8588_v50 = vld [vmem:[#allocation8 + $0xd0] sm:$0xf0] }
 0x6c9   :  { %1637 = vadd.xlane.f32.xlu1 %v12375_v53  ;;  %v1640_v46 = vmul.f32 %v12375_v53, %v12375_v53  ;;  %2793 = vmatpush.bf16.msra.mxu2 %v8711_v25  ;;  %v8842_v25 = vld [vmem:[#allocation8 + $0x290] sm:$0xf]  ;;  %v8587_v42 = vor.u32 %v10756_v54, %v8586_v56  ;;  %v10855_v56 = vld [vmem:[#allocation8 + $0x3e4] sm:$0xf0]  ;;  %v10847_v54 = vld [vmem:[#allocation8 + $0x3ac] sm:$0xf] }
 0x6ca   :  { %2753 = vmatpush.bf16.msra.mxu3 %v8571_v11  ;;  %v8843_v61 = vor.u32 %v10820_v49, %v8842_v25  ;;  %2819 = vmatpush.bf16.msrb.mxu0 %v8847_v3  ;;  %v8780_v11 = vld [vmem:[#allocation8 + $0x250] sm:$0xf0]  ;;  %v8591_v49 = vor.u32 %v10748_v1, %v8588_v50  ;;  %v8996_v1 = vld [vmem:[#allocation8 + $0x3e8] sm:$0xf0] }
 0x6cb   :  { %1643 = vadd.xlane.f32.xlu0 %v1640_v46  ;;  %v10836_v46 = vld [vmem:[#allocation8 + $0x34c] sm:$0xf0]  ;;  %v8783_v45 = vor.u32 %v10796_v10, %v8780_v11  ;;  %v8530_v10 = vld [vmem:[#allocation8 + $0x18] sm:$0xf] }
 0x6cc   :  { %v8907_v24 = vor.u32 %v10836_v46, %v8906_v57  ;;  %2832 = vmatpush.bf16.msrb.mxu1 %v8915_v58  ;;  %v10773_v57 = vld [vmem:[#allocation8 + $0x154] sm:$0xf0]  ;;  %v10765_v46 = vld [vmem:[#allocation8 + $0x11c] sm:$0xf] }
 0x6cd   :  { %2794 = vmatpush.bf16.msra.mxu2 %v8647_v9  ;;  %v8778_v9 = vld [vmem:[#allocation8 + $0x210] sm:$0xf]  ;;  %v8594_v58 = vld [vmem:[#allocation8 + $0x98] sm:$0xf] }
 0x6ce   :  { %2754 = vmatpush.bf16.msra.mxu3 %v8507_v20  ;;  %v8779_v17 = vor.u32 %v10804_v52, %v8778_v9  ;;  %2820 = vmatpush.bf16.msrb.mxu0 %v8783_v45  ;;  %v8716_v20 = vld [vmem:[#allocation8 + $0x1d0] sm:$0xf0]  ;;  %v10733_v45 = vld [vmem:[#allocation8 + $0x1c] sm:$0xf] }
 0x6cf   :  { %v8719_v19 = vor.u32 %v10780_v13, %v8716_v20  ;;  %v10732_v9 = vld [vmem:[#allocation8 + $0x14] sm:$0xf] }
 0x6d0   :  { %2833 = vmatpush.bf16.msrb.mxu1 %v8851_v60  ;;  %v8522_v60 = vld [vmem:[#allocation8 + $0x10] sm:$0xf]  ;;  %v8524_v52 = vld [vmem:[#allocation8 + $0x50] sm:$0xf0] }
 0x6d1   :  { %2795 = vmatpush.bf16.msra.mxu2 %v8583_v22  ;;  %v8714_v22 = vld [vmem:[#allocation8 + $0x190] sm:$0xf]  ;;  %v8527_v55 = vor.u32 %v10732_v9, %v8524_v52 }
 0x6d2   :  { %2803 = vmatpush.bf16.msrb.mxu3 %v8971_v31  ;;  %v8715_v7 = vor.u32 %v10788_v18, %v8714_v22  ;;  %2821 = vmatpush.bf16.msrb.mxu0 %v8719_v19  ;;  %v8651_v31 = vor.u32 %v10772_v35, %v8650_v38 }
 0x6d4   :  { %2834 = vmatpush.bf16.msrb.mxu1 %v8787_v12  ;;  %v8531_v12 = vor.u32 %v10741_v4, %v8530_v10  ;;  %v10814_v10 = vld [vmem:[#allocation8 + $0x2a4] sm:$0xf]  ;;  %v10815_v4 = vld [vmem:[#allocation8 + $0x2ac] sm:$0xf] }
 0x6d5   :  { %2796 = vmatpush.bf16.msra.mxu2 %v8519_v26 }
 0x6d6   :  { %2804 = vmatpush.bf16.msrb.mxu3 %v8907_v24  ;;  %v8660_v24 = vld [vmem:[#allocation8 + $0x158] sm:$0xf0]  ;;  %2822 = vmatpush.bf16.msrb.mxu0 %v8655_v28 }
 0x6d7   :  { %v8663_v44 = vor.u32 %v10765_v46, %v8660_v24  ;;  %v8986_v46 = vld [vmem:[#allocation8 + $0x3a0] sm:$0xf]  ;;  %v10846_v24 = vld [vmem:[#allocation8 + $0x3a4] sm:$0xf] }
 0x6d8   :  { %2835 = vmatpush.bf16.msrb.mxu1 %v8723_v43 }
 0x6d9   :  { %2845 = vmatpush.bf16.msrb.mxu2 %v8983_v40  ;;  %v8659_v40 = vor.u32 %v10773_v57, %v8658_v29 }
 0x6da   :  { %2805 = vmatpush.bf16.msrb.mxu3 %v8843_v61  ;;  %v10749_v61 = vld [vmem:[#allocation8 + $0x9c] sm:$0xf]  ;;  %2823 = vmatpush.bf16.msrb.mxu0 %v8591_v49  ;;  %v8999_v49 = vor.u32 %v10847_v54, %v8996_v1  ;;  %v10767_v54 = vld [vmem:[#allocation8 + $0x12c] sm:$0xf] }
 0x6db   :  { %v8599_v0 = vor.u32 %v10749_v61, %v8596_v62  ;;  %v8924_v61 = vld [vmem:[#allocation8 + $0x360] sm:$0xf0]  ;;  %v8930_v62 = vld [vmem:[#allocation8 + $0x328] sm:$0xf]  ;;  %v8676_v1 = vld [vmem:[#allocation8 + $0x168] sm:$0xf0] }
 0x6dc   :  { %2836 = vmatpush.bf16.msrb.mxu1 %v8659_v40  ;;  %v10854_v40 = vld [vmem:[#allocation8 + $0x3dc] sm:$0xf0] }
 0x6dd   :  { %2846 = vmatpush.bf16.msrb.mxu2 %v8919_v51  ;;  %v10757_v51 = vld [vmem:[#allocation8 + $0xd4] sm:$0xf0] }
 0x6de   :  { %2806 = vmatpush.bf16.msrb.mxu3 %v8779_v17  ;;  %v8595_v59 = vor.u32 %v10757_v51, %v8594_v58  ;;  %2824 = vmatpush.bf16.msrb.mxu0 %v8527_v55  ;;  %v8922_v58 = vld [vmem:[#allocation8 + $0x320] sm:$0xf]  ;;  %v10823_v55 = vld [vmem:[#allocation8 + $0x2e4] sm:$0xf0] }
 0x6df   :  { %v10838_v51 = vld [vmem:[#allocation8 + $0x35c] sm:$0xf0] }
 0x6e0   :  { %2837 = vmatpush.bf16.msrb.mxu1 %v8595_v59  ;;  %v10830_v59 = vld [vmem:[#allocation8 + $0x324] sm:$0xf] }
 0x6e1   :  { %2847 = vmatpush.bf16.msrb.mxu2 %v8855_v8  ;;  %v8523_v8 = vor.u32 %v10740_v5, %v8522_v60  ;;  %v8923_v60 = vor.u32 %v10838_v51, %v8922_v58  ;;  %v8927_v5 = vor.u32 %v10830_v59, %v8924_v61  ;;  %v8602_v58 = vld [vmem:[#allocation8 + $0xa0] sm:$0xf]  ;;  %v10750_v59 = vld [vmem:[#allocation8 + $0xa4] sm:$0xf] }
 0x6e2   :  { %2807 = vmatpush.bf16.msrb.mxu3 %v8715_v7  ;;  %v10758_v51 = vld [vmem:[#allocation8 + $0xdc] sm:$0xf0]  ;;  %v8604_v61 = vld [vmem:[#allocation8 + $0xe0] sm:$0xf0] }
 0x6e4   :  { %2838 = vmatpush.bf16.msrb.mxu1 %v8531_v12 }
 0x6e5   :  { %2848 = vmatpush.bf16.msrb.mxu2 %v8791_v2  ;;  %v8535_v2 = vor.u32 %v10733_v45, %v8532_v14  ;;  %v8868_v45 = vld [vmem:[#allocation8 + $0x2e8] sm:$0xf0] }
 0x6e6   :  { %2808 = vmatpush.bf16.msrb.mxu3 %v8651_v31 }
 0x6e9   :  { %2849 = vmatpush.bf16.msrb.mxu2 %v8727_v27 }
 0x6ea   :  { %2809 = vmatpush.bf16.msrb.mxu3 %v8587_v42  ;;  %v8987_v42 = vor.u32 %v10854_v40, %v8986_v46 }
 0x6ed   :  { %2850 = vmatpush.bf16.msrb.mxu2 %v8663_v44  ;;  %v8994_v44 = vld [vmem:[#allocation8 + $0x3a8] sm:$0xf] }
 0x6ee   :  { %2810 = vmatpush.bf16.msrb.mxu3 %v8523_v8  ;;  %v10822_v8 = vld [vmem:[#allocation8 + $0x2dc] sm:$0xf0] }
 0x6f1   :  { %2851 = vmatpush.bf16.msrb.mxu2 %v8599_v0  ;;  %v10831_v0 = vld [vmem:[#allocation8 + $0x32c] sm:$0xf] }
 0x6f5   :  { %2852 = vmatpush.bf16.msrb.mxu2 %v8535_v2  ;;  %v10806_v2 = vld [vmem:[#allocation8 + $0x25c] sm:$0xf0] }
 0x734   :  { %v1636_v23 = vpop.xlane.xlu0 %1635 }
 0x735   :  { %v12380_v26 = vmul.f32 0.009259259, %v1636_v23 }
 0x736   :  { %v1642_v21 = vpop.xlane.xlu2 %1641 }
 0x737   :  { %v1649_v33 = vmul.f32 %v12380_v26, %v12380_v26  ;;  %v1647_v41 = vmul.f32 0.009259259, %v1642_v21  ;;  %v1653_v38 = vsub.f32 %v12369_v39, %v12380_v26  ;;  %v1679_v21 = vperm.slane %v259_v37, 0 }
 0x739   :  { %v1651_v48 = vsub.f32 %v1647_v41, %v1649_v33  ;;  %v1682_v33 = vperm.slane %v259_v37, 1  ;;  %v8730_v37 = vld [vmem:[#allocation8 + $0x1a0] sm:$0xf] }
 0x73b   :  { %v1655_v25 = vadd.f32 1e-05, %v1651_v48  ;;  %v8988_v48 = vld [vmem:[#allocation8 + $0x3e0] sm:$0xf0] }
 0x73c   :  { %v1638_v63 = vpop.xlane.xlu1 %1637  ;;  %v8991_v50 = vor.u32 %v10846_v24, %v8988_v48  ;;  %v10766_v24 = vld [vmem:[#allocation8 + $0x124] sm:$0xf] }
 0x73d   :  { %11369 = vrsqrt.f32 %v1655_v25  ;;  %v1646_v3 = vmul.f32 0.009259259, %v1638_v63  ;;  %vm1663_vm2 = vweird.f32 %v1655_v25  ;;  %v10839_v63 = vld [vmem:[#allocation8 + $0x364] sm:$0xf0]  ;;  %v8668_v48 = vld [vmem:[#allocation8 + $0x160] sm:$0xf0] }
 0x73e   :  { %v1644_v6 = vpop.xlane.xlu0 %1643  ;;  %v8931_v9 = vor.u32 %v10839_v63, %v8930_v62  ;;  %v8610_v62 = vld [vmem:[#allocation8 + $0xa8] sm:$0xf] }
 0x73f   :  { %v1650_v17 = vmul.f32 %v1646_v3, %v1646_v3  ;;  %v1648_v11 = vmul.f32 0.009259259, %v1644_v6  ;;  %v1654_v47 = vsub.f32 %v12375_v53, %v1646_v3  ;;  %v8932_v3 = vld [vmem:[#allocation8 + $0x368] sm:$0xf0]  ;;  %v8858_v6 = vld [vmem:[#allocation8 + $0x2a0] sm:$0xf] }
 0x740   :  { %v8935_v52 = vor.u32 %v10831_v0, %v8932_v3  ;;  %v8859_v12 = vor.u32 %v10822_v8, %v8858_v6  ;;  %v10759_v63 = vld [vmem:[#allocation8 + $0xe4] sm:$0xf0]  ;;  %v10751_v0 = vld [vmem:[#allocation8 + $0xac] sm:$0xf]  ;;  %v8607_v6 = vor.u32 %v10750_v59, %v8604_v61  ;;  %v10742_v8 = vld [vmem:[#allocation8 + $0x5c] sm:$0xf0] }
 0x741   :  { %v1652_v16 = vsub.f32 %v1648_v11, %v1650_v17  ;;  %v8860_v17 = vld [vmem:[#allocation8 + $0x2e0] sm:$0xf0]  ;;  %v8866_v11 = vld [vmem:[#allocation8 + $0x2a8] sm:$0xf]  ;;  %v8612_v3 = vld [vmem:[#allocation8 + $0xe8] sm:$0xf0] }
 0x742   :  { %v8863_v14 = vor.u32 %v10814_v10, %v8860_v17  ;;  %v8611_v10 = vor.u32 %v10759_v63, %v8610_v62  ;;  %v8615_v17 = vor.u32 %v10751_v0, %v8612_v3  ;;  %v10800_v59 = vld [vmem:[#allocation8 + $0x234] sm:$0xf]  ;;  %v8818_v62 = vld [vmem:[#allocation8 + $0x238] sm:$0xf]  ;;  %v10801_v0 = vld [vmem:[#allocation8 + $0x23c] sm:$0xf] }
 0x743   :  { %v11370_v22 = vpop.eup %11369  ;;  %v1656_v18 = vadd.f32 1e-05, %v1652_v16  ;;  %v8794_v16 = vld [vmem:[#allocation8 + $0x220] sm:$0xf]  ;;  %v8812_v61 = vld [vmem:[#allocation8 + $0x270] sm:$0xf0] }
 0x744   :  { %v1658_v13 = vmul.f32 %v11370_v22, %v1655_v25  ;;  %vm1664_vm1 = vweird.f32 %v11370_v22  ;;  %v8995_v25 = vor.u32 %v10855_v56, %v8994_v44  ;;  %v8674_v44 = vld [vmem:[#allocation8 + $0x128] sm:$0xf]  ;;  %v10809_v63 = vld [vmem:[#allocation8 + $0x274] sm:$0xf0]  ;;  %v8820_v3 = vld [vmem:[#allocation8 + $0x278] sm:$0xf0] }
 0x745   :  { %11371 = vrsqrt.f32 %v1656_v18  ;;  %vm1665_vm3 = vmor %vm1663_vm2, %vm1664_vm1  ;;  %vm1673_vm5 = vweird.f32 %v1656_v18  ;;  %v10775_v56 = vld [vmem:[#allocation8 + $0x164] sm:$0xf0] }
 0x746   :  { %v1659_v7 = vmul.f32 %v11370_v22, %v1658_v13  ;;  %v10798_v13 = vld [vmem:[#allocation8 + $0x224] sm:$0xf] }
 0x748   :  { %v1660_v20 = vmul.f32 0.5, %v1659_v7  ;;  %v8796_v7 = vld [vmem:[#allocation8 + $0x260] sm:$0xf0] }
 0x74a   :  { %v1661_v15 = vsub.f32 1.5, %v1660_v20  ;;  %v8802_v20 = vld [vmem:[#allocation8 + $0x228] sm:$0xf] }
 0x74b   :  { %v11372_v36 = vpop.eup %11371 }
 0x74c   :  { %v1662_v19 = vmul.f32 %v11370_v22, %v1661_v15  ;;  %v1668_v43 = vmul.f32 %v11372_v36, %v1656_v18  ;;  %vm1674_vm4 = vweird.f32 %v11372_v36  ;;  %v8871_v18 = vor.u32 %v10815_v4, %v8868_v45  ;;  %v10807_v15 = vld [vmem:[#allocation8 + $0x264] sm:$0xf0]  ;;  %v10735_v4 = vld [vmem:[#allocation8 + $0x2c] sm:$0xf] }
 0x74d   :  { %vm1675_vm6 = vmor %vm1673_vm5, %vm1674_vm4  ;;  %v8548_v45 = vld [vmem:[#allocation8 + $0x68] sm:$0xf0] }
 0x74e   :  { %v1669_v34 = vmul.f32 %v11372_v36, %v1668_v43  ;;  %v1666_v23 = vsel %vm1665_vm3, %v11370_v22, %v1662_v19  ;;  %v8867_v22 = vor.u32 %v10823_v55, %v8866_v11  ;;  %v8804_v19 = vld [vmem:[#allocation8 + $0x268] sm:$0xf0]  ;;  %v8795_v43 = vor.u32 %v10806_v2, %v8794_v16  ;;  %v8546_v11 = vld [vmem:[#allocation8 + $0x28] sm:$0xf]  ;;  %v10848_v16 = vld [vmem:[#allocation8 + $0x3b4] sm:$0xf] }
 0x74f   :  { %v1677_v31 = vmul.f32 %v1666_v23, %v1653_v38  ;;  %v10790_v23 = vld [vmem:[#allocation8 + $0x1dc] sm:$0xf0]  ;;  %v10743_v55 = vld [vmem:[#allocation8 + $0x64] sm:$0xf0]  ;;  %v9004_v2 = vld [vmem:[#allocation8 + $0x3f0] sm:$0xf0] }
 0x750   :  { %v1670_v27 = vmul.f32 0.5, %v1669_v34  ;;  %v8799_v34 = vor.u32 %v10798_v13, %v8796_v7  ;;  %v10857_v7 = vld [vmem:[#allocation8 + $0x3f4] sm:$0xf0] }
 0x751   :  { %v1680_v41 = vmul.f32 %v1679_v21, %v1677_v31  ;;  %v8738_v31 = vld [vmem:[#allocation8 + $0x1a8] sm:$0xf] }
 0x752   :  { %v1671_v35 = vsub.f32 1.5, %v1670_v27  ;;  %v8803_v27 = vor.u32 %v10807_v15, %v8802_v20  ;;  %v10849_v20 = vld [vmem:[#allocation8 + $0x3bc] sm:$0xf] }
 0x753   :  { %v12387_v39 = vadd.f32 %v1682_v33, %v1680_v41  ;;  %v9012_v15 = vld [vmem:[#allocation8 + $0x3f8] sm:$0xf0] }
 0x754   :  { %v1672_v32 = vmul.f32 %v11372_v36, %v1671_v35  ;;  %v10782_v35 = vld [vmem:[#allocation8 + $0x1a4] sm:$0xf] }
 0x756   :  { %v1676_v29 = vsel %vm1675_vm6, %v11372_v36, %v1672_v32  ;;  %v10799_v36 = vld [vmem:[#allocation8 + $0x22c] sm:$0xf]  ;;  %v10791_v32 = vld [vmem:[#allocation8 + $0x1e4] sm:$0xf0]  ;;  %vm6960_vm6 = vcmask 1042434  }
 0x757   :  { %v1678_v28 = vmul.f32 %v1676_v29, %v1654_v47  ;;  %v8807_v38 = vor.u32 %v10799_v36, %v8804_v19  ;;  %v10783_v47 = vld [vmem:[#allocation8 + $0x1ac] sm:$0xf]  ;;  %v8739_v46 = vor.u32 %v10791_v32, %v8738_v31  ;;  %v8547_v36 = vor.u32 %v10743_v55, %v8546_v11  ;;  %v8946_v31 = vld [vmem:[#allocation8 + $0x338] sm:$0xf] }
 0x758   :  { %v8740_v29 = vld [vmem:[#allocation8 + $0x1e8] sm:$0xf0]  ;;  %v8551_v19 = vor.u32 %v10735_v4, %v8548_v45  ;;  %v10841_v32 = vld [vmem:[#allocation8 + $0x374] sm:$0xf0]  ;;  %v10785_v4 = vld [vmem:[#allocation8 + $0x1bc] sm:$0xf] }
 0x759   :  { %v1681_v57 = vmul.f32 %v1679_v21, %v1678_v28  ;;  %v8732_v21 = vld [vmem:[#allocation8 + $0x1e0] sm:$0xf0]  ;;  %v8666_v28 = vld [vmem:[#allocation8 + $0x120] sm:$0xf]  ;;  %v8743_v40 = vor.u32 %v10783_v47, %v8740_v29  ;;  %v10833_v47 = vld [vmem:[#allocation8 + $0x33c] sm:$0xf] }
 0x75a   :  { %v8735_v41 = vor.u32 %v10782_v35, %v8732_v21  ;;  %v10832_v35 = vld [vmem:[#allocation8 + $0x334] sm:$0xf]  ;;  %v8948_v29 = vld [vmem:[#allocation8 + $0x378] sm:$0xf0]  ;;  %v8754_v11 = vld [vmem:[#allocation8 + $0x1b8] sm:$0xf] }
 0x75b   :  { %v12389_v26 = vadd.f32 %v1682_v33, %v1681_v57  ;;  %v8731_v33 = vor.u32 %v10790_v23, %v8730_v37  ;;  %v10774_v57 = vld [vmem:[#allocation8 + $0x15c] sm:$0xf0]  ;;  %v8938_v37 = vld [vmem:[#allocation8 + $0x330] sm:$0xf]  ;;  %v8940_v21 = vld [vmem:[#allocation8 + $0x370] sm:$0xf0] }
 0x75c   :  { %v10840_v23 = vld [vmem:[#allocation8 + $0x36c] sm:$0xf0]  ;;  %v10793_v55 = vld [vmem:[#allocation8 + $0x1f4] sm:$0xf0]  ;;  %v8756_v45 = vld [vmem:[#allocation8 + $0x1f8] sm:$0xf0] }
 0x75d   :  { %v12393_v53 = vpack.c.bf16 %v12389_v26, %v12387_v39 }
 0x75f   :  { %2755 = vmatmul.bf16.vlgmr.msra.gmra.mxu3 %v12393_v53  ;;  %2769 = vmatmul.bf16.vlgmr.msra.gmra.mxu0 %v12393_v53 }
 0x760   :  { %2783 = vmatmul.bf16.vlgmr.msra.gmra.mxu1 %v12393_v53  ;;  %2797 = vmatmul.bf16.vlgmr.msra.gmra.mxu2 %v12393_v53 }
 0x761   :  { %2859 = vmatpush.bf16.msra.mxu3 %v8987_v42  ;;  %2873 = vmatpush.bf16.msra.mxu0 %v8991_v50  ;;  %v8667_v42 = vor.u32 %v10774_v57, %v8666_v28  ;;  %v8671_v50 = vor.u32 %v10766_v24, %v8668_v48  ;;  %v8874_v28 = vld [vmem:[#allocation8 + $0x2b0] sm:$0xf]  ;;  %v10816_v24 = vld [vmem:[#allocation8 + $0x2b4] sm:$0xf] }
 0x762   :  { %2887 = vmatpush.bf16.msra.mxu1 %v8995_v25  ;;  %2901 = vmatpush.bf16.msra.mxu2 %v8999_v49  ;;  %v8675_v25 = vor.u32 %v10775_v56, %v8674_v44  ;;  %v8679_v49 = vor.u32 %v10767_v54, %v8676_v1  ;;  %v10824_v57 = vld [vmem:[#allocation8 + $0x2ec] sm:$0xf0]  ;;  %v8876_v48 = vld [vmem:[#allocation8 + $0x2f0] sm:$0xf0]  ;;  %v8882_v44 = vld [vmem:[#allocation8 + $0x2b8] sm:$0xf] }
 0x763   :  { %v10825_v56 = vld [vmem:[#allocation8 + $0x2f4] sm:$0xf0]  ;;  %v10817_v54 = vld [vmem:[#allocation8 + $0x2bc] sm:$0xf] }
 0x764   :  { %v8884_v1 = vld [vmem:[#allocation8 + $0x2f8] sm:$0xf0] }
 0x765   :  { %2860 = vmatpush.bf16.msra.mxu3 %v8923_v60  ;;  %2874 = vmatpush.bf16.msra.mxu0 %v8927_v5  ;;  %v8538_v60 = vld [vmem:[#allocation8 + $0x20] sm:$0xf]  ;;  %v8603_v5 = vor.u32 %v10758_v51, %v8602_v58  ;;  %v8810_v58 = vld [vmem:[#allocation8 + $0x230] sm:$0xf] }
 0x766   :  { %2888 = vmatpush.bf16.msra.mxu1 %v8931_v9  ;;  %2902 = vmatpush.bf16.msra.mxu2 %v8935_v52  ;;  %v10734_v9 = vld [vmem:[#allocation8 + $0x24] sm:$0xf]  ;;  %v10808_v51 = vld [vmem:[#allocation8 + $0x26c] sm:$0xf0] }
 0x767   :  { %v8540_v52 = vld [vmem:[#allocation8 + $0x60] sm:$0xf0] }
 0x768   :  { %v8543_v13 = vor.u32 %v10734_v9, %v8540_v52  ;;  %v8819_v9 = vor.u32 %v10809_v63, %v8818_v62  ;;  %v8823_v52 = vor.u32 %v10801_v0, %v8820_v3  ;;  %v10872_v62 = vld [vmem:[#allocation10 + $0x70] sm:$0xff] }
 0x769   :  { %2861 = vmatpush.bf16.msra.mxu3 %v8859_v12  ;;  %2875 = vmatpush.bf16.msra.mxu0 %v8863_v14  ;;  %v9002_v12 = vld [vmem:[#allocation8 + $0x3b0] sm:$0xf] }
 0x76a   :  { %2889 = vmatpush.bf16.msra.mxu1 %v8867_v22  ;;  %2903 = vmatpush.bf16.msra.mxu2 %v8871_v18  ;;  %v10856_v14 = vld [vmem:[#allocation8 + $0x3ec] sm:$0xf0]  ;;  %v9010_v22 = vld [vmem:[#allocation8 + $0x3b8] sm:$0xf]  ;;  %v8539_v18 = vor.u32 %v10742_v8, %v8538_v60  ;;  %v8811_v60 = vor.u32 %v10808_v51, %v8810_v58 }
 0x76b   :  { %v10792_v8 = vld [vmem:[#allocation8 + $0x1ec] sm:$0xf0] }
 0x76c   :  { %v10880_v63 = vld [vmem:[#allocation10 + $0xb0] sm:$0xff] }
 0x76d   :  { %2862 = vmatpush.bf16.msra.mxu3 %v8795_v43  ;;  %2876 = vmatpush.bf16.msra.mxu0 %v8799_v34  ;;  %v9003_v43 = vor.u32 %v10856_v14, %v9002_v12  ;;  %v9007_v34 = vor.u32 %v10848_v16, %v9004_v2  ;;  %v8682_v16 = vld [vmem:[#allocation8 + $0x130] sm:$0xf] }
 0x76e   :  { %2890 = vmatpush.bf16.msra.mxu1 %v8803_v27  ;;  %2904 = vmatpush.bf16.msra.mxu2 %v8807_v38  ;;  %v9011_v27 = vor.u32 %v10857_v7, %v9010_v22  ;;  %v9015_v38 = vor.u32 %v10849_v20, %v9012_v15  ;;  %v10776_v2 = vld [vmem:[#allocation8 + $0x16c] sm:$0xf0]  ;;  %v8755_v22 = vor.u32 %v10793_v55, %v8754_v11  ;;  %v8684_v7 = vld [vmem:[#allocation8 + $0x170] sm:$0xf0]  ;;  %v8690_v20 = vld [vmem:[#allocation8 + $0x138] sm:$0xf] }
 0x76f   :  { %2811 = vmatmul.bf16.vlgmr.msrb.gmra.mxu3 %v12393_v53  ;;  %2825 = vmatmul.bf16.vlgmr.msrb.gmra.mxu0 %v12393_v53  ;;  %v10777_v15 = vld [vmem:[#allocation8 + $0x174] sm:$0xf0]  ;;  %v10864_v0 = vld [vmem:[#allocation10 + $0x30] sm:$0xff] }
 0x770   :  { %2839 = vmatmul.bf16.vlgmr.msrb.gmra.mxu1 %v12393_v53  ;;  %2853 = vmatmul.bf16.vlgmr.msrb.gmra.mxu2 %v12393_v53  ;;  %v10888_v3 = vld [vmem:[#allocation10 + $0xf0] sm:$0xff]  ;;  %v10877_v11 = vld [vmem:[#allocation10 + $0x98] sm:$0xff] }
 0x771   :  { %2863 = vmatpush.bf16.msra.mxu3 %v8731_v33  ;;  %2877 = vmatpush.bf16.msra.mxu0 %v8735_v41  ;;  %v8939_v33 = vor.u32 %v10840_v23, %v8938_v37  ;;  %v8943_v41 = vor.u32 %v10832_v35, %v8940_v21  ;;  %v8618_v37 = vld [vmem:[#allocation8 + $0xb0] sm:$0xf]  ;;  %v10752_v35 = vld [vmem:[#allocation8 + $0xb4] sm:$0xf]  ;;  %v10861_v55 = vld [vmem:[#allocation10 + $0x18] sm:$0xff] }
 0x772   :  { %2891 = vmatpush.bf16.msra.mxu1 %v8739_v46  ;;  %2905 = vmatpush.bf16.msra.mxu2 %v8743_v40  ;;  %v8947_v46 = vor.u32 %v10841_v32, %v8946_v31  ;;  %v8951_v40 = vor.u32 %v10833_v47, %v8948_v29  ;;  %v10760_v23 = vld [vmem:[#allocation8 + $0xec] sm:$0xf0]  ;;  %v8620_v21 = vld [vmem:[#allocation8 + $0xf0] sm:$0xf0]  ;;  %v8626_v31 = vld [vmem:[#allocation8 + $0xb8] sm:$0xf] }
 0x773   :  { %v10761_v32 = vld [vmem:[#allocation8 + $0xf4] sm:$0xf0]  ;;  %v10753_v47 = vld [vmem:[#allocation8 + $0xbc] sm:$0xf] }
 0x774   :  { %v8628_v29 = vld [vmem:[#allocation8 + $0xf8] sm:$0xf0] }
 0x775   :  { %2864 = vmatpush.bf16.msra.mxu3 %v8667_v42  ;;  %2878 = vmatpush.bf16.msra.mxu0 %v8671_v50  ;;  %v8875_v42 = vor.u32 %v10824_v57, %v8874_v28  ;;  %v8879_v50 = vor.u32 %v10816_v24, %v8876_v48  ;;  %v8554_v28 = vld [vmem:[#allocation8 + $0x30] sm:$0xf]  ;;  %v10736_v24 = vld [vmem:[#allocation8 + $0x34] sm:$0xf] }
 0x776   :  { %2892 = vmatpush.bf16.msra.mxu1 %v8675_v25  ;;  %2906 = vmatpush.bf16.msra.mxu2 %v8679_v49  ;;  %v8883_v25 = vor.u32 %v10825_v56, %v8882_v44  ;;  %v8887_v49 = vor.u32 %v10817_v54, %v8884_v1  ;;  %v10744_v57 = vld [vmem:[#allocation8 + $0x6c] sm:$0xf0]  ;;  %v8556_v48 = vld [vmem:[#allocation8 + $0x70] sm:$0xf0]  ;;  %v8562_v44 = vld [vmem:[#allocation8 + $0x38] sm:$0xf] }
 0x777   :  { %v10745_v56 = vld [vmem:[#allocation8 + $0x74] sm:$0xf0]  ;;  %v10737_v54 = vld [vmem:[#allocation8 + $0x3c] sm:$0xf] }
 0x778   :  { %v8564_v1 = vld [vmem:[#allocation8 + $0x78] sm:$0xf0]  ;;  %v8563_v58 = vor.u32 %v10745_v56, %v8562_v44  ;;  %v10908_v44 = vld [vmem:[#allocation10 + $0x190] sm:$0xff] }
 0x779   :  { %2865 = vmatpush.bf16.msra.mxu3 %v8603_v5  ;;  %2879 = vmatpush.bf16.msra.mxu0 %v8607_v6  ;;  %v8815_v5 = vor.u32 %v10800_v59, %v8812_v61  ;;  %v8746_v6 = vld [vmem:[#allocation8 + $0x1b0] sm:$0xf]  ;;  %v8567_v51 = vor.u32 %v10737_v54, %v8564_v1  ;;  %v10865_v59 = vld [vmem:[#allocation10 + $0x38] sm:$0xff]  ;;  %v10899_v1 = vld [vmem:[#allocation10 + $0x148] sm:$0xff] }
 0x77a   :  { %2893 = vmatpush.bf16.msra.mxu1 %v8611_v10  ;;  %2907 = vmatpush.bf16.msra.mxu2 %v8615_v17  ;;  %v10784_v10 = vld [vmem:[#allocation8 + $0x1b4] sm:$0xf]  ;;  %v8747_v12 = vor.u32 %v10792_v8, %v8746_v6  ;;  %v10889_v61 = vld [vmem:[#allocation10 + $0xf8] sm:$0xff]  ;;  %v10863_v6 = vld [vmem:[#allocation10 + $0x28] sm:$0xff] }
 0x77b   :  { %v8748_v17 = vld [vmem:[#allocation8 + $0x1f0] sm:$0xf0]  ;;  %v10887_v8 = vld [vmem:[#allocation10 + $0xe8] sm:$0xff] }
 0x77c   :  { %v8751_v14 = vor.u32 %v10784_v10, %v8748_v17  ;;  %v10862_v10 = vld [vmem:[#allocation10 + $0x20] sm:$0xff]  ;;  %v10869_v17 = vld [vmem:[#allocation10 + $0x58] sm:$0xff]  ;;  %v10892_v56 = vld [vmem:[#allocation10 + $0x110] sm:$0xff] }
 0x77d   :  { %2866 = vmatpush.bf16.msra.mxu3 %v8539_v18  ;;  %2880 = vmatpush.bf16.msra.mxu0 %v8543_v13  ;;  %v8759_v18 = vor.u32 %v10785_v4, %v8756_v45  ;;  %v10768_v13 = vld [vmem:[#allocation8 + $0x134] sm:$0xf]  ;;  %v10885_v4 = vld [vmem:[#allocation10 + $0xd8] sm:$0xff] }
 0x77e   :  { %2894 = vmatpush.bf16.msra.mxu1 %v8547_v36  ;;  %2908 = vmatpush.bf16.msra.mxu2 %v8551_v19  ;;  %v10769_v36 = vld [vmem:[#allocation8 + $0x13c] sm:$0xf]  ;;  %v10868_v45 = vld [vmem:[#allocation10 + $0x50] sm:$0xff] }
 0x77f   :  { %v8692_v19 = vld [vmem:[#allocation8 + $0x178] sm:$0xf0]  ;;  %v10916_v54 = vld [vmem:[#allocation10 + $0x1d0] sm:$0xff] }
 0x780   :  { %2867 = vmatmul.bf16.vlgmr.msra.gmra.mxu3 %v12393_v53  ;;  %2881 = vmatmul.bf16.vlgmr.msra.gmra.mxu0 %v12393_v53 }
 0x781   :  { %2915 = vmatpush.bf16.msrb.mxu3 %v9003_v43  ;;  %2929 = vmatpush.bf16.msrb.mxu0 %v9007_v34  ;;  %v8683_v43 = vor.u32 %v10776_v2, %v8682_v16  ;;  %v8687_v34 = vor.u32 %v10768_v13, %v8684_v7  ;;  %v10884_v16 = vld [vmem:[#allocation10 + $0xd0] sm:$0xff]  ;;  %v10867_v2 = vld [vmem:[#allocation10 + $0x48] sm:$0xff]  ;;  %v10866_v7 = vld [vmem:[#allocation10 + $0x40] sm:$0xff] }
 0x782   :  { %2943 = vmatpush.bf16.msrb.mxu1 %v9011_v27  ;;  %2957 = vmatpush.bf16.msrb.mxu2 %v9015_v38  ;;  %v8691_v27 = vor.u32 %v10777_v15, %v8690_v20  ;;  %v8695_v38 = vor.u32 %v10769_v36, %v8692_v19  ;;  %v10883_v13 = vld [vmem:[#allocation10 + $0xc8] sm:$0xff]  ;;  %v10874_v20 = vld [vmem:[#allocation10 + $0x80] sm:$0xff]  ;;  %v10905_v15 = vld [vmem:[#allocation10 + $0x178] sm:$0xff] }
 0x783   :  { %2895 = vmatmul.bf16.vlgmr.msra.gmra.mxu1 %v12393_v53  ;;  %2909 = vmatmul.bf16.vlgmr.msra.gmra.mxu2 %v12393_v53  ;;  %v10913_v36 = vld [vmem:[#allocation10 + $0x1b8] sm:$0xff]  ;;  %v10858_v19 = vld [vmem:[#allocation10] sm:$0xff] }
 0x785   :  { %2916 = vmatpush.bf16.msrb.mxu3 %v8939_v33  ;;  %2930 = vmatpush.bf16.msrb.mxu0 %v8943_v41  ;;  %v8619_v33 = vor.u32 %v10760_v23, %v8618_v37  ;;  %v8623_v41 = vor.u32 %v10752_v35, %v8620_v21  ;;  %v10921_v37 = vld [vmem:[#allocation10 + $0x1f8] sm:$0xff]  ;;  %v10904_v23 = vld [vmem:[#allocation10 + $0x170] sm:$0xff]  ;;  %v10903_v21 = vld [vmem:[#allocation10 + $0x168] sm:$0xff] }
 0x786   :  { %2944 = vmatpush.bf16.msrb.mxu1 %v8947_v46  ;;  %2958 = vmatpush.bf16.msrb.mxu2 %v8951_v40  ;;  %v8627_v46 = vor.u32 %v10761_v32, %v8626_v31  ;;  %v8631_v40 = vor.u32 %v10753_v47, %v8628_v29  ;;  %v10920_v35 = vld [vmem:[#allocation10 + $0x1f0] sm:$0xff]  ;;  %v10911_v31 = vld [vmem:[#allocation10 + $0x1a8] sm:$0xff]  ;;  %v10902_v29 = vld [vmem:[#allocation10 + $0x160] sm:$0xff] }
 0x787   :  { %v10895_v32 = vld [vmem:[#allocation10 + $0x128] sm:$0xff] }
 0x788   :  { %v10919_v47 = vld [vmem:[#allocation10 + $0x1e8] sm:$0xff] }
 0x789   :  { %2917 = vmatpush.bf16.msrb.mxu3 %v8875_v42  ;;  %2931 = vmatpush.bf16.msrb.mxu0 %v8879_v50  ;;  %v8555_v42 = vor.u32 %v10744_v57, %v8554_v28  ;;  %v8559_v50 = vor.u32 %v10736_v24, %v8556_v48  ;;  %v10918_v28 = vld [vmem:[#allocation10 + $0x1e0] sm:$0xff]  ;;  %v10901_v57 = vld [vmem:[#allocation10 + $0x158] sm:$0xff]  ;;  %v10900_v48 = vld [vmem:[#allocation10 + $0x150] sm:$0xff] }
 0x78a   :  { %2945 = vmatpush.bf16.msrb.mxu1 %v8883_v25  ;;  %2959 = vmatpush.bf16.msrb.mxu2 %v8887_v49  ;;  %v10873_v25 = vld [vmem:[#allocation10 + $0x78] sm:$0xff] }
 0x78b   :  { %v10881_v49 = vld [vmem:[#allocation10 + $0xb8] sm:$0xff] }
 0x78c   :  { %v10917_v24 = vld [vmem:[#allocation10 + $0x1d8] sm:$0xff] }
 0x78d   :  { %2918 = vmatpush.bf16.msrb.mxu3 %v8811_v60  ;;  %2932 = vmatpush.bf16.msrb.mxu0 %v8815_v5  ;;  %v10871_v60 = vld [vmem:[#allocation10 + $0x68] sm:$0xff] }
 0x78e   :  { %2946 = vmatpush.bf16.msrb.mxu1 %v8819_v9  ;;  %2960 = vmatpush.bf16.msrb.mxu2 %v8823_v52  ;;  %v10879_v5 = vld [vmem:[#allocation10 + $0xa8] sm:$0xff]  ;;  %v10870_v9 = vld [vmem:[#allocation10 + $0x60] sm:$0xff] }
 0x78f   :  { %v10878_v52 = vld [vmem:[#allocation10 + $0xa0] sm:$0xff] }
 0x791   :  { %2919 = vmatpush.bf16.msrb.mxu3 %v8747_v12  ;;  %2933 = vmatpush.bf16.msrb.mxu0 %v8751_v14  ;;  %v10876_v12 = vld [vmem:[#allocation10 + $0x90] sm:$0xff] }
 0x792   :  { %2947 = vmatpush.bf16.msrb.mxu1 %v8755_v22  ;;  %2961 = vmatpush.bf16.msrb.mxu2 %v8759_v18  ;;  %v10860_v14 = vld [vmem:[#allocation10 + $0x10] sm:$0xff]  ;;  %v10875_v22 = vld [vmem:[#allocation10 + $0x88] sm:$0xff] }
 0x793   :  { %v10859_v18 = vld [vmem:[#allocation10 + $0x8] sm:$0xff] }
 0x795   :  { %2920 = vmatpush.bf16.msrb.mxu3 %v8683_v43  ;;  %2934 = vmatpush.bf16.msrb.mxu0 %v8687_v34  ;;  %v10882_v43 = vld [vmem:[#allocation10 + $0xc0] sm:$0xff]  ;;  %v10897_v34 = vld [vmem:[#allocation10 + $0x138] sm:$0xff] }
 0x796   :  { %2948 = vmatpush.bf16.msrb.mxu1 %v8691_v27  ;;  %2962 = vmatpush.bf16.msrb.mxu2 %v8695_v38  ;;  %v10912_v27 = vld [vmem:[#allocation10 + $0x1b0] sm:$0xff] }
 0x797   :  { %v10896_v38 = vld [vmem:[#allocation10 + $0x130] sm:$0xff] }
 0x799   :  { %2921 = vmatpush.bf16.msrb.mxu3 %v8619_v33  ;;  %2935 = vmatpush.bf16.msrb.mxu0 %v8623_v41  ;;  %v10910_v33 = vld [vmem:[#allocation10 + $0x1a0] sm:$0xff] }
 0x79a   :  { %2949 = vmatpush.bf16.msrb.mxu1 %v8627_v46  ;;  %2963 = vmatpush.bf16.msrb.mxu2 %v8631_v40  ;;  %v10894_v41 = vld [vmem:[#allocation10 + $0x120] sm:$0xff]  ;;  %v10909_v46 = vld [vmem:[#allocation10 + $0x198] sm:$0xff] }
 0x79b   :  { %v10893_v40 = vld [vmem:[#allocation10 + $0x118] sm:$0xff] }
 0x79d   :  { %2922 = vmatpush.bf16.msrb.mxu3 %v8555_v42  ;;  %2936 = vmatpush.bf16.msrb.mxu0 %v8559_v50  ;;  %v10907_v42 = vld [vmem:[#allocation10 + $0x188] sm:$0xff] }
 0x79e   :  { %2950 = vmatpush.bf16.msrb.mxu1 %v8563_v58  ;;  %2964 = vmatpush.bf16.msrb.mxu2 %v8567_v51  ;;  %v10891_v50 = vld [vmem:[#allocation10 + $0x108] sm:$0xff]  ;;  %v10898_v51 = vld [vmem:[#allocation10 + $0x140] sm:$0xff] }
 0x79f   :  { %v10915_v58 = vld [vmem:[#allocation10 + $0x1c8] sm:$0xff] }
 0x7a0   :  { %2923 = vmatmul.bf16.vlgmr.msrb.gmra.mxu3 %v12393_v53  ;;  %2937 = vmatmul.bf16.vlgmr.msrb.gmra.mxu0 %v12393_v53 }
 0x7a1   :  { %3804 = vmatpush.bf16.msra.mxu0 %v10873_v25  ;;  %2951 = vmatmul.bf16.vlgmr.msrb.gmra.mxu1 %v12393_v53  ;;  %v10906_v25 = vld [vmem:[#allocation10 + $0x180] sm:$0xff] }
 0x7a2   :  { %3818 = vmatpush.bf16.msra.mxu1 %v10881_v49  ;;  %2965 = vmatmul.bf16.vlgmr.msrb.gmra.mxu2 %v12393_v53  ;;  %v10886_v53 = vld [vmem:[#allocation10 + $0xe0] sm:$0xff] }
 0x7a3   :  { %3790 = vmatpush.bf16.msra.mxu3 %v10865_v59  ;;  %3832 = vmatpush.bf16.msra.mxu2 %v10889_v61  ;;  %v10890_v49 = vld [vmem:[#allocation10 + $0x100] sm:$0xff]  ;;  %v12414_v61 = vld [vmem:[%s13043_s8] sm:$0xff] }
 0x7a4   :  { %v10914_v59 = vld [vmem:[#allocation10 + $0x1c0] sm:$0xff] }
 0x7a5   :  { %3805 = vmatpush.bf16.msra.mxu0 %v10872_v62 }
 0x7a6   :  { %3819 = vmatpush.bf16.msra.mxu1 %v10880_v63 }
 0x7a7   :  { %3791 = vmatpush.bf16.msra.mxu3 %v10864_v0  ;;  %3833 = vmatpush.bf16.msra.mxu2 %v10888_v3  ;;  %v2076_v0 = vperm.slane %v12414_v61, 1  ;;  %v2077_v3 = vperm.slane %v12414_v61, 2 }
 0x7a9   :  { %3806 = vmatpush.bf16.msra.mxu0 %v10871_v60 }
 0x7aa   :  { %3820 = vmatpush.bf16.msra.mxu1 %v10879_v5 }
 0x7ab   :  { %3792 = vmatpush.bf16.msra.mxu3 %v10863_v6  ;;  %3834 = vmatpush.bf16.msra.mxu2 %v10887_v8 }
 0x7ad   :  { %3807 = vmatpush.bf16.msra.mxu0 %v10870_v9 }
 0x7ae   :  { %3821 = vmatpush.bf16.msra.mxu1 %v10878_v52  ;;  %v2075_v52 = vperm.slane %v12414_v61, 0 }
 0x7af   :  { %3793 = vmatpush.bf16.msra.mxu3 %v10862_v10  ;;  %3835 = vmatpush.bf16.msra.mxu2 %v10886_v53 }
 0x7b1   :  { %3808 = vmatpush.bf16.msra.mxu0 %v10869_v17  ;;  %v2078_v17 = vperm.slane %v12414_v61, 3 }
 0x7b2   :  { %3822 = vmatpush.bf16.msra.mxu1 %v10877_v11 }
 0x7b3   :  { %3794 = vmatpush.bf16.msra.mxu3 %v10861_v55  ;;  %3836 = vmatpush.bf16.msra.mxu2 %v10885_v4 }
 0x7b5   :  { %3809 = vmatpush.bf16.msra.mxu0 %v10868_v45 }
 0x7b6   :  { %3823 = vmatpush.bf16.msra.mxu1 %v10876_v12 }
 0x7b7   :  { %3795 = vmatpush.bf16.msra.mxu3 %v10860_v14  ;;  %3837 = vmatpush.bf16.msra.mxu2 %v10884_v16  ;;  %v10937_v14 = vld [vmem:[#allocation10 + $0x278] sm:$0xff] }
 0x7b9   :  { %3810 = vmatpush.bf16.msra.mxu0 %v10867_v2 }
 0x7ba   :  { %3824 = vmatpush.bf16.msra.mxu1 %v10875_v22  ;;  %v10945_v22 = vld [vmem:[#allocation10 + $0x2b8] sm:$0xff] }
 0x7bb   :  { %3796 = vmatpush.bf16.msra.mxu3 %v10859_v18  ;;  %3838 = vmatpush.bf16.msra.mxu2 %v10883_v13 }
 0x7bd   :  { %3811 = vmatpush.bf16.msra.mxu0 %v10866_v7 }
 0x7be   :  { %3825 = vmatpush.bf16.msra.mxu1 %v10874_v20 }
 0x7bf   :  { %3797 = vmatpush.bf16.msra.mxu3 %v10858_v19  ;;  %3839 = vmatpush.bf16.msra.mxu2 %v10882_v43  ;;  %v10936_v43 = vld [vmem:[#allocation10 + $0x270] sm:$0xff] }
 0x7c1   :  { %3860 = vmatpush.bf16.msrb.mxu0 %v10905_v15 }
 0x7c2   :  { %3874 = vmatpush.bf16.msrb.mxu1 %v10913_v36 }
 0x7c3   :  { %3846 = vmatpush.bf16.msrb.mxu3 %v10897_v34  ;;  %3888 = vmatpush.bf16.msrb.mxu2 %v10921_v37 }
 0x7c5   :  { %3861 = vmatpush.bf16.msrb.mxu0 %v10904_v23 }
 0x7c6   :  { %3875 = vmatpush.bf16.msrb.mxu1 %v10912_v27  ;;  %v10944_v27 = vld [vmem:[#allocation10 + $0x2b0] sm:$0xff] }
 0x7c7   :  { %3847 = vmatpush.bf16.msrb.mxu3 %v10896_v38  ;;  %3889 = vmatpush.bf16.msrb.mxu2 %v10920_v35 }
 0x7c9   :  { %3862 = vmatpush.bf16.msrb.mxu0 %v10903_v21  ;;  %v10929_v21 = vld [vmem:[#allocation10 + $0x238] sm:$0xff] }
 0x7ca   :  { %3876 = vmatpush.bf16.msrb.mxu1 %v10911_v31 }
 0x7cb   :  { %3848 = vmatpush.bf16.msrb.mxu3 %v10895_v32  ;;  %3890 = vmatpush.bf16.msrb.mxu2 %v10919_v47  ;;  %v2080_v32 = vperm.slane %v12414_v61, 5  ;;  %v10953_v47 = vld [vmem:[#allocation10 + $0x2f8] sm:$0xff] }
 0x7cd   :  { %3863 = vmatpush.bf16.msrb.mxu0 %v10902_v29 }
 0x7ce   :  { %3877 = vmatpush.bf16.msrb.mxu1 %v10910_v33  ;;  %v2081_v33 = vperm.slane %v12414_v61, 6 }
 0x7cf   :  { %3849 = vmatpush.bf16.msrb.mxu3 %v10894_v41  ;;  %3891 = vmatpush.bf16.msrb.mxu2 %v10918_v28  ;;  %v10935_v41 = vld [vmem:[#allocation10 + $0x268] sm:$0xff] }
 0x7d0   :  { %v10943_v28 = vld [vmem:[#allocation10 + $0x2a8] sm:$0xff] }
 0x7d1   :  { %3864 = vmatpush.bf16.msrb.mxu0 %v10901_v57 }
 0x7d2   :  { %3878 = vmatpush.bf16.msrb.mxu1 %v10909_v46  ;;  %v10928_v46 = vld [vmem:[#allocation10 + $0x230] sm:$0xff] }
 0x7d3   :  { %3850 = vmatpush.bf16.msrb.mxu3 %v10893_v40  ;;  %3892 = vmatpush.bf16.msrb.mxu2 %v10917_v24 }
 0x7d5   :  { %3865 = vmatpush.bf16.msrb.mxu0 %v10900_v48  ;;  %v10952_v48 = vld [vmem:[#allocation10 + $0x2f0] sm:$0xff] }
 0x7d6   :  { %3879 = vmatpush.bf16.msrb.mxu1 %v10908_v44 }
 0x7d7   :  { %3851 = vmatpush.bf16.msrb.mxu3 %v10892_v56  ;;  %3893 = vmatpush.bf16.msrb.mxu2 %v10916_v54  ;;  %v10934_v54 = vld [vmem:[#allocation10 + $0x260] sm:$0xff] }
 0x7d9   :  { %3866 = vmatpush.bf16.msrb.mxu0 %v10899_v1  ;;  %v2079_v1 = vperm.slane %v12414_v61, 4 }
 0x7da   :  { %3880 = vmatpush.bf16.msrb.mxu1 %v10907_v42 }
 0x7db   :  { %3852 = vmatpush.bf16.msrb.mxu3 %v10891_v50  ;;  %3894 = vmatpush.bf16.msrb.mxu2 %v10915_v58  ;;  %v10942_v58 = vld [vmem:[#allocation10 + $0x2a0] sm:$0xff] }
 0x7dc   :  { %v2770_v62 = vpop.f32.mrf.mxu0 }
 0x7dd   :  { %3867 = vmatpush.bf16.msrb.mxu0 %v10898_v51  ;;  %v2784_v63 = vpop.f32.mrf.mxu1  ;;  %v2771_v5 = vadd.f32 %v2770_v62, %v2076_v0  ;;  %v2082_v51 = vperm.slane %v12414_v61, 7  ;;  %v10926_v61 = vld [vmem:[#allocation10 + $0x220] sm:$0xff] }
 0x7de   :  { %3881 = vmatpush.bf16.msrb.mxu1 %v10906_v25  ;;  %v2785_v8 = vadd.f32 %v2784_v63, %v2077_v3  ;;  %v10951_v63 = vld [vmem:[#allocation10 + $0x2e8] sm:$0xff] }
 0x7df   :  { %3853 = vmatpush.bf16.msrb.mxu3 %v10890_v49  ;;  %3895 = vmatpush.bf16.msrb.mxu2 %v10914_v59  ;;  %v2972_v55 = vmax.f32 %v2771_v5, 0.0  ;;  %v10927_v49 = vld [vmem:[#allocation10 + $0x228] sm:$0xff] }
 0x7e0   :  { %v2973_v45 = vmax.f32 %v2785_v8, 0.0  ;;  %v10941_v8 = vld [vmem:[#allocation10 + $0x298] sm:$0xff] }
 0x7e2   :  { %v2756_v60 = vpop.f32.mrf.mxu3 }
 0x7e3   :  { %v2798_v6 = vpop.f32.mrf.mxu2  ;;  %v2757_v16 = vadd.f32 %v2756_v60, %v2075_v52  ;;  %v10933_v60 = vld [vmem:[#allocation10 + $0x258] sm:$0xff] }
 0x7e4   :  { %v2772_v9 = vpop.f32.mrf.mxu0  ;;  %v2799_v18 = vadd.f32 %v2798_v6, %v2078_v17 }
 0x7e5   :  { %v2773_v10 = vadd.f32 %v2772_v9, %v2076_v0  ;;  %v2786_v53 = vpop.f32.mrf.mxu1  ;;  %v2971_v34 = vmax.f32 %v2757_v16, 0.0 }
 0x7e6   :  { %v2787_v11 = vadd.f32 %v2786_v53, %v2077_v3  ;;  %v2974_v38 = vmax.f32 %v2799_v18, 0.0 }
 0x7e7   :  { %v2988_v4 = vmax.f32 %v2773_v10, 0.0 }
 0x7e8   :  { %v2989_v12 = vmax.f32 %v2787_v11, 0.0  ;;  %v10950_v11 = vld [vmem:[#allocation10 + $0x2e0] sm:$0xff] }
 0x7e9   :  { %v3004_v2 = vpack.c.bf16 %v2988_v4, %v2972_v55  ;;  %v10932_v4 = vld [vmem:[#allocation10 + $0x250] sm:$0xff] }
 0x7ea   :  { %v3005_v13 = vpack.c.bf16 %v2989_v12, %v2973_v45  ;;  %v2758_v7 = vpop.f32.mrf.mxu3 }
 0x7eb   :  { %v2759_v20 = vadd.f32 %v2758_v7, %v2075_v52  ;;  %v2800_v15 = vpop.f32.mrf.mxu2  ;;  %3812 = vmatmul.bf16.vlgmr.msra.gmra.mxu0 %v3004_v2 }
 0x7ec   :  { %v2801_v36 = vadd.f32 %v2800_v15, %v2078_v17  ;;  %3826 = vmatmul.bf16.vlgmr.msra.gmra.mxu1 %v3005_v13  ;;  %3916 = vmatpush.bf16.msra.mxu0 %v10937_v14  ;;  %v2826_v19 = vpop.f32.mrf.mxu0  ;;  %v10940_v14 = vld [vmem:[#allocation10 + $0x290] sm:$0xff]  ;;  %v10925_v13 = vld [vmem:[#allocation10 + $0x218] sm:$0xff] }
 0x7ed   :  { %v2987_v37 = vmax.f32 %v2759_v20, 0.0  ;;  %3930 = vmatpush.bf16.msra.mxu1 %v10945_v22  ;;  %v2840_v23 = vpop.f32.mrf.mxu1  ;;  %v2827_v40 = vadd.f32 %v2826_v19, %v2080_v32  ;;  %v12427_v22 = vld [vmem:[%s13043_s8 + $0x8] sm:$0xff]  ;;  %v10949_v15 = vld [vmem:[#allocation10 + $0x2d8] sm:$0xff]  ;;  %v10931_v19 = vld [vmem:[#allocation10 + $0x248] sm:$0xff] }
 0x7ee   :  { %v2990_v35 = vmax.f32 %v2801_v36, 0.0  ;;  %v2841_v44 = vadd.f32 %v2840_v23, %v2081_v33  ;;  %v10924_v23 = vld [vmem:[#allocation10 + $0x210] sm:$0xff] }
 0x7ef   :  { %v3003_v31 = vpack.c.bf16 %v2987_v37, %v2971_v34  ;;  %v2976_v59 = vmax.f32 %v2827_v40, 0.0  ;;  %v10939_v34 = vld [vmem:[#allocation10 + $0x288] sm:$0xff]  ;;  %v2085_v37 = vperm.slane %v12427_v22, 2 }
 0x7f0   :  { %v3006_v29 = vpack.c.bf16 %v2990_v35, %v2974_v38  ;;  %3917 = vmatpush.bf16.msra.mxu0 %v10936_v43  ;;  %v2977_v0 = vmax.f32 %v2841_v44, 0.0  ;;  %v2084_v43 = vperm.slane %v12427_v22, 1  ;;  %v10930_v35 = vld [vmem:[#allocation10 + $0x240] sm:$0xff] }
 0x7f1   :  { %3931 = vmatpush.bf16.msra.mxu1 %v10944_v27  ;;  %3798 = vmatmul.bf16.vlgmr.msra.gmra.mxu3 %v3003_v31  ;;  %v10948_v27 = vld [vmem:[#allocation10 + $0x2d0] sm:$0xff] }
 0x7f2   :  { %3840 = vmatmul.bf16.vlgmr.msra.gmra.mxu2 %v3006_v29  ;;  %3902 = vmatpush.bf16.msra.mxu3 %v10929_v21  ;;  %v2812_v57 = vpop.f32.mrf.mxu3 }
 0x7f3   :  { %3944 = vmatpush.bf16.msra.mxu2 %v10953_v47  ;;  %v2854_v24 = vpop.f32.mrf.mxu2  ;;  %v2813_v5 = vadd.f32 %v2812_v57, %v2079_v1  ;;  %v10969_v47 = vld [vmem:[#allocation10 + $0x378] sm:$0xff]  ;;  %v2083_v57 = vperm.slane %v12427_v22, 0 }
 0x7f4   :  { %3918 = vmatpush.bf16.msra.mxu0 %v10935_v41  ;;  %v2828_v56 = vpop.f32.mrf.mxu0  ;;  %v2855_v9 = vadd.f32 %v2854_v24, %v2082_v51  ;;  %v10977_v41 = vld [vmem:[#allocation10 + $0x3b8] sm:$0xff]  ;;  %v10947_v24 = vld [vmem:[#allocation10 + $0x2c8] sm:$0xff] }
 0x7f5   :  { %3932 = vmatpush.bf16.msra.mxu1 %v10943_v28  ;;  %v2829_v42 = vadd.f32 %v2828_v56, %v2080_v32  ;;  %v2842_v50 = vpop.f32.mrf.mxu1  ;;  %v2975_v45 = vmax.f32 %v2813_v5, 0.0  ;;  %v10938_v32 = vld [vmem:[#allocation10 + $0x280] sm:$0xff]  ;;  %v10923_v28 = vld [vmem:[#allocation10 + $0x208] sm:$0xff] }
 0x7f6   :  { %v2843_v25 = vadd.f32 %v2842_v50, %v2081_v33  ;;  %3903 = vmatpush.bf16.msra.mxu3 %v10928_v46  ;;  %v2978_v16 = vmax.f32 %v2855_v9, 0.0  ;;  %v10968_v50 = vld [vmem:[#allocation10 + $0x370] sm:$0xff]  ;;  %v10967_v9 = vld [vmem:[#allocation10 + $0x368] sm:$0xff] }
 0x7f7   :  { %v2992_v62 = vmax.f32 %v2829_v42, 0.0  ;;  %3945 = vmatpush.bf16.msra.mxu2 %v10952_v48  ;;  %v2086_v48 = vperm.slane %v12427_v22, 3 }
 0x7f8   :  { %v2993_v3 = vmax.f32 %v2843_v25, 0.0  ;;  %3919 = vmatpush.bf16.msra.mxu0 %v10934_v54  ;;  %v10976_v25 = vld [vmem:[#allocation10 + $0x3b0] sm:$0xff] }
 0x7f9   :  { %v3008_v6 = vpack.c.bf16 %v2992_v62, %v2976_v59  ;;  %3933 = vmatpush.bf16.msra.mxu1 %v10942_v58 }
 0x7fa   :  { %v3009_v52 = vpack.c.bf16 %v2993_v3, %v2977_v0  ;;  %3904 = vmatpush.bf16.msra.mxu3 %v10927_v49  ;;  %v2814_v10 = vpop.f32.mrf.mxu3  ;;  %v10922_v49 = vld [vmem:[#allocation10 + $0x200] sm:$0xff]  ;;  %v10961_v3 = vld [vmem:[#allocation10 + $0x338] sm:$0xff] }
 0x7fb   :  { %3946 = vmatpush.bf16.msra.mxu2 %v10951_v63  ;;  %v2815_v53 = vadd.f32 %v2814_v10, %v2079_v1  ;;  %v2856_v17 = vpop.f32.mrf.mxu2  ;;  %3868 = vmatmul.bf16.vlgmr.msrb.gmra.mxu0 %v3008_v6  ;;  %v10946_v0 = vld [vmem:[#allocation10 + $0x2c0] sm:$0xff]  ;;  %v10985_v6 = vld [vmem:[#allocation10 + $0x3f8] sm:$0xff] }
 0x7fc   :  { %v2857_v55 = vadd.f32 %v2856_v17, %v2082_v51  ;;  %3882 = vmatmul.bf16.vlgmr.msrb.gmra.mxu1 %v3009_v52  ;;  %3920 = vmatpush.bf16.msra.mxu0 %v10933_v60 }
 0x7fd   :  { %v2991_v12 = vmax.f32 %v2815_v53, 0.0  ;;  %3934 = vmatpush.bf16.msra.mxu1 %v10941_v8  ;;  %v2882_v18 = vpop.f32.mrf.mxu0 }
 0x7fe   :  { %v2994_v2 = vmax.f32 %v2857_v55, 0.0  ;;  %3905 = vmatpush.bf16.msra.mxu3 %v10926_v61  ;;  %v2883_v21 = vadd.f32 %v2882_v18, %v2084_v43  ;;  %v10975_v61 = vld [vmem:[#allocation10 + $0x3a8] sm:$0xff]  ;;  %v10965_v18 = vld [vmem:[#allocation10 + $0x358] sm:$0xff] }
 0x7ff   :  { %v3007_v7 = vpack.c.bf16 %v2991_v12, %v2975_v45  ;;  %3947 = vmatpush.bf16.msra.mxu2 %v10950_v11  ;;  %v10960_v11 = vld [vmem:[#allocation10 + $0x330] sm:$0xff]  ;;  %v10966_v12 = vld [vmem:[#allocation10 + $0x360] sm:$0xff] }
 0x800   :  { %v2896_v20 = vpop.f32.mrf.mxu1  ;;  %v3010_v36 = vpack.c.bf16 %v2994_v2, %v2978_v16  ;;  %3921 = vmatpush.bf16.msra.mxu0 %v10932_v4  ;;  %v2980_v56 = vmax.f32 %v2883_v21, 0.0  ;;  %v10984_v4 = vld [vmem:[#allocation10 + $0x3f0] sm:$0xff]  ;;  %v10959_v16 = vld [vmem:[#allocation10 + $0x328] sm:$0xff] }
 0x801   :  { %3935 = vmatpush.bf16.msra.mxu1 %v10940_v14  ;;  %3854 = vmatmul.bf16.vlgmr.msrb.gmra.mxu3 %v3007_v7  ;;  %v2897_v29 = vadd.f32 %v2896_v20, %v2085_v37  ;;  %v10974_v14 = vld [vmem:[#allocation10 + $0x3a0] sm:$0xff]  ;;  %v10983_v2 = vld [vmem:[#allocation10 + $0x3e8] sm:$0xff]  ;;  %v10956_v21 = vld [vmem:[#allocation10 + $0x310] sm:$0xff] }
 0x802   :  { %3896 = vmatmul.bf16.vlgmr.msrb.gmra.mxu2 %v3010_v36  ;;  %3906 = vmatpush.bf16.msra.mxu3 %v10925_v13  ;;  %v10973_v13 = vld [vmem:[#allocation10 + $0x398] sm:$0xff]  ;;  %v10958_v7 = vld [vmem:[#allocation10 + $0x320] sm:$0xff] }
 0x803   :  { %3948 = vmatpush.bf16.msra.mxu2 %v10949_v15  ;;  %v2868_v38 = vpop.f32.mrf.mxu3  ;;  %v2981_v1 = vmax.f32 %v2897_v29, 0.0  ;;  %v10982_v20 = vld [vmem:[#allocation10 + $0x3e0] sm:$0xff]  ;;  %v10964_v15 = vld [vmem:[#allocation10 + $0x350] sm:$0xff] }
 0x804   :  { %3922 = vmatpush.bf16.msra.mxu0 %v10931_v19  ;;  %v2869_v58 = vadd.f32 %v2868_v38, %v2083_v57  ;;  %v10972_v19 = vld [vmem:[#allocation10 + $0x390] sm:$0xff]  ;;  %v2089_v38 = vperm.slane %v12427_v22, 6 }
 0x805   :  { %3936 = vmatpush.bf16.msra.mxu1 %v10939_v34  ;;  %v2884_v33 = vpop.f32.mrf.mxu0  ;;  %v10957_v34 = vld [vmem:[#allocation10 + $0x318] sm:$0xff] }
 0x806   :  { %v2910_v31 = vpop.f32.mrf.mxu2  ;;  %3907 = vmatpush.bf16.msra.mxu3 %v10924_v23  ;;  %v2885_v46 = vadd.f32 %v2884_v33, %v2084_v43  ;;  %v2979_v52 = vmax.f32 %v2869_v58, 0.0  ;;  %v2088_v23 = vperm.slane %v12427_v22, 5  ;;  %v10962_v33 = vld [vmem:[#allocation10 + $0x340] sm:$0xff] }
 0x807   :  { %3949 = vmatpush.bf16.msra.mxu2 %v10948_v27  ;;  %v2911_v59 = vadd.f32 %v2910_v31, %v2086_v48  ;;  %v10963_v27 = vld [vmem:[#allocation10 + $0x348] sm:$0xff] }
 0x808   :  { %v2898_v40 = vpop.f32.mrf.mxu1  ;;  %3923 = vmatpush.bf16.msra.mxu0 %v10930_v35  ;;  %v2996_v54 = vmax.f32 %v2885_v46, 0.0  ;;  %v10971_v35 = vld [vmem:[#allocation10 + $0x388] sm:$0xff]  ;;  %v2087_v46 = vperm.slane %v12427_v22, 4 }
 0x809   :  { %v2899_v44 = vadd.f32 %v2898_v40, %v2085_v37  ;;  %3937 = vmatpush.bf16.msra.mxu1 %v10938_v32  ;;  %v2982_v53 = vmax.f32 %v2911_v59, 0.0  ;;  %v10981_v37 = vld [vmem:[#allocation10 + $0x3d8] sm:$0xff]  ;;  %v10980_v32 = vld [vmem:[#allocation10 + $0x3d0] sm:$0xff] }
 0x80a   :  { %3908 = vmatpush.bf16.msra.mxu3 %v10923_v28  ;;  %v3012_v51 = vpack.c.bf16 %v2996_v54, %v2980_v56  ;;  %v10979_v54 = vld [vmem:[#allocation10 + $0x3c8] sm:$0xff] }
 0x80b   :  { %v2997_v42 = vmax.f32 %v2899_v44, 0.0  ;;  %3950 = vmatpush.bf16.msra.mxu2 %v10947_v24  ;;  %v2870_v63 = vpop.f32.mrf.mxu3  ;;  %v2090_v44 = vperm.slane %v12427_v22, 7 }
 0x80c   :  { %3972 = vmatpush.bf16.msrb.mxu0 %v10969_v47  ;;  %v2871_v60 = vadd.f32 %v2870_v63, %v2083_v57  ;;  %v10970_v57 = vld [vmem:[#allocation10 + $0x380] sm:$0xff] }
 0x80d   :  { %3986 = vmatpush.bf16.msrb.mxu1 %v10977_v41  ;;  %v3013_v62 = vpack.c.bf16 %v2997_v42, %v2981_v1  ;;  %3924 = vmatmul.bf16.vlgmr.msra.gmra.mxu0 %v3012_v51 }
 0x80e   :  { %v2912_v5 = vpop.f32.mrf.mxu2  ;;  %v2995_v10 = vmax.f32 %v2871_v60, 0.0  ;;  %3909 = vmatpush.bf16.msra.mxu3 %v10922_v49  ;;  %v10954_v49 = vld [vmem:[#allocation10 + $0x300] sm:$0xff] }
 0x80f   :  { %v2913_v8 = vadd.f32 %v2912_v5, %v2086_v48  ;;  %3938 = vmatmul.bf16.vlgmr.msra.gmra.mxu1 %v3013_v62  ;;  %3951 = vmatpush.bf16.msra.mxu2 %v10946_v0  ;;  %v10955_v48 = vld [vmem:[#allocation10 + $0x308] sm:$0xff]  ;;  %v10978_v0 = vld [vmem:[#allocation10 + $0x3c0] sm:$0xff] }
 0x810   :  { %3973 = vmatpush.bf16.msrb.mxu0 %v10968_v50  ;;  %v3011_v55 = vpack.c.bf16 %v2995_v10, %v2979_v52 }
 0x811   :  { %3987 = vmatpush.bf16.msrb.mxu1 %v10976_v25  ;;  %v2998_v17 = vmax.f32 %v2913_v8, 0.0 }
 0x812   :  { %3958 = vmatpush.bf16.msrb.mxu3 %v10961_v3 }
 0x813   :  { %4000 = vmatpush.bf16.msrb.mxu2 %v10985_v6  ;;  %v3014_v45 = vpack.c.bf16 %v2998_v17, %v2982_v53  ;;  %3910 = vmatmul.bf16.vlgmr.msra.gmra.mxu3 %v3011_v55 }
 0x814   :  { %3974 = vmatpush.bf16.msrb.mxu0 %v10967_v9 }
 0x815   :  { %3988 = vmatpush.bf16.msrb.mxu1 %v10975_v61  ;;  %3952 = vmatmul.bf16.vlgmr.msra.gmra.mxu2 %v3014_v45 }
 0x816   :  { %3959 = vmatpush.bf16.msrb.mxu3 %v10960_v11 }
 0x817   :  { %4001 = vmatpush.bf16.msrb.mxu2 %v10984_v4 }
 0x818   :  { %3975 = vmatpush.bf16.msrb.mxu0 %v10966_v12  ;;  %v11294_v12 = vld [vmem:[#allocation11] ss:$0 sm:$0xff] }
 0x819   :  { %3989 = vmatpush.bf16.msrb.mxu1 %v10974_v14 }
 0x81a   :  { %3960 = vmatpush.bf16.msrb.mxu3 %v10959_v16 }
 0x81b   :  { %4002 = vmatpush.bf16.msrb.mxu2 %v10983_v2 }
 0x81c   :  { %3976 = vmatpush.bf16.msrb.mxu0 %v10965_v18 }
 0x81d   :  { %v2938_v36 = vpop.f32.mrf.mxu0  ;;  %3990 = vmatpush.bf16.msrb.mxu1 %v10973_v13 }
 0x81e   :  { %v2952_v43 = vpop.f32.mrf.mxu1  ;;  %3961 = vmatpush.bf16.msrb.mxu3 %v10958_v7  ;;  %v2939_v47 = vadd.f32 %v2938_v36, %v2088_v23 }
 0x81f   :  { %4003 = vmatpush.bf16.msrb.mxu2 %v10982_v20  ;;  %v2953_v41 = vadd.f32 %v2952_v43, %v2089_v38 }
 0x820   :  { %3977 = vmatpush.bf16.msrb.mxu0 %v10964_v15  ;;  %v2984_v1 = vmax.f32 %v2939_v47, 0.0 }
 0x821   :  { %3991 = vmatpush.bf16.msrb.mxu1 %v10972_v19  ;;  %v2985_v50 = vmax.f32 %v2953_v41, 0.0 }
 0x822   :  { %3962 = vmatpush.bf16.msrb.mxu3 %v10957_v34 }
 0x823   :  { %v2924_v31 = vpop.f32.mrf.mxu3  ;;  %4004 = vmatpush.bf16.msrb.mxu2 %v10981_v37 }
 0x824   :  { %3978 = vmatpush.bf16.msrb.mxu0 %v10963_v27  ;;  %v2925_v51 = vadd.f32 %v2924_v31, %v2087_v46 }
 0x825   :  { %v2966_v29 = vpop.f32.mrf.mxu2  ;;  %v2940_v28 = vpop.f32.mrf.mxu0  ;;  %3992 = vmatpush.bf16.msrb.mxu1 %v10971_v35 }
 0x826   :  { %v2941_v40 = vadd.f32 %v2940_v28, %v2088_v23  ;;  %v2954_v24 = vpop.f32.mrf.mxu1  ;;  %3963 = vmatpush.bf16.msrb.mxu3 %v10956_v21  ;;  %v2967_v59 = vadd.f32 %v2966_v29, %v2090_v44  ;;  %v2983_v5 = vmax.f32 %v2925_v51, 0.0 }
 0x827   :  { %v2955_v56 = vadd.f32 %v2954_v24, %v2089_v38  ;;  %4005 = vmatpush.bf16.msrb.mxu2 %v10980_v32 }
 0x828   :  { %v3000_v42 = vmax.f32 %v2941_v40, 0.0  ;;  %3979 = vmatpush.bf16.msrb.mxu0 %v10962_v33  ;;  %v2986_v8 = vmax.f32 %v2967_v59, 0.0 }
 0x829   :  { %v3001_v58 = vmax.f32 %v2955_v56, 0.0  ;;  %3993 = vmatpush.bf16.msrb.mxu1 %v10970_v57 }
 0x82a   :  { %v3016_v25 = vpack.c.bf16 %v3000_v42, %v2984_v1  ;;  %3964 = vmatpush.bf16.msrb.mxu3 %v10955_v48 }
 0x82b   :  { %v3017_v62 = vpack.c.bf16 %v3001_v58, %v2985_v50  ;;  %v2926_v63 = vpop.f32.mrf.mxu3  ;;  %4006 = vmatpush.bf16.msrb.mxu2 %v10979_v54 }
 0x82c   :  { %v2927_v3 = vadd.f32 %v2926_v63, %v2087_v46  ;;  %3980 = vmatmul.bf16.vlgmr.msrb.gmra.mxu0 %v3016_v25 }
 0x82d   :  { %v2968_v22 = vpop.f32.mrf.mxu2  ;;  %3994 = vmatmul.bf16.vlgmr.msrb.gmra.mxu1 %v3017_v62 }
 0x82e   :  { %v2969_v60 = vadd.f32 %v2968_v22, %v2090_v44  ;;  %v2999_v6 = vmax.f32 %v2927_v3, 0.0  ;;  %3965 = vmatpush.bf16.msrb.mxu3 %v10954_v49 }
 0x82f   :  { %4007 = vmatpush.bf16.msrb.mxu2 %v10978_v0 }
 0x830   :  { %v3002_v9 = vmax.f32 %v2969_v60, 0.0  ;;  %v3015_v52 = vpack.c.bf16 %v2999_v6, %v2983_v5 }
 0x832   :  { %v3018_v10 = vpack.c.bf16 %v3002_v9, %v2986_v8  ;;  %3966 = vmatmul.bf16.vlgmr.msrb.gmra.mxu3 %v3015_v52 }
 0x834   :  { %4008 = vmatmul.bf16.vlgmr.msrb.gmra.mxu2 %v3018_v10 }
 0x868   :  { %v3813_v61 = vpop.f32.mrf.mxu0 }
 0x869   :  { %v3827_v17 = vpop.f32.mrf.mxu1 }
 0x870   :  { %v3815_v55 = vpop.f32.mrf.mxu0 }
 0x871   :  { %v3829_v45 = vpop.f32.mrf.mxu1 }
 0x874   :  { %v3799_v53 = vpop.f32.mrf.mxu3 }
 0x875   :  { %v3841_v11 = vpop.f32.mrf.mxu2  ;;  %v3800_v16 = vadd.f32 %v11294_v12, %v3799_v53 }
 0x877   :  { %v3814_v13 = vadd.f32 %v3813_v61, %v3800_v16  ;;  %v11009_v16 = vld [vmem:[%s13046_s11 + $0xb8] sm:$0xff] }
 0x878   :  { %v3869_v2 = vpop.f32.mrf.mxu0  ;;  %4319 = vmatpush.bf16.msra.mxu1 %v11009_v16 }
 0x879   :  { %v3883_v7 = vpop.f32.mrf.mxu1  ;;  %v3828_v15 = vadd.f32 %v3827_v17, %v3814_v13  ;;  %v11008_v13 = vld [vmem:[%s13046_s11 + $0xb0] sm:$0xff] }
 0x87b   :  { %v3842_v19 = vadd.f32 %v3841_v11, %v3828_v15  ;;  %v11007_v15 = vld [vmem:[%s13046_s11 + $0xa8] sm:$0xff] }
 0x87c   :  { %v3801_v4 = vpop.f32.mrf.mxu3  ;;  %4320 = vmatpush.bf16.msra.mxu1 %v11008_v13 }
 0x87d   :  { %v3843_v14 = vpop.f32.mrf.mxu2  ;;  %v3802_v36 = vadd.f32 %v11294_v12, %v3801_v4  ;;  %v10993_v12 = vld [vmem:[%s13046_s11 + $0x38] sm:$0xff] }
 0x87e   :  { %4190 = vmatpush.bf16.msra.mxu3 %v10993_v12 }
 0x87f   :  { %v3816_v43 = vadd.f32 %v3815_v55, %v3802_v36  ;;  %v10989_v36 = vld [vmem:[%s13046_s11 + $0x18] sm:$0xff] }
 0x880   :  { %v3871_v34 = vpop.f32.mrf.mxu0  ;;  %4321 = vmatpush.bf16.msra.mxu1 %v11007_v15 }
 0x881   :  { %v3885_v27 = vpop.f32.mrf.mxu1  ;;  %v3830_v38 = vadd.f32 %v3829_v45, %v3816_v43  ;;  %v11006_v43 = vld [vmem:[%s13046_s11 + $0xa0] sm:$0xff] }
 0x883   :  { %v3844_v31 = vadd.f32 %v3843_v14, %v3830_v38  ;;  %v10992_v14 = vld [vmem:[%s13046_s11 + $0x30] sm:$0xff]  ;;  %v10987_v38 = vld [vmem:[%s13046_s11 + $0x8] sm:$0xff] }
 0x884   :  { %v3855_v18 = vpop.f32.mrf.mxu3  ;;  %4191 = vmatpush.bf16.msra.mxu3 %v10992_v14  ;;  %4322 = vmatpush.bf16.msra.mxu1 %v11006_v43 }
 0x885   :  { %v3897_v20 = vpop.f32.mrf.mxu2  ;;  %v3856_v23 = vadd.f32 %v3855_v18, %v3842_v19  ;;  %v11000_v18 = vld [vmem:[%s13046_s11 + $0x70] sm:$0xff]  ;;  %v10998_v19 = vld [vmem:[%s13046_s11 + $0x60] sm:$0xff] }
 0x887   :  { %v3870_v21 = vadd.f32 %v3869_v2, %v3856_v23  ;;  %v10991_v2 = vld [vmem:[%s13046_s11 + $0x28] sm:$0xff]  ;;  %v11005_v23 = vld [vmem:[%s13046_s11 + $0x98] sm:$0xff] }
 0x888   :  { %4192 = vmatpush.bf16.msra.mxu3 %v10991_v2  ;;  %4323 = vmatpush.bf16.msra.mxu1 %v11005_v23 }
 0x889   :  { %v3884_v32 = vadd.f32 %v3883_v7, %v3870_v21  ;;  %v10990_v7 = vld [vmem:[%s13046_s11 + $0x20] sm:$0xff] }
 0x88a   :  { %v3925_v29 = vpop.f32.mrf.mxu0 }
 0x88b   :  { %v3898_v28 = vadd.f32 %v3897_v20, %v3884_v32  ;;  %v10999_v20 = vld [vmem:[%s13046_s11 + $0x68] sm:$0xff]  ;;  %v11004_v32 = vld [vmem:[%s13046_s11 + $0x90] sm:$0xff] }
 0x88c   :  { %v3857_v37 = vpop.f32.mrf.mxu3  ;;  %v3939_v41 = vpop.f32.mrf.mxu1  ;;  %4193 = vmatpush.bf16.msra.mxu3 %v10990_v7  ;;  %4324 = vmatpush.bf16.msra.mxu1 %v11004_v32 }
 0x88d   :  { %v3899_v35 = vpop.f32.mrf.mxu2  ;;  %v3858_v47 = vadd.f32 %v3857_v37, %v3844_v31  ;;  %v10997_v37 = vld [vmem:[%s13046_s11 + $0x58] sm:$0xff]  ;;  %v10996_v31 = vld [vmem:[%s13046_s11 + $0x50] sm:$0xff] }
 0x88f   :  { %v3872_v57 = vadd.f32 %v3871_v34, %v3858_v47  ;;  %v10988_v34 = vld [vmem:[%s13046_s11 + $0x10] sm:$0xff] }
 0x890   :  { %4194 = vmatpush.bf16.msra.mxu3 %v10989_v36 }
 0x891   :  { %v3886_v24 = vadd.f32 %v3885_v27, %v3872_v57  ;;  %v4067_v27 = vld [vmem:[%s13069_s1] sm:$0x1] }
 0x892   :  { %v3927_v44 = vpop.f32.mrf.mxu0 }
 0x893   :  { %v3900_v54 = vadd.f32 %v3899_v35, %v3886_v24  ;;  %v4133_v35 = vpack.c.bf16 %v4067_v27, %v4067_v27  ;;  %v10995_v24 = vld [vmem:[%s13046_s11 + $0x48] sm:$0xff] }
 0x894   :  { %v3941_v1 = vpop.f32.mrf.mxu1  ;;  %4195 = vmatpush.bf16.msra.mxu3 %v10988_v34 }
 0x895   :  { %v4136_v21 = vunpack.c.l.b16 %v4133_v35 }
 0x896   :  { %v3911_v33 = vpop.f32.mrf.mxu3 }
 0x897   :  { %v3912_v40 = vadd.f32 %v3911_v33, %v3898_v28  ;;  %v4137_v33 = vrot.slane %v4136_v21, 7 }
 0x898   :  { %v3953_v46 = vpop.f32.mrf.mxu2  ;;  %4196 = vmatpush.bf16.msra.mxu3 %v10987_v38 }
 0x899   :  { %v3926_v48 = vadd.f32 %v3925_v29, %v3912_v40  ;;  %v10986_v29 = vld [vmem:[%s13046_s11] sm:$0xff]  ;;  %v4139_v57 = vsel %vm4138_vm7, %v4137_v33, %v4136_v21 }
 0x89b   :  { %v3940_v42 = vadd.f32 %v3939_v41, %v3926_v48  ;;  %v11003_v48 = vld [vmem:[%s13046_s11 + $0x88] sm:$0xff] }
 0x89c   :  { %4197 = vmatpush.bf16.msra.mxu3 %v10986_v29  ;;  %4325 = vmatpush.bf16.msra.mxu1 %v11003_v48 }
 0x89d   :  { %v3954_v51 = vadd.f32 %v3953_v46, %v3940_v42 }
 0x89e   :  { %v3913_v56 = vpop.f32.mrf.mxu3 }
 0x89f   :  { %v3914_v50 = vadd.f32 %v3913_v56, %v3900_v54  ;;  %v10994_v54 = vld [vmem:[%s13046_s11 + $0x40] sm:$0xff] }
 0x8a0   :  { %v3955_v58 = vpop.f32.mrf.mxu2 }
 0x8a1   :  { %v3928_v25 = vadd.f32 %v3927_v44, %v3914_v50  ;;  %v4140_v44 = vpack.c.b16 %v4139_v57, %v4139_v57 }
 0x8a3   :  { %v3942_v0 = vadd.f32 %v3941_v1, %v3928_v25  ;;  %v11002_v1 = vld [vmem:[%s13046_s11 + $0x80] sm:$0xff]  ;;  %4198 = vmatmul.bf16.vlgmr.msra.gmra.mxu3 %v4140_v44 }
 0x8a4   :  { %4326 = vmatpush.bf16.msra.mxu1 %v11002_v1 }
 0x8a5   :  { %v3956_v5 = vadd.f32 %v3955_v58, %v3942_v0 }
 0x8a9   :  { %v3981_v49 = vpop.f32.mrf.mxu0 }
 0x8aa   :  { %v3995_v63 = vpop.f32.mrf.mxu1 }
 0x8b1   :  { %v3983_v10 = vpop.f32.mrf.mxu0 }
 0x8b2   :  { %v3997_v17 = vpop.f32.mrf.mxu1 }
 0x8b5   :  { %v3967_v59 = vpop.f32.mrf.mxu3 }
 0x8b6   :  { %v3968_v62 = vadd.f32 %v3967_v59, %v3954_v51 }
 0x8b7   :  { %v4009_v22 = vpop.f32.mrf.mxu2 }
 0x8b8   :  { %v3982_v3 = vadd.f32 %v3981_v49, %v3968_v62 }
 0x8ba   :  { %v3996_v60 = vadd.f32 %v3995_v63, %v3982_v3 }
 0x8bc   :  { %v4010_v6 = vadd.f32 %v4009_v22, %v3996_v60 }
 0x8bd   :  { %v3969_v8 = vpop.f32.mrf.mxu3 }
 0x8be   :  { %v12438_v9 = vadd.f32 %v4010_v6, %v12387_v39  ;;  %v3970_v52 = vadd.f32 %v3969_v8, %v3956_v5 }
 0x8bf   :  { %v4011_v55 = vpop.f32.mrf.mxu2 }
 0x8c0   :  { %v3984_v61 = vadd.f32 %v3983_v10, %v3970_v52  ;;  %4016 = vadd.xlane.f32.xlu1 %v12438_v9  ;;  %v4020_v53 = vmul.f32 %v12438_v9, %v12438_v9 }
 0x8c2   :  { %v3998_v11 = vadd.f32 %v3997_v17, %v3984_v61  ;;  %4022 = vadd.xlane.f32.xlu0 %v4020_v53 }
 0x8c4   :  { %v4012_v4 = vadd.f32 %v4011_v55, %v3998_v11  ;;  %v11458_v11 = vld [vmem:[#allocation7] sm:$0xf] }
 0x8c5   :  { %v4060_v55 = vperm.slane %v11458_v11, 2  ;;  %v4063_v2 = vperm.slane %v11458_v11, 3 }
 0x8c6   :  { %v12444_v45 = vadd.f32 %v4012_v4, %v12389_v26  ;;  %v11001_v26 = vld [vmem:[%s13046_s11 + $0x78] sm:$0xff] }
 0x8c7   :  { %4256 = vmatpush.bf16.msra.mxu0 %v11001_v26 }
 0x8c8   :  { %4018 = vadd.xlane.f32.xlu2 %v12444_v45  ;;  %v4021_v39 = vmul.f32 %v12444_v45, %v12444_v45 }
 0x8ca   :  { %4024 = vadd.xlane.f32.xlu1 %v4021_v39 }
 0x8cb   :  { %4257 = vmatpush.bf16.msra.mxu0 %v11000_v18 }
 0x8cf   :  { %4258 = vmatpush.bf16.msra.mxu0 %v10999_v20 }
 0x8d3   :  { %4259 = vmatpush.bf16.msra.mxu0 %v10998_v19 }
 0x8d7   :  { %4260 = vmatpush.bf16.msra.mxu0 %v10997_v37 }
 0x8db   :  { %4261 = vmatpush.bf16.msra.mxu0 %v10996_v31 }
 0x8df   :  { %4262 = vmatpush.bf16.msra.mxu0 %v10995_v24 }
 0x8e3   :  { %4263 = vmatpush.bf16.msra.mxu0 %v10994_v54 }
 0x926   :  { %v4199_v21 = vpop.f32.mrf.mxu3 }
 0x92e   :  { %v4201_v32 = vpop.f32.mrf.mxu3 }
 0x933   :  { %v4017_v47 = vpop.xlane.xlu1 %4016 }
 0x934   :  { %v4026_v41 = vmul.f32 0.009259259, %v4017_v47  ;;  %v4132_v47 = vld [vmem:[#allocation13] sm:$0xf] }
 0x935   :  { %v4023_v28 = vpop.xlane.xlu0 %4022  ;;  %v4134_v29 = vperm.slane %v4132_v47, 0  ;;  %v4207_v33 = vperm.slane %v4132_v47, 1 }
 0x936   :  { %v4030_v46 = vmul.f32 %v4026_v41, %v4026_v41  ;;  %v4028_v40 = vmul.f32 0.009259259, %v4023_v28  ;;  %v4034_v53 = vsub.f32 %v12438_v9, %v4026_v41  ;;  %v4453_v9 = vld [vmem:[#allocation1 + $0x1] ss:$9 sm:$0xff]  ;;  %v4270_v41 = vperm.slane %v4132_v47, 2 }
 0x937   :  { %4454 = vst [vmem:[#allocation1] sm:$0xff] %v12075_v30  ;;  %v12550_v28 = vadd.f32 %v4199_v21, %v4134_v29 }
 0x938   :  { %v4032_v56 = vsub.f32 %v4028_v40, %v4030_v46 }
 0x939   :  { %v4333_v48 = vmul.f32 %v12550_v28, %v12075_v30  ;;  %v4204_v44 = vrot.slane %v12550_v28, 1 }
 0x93a   :  { %v4036_v42 = vadd.f32 1e-05, %v4032_v56 }
 0x93b   :  { %v4019_v50 = vpop.xlane.xlu2 %4018 }
 0x93c   :  { %11373 = vrsqrt.f32 %v4036_v42  ;;  %v4027_v58 = vmul.f32 0.009259259, %v4019_v50  ;;  %vm4044_vm9 = vweird.f32 %v4036_v42  ;;  %v4334_v50 = vmul.f32 %v4204_v44, %v12075_v30 }
 0x93d   :  { %v4025_v51 = vpop.xlane.xlu1 %4024 }
 0x93e   :  { %v4031_v25 = vmul.f32 %v4027_v58, %v4027_v58  ;;  %v4029_v49 = vmul.f32 0.009259259, %v4025_v51  ;;  %v4035_v12 = vsub.f32 %v12444_v45, %v4027_v58  ;;  %v4455_v15 = vld [vmem:[#allocation1 + $0x1] ss:$9 sm:$0xff]  ;;  %v4458_v58 = vmul.f32 %v4453_v9, %v12550_v28 }
 0x93f   :  { %4586 = vst [vmem:[#allocation1] sm:$0xff] %v12075_v30  ;;  %v4459_v51 = vmul.f32 %v4455_v15, %v4204_v44 }
 0x940   :  { %v4033_v59 = vsub.f32 %v4029_v49, %v4031_v25 }
 0x942   :  { %v11374_v62 = vpop.eup %11373  ;;  %v4037_v63 = vadd.f32 1e-05, %v4033_v59 }
 0x943   :  { %v4039_v0 = vmul.f32 %v11374_v62, %v4036_v42  ;;  %vm4045_vm8 = vweird.f32 %v11374_v62 }
 0x944   :  { %11375 = vrsqrt.f32 %v4037_v63  ;;  %vm4046_vm10 = vmor %vm4044_vm9, %vm4045_vm8  ;;  %vm4054_vm12 = vweird.f32 %v4037_v63  ;;  %vm6962_vm8 = vcmask 1041408   ;;  %vm6980_vm9 = vcmask 1043459  }
 0x945   :  { %v4040_v3 = vmul.f32 %v11374_v62, %v4039_v0 }
 0x946   :  { %v4588_v36 = vld [vmem:[#allocation1 + $0x2] ss:$9 sm:$0xff] }
 0x947   :  { %v4041_v22 = vmul.f32 0.5, %v4040_v3  ;;  %4589 = vst [vmem:[#allocation1] sm:$0xff] %v12075_v30  ;;  %v4593_v25 = vmul.f32 %v4588_v36, %v12550_v28 }
 0x949   :  { %v4042_v60 = vsub.f32 1.5, %v4041_v22 }
 0x94a   :  { %v11376_v5 = vpop.eup %11375 }
 0x94b   :  { %v4043_v6 = vmul.f32 %v11374_v62, %v4042_v60  ;;  %v4049_v8 = vmul.f32 %v11376_v5, %v4037_v63  ;;  %vm4055_vm11 = vweird.f32 %v11376_v5 }
 0x94c   :  { %vm4056_vm13 = vmor %vm4054_vm12, %vm4055_vm11  ;;  %vm6964_vm11 = vcmask 1044484   ;;  %vm6984_vm12 = vcmask 1045509  }
 0x94d   :  { %v4050_v52 = vmul.f32 %v11376_v5, %v4049_v8  ;;  %v4047_v10 = vsel %vm4046_vm10, %v11374_v62, %v4043_v6  ;;  %v12579_v8 = vld [vmem:[%s13068_s0 + $0x8] sm:$0x1]  ;;  %vm6982_vm10 = vcmask 1042433  }
 0x94e   :  { %v4058_v4 = vmul.f32 %v4047_v10, %v4034_v53  ;;  %v4590_v45 = vld [vmem:[#allocation1 + $0x2] ss:$9 sm:$0xff]  ;;  %v5397_v53 = vmul.f32 %v4204_v44, %v12579_v8 }
 0x94f   :  { %v4051_v61 = vmul.f32 0.5, %v4050_v52  ;;  %4721 = vst [vmem:[#allocation1] sm:$0xff] %v12075_v30  ;;  %v4594_v49 = vmul.f32 %v4590_v45, %v4204_v44 }
 0x950   :  { %v4061_v26 = vmul.f32 %v4060_v55, %v4058_v4 }
 0x951   :  { %v4052_v17 = vsub.f32 1.5, %v4051_v61  ;;  %v5396_v61 = vmul.f32 %v12550_v28, %v12579_v8 }
 0x952   :  { %v4064_v13 = vadd.f32 %v4063_v2, %v4061_v26 }
 0x953   :  { %v4053_v39 = vmul.f32 %v11376_v5, %v4052_v17 }
 0x955   :  { %v4057_v14 = vsel %vm4056_vm13, %v11376_v5, %v4053_v39  ;;  %vm6966_vm13 = vcmask 1046534  }
 0x956   :  { %v4059_v16 = vmul.f32 %v4057_v14, %v4035_v12  ;;  %v4723_v19 = vld [vmem:[#allocation1 + $0x3] ss:$9 sm:$0xff] }
 0x957   :  { %4724 = vst [vmem:[#allocation1] sm:$0xff] %v12075_v30  ;;  %v4728_v59 = vmul.f32 %v4723_v19, %v12550_v28 }
 0x958   :  { %v4062_v18 = vmul.f32 %v4060_v55, %v4059_v16 }
 0x95a   :  { %v4065_v7 = vadd.f32 %v4063_v2, %v4062_v18 }
 0x95c   :  { %v4206_v20 = vpack.c.bf16 %v4065_v7, %v4064_v13 }
 0x95e   :  { %4264 = vmatmul.bf16.vlgmr.msra.gmra.mxu0 %v4206_v20  ;;  %4327 = vmatmul.bf16.vlgmr.msra.gmra.mxu1 %v4206_v20  ;;  %v4725_v43 = vld [vmem:[#allocation1 + $0x3] ss:$9 sm:$0xff] }
 0x95f   :  { %4856 = vst [vmem:[#allocation1] sm:$0xff] %v12075_v30  ;;  %v4729_v62 = vmul.f32 %v4725_v43, %v4204_v44 }
 0x966   :  { %v4858_v34 = vld [vmem:[#allocation1 + $0x4] ss:$9 sm:$0xff] }
 0x967   :  { %4859 = vst [vmem:[#allocation1] sm:$0xff] %v12075_v30  ;;  %v4863_v63 = vmul.f32 %v4858_v34, %v12550_v28 }
 0x96e   :  { %v12534_v37 = vld [vmem:[#allocation1 + $0x4] ss:$9 sm:$0xff] }
 0x96f   :  { %4991 = vst [vmem:[#allocation1] sm:$0xff] %v12075_v30  ;;  %v4864_v0 = vmul.f32 %v12534_v37, %v4204_v44 }
 0x976   :  { %v4993_v23 = vld [vmem:[#allocation1 + $0x5] ss:$9 sm:$0xff] }
 0x977   :  { %4994 = vst [vmem:[#allocation1] sm:$0xff] %v12075_v30  ;;  %v4998_v3 = vmul.f32 %v4993_v23, %v12550_v28 }
 0x97e   :  { %v12538_v27 = vld [vmem:[#allocation1 + $0x5] ss:$9 sm:$0xff] }
 0x97f   :  { %5126 = vst [vmem:[#allocation1] sm:$0xff] %v12075_v30  ;;  %v4999_v22 = vmul.f32 %v12538_v27, %v4204_v44 }
 0x986   :  { %v12541_v38 = vld [vmem:[#allocation1 + $0x6] ss:$9 sm:$0xff] }
 0x987   :  { %5129 = vst [vmem:[#allocation1] sm:$0xff] %v12075_v30  ;;  %v5133_v60 = vmul.f32 %v12541_v38, %v12550_v28 }
 0x98e   :  { %v12544_v35 = vld [vmem:[#allocation1 + $0x6] ss:$9 sm:$0xff] }
 0x98f   :  { %5261 = vst [vmem:[#allocation1] sm:$0xff] %v12075_v30  ;;  %v5134_v5 = vmul.f32 %v12544_v35, %v4204_v44 }
 0x996   :  { %v12547_v31 = vld [vmem:[#allocation1 + $0x7] ss:$9 sm:$0xff] }
 0x997   :  { %5264 = vst [vmem:[#allocation1] sm:$0xff] %v12075_v30  ;;  %v5268_v6 = vmul.f32 %v12547_v31, %v12550_v28 }
 0x99e   :  { %v5265_v52 = vld [vmem:[#allocation1 + $0x7] ss:$9 sm:$0xff] }
 0x99f   :  { %v5269_v10 = vmul.f32 %v5265_v52, %v4204_v44 }
 0x9db   :  { %v4265_v57 = vpop.f32.mrf.mxu0  ;;  %v4328_v46 = vpop.f32.mrf.mxu1 }
 0x9dc   :  { %v4266_v40 = vadd.f32 %v4265_v57, %v4207_v33  ;;  %v12552_v24 = vadd.f32 %v4328_v46, %v4270_v41 }
 0x9de   :  { %4350 = vmatpush.xpose.msra.mxu2 %v4266_v40  ;;  %4418 = vmatpush.msrb.mxu0 %v12552_v24 }
 0x9e0   :  { %4542 = vmatpush.msra.mxu0 %v12552_v24 }
 0x9e1   :  { %4351 = vmatmul.f32.vlgmr.msra.gmra.mxu2 %v4333_v48 }
 0x9e2   :  { %4475 = vmatpush.xpose.msrb.mxu2 %v4266_v40 }
 0x9e3   :  { %v4267_v56 = vpop.f32.mrf.mxu0  ;;  %v4330_v54 = vpop.f32.mrf.mxu1 }
 0x9e4   :  { %v4268_v1 = vadd.f32 %v4267_v56, %v4207_v33  ;;  %v12559_v42 = vadd.f32 %v4330_v54, %v4270_v41 }
 0x9e6   :  { %4610 = vmatpush.xpose.msra.mxu2 %v4266_v40  ;;  %4370 = vmatpush.xpose.msrb.mxu3 %v4268_v1 }
 0x9e7   :  { %4441 = vmatpush.msrb.mxu1 %v12559_v42 }
 0x9e9   :  { %4565 = vmatpush.msra.mxu1 %v12559_v42  ;;  %4371 = vmatmul.f32.vlgmr.msrb.gmra.mxu3 %v4334_v50 }
 0x9ea   :  { %4495 = vmatpush.xpose.msra.mxu3 %v4268_v1  ;;  %4476 = vmatmul.f32.vlgmr.msrb.gmra.mxu2 %v4458_v58 }
 0x9eb   :  { %4745 = vmatpush.xpose.msrb.mxu2 %v4266_v40 }
 0x9ee   :  { %4630 = vmatpush.xpose.msrb.mxu3 %v4268_v1 }
 0x9f1   :  { %4496 = vmatmul.f32.vlgmr.msra.gmra.mxu3 %v4459_v51 }
 0x9f2   :  { %4611 = vmatmul.f32.vlgmr.msra.gmra.mxu2 %v4593_v25  ;;  %4765 = vmatpush.xpose.msra.mxu3 %v4268_v1 }
 0x9f3   :  { %4880 = vmatpush.xpose.msra.mxu2 %v4266_v40 }
 0x9f9   :  { %4631 = vmatmul.f32.vlgmr.msrb.gmra.mxu3 %v4594_v49 }
 0x9fa   :  { %4746 = vmatmul.f32.vlgmr.msrb.gmra.mxu2 %v4728_v59  ;;  %4900 = vmatpush.xpose.msrb.mxu3 %v4268_v1 }
 0x9fb   :  { %5015 = vmatpush.xpose.msrb.mxu2 %v4266_v40 }
 0xa01   :  { %4766 = vmatmul.f32.vlgmr.msra.gmra.mxu3 %v4729_v62 }
 0xa02   :  { %4881 = vmatmul.f32.vlgmr.msra.gmra.mxu2 %v4863_v63  ;;  %5035 = vmatpush.xpose.msra.mxu3 %v4268_v1 }
 0xa03   :  { %5150 = vmatpush.xpose.msra.mxu2 %v4266_v40 }
 0xa09   :  { %4901 = vmatmul.f32.vlgmr.msrb.gmra.mxu3 %v4864_v0 }
 0xa0a   :  { %5016 = vmatmul.f32.vlgmr.msrb.gmra.mxu2 %v4998_v3  ;;  %5170 = vmatpush.xpose.msrb.mxu3 %v4268_v1 }
 0xa0b   :  { %5285 = vmatpush.xpose.msrb.mxu2 %v4266_v40 }
 0xa11   :  { %5036 = vmatmul.f32.vlgmr.msra.gmra.mxu3 %v4999_v22 }
 0xa12   :  { %5151 = vmatmul.f32.vlgmr.msra.gmra.mxu2 %v5133_v60  ;;  %5305 = vmatpush.xpose.msra.mxu3 %v4268_v1 }
 0xa13   :  { %5413 = vmatpush.xpose.msra.mxu2 %v4266_v40 }
 0xa19   :  { %5171 = vmatmul.f32.vlgmr.msrb.gmra.mxu3 %v5134_v5 }
 0xa1a   :  { %5286 = vmatmul.f32.vlgmr.msrb.gmra.mxu2 %v5268_v6  ;;  %5433 = vmatpush.xpose.msrb.mxu3 %v4268_v1 }
 0xa21   :  { %5306 = vmatmul.f32.vlgmr.msra.gmra.mxu3 %v5269_v10 }
 0xa22   :  { %5414 = vmatmul.f32.vlgmr.msra.gmra.mxu2 %v5396_v61 }
 0xa29   :  { %5434 = vmatmul.f32.vlgmr.msrb.gmra.mxu3 %v5397_v53 }
 0xa64   :  { %v4352_v17 = vpop.f32.mrf.mxu2 }
 0xa65   :  { %v4375_v11 = vmul.f32 0.28867513, %v4352_v17 }
 0xa67   :  { %v4378_v55 = vsel %vm4377_vm14, %v4375_v11, -inf }
 0xa68   :  { %4379 = vmax.xlane.f32.xlu0 %v4378_v55 }
 0xa6c   :  { %v4372_v4 = vpop.f32.mrf.mxu3 }
 0xa6d   :  { %v4477_v39 = vpop.f32.mrf.mxu2  ;;  %v4376_v12 = vmul.f32 0.28867513, %v4372_v4 }
 0xa6e   :  { %v12586_v26 = vmul.f32 0.28867513, %v4477_v39 }
 0xa6f   :  { %v4381_v14 = vsel %vm4377_vm14, %v4376_v12, -inf }
 0xa70   :  { %4382 = vmax.xlane.f32.xlu2 %v4381_v14  ;;  %v4502_v7 = vsel %vm4377_vm14, %v12586_v26, -inf }
 0xa74   :  { %v4497_v16 = vpop.f32.mrf.mxu3 }
 0xa75   :  { %v4612_v2 = vpop.f32.mrf.mxu2  ;;  %v12588_v18 = vmul.f32 0.28867513, %v4497_v16 }
 0xa76   :  { %v12594_v20 = vmul.f32 0.28867513, %v4612_v2 }
 0xa77   :  { %v4505_v13 = vsel %vm4377_vm14, %v12588_v18, -inf }
 0xa78   :  { %4506 = vmax.xlane.f32.xlu1 %v4505_v13  ;;  %4503 = vmax.xlane.f32.xlu2 %v4502_v7  ;;  %v4637_v45 = vsel %vm4377_vm14, %v12594_v20, -inf }
 0xa7c   :  { %v4632_v9 = vpop.f32.mrf.mxu3 }
 0xa7d   :  { %v4747_v15 = vpop.f32.mrf.mxu2  ;;  %v12596_v36 = vmul.f32 0.28867513, %v4632_v9 }
 0xa7e   :  { %v12602_v43 = vmul.f32 0.28867513, %v4747_v15 }
 0xa7f   :  { %v4640_v19 = vsel %vm4377_vm14, %v12596_v36, -inf }
 0xa80   :  { %4638 = vmax.xlane.f32.xlu1 %v4637_v45  ;;  %4641 = vmax.xlane.f32.xlu0 %v4640_v19  ;;  %v4772_v38 = vsel %vm4377_vm14, %v12602_v43, -inf }
 0xa84   :  { %v4767_v34 = vpop.f32.mrf.mxu3 }
 0xa85   :  { %v4882_v37 = vpop.f32.mrf.mxu2  ;;  %v12604_v23 = vmul.f32 0.28867513, %v4767_v34 }
 0xa86   :  { %v12610_v35 = vmul.f32 0.28867513, %v4882_v37 }
 0xa87   :  { %v4775_v27 = vsel %vm4377_vm14, %v12604_v23, -inf }
 0xa88   :  { %4776 = vmax.xlane.f32.xlu2 %v4775_v27  ;;  %4773 = vmax.xlane.f32.xlu0 %v4772_v38  ;;  %v4907_v29 = vsel %vm4377_vm14, %v12610_v35, -inf }
 0xa8c   :  { %v4902_v21 = vpop.f32.mrf.mxu3 }
 0xa8d   :  { %v12612_v31 = vmul.f32 0.28867513, %v4902_v21  ;;  %v5017_v32 = vpop.f32.mrf.mxu2 }
 0xa8e   :  { %v12618_v33 = vmul.f32 0.28867513, %v5017_v32 }
 0xa8f   :  { %v4910_v47 = vsel %vm4377_vm14, %v12612_v31, -inf }
 0xa90   :  { %4911 = vmax.xlane.f32.xlu1 %v4910_v47  ;;  %4908 = vmax.xlane.f32.xlu2 %v4907_v29  ;;  %v5042_v57 = vsel %vm4377_vm14, %v12618_v33, -inf }
 0xa94   :  { %v5037_v41 = vpop.f32.mrf.mxu3 }
 0xa95   :  { %v12620_v28 = vmul.f32 0.28867513, %v5037_v41  ;;  %v5152_v40 = vpop.f32.mrf.mxu2 }
 0xa96   :  { %v12626_v48 = vmul.f32 0.28867513, %v5152_v40 }
 0xa97   :  { %v5045_v46 = vsel %vm4377_vm14, %v12620_v28, -inf }
 0xa98   :  { %5043 = vmax.xlane.f32.xlu1 %v5042_v57  ;;  %5046 = vmax.xlane.f32.xlu0 %v5045_v46  ;;  %v5177_v1 = vsel %vm4377_vm14, %v12626_v48, -inf }
 0xa9c   :  { %v5172_v44 = vpop.f32.mrf.mxu3 }
 0xa9d   :  { %v12628_v56 = vmul.f32 0.28867513, %v5172_v44  ;;  %v5287_v61 = vpop.f32.mrf.mxu2 }
 0xa9e   :  { %v12648_v55 = vmul.f32 0.28867513, %v5287_v61 }
 0xa9f   :  { %v5180_v54 = vsel %vm4377_vm14, %v12628_v56, -inf }
 0xaa0   :  { %5181 = vmax.xlane.f32.xlu2 %v5180_v54  ;;  %5178 = vmax.xlane.f32.xlu0 %v5177_v1 }
 0xaa4   :  { %v5307_v50 = vpop.f32.mrf.mxu3 }
 0xaa5   :  { %v12634_v58 = vmul.f32 0.28867513, %v5307_v50  ;;  %v5415_v7 = vpop.f32.mrf.mxu2 }
 0xaa7   :  { %v5315_v51 = vsel %vm4377_vm14, %v12634_v58, -inf }
 0xaa8   :  { %5316 = vmax.xlane.f32.xlu0 %v5315_v51 }
 0xaac   :  { %v5435_v9 = vpop.f32.mrf.mxu3 }
 0xaad   :  { %v12664_v45 = vmul.f32 0.28867513, %v5435_v9 }
 0xaaf   :  { %v5443_v47 = vsel %vm4377_vm14, %v12664_v45, -inf }
 0xadb   :  { %v4380_v25 = vpop.xlane.xlu0 %4379 }
 0xadc   :  { %v4384_v49 = vsub.f32 %v4375_v11, %v4380_v25 }
 0xade   :  { %v4386_v59 = vmul.f32 1.442695, %v4384_v49 }
 0xae0   :  { %11377 = vpow2.f32 %v4386_v59 }
 0xae3   :  { %v4383_v62 = vpop.xlane.xlu2 %4382 }
 0xae4   :  { %v4385_v63 = vsub.f32 %v4376_v12, %v4383_v62 }
 0xae6   :  { %v12638_v0 = vpop.eup %11377  ;;  %v4388_v3 = vmul.f32 1.442695, %v4385_v63 }
 0xae7   :  { %v4390_v22 = vsel %vm4377_vm14, %v12638_v0, 0.0 }
 0xae8   :  { %11379 = vpow2.f32 %v4388_v3  ;;  %4391 = vadd.xlane.f32.xlu2 %v4390_v22 }
 0xaeb   :  { %v4507_v60 = vpop.xlane.xlu1 %4506  ;;  %v4504_v5 = vpop.xlane.xlu2 %4503 }
 0xaec   :  { %v4509_v6 = vsub.f32 %v12588_v18, %v4507_v60  ;;  %v4508_v52 = vsub.f32 %v12586_v26, %v4504_v5  ;;  %v5312_v18 = vsel %vm4377_vm14, %v12648_v55, -inf }
 0xaee   :  { %v12644_v10 = vpop.eup %11379  ;;  %v4512_v53 = vmul.f32 1.442695, %v4509_v6  ;;  %v4510_v17 = vmul.f32 1.442695, %v4508_v52 }
 0xaef   :  { %v4393_v11 = vsel %vm4377_vm14, %v12644_v10, 0.0 }
 0xaf0   :  { %11381 = vpow2.f32 %v4512_v53  ;;  %4394 = vadd.xlane.f32.xlu1 %v4393_v11 }
 0xaf1   :  { %11383 = vpow2.f32 %v4510_v17 }
 0xaf3   :  { %v4639_v4 = vpop.xlane.xlu1 %4638  ;;  %v4642_v39 = vpop.xlane.xlu0 %4641 }
 0xaf4   :  { %v4644_v12 = vsub.f32 %v12596_v36, %v4642_v39  ;;  %v4643_v26 = vsub.f32 %v12594_v20, %v4639_v4  ;;  %v12662_v20 = vmul.f32 0.28867513, %v5415_v7 }
 0xaf6   :  { %v12651_v14 = vpop.eup %11381  ;;  %v4647_v16 = vmul.f32 1.442695, %v4644_v12  ;;  %v4645_v36 = vmul.f32 1.442695, %v4643_v26  ;;  %v5440_v29 = vsel %vm4377_vm14, %v12662_v20, -inf }
 0xaf7   :  { %v12654_v2 = vpop.eup %11383  ;;  %v4517_v13 = vsel %vm4377_vm14, %v12651_v14, 0.0 }
 0xaf8   :  { %5313 = vmax.xlane.f32.xlu1 %v5312_v18  ;;  %v4514_v15 = vsel %vm4377_vm14, %v12654_v2, 0.0  ;;  %4518 = vadd.xlane.f32.xlu2 %v4517_v13  ;;  %11385 = vpow2.f32 %v4647_v16 }
 0xaf9   :  { %4515 = vadd.xlane.f32.xlu0 %v4514_v15  ;;  %11387 = vpow2.f32 %v4645_v36 }
 0xafb   :  { %v4777_v19 = vpop.xlane.xlu2 %4776  ;;  %v4774_v34 = vpop.xlane.xlu0 %4773 }
 0xafc   :  { %v4779_v37 = vsub.f32 %v12604_v23, %v4777_v19  ;;  %v4778_v27 = vsub.f32 %v12602_v43, %v4774_v34 }
 0xafe   :  { %v4782_v38 = vmul.f32 1.442695, %v4779_v37  ;;  %v4780_v21 = vmul.f32 1.442695, %v4778_v27  ;;  %v12668_v32 = vpop.eup %11385 }
 0xaff   :  { %v4652_v41 = vsel %vm4377_vm14, %v12668_v32, 0.0  ;;  %v12676_v57 = vpop.eup %11387 }
 0xb00   :  { %11389 = vpow2.f32 %v4782_v38  ;;  %5444 = vmax.xlane.f32.xlu1 %v5443_v47  ;;  %5441 = vmax.xlane.f32.xlu2 %v5440_v29  ;;  %v4649_v51 = vsel %vm4377_vm14, %v12676_v57, 0.0 }
 0xb01   :  { %11391 = vpow2.f32 %v4780_v21  ;;  %4653 = vadd.xlane.f32.xlu0 %v4652_v41 }
 0xb03   :  { %v4912_v43 = vpop.xlane.xlu1 %4911  ;;  %v4909_v23 = vpop.xlane.xlu2 %4908 }
 0xb04   :  { %v4914_v46 = vsub.f32 %v12612_v31, %v4912_v43  ;;  %v4913_v40 = vsub.f32 %v12610_v35, %v4909_v23 }
 0xb06   :  { %v12680_v44 = vpop.eup %11389  ;;  %v4917_v54 = vmul.f32 1.442695, %v4914_v46  ;;  %v4915_v1 = vmul.f32 1.442695, %v4913_v40 }
 0xb07   :  { %v12682_v50 = vpop.eup %11391  ;;  %v4787_v25 = vsel %vm4377_vm14, %v12680_v44, 0.0 }
 0xb08   :  { %11393 = vpow2.f32 %v4917_v54  ;;  %4650 = vadd.xlane.f32.xlu1 %v4649_v51  ;;  %4788 = vadd.xlane.f32.xlu2 %v4787_v25  ;;  %v4784_v31 = vsel %vm4377_vm14, %v12682_v50, 0.0 }
 0xb09   :  { %11395 = vpow2.f32 %v4915_v1  ;;  %4785 = vadd.xlane.f32.xlu0 %v4784_v31 }
 0xb0b   :  { %v5044_v35 = vpop.xlane.xlu1 %5043  ;;  %v5047_v49 = vpop.xlane.xlu0 %5046 }
 0xb0c   :  { %v5048_v59 = vsub.f32 %v12618_v33, %v5044_v35  ;;  %v5049_v62 = vsub.f32 %v12620_v28, %v5047_v49 }
 0xb0e   :  { %v12692_v63 = vpop.eup %11393  ;;  %v5050_v3 = vmul.f32 1.442695, %v5048_v59  ;;  %v5052_v22 = vmul.f32 1.442695, %v5049_v62 }
 0xb0f   :  { %v12694_v60 = vpop.eup %11395  ;;  %v4922_v5 = vsel %vm4377_vm14, %v12692_v63, 0.0 }
 0xb10   :  { %11397 = vpow2.f32 %v5050_v3  ;;  %4923 = vadd.xlane.f32.xlu1 %v4922_v5  ;;  %v4919_v6 = vsel %vm4377_vm14, %v12694_v60, 0.0 }
 0xb11   :  { %11399 = vpow2.f32 %v5052_v22  ;;  %4920 = vadd.xlane.f32.xlu2 %v4919_v6 }
 0xb13   :  { %v5182_v52 = vpop.xlane.xlu2 %5181  ;;  %v5179_v33 = vpop.xlane.xlu0 %5178 }
 0xb14   :  { %v5184_v28 = vsub.f32 %v12628_v56, %v5182_v52  ;;  %v5183_v61 = vsub.f32 %v12626_v48, %v5179_v33 }
 0xb16   :  { %v12702_v53 = vpop.eup %11397  ;;  %v5187_v17 = vmul.f32 1.442695, %v5184_v28  ;;  %v5185_v11 = vmul.f32 1.442695, %v5183_v61 }
 0xb17   :  { %v12704_v4 = vpop.eup %11399  ;;  %v5054_v39 = vsel %vm4377_vm14, %v12702_v53, 0.0 }
 0xb18   :  { %11401 = vpow2.f32 %v5187_v17  ;;  %5055 = vadd.xlane.f32.xlu1 %v5054_v39  ;;  %v5057_v12 = vsel %vm4377_vm14, %v12704_v4, 0.0 }
 0xb19   :  { %11403 = vpow2.f32 %v5185_v11  ;;  %5058 = vadd.xlane.f32.xlu0 %v5057_v12 }
 0xb1b   :  { %v5317_v26 = vpop.xlane.xlu0 %5316 }
 0xb1c   :  { %v5319_v56 = vsub.f32 %v12634_v58, %v5317_v26 }
 0xb1e   :  { %v12711_v48 = vpop.eup %11401  ;;  %v5322_v16 = vmul.f32 1.442695, %v5319_v56 }
 0xb1f   :  { %v12713_v18 = vpop.eup %11403  ;;  %v5192_v13 = vsel %vm4377_vm14, %v12711_v48, 0.0 }
 0xb20   :  { %11405 = vpow2.f32 %v5322_v16  ;;  %5193 = vadd.xlane.f32.xlu2 %v5192_v13  ;;  %v5189_v7 = vsel %vm4377_vm14, %v12713_v18, 0.0 }
 0xb21   :  { %5190 = vadd.xlane.f32.xlu0 %v5189_v7 }
 0xb26   :  { %v12719_v9 = vpop.eup %11405 }
 0xb27   :  { %v5327_v15 = vsel %vm4377_vm14, %v12719_v9, 0.0 }
 0xb28   :  { %5328 = vadd.xlane.f32.xlu1 %v5327_v15 }
 0xb5b   :  { %v4392_v58 = vpop.xlane.xlu2 %4391 }
 0xb5c   :  { %11407 = vrcp.f32 %v4392_v58 }
 0xb62   :  { %v11408_v36 = vpop.eup %11407 }
 0xb63   :  { %v4398_v19 = vmul.f32 %v11408_v36, %v12638_v0  ;;  %v4395_v34 = vpop.xlane.xlu1 %4394 }
 0xb64   :  { %11409 = vrcp.f32 %v4395_v34 }
 0xb65   :  { %9624 = vmatmul.msk.f32.vlgmr.msrb.gmra.mxu0 %vm560_vm0, %v4398_v19 }
 0xb66   :  { %4677 = vmatpush.msrb.mxu0 %v12552_v24 }
 0xb6a   :  { %v11410_v37 = vpop.eup %11409 }
 0xb6b   :  { %v4399_v27 = vmul.f32 %v11410_v37, %v12644_v10  ;;  %v5314_v38 = vpop.xlane.xlu1 %5313  ;;  %v4519_v21 = vpop.xlane.xlu2 %4518 }
 0xb6c   :  { %v5318_v47 = vsub.f32 %v12648_v55, %v5314_v38  ;;  %11411 = vrcp.f32 %v4519_v21  ;;  %v4516_v29 = vpop.xlane.xlu0 %4515 }
 0xb6d   :  { %11413 = vrcp.f32 %v4516_v29  ;;  %9625 = vmatmul.msk.f32.vlgmr.msrb.gmra.mxu1 %vm560_vm0, %v4399_v27  ;;  %v11015_v29 = vld [vmem:[%s13046_s11 + $0xe8] sm:$0xff] }
 0xb6e   :  { %v5320_v41 = vmul.f32 1.442695, %v5318_v47  ;;  %4700 = vmatpush.msrb.mxu1 %v12559_v42  ;;  %v11016_v47 = vld [vmem:[%s13046_s11 + $0xf0] sm:$0xff] }
 0xb70   :  { %11415 = vpow2.f32 %v5320_v41 }
 0xb72   :  { %v11412_v0 = vpop.eup %11411 }
 0xb73   :  { %v11414_v43 = vpop.eup %11413  ;;  %v4523_v23 = vmul.f32 %v11412_v0, %v12651_v14  ;;  %v5445_v46 = vpop.xlane.xlu1 %5444 }
 0xb74   :  { %v5442_v40 = vpop.xlane.xlu2 %5441  ;;  %v4522_v10 = vmul.f32 %v11414_v43, %v12654_v2  ;;  %v5447_v54 = vsub.f32 %v12664_v45, %v5445_v46  ;;  %v4654_v1 = vpop.xlane.xlu0 %4653 }
 0xb75   :  { %v5446_v55 = vsub.f32 %v12662_v20, %v5442_v40  ;;  %11417 = vrcp.f32 %v4654_v1  ;;  %9627 = vmatmul.msk.f32.vlgmr.msra.gmra.mxu1 %vm560_vm0, %v4523_v23  ;;  %v11014_v1 = vld [vmem:[%s13046_s11 + $0xe0] sm:$0xff] }
 0xb76   :  { %v12735_v51 = vpop.eup %11415  ;;  %v5450_v25 = vmul.f32 1.442695, %v5447_v54  ;;  %9626 = vmatmul.msk.f32.vlgmr.msra.gmra.mxu0 %vm560_vm0, %v4522_v10  ;;  %4835 = vmatpush.msra.mxu1 %v12559_v42 }
 0xb77   :  { %v5448_v31 = vmul.f32 1.442695, %v5446_v55  ;;  %4812 = vmatpush.msra.mxu0 %v12552_v24  ;;  %v5324_v14 = vsel %vm4377_vm14, %v12735_v51, 0.0 }
 0xb78   :  { %11419 = vpow2.f32 %v5450_v25  ;;  %5325 = vadd.xlane.f32.xlu2 %v5324_v14  ;;  %v11013_v25 = vld [vmem:[%s13046_s11 + $0xd8] sm:$0xff]  ;;  %v11012_v14 = vld [vmem:[%s13046_s11 + $0xd0] sm:$0xff] }
 0xb79   :  { %11421 = vpow2.f32 %v5448_v31 }
 0xb7b   :  { %v11418_v2 = vpop.eup %11417  ;;  %v4651_v20 = vpop.xlane.xlu1 %4650 }
 0xb7c   :  { %v4789_v45 = vpop.xlane.xlu2 %4788  ;;  %v4658_v35 = vmul.f32 %v11418_v2, %v12668_v32  ;;  %11423 = vrcp.f32 %v4651_v20  ;;  %v4786_v62 = vpop.xlane.xlu0 %4785  ;;  %v11011_v20 = vld [vmem:[%s13046_s11 + $0xc8] sm:$0xff] }
 0xb7d   :  { %11425 = vrcp.f32 %v4789_v45 }
 0xb7e   :  { %v12743_v49 = vpop.eup %11419  ;;  %9629 = vmatmul.msk.f32.vlgmr.msrb.gmra.mxu1 %vm560_vm0, %v4658_v35  ;;  %11427 = vrcp.f32 %v4786_v62  ;;  %v11010_v62 = vld [vmem:[%s13046_s11 + $0xc0] sm:$0xff] }
 0xb7f   :  { %v12746_v59 = vpop.eup %11421  ;;  %4970 = vmatpush.msrb.mxu1 %v12559_v42  ;;  %v5455_v3 = vsel %vm4377_vm14, %v12743_v49, 0.0 }
 0xb80   :  { %5456 = vadd.xlane.f32.xlu0 %v5455_v3  ;;  %v5452_v22 = vsel %vm4377_vm14, %v12746_v59, 0.0  ;;  %vm6968_vm14 = vcmask 1045508  }
 0xb81   :  { %5453 = vadd.xlane.f32.xlu1 %v5452_v22 }
 0xb82   :  { %v11424_v32 = vpop.eup %11423 }
 0xb83   :  { %v11426_v5 = vpop.eup %11425  ;;  %v4657_v6 = vmul.f32 %v11424_v32, %v12676_v57  ;;  %v4924_v52 = vpop.xlane.xlu1 %4923 }
 0xb84   :  { %v4793_v33 = vmul.f32 %v11426_v5, %v12680_v44  ;;  %11429 = vrcp.f32 %v4924_v52  ;;  %v4921_v28 = vpop.xlane.xlu2 %4920  ;;  %v11428_v61 = vpop.eup %11427 }
 0xb85   :  { %9628 = vmatmul.msk.f32.vlgmr.msrb.gmra.mxu0 %vm560_vm0, %v4657_v6  ;;  %11431 = vrcp.f32 %v4921_v28  ;;  %v4792_v11 = vmul.f32 %v11428_v61, %v12682_v50 }
 0xb86   :  { %9631 = vmatmul.msk.f32.vlgmr.msra.gmra.mxu1 %vm560_vm0, %v4793_v33  ;;  %4947 = vmatpush.msrb.mxu0 %v12552_v24 }
 0xb87   :  { %5105 = vmatpush.msra.mxu1 %v12559_v42 }
 0xb8a   :  { %v11430_v17 = vpop.eup %11429 }
 0xb8b   :  { %v4928_v57 = vmul.f32 %v11430_v17, %v12692_v63  ;;  %v5056_v44 = vpop.xlane.xlu1 %5055  ;;  %v11432_v12 = vpop.eup %11431 }
 0xb8c   :  { %v5059_v39 = vpop.xlane.xlu0 %5058  ;;  %v4927_v56 = vmul.f32 %v11432_v12, %v12694_v60 }
 0xb8d   :  { %11433 = vrcp.f32 %v5059_v39  ;;  %9630 = vmatmul.msk.f32.vlgmr.msra.gmra.mxu0 %vm560_vm0, %v4792_v11 }
 0xb8e   :  { %9633 = vmatmul.msk.f32.vlgmr.msrb.gmra.mxu1 %vm560_vm0, %v4928_v57  ;;  %5082 = vmatpush.msra.mxu0 %v12552_v24  ;;  %11435 = vrcp.f32 %v5056_v44 }
 0xb8f   :  { %5240 = vmatpush.msrb.mxu1 %v12559_v42 }
 0xb93   :  { %v11434_v26 = vpop.eup %11433  ;;  %v5194_v16 = vpop.xlane.xlu2 %5193 }
 0xb94   :  { %v5063_v50 = vmul.f32 %v11434_v26, %v12704_v4  ;;  %11437 = vrcp.f32 %v5194_v16  ;;  %v5191_v63 = vpop.xlane.xlu0 %5190  ;;  %v11436_v13 = vpop.eup %11435 }
 0xb95   :  { %9632 = vmatmul.msk.f32.vlgmr.msrb.gmra.mxu0 %vm560_vm0, %v4927_v56  ;;  %11439 = vrcp.f32 %v5191_v63  ;;  %v5062_v15 = vmul.f32 %v11436_v13, %v12702_v53 }
 0xb96   :  { %9635 = vmatmul.msk.f32.vlgmr.msra.gmra.mxu1 %vm560_vm0, %v5063_v50  ;;  %5217 = vmatpush.msrb.mxu0 %v12552_v24 }
 0xb97   :  { %5375 = vmatpush.msra.mxu1 %v12559_v42 }
 0xb9a   :  { %v11438_v7 = vpop.eup %11437 }
 0xb9b   :  { %v5198_v60 = vmul.f32 %v11438_v7, %v12711_v48  ;;  %v5329_v58 = vpop.xlane.xlu1 %5328  ;;  %v11440_v4 = vpop.eup %11439 }
 0xb9c   :  { %11441 = vrcp.f32 %v5329_v58  ;;  %v5197_v19 = vmul.f32 %v11440_v4, %v12713_v18 }
 0xb9d   :  { %9634 = vmatmul.msk.f32.vlgmr.msra.gmra.mxu0 %vm560_vm0, %v5062_v15 }
 0xb9e   :  { %9637 = vmatmul.msk.f32.vlgmr.msrb.gmra.mxu1 %vm560_vm0, %v5198_v60  ;;  %5352 = vmatpush.msra.mxu0 %v12552_v24 }
 0xb9f   :  { %5503 = vmatpush.msrb.mxu1 %v12559_v42 }
 0xba2   :  { %v11442_v36 = vpop.eup %11441 }
 0xba3   :  { %v5333_v34 = vmul.f32 %v11442_v36, %v12719_v9 }
 0xba5   :  { %9636 = vmatmul.msk.f32.vlgmr.msrb.gmra.mxu0 %vm560_vm0, %v5197_v19 }
 0xba6   :  { %9639 = vmatmul.msk.f32.vlgmr.msra.gmra.mxu1 %vm560_vm0, %v5333_v34  ;;  %5480 = vmatpush.msrb.mxu0 %v12552_v24  ;;  %v11017_v24 = vld [vmem:[%s13046_s11 + $0xf8] sm:$0xff] }
 0xba7   :  { %5571 = vmatpush.bf16.msrb.mxu2 %v11017_v24 }
 0xbab   :  { %5572 = vmatpush.bf16.msrb.mxu2 %v11016_v47 }
 0xbaf   :  { %5573 = vmatpush.bf16.msrb.mxu2 %v11015_v29 }
 0xbb3   :  { %5574 = vmatpush.bf16.msrb.mxu2 %v11014_v1 }
 0xbb7   :  { %5575 = vmatpush.bf16.msrb.mxu2 %v11013_v25 }
 0xbbb   :  { %5576 = vmatpush.bf16.msrb.mxu2 %v11012_v14 }
 0xbbf   :  { %5577 = vmatpush.bf16.msrb.mxu2 %v11011_v20 }
 0xbc3   :  { %5578 = vmatpush.bf16.msrb.mxu2 %v11010_v62 }
 0xbe2   :  { %v4420_v43 = vpop.f32.mrf.mxu0 }
 0xbe3   :  { %v4446_v7 = vmul.f32 %v4420_v43, %v12075_v30 }
 0xbea   :  { %v4443_v41 = vpop.f32.mrf.mxu1 }
 0xbeb   :  { %v5326_v53 = vpop.xlane.xlu2 %5325  ;;  %v4447_v16 = vmul.f32 %v4443_v41, %v12075_v30 }
 0xbec   :  { %11443 = vrcp.f32 %v5326_v53 }
 0xbf2   :  { %v11444_v48 = vpop.eup %11443  ;;  %v4567_v0 = vpop.f32.mrf.mxu1 }
 0xbf3   :  { %v5332_v37 = vmul.f32 %v11444_v48, %v12735_v51  ;;  %v5457_v27 = vpop.xlane.xlu0 %5456  ;;  %v4544_v23 = vpop.f32.mrf.mxu0  ;;  %v4573_v35 = vrot.slane %v4567_v0, 7 }
 0xbf4   :  { %v5454_v38 = vpop.xlane.xlu1 %5453  ;;  %11445 = vrcp.f32 %v5457_v27 }
 0xbf5   :  { %11447 = vrcp.f32 %v5454_v38  ;;  %9638 = vmatmul.msk.f32.vlgmr.msra.gmra.mxu0 %vm560_vm0, %v5332_v37  ;;  %v4577_v22 = vmul.f32 %v4573_v35, %v12075_v30 }
 0xbf7   :  { %v4581_v11 = vrot.slane %v4577_v22, 1 }
 0xbf9   :  { %v4585_v4 = vadd.f32 %v4581_v11, %v4447_v16  ;;  %v11130_v11 = vld [vmem:[#allocation16 + $0x384] sm:$0xf]  ;;  %v10134_v16 = vld [vmem:[#allocation16 + $0x3c8] sm:$0xf0] }
 0xbfa   :  { %v11446_v42 = vpop.eup %11445 }
 0xbfb   :  { %v11448_v18 = vpop.eup %11447  ;;  %v5461_v9 = vmul.f32 %v11446_v42, %v12743_v49  ;;  %v4702_v46 = vpop.f32.mrf.mxu1  ;;  %v4572_v49 = vrot.slane %v4544_v23, 7 }
 0xbfc   :  { %v5460_v21 = vmul.f32 %v11448_v18, %v12746_v59  ;;  %v4708_v59 = vrot.slane %v4702_v46, 6 }
 0xbfd   :  { %9641 = vmatmul.msk.f32.vlgmr.msrb.gmra.mxu1 %vm560_vm0, %v5461_v9  ;;  %v4576_v5 = vmul.f32 %v4572_v49, %v12075_v30 }
 0xbfe   :  { %9640 = vmatmul.msk.f32.vlgmr.msrb.gmra.mxu0 %vm560_vm0, %v5460_v21  ;;  %v4712_v52 = vmul.f32 %v4708_v59, %v12075_v30 }
 0xbff   :  { %v4580_v44 = vrot.slane %v4576_v5, 1 }
 0xc00   :  { %v4716_v50 = vrot.slane %v4712_v52, 2 }
 0xc01   :  { %v4584_v53 = vadd.f32 %v4580_v44, %v4446_v7  ;;  %v10132_v44 = vld [vmem:[#allocation16 + $0x388] sm:$0xf]  ;;  %v11114_v7 = vld [vmem:[#allocation16 + $0x304] sm:$0xf] }
 0xc02   :  { %v4679_v40 = vpop.f32.mrf.mxu0  ;;  %v4720_v27 = vadd.f32 %v4716_v50, %v4585_v4  ;;  %v10060_v50 = vld [vmem:[#allocation16 + $0x300] sm:$0xf]  ;;  %v10068_v4 = vld [vmem:[#allocation16 + $0x308] sm:$0xf] }
 0xc03   :  { %v4837_v10 = vpop.f32.mrf.mxu1  ;;  %v4707_v3 = vrot.slane %v4679_v40, 6 }
 0xc04   :  { %v4843_v32 = vrot.slane %v4837_v10, 5 }
 0xc05   :  { %v4711_v28 = vmul.f32 %v4707_v3, %v12075_v30 }
 0xc06   :  { %v4847_v57 = vmul.f32 %v4843_v32, %v12075_v30 }
 0xc07   :  { %v4715_v15 = vrot.slane %v4711_v28, 2 }
 0xc08   :  { %v4851_v36 = vrot.slane %v4847_v57, 3 }
 0xc09   :  { %v4719_v18 = vadd.f32 %v4715_v15, %v4584_v53  ;;  %v10062_v15 = vld [vmem:[#allocation16 + $0x340] sm:$0xf0]  ;;  %v10070_v53 = vld [vmem:[#allocation16 + $0x348] sm:$0xf0] }
 0xc0a   :  { %v4814_v54 = vpop.f32.mrf.mxu0  ;;  %v4855_v47 = vadd.f32 %v4851_v36, %v4720_v27  ;;  %v11123_v36 = vld [vmem:[#allocation16 + $0x344] sm:$0xf0] }
 0xc0b   :  { %v4972_v55 = vpop.f32.mrf.mxu1  ;;  %v4842_v6 = vrot.slane %v4814_v54, 5 }
 0xc0c   :  { %v4978_v33 = vrot.slane %v4972_v55, 4 }
 0xc0d   :  { %v4846_v12 = vmul.f32 %v4842_v6, %v12075_v30 }
 0xc0e   :  { %v4982_v63 = vmul.f32 %v4978_v33, %v12075_v30 }
 0xc0f   :  { %v4850_v48 = vrot.slane %v4846_v12, 3  ;;  %v11139_v12 = vld [vmem:[#allocation16 + $0x3c4] sm:$0xf0] }
 0xc10   :  { %v4986_v38 = vrot.slane %v4982_v63, 4 }
 0xc11   :  { %v4854_v43 = vadd.f32 %v4850_v48, %v4719_v18  ;;  %v9996_v48 = vld [vmem:[#allocation16 + $0x280] sm:$0xf]  ;;  %v10004_v18 = vld [vmem:[#allocation16 + $0x288] sm:$0xf] }
 0xc12   :  { %v4949_v51 = vpop.f32.mrf.mxu0  ;;  %v4990_v46 = vadd.f32 %v4986_v38, %v4855_v47  ;;  %v11098_v38 = vld [vmem:[#allocation16 + $0x284] sm:$0xf]  ;;  %v10006_v47 = vld [vmem:[#allocation16 + $0x2c8] sm:$0xf0] }
 0xc13   :  { %v5107_v31 = vpop.f32.mrf.mxu1  ;;  %v4977_v61 = vrot.slane %v4949_v51, 4 }
 0xc14   :  { %v5113_v39 = vrot.slane %v5107_v31, 3 }
 0xc15   :  { %v4981_v60 = vmul.f32 %v4977_v61, %v12075_v30  ;;  %v10124_v61 = vld [vmem:[#allocation16 + $0x380] sm:$0xf] }
 0xc16   :  { %v5117_v19 = vmul.f32 %v5113_v39, %v12075_v30  ;;  %v10126_v39 = vld [vmem:[#allocation16 + $0x3c0] sm:$0xf0] }
 0xc17   :  { %v4985_v9 = vrot.slane %v4981_v60, 4 }
 0xc18   :  { %v5121_v29 = vrot.slane %v5117_v19, 5  ;;  %v11115_v19 = vld [vmem:[#allocation16 + $0x30c] sm:$0xf] }
 0xc19   :  { %v4989_v54 = vadd.f32 %v4985_v9, %v4854_v43  ;;  %v10073_v27 = vor.u32 %v11115_v19, %v10070_v53  ;;  %v11459_v43 = vld [vmem:[#allocation13] sm:$0xf]  ;;  %v9814_v53 = vld [vmem:[#allocation16 + $0x148] sm:$0xf0] }
 0xc1a   :  { %v5084_v2 = vpop.f32.mrf.mxu0  ;;  %v5125_v1 = vadd.f32 %v5121_v29, %v4990_v46 }
 0xc1b   :  { %v5242_v45 = vpop.f32.mrf.mxu1  ;;  %v5112_v26 = vrot.slane %v5084_v2, 3 }
 0xc1c   :  { %v5248_v13 = vrot.slane %v5242_v45, 2 }
 0xc1d   :  { %v5116_v37 = vmul.f32 %v5112_v26, %v12075_v30  ;;  %v10129_v26 = vor.u32 %v11130_v11, %v10126_v39  ;;  %v9870_v39 = vld [vmem:[#allocation16 + $0x1c0] sm:$0xf0] }
 0xc1e   :  { %v5252_v42 = vmul.f32 %v5248_v13, %v12075_v30  ;;  %v11122_v13 = vld [vmem:[#allocation16 + $0x33c] sm:$0xf0] }
 0xc1f   :  { %v5120_v23 = vrot.slane %v5116_v37, 5  ;;  %6734 = vmatpush.bf16.msra.mxu0 %v10129_v26  ;;  %v10061_v60 = vor.u32 %v11122_v13, %v10060_v50  ;;  %v11106_v37 = vld [vmem:[#allocation16 + $0x2bc] sm:$0xf0]  ;;  %v11075_v26 = vld [vmem:[#allocation16 + $0x1c4] sm:$0xf0] }
 0xc20   :  { %v5256_v40 = vrot.slane %v5252_v42, 6  ;;  %v9998_v42 = vld [vmem:[#allocation16 + $0x2c0] sm:$0xf0]  ;;  %v9997_v9 = vor.u32 %v11106_v37, %v9996_v48  ;;  %v11058_v13 = vld [vmem:[#allocation16 + $0x13c] sm:$0xf0] }
 0xc21   :  { %v5124_v25 = vadd.f32 %v5120_v23, %v4989_v54  ;;  %v10001_v29 = vor.u32 %v11098_v38, %v9998_v42  ;;  %v5514_v23 = vperm.slane %v11459_v43, 3  ;;  %v11460_v54 = vld [vmem:[%s13069_s1] sm:$0x1]  ;;  %v11042_v38 = vld [vmem:[#allocation16 + $0xbc] sm:$0xf0] }
 0xc22   :  { %v5219_v17 = vpop.f32.mrf.mxu0  ;;  %v5260_v14 = vadd.f32 %v5256_v40, %v5125_v1 }
 0xc23   :  { %v5377_v56 = vpop.f32.mrf.mxu1  ;;  %v5247_v58 = vrot.slane %v5219_v17, 2  ;;  %v11138_v17 = vld [vmem:[#allocation16 + $0x3bc] sm:$0xf0] }
 0xc24   :  { %v5383_v34 = vrot.slane %v5377_v56, 1  ;;  %v10125_v57 = vor.u32 %v11138_v17, %v10124_v61  ;;  %v11131_v56 = vld [vmem:[#allocation16 + $0x38c] sm:$0xf]  ;;  %v9868_v61 = vld [vmem:[#allocation16 + $0x180] sm:$0xf] }
 0xc25   :  { %v5251_v21 = vmul.f32 %v5247_v58, %v12075_v30  ;;  %v10137_v63 = vor.u32 %v11131_v56, %v10134_v16  ;;  %v10065_v58 = vor.u32 %v11114_v7, %v10062_v15  ;;  %v11074_v17 = vld [vmem:[#allocation16 + $0x1bc] sm:$0xf0]  ;;  %v9878_v16 = vld [vmem:[#allocation16 + $0x1c8] sm:$0xf0]  ;;  %v11050_v7 = vld [vmem:[#allocation16 + $0x104] sm:$0xf] }
 0xc26   :  { %v5387_v41 = vmul.f32 %v5383_v34, %v12075_v30  ;;  %6721 = vmatpush.bf16.msra.mxu3 %v10125_v57  ;;  %v10069_v34 = vor.u32 %v11123_v36, %v10068_v4  ;;  %v9869_v11 = vor.u32 %v11074_v17, %v9868_v61  ;;  %v11066_v57 = vld [vmem:[#allocation16 + $0x184] sm:$0xf]  ;;  %v11059_v4 = vld [vmem:[#allocation16 + $0x144] sm:$0xf0]  ;;  %v10076_v17 = vld [vmem:[#allocation16 + $0x310] sm:$0xf] }
 0xc27   :  { %v5255_v55 = vrot.slane %v5251_v21, 6  ;;  %6760 = vmatpush.bf16.msra.mxu2 %v10137_v63  ;;  %v11107_v21 = vld [vmem:[#allocation16 + $0x2c4] sm:$0xf0]  ;;  %6735 = vmatpush.bf16.msra.mxu0 %v10065_v58  ;;  %v9804_v63 = vld [vmem:[#allocation16 + $0x100] sm:$0xf] }
 0xc28   :  { %v5391_v51 = vrot.slane %v5387_v41, 7  ;;  %v10005_v41 = vor.u32 %v11107_v21, %v10004_v18  ;;  %v9805_v15 = vor.u32 %v11058_v13, %v9804_v63  ;;  %v9812_v58 = vld [vmem:[#allocation16 + $0x108] sm:$0xf]  ;;  %v11034_v18 = vld [vmem:[#allocation16 + $0x84] sm:$0xf] }
 0xc29   :  { %v5259_v2 = vadd.f32 %v5255_v55, %v5124_v25  ;;  %v9813_v19 = vor.u32 %v11059_v4, %v9812_v58  ;;  %v10012_v13 = vld [vmem:[#allocation16 + $0x290] sm:$0xf]  ;;  %v10014_v58 = vld [vmem:[#allocation16 + $0x2d0] sm:$0xf0]  ;;  %v10020_v4 = vld [vmem:[#allocation16 + $0x298] sm:$0xf] }
 0xc2a   :  { %v5395_v35 = vadd.f32 %v5391_v51, %v5260_v14  ;;  %6722 = vmatpush.bf16.msra.mxu3 %v10061_v60  ;;  %v9806_v60 = vld [vmem:[#allocation16 + $0x140] sm:$0xf0] }
 0xc2b   :  { %6761 = vmatpush.bf16.msra.mxu2 %v10073_v27  ;;  %6736 = vmatpush.bf16.msra.mxu0 %v10001_v29  ;;  %v9809_v36 = vor.u32 %v11050_v7, %v9806_v60  ;;  %v9740_v27 = vld [vmem:[#allocation16 + $0x80] sm:$0xf]  ;;  %v11035_v29 = vld [vmem:[#allocation16 + $0x8c] sm:$0xf]  ;;  %v11108_v7 = vld [vmem:[#allocation16 + $0x2cc] sm:$0xf0] }
 0xc2c   :  { %v9741_v42 = vor.u32 %v11042_v38, %v9740_v27  ;;  %v10013_v60 = vor.u32 %v11108_v7, %v10012_v13  ;;  %v9948_v38 = vld [vmem:[#allocation16 + $0x210] sm:$0xf]  ;;  %v11036_v7 = vld [vmem:[#allocation16 + $0x94] sm:$0xf] }
 0xc2d   :  { %v11044_v13 = vld [vmem:[#allocation16 + $0xcc] sm:$0xf0] }
 0xc2e   :  { %6723 = vmatpush.bf16.msra.mxu3 %v9997_v9  ;;  %v9742_v9 = vld [vmem:[#allocation16 + $0xc0] sm:$0xf0] }
 0xc2f   :  { %v9745_v21 = vor.u32 %v11034_v18, %v9742_v9  ;;  %v11084_v18 = vld [vmem:[#allocation16 + $0x214] sm:$0xf] }
 0xc72   :  { %v5354_v24 = vpop.f32.mrf.mxu0 }
 0xc73   :  { %v5382_v0 = vrot.slane %v5354_v24, 1  ;;  %v11099_v24 = vld [vmem:[#allocation16 + $0x28c] sm:$0xf] }
 0xc75   :  { %v5386_v10 = vmul.f32 %v5382_v0, %v12075_v30  ;;  %v10009_v0 = vor.u32 %v11099_v24, %v10006_v47  ;;  %v9748_v24 = vld [vmem:[#allocation16 + $0x88] sm:$0xf] }
 0xc76   :  { %v11043_v47 = vld [vmem:[#allocation16 + $0xc4] sm:$0xf0] }
 0xc77   :  { %v5390_v31 = vrot.slane %v5386_v10, 7  ;;  %6762 = vmatpush.bf16.msra.mxu2 %v10009_v0  ;;  %v9750_v0 = vld [vmem:[#allocation16 + $0xc8] sm:$0xf0] }
 0xc78   :  { %v9753_v43 = vor.u32 %v11035_v29, %v9750_v0  ;;  %v11085_v0 = vld [vmem:[#allocation16 + $0x21c] sm:$0xf] }
 0xc79   :  { %v5394_v59 = vadd.f32 %v5390_v31, %v5259_v2 }
 0xc7a   :  { %v5505_v20 = vpop.f32.mrf.mxu1 }
 0xc7b   :  { %v5482_v45 = vpop.f32.mrf.mxu0  ;;  %v5509_v49 = vmul.f32 %v5505_v20, %v12579_v8 }
 0xc7c   :  { %v5508_v62 = vmul.f32 %v5482_v45, %v12579_v8  ;;  %v10133_v8 = vor.u32 %v11139_v12, %v10132_v44  ;;  %v9873_v44 = vor.u32 %v11066_v57, %v9870_v39  ;;  %v9876_v12 = vld [vmem:[#allocation16 + $0x188] sm:$0xf]  ;;  %v11116_v57 = vld [vmem:[#allocation16 + $0x314] sm:$0xf] }
 0xc7d   :  { %v5511_v3 = vadd.f32 %v5509_v49, %v5395_v35  ;;  %v9932_v35 = vld [vmem:[#allocation16 + $0x200] sm:$0xf]  ;;  %v9877_v56 = vor.u32 %v11075_v26, %v9876_v12  ;;  %v10084_v12 = vld [vmem:[#allocation16 + $0x318] sm:$0xf] }
 0xc7e   :  { %v5510_v22 = vadd.f32 %v5508_v62, %v5394_v59  ;;  %6747 = vmatpush.bf16.msra.mxu1 %v10133_v8  ;;  %v11090_v49 = vld [vmem:[#allocation16 + $0x23c] sm:$0xf0]  ;;  %v11082_v59 = vld [vmem:[#allocation16 + $0x204] sm:$0xf]  ;;  %v11067_v8 = vld [vmem:[#allocation16 + $0x18c] sm:$0xf] }
 0xc7f   :  { %v5513_v32 = vpack.c.bf16 %v5511_v3, %v5511_v3  ;;  %v9933_v62 = vor.u32 %v11090_v49, %v9932_v35  ;;  %v9934_v3 = vld [vmem:[#allocation16 + $0x240] sm:$0xf0]  ;;  %v9881_v50 = vor.u32 %v11067_v8, %v9878_v16  ;;  %v11140_v49 = vld [vmem:[#allocation16 + $0x3cc] sm:$0xf0]  ;;  %v11125_v26 = vld [vmem:[#allocation16 + $0x354] sm:$0xf0] }
 0xc80   :  { %v5512_v30 = vpack.c.bf16 %v5510_v22, %v5510_v22  ;;  %v9940_v22 = vld [vmem:[#allocation16 + $0x208] sm:$0xf]  ;;  %v11117_v16 = vld [vmem:[#allocation16 + $0x31c] sm:$0xf] }
 0xc81   :  { %v5518_v5 = vunpack.c.l.b16 %v5513_v32  ;;  %v11091_v32 = vld [vmem:[#allocation16 + $0x244] sm:$0xf0]  ;;  %6724 = vmatpush.bf16.msra.mxu3 %v9933_v62  ;;  %v10142_v62 = vld [vmem:[#allocation16 + $0x3d0] sm:$0xf0] }
 0xc82   :  { %v5517_v6 = vunpack.c.l.b16 %v5512_v30  ;;  %6748 = vmatpush.bf16.msra.mxu1 %v10069_v34  ;;  %v9937_v30 = vor.u32 %v11082_v59, %v9934_v3  ;;  %v11051_v34 = vld [vmem:[#allocation16 + $0x10c] sm:$0xf]  ;;  %v11132_v59 = vld [vmem:[#allocation16 + $0x394] sm:$0xf] }
 0xc83   :  { %v5519_v52 = vrot.slane %v5518_v5, 7  ;;  %v9941_v5 = vor.u32 %v11091_v32, %v9940_v22  ;;  %v9817_v48 = vor.u32 %v11051_v34, %v9814_v53  ;;  %v10145_v32 = vor.u32 %v11132_v59, %v10142_v62  ;;  %v11101_v53 = vld [vmem:[#allocation16 + $0x29c] sm:$0xf] }
 0xc84   :  { %6737 = vmatpush.bf16.msra.mxu0 %v9937_v30  ;;  %v10148_v30 = vld [vmem:[#allocation16 + $0x398] sm:$0xf]  ;;  %v9894_v59 = vld [vmem:[#allocation16 + $0x1d8] sm:$0xf0] }
 0xc85   :  { %v5520_v33 = vsel %vm4138_vm7, %v5519_v52, %v5517_v6  ;;  %v11083_v6 = vld [vmem:[#allocation16 + $0x20c] sm:$0xf]  ;;  %6725 = vmatpush.bf16.msra.mxu3 %v9869_v11  ;;  %v11124_v11 = vld [vmem:[#allocation16 + $0x34c] sm:$0xf0] }
 0xc86   :  { %v5521_v28 = vpack.c.b16 %v5520_v33, %v5520_v33  ;;  %6749 = vmatpush.bf16.msra.mxu1 %v10005_v41  ;;  %v9942_v52 = vld [vmem:[#allocation16 + $0x248] sm:$0xf0]  ;;  %v9749_v41 = vor.u32 %v11043_v47, %v9748_v24  ;;  %v10077_v39 = vor.u32 %v11124_v11, %v10076_v17  ;;  %v9956_v24 = vld [vmem:[#allocation16 + $0x218] sm:$0xf]  ;;  %v9822_v11 = vld [vmem:[#allocation16 + $0x150] sm:$0xf0] }
 0xc87   :  { %v9945_v33 = vor.u32 %v11083_v6, %v9942_v52  ;;  %v11133_v52 = vld [vmem:[#allocation16 + $0x39c] sm:$0xf]  ;;  %v11093_v47 = vld [vmem:[#allocation16 + $0x254] sm:$0xf0] }
 0xc88   :  { %5579 = vmatmul.bf16.vlgmr.msrb.gmra.mxu2 %v5521_v28  ;;  %v12848_v28 = vld [vmem:[#allocation14] sm:$0xf]  ;;  %6738 = vmatpush.bf16.msra.mxu0 %v9873_v44  ;;  %v10078_v44 = vld [vmem:[#allocation16 + $0x350] sm:$0xf0] }
 0xc89   :  { %6763 = vmatpush.bf16.msra.mxu2 %v9945_v33  ;;  %5641 = vst [vmem:[#allocation1] sm:$0xff] %v12848_v28  ;;  %6726 = vmatpush.bf16.msra.mxu3 %v9805_v15  ;;  %v10150_v33 = vld [vmem:[#allocation16 + $0x3d8] sm:$0xf0]  ;;  %v10081_v8 = vor.u32 %v11116_v57, %v10078_v44  ;;  %v11100_v15 = vld [vmem:[#allocation16 + $0x294] sm:$0xf] }
 0xc8a   :  { %6750 = vmatpush.bf16.msra.mxu1 %v9941_v5  ;;  %v11141_v5 = vld [vmem:[#allocation16 + $0x3d4] sm:$0xf0]  ;;  %v10153_v61 = vor.u32 %v11133_v52, %v10150_v33  ;;  %v11060_v52 = vld [vmem:[#allocation16 + $0x14c] sm:$0xf0]  ;;  %v11052_v33 = vld [vmem:[#allocation16 + $0x114] sm:$0xf] }
 0xc8b   :  { %v10149_v6 = vor.u32 %v11141_v5, %v10148_v30  ;;  %v9828_v57 = vld [vmem:[#allocation16 + $0x118] sm:$0xf]  ;;  %v9825_v44 = vor.u32 %v11052_v33, %v9822_v11 }
 0xc8c   :  { %6739 = vmatpush.bf16.msra.mxu0 %v9809_v36  ;;  %v11109_v36 = vld [vmem:[#allocation16 + $0x2d4] sm:$0xf0] }
 0xc8d   :  { %6764 = vmatpush.bf16.msra.mxu2 %v9881_v50  ;;  %6727 = vmatpush.bf16.msra.mxu3 %v9741_v42  ;;  %v10086_v50 = vld [vmem:[#allocation16 + $0x358] sm:$0xf0]  ;;  %v10021_v34 = vor.u32 %v11109_v36, %v10020_v4  ;;  %v11092_v42 = vld [vmem:[#allocation16 + $0x24c] sm:$0xf0]  ;;  %v9758_v4 = vld [vmem:[#allocation16 + $0xd0] sm:$0xf0] }
 0xc8e   :  { %6751 = vmatpush.bf16.msra.mxu1 %v9877_v56  ;;  %v10085_v56 = vor.u32 %v11125_v26, %v10084_v12  ;;  %v10089_v63 = vor.u32 %v11117_v16, %v10086_v50  ;;  %v9949_v9 = vor.u32 %v11092_v42, %v9948_v38  ;;  %v11053_v26 = vld [vmem:[#allocation16 + $0x11c] sm:$0xf]  ;;  %v9764_v36 = vld [vmem:[#allocation16 + $0x98] sm:$0xf] }
 0xc90   :  { %v12851_v37 = vld [vmem:[#allocation1 + $0x1] ss:$9 sm:$0xff]  ;;  %6740 = vmatpush.bf16.msra.mxu0 %v9745_v21 }
 0xc91   :  { %5644 = vst [vmem:[#allocation1] sm:$0xff] %v12848_v28  ;;  %6765 = vmatpush.bf16.msra.mxu2 %v9817_v48  ;;  %v10022_v48 = vld [vmem:[#allocation16 + $0x2d8] sm:$0xf0]  ;;  %v9950_v21 = vld [vmem:[#allocation16 + $0x250] sm:$0xf0] }
 0xc92   :  { %6752 = vmatpush.bf16.msra.mxu1 %v9813_v19  ;;  %v10017_v19 = vor.u32 %v11100_v15, %v10014_v58  ;;  %v10025_v27 = vor.u32 %v11101_v53, %v10022_v48  ;;  %v9953_v29 = vor.u32 %v11084_v18, %v9950_v21  ;;  %v11037_v53 = vld [vmem:[#allocation16 + $0x9c] sm:$0xf]  ;;  %v9692_v18 = vld [vmem:[#allocation16 + $0x10] sm:$0xf]  ;;  %v11020_v21 = vld [vmem:[#allocation16 + $0x14] sm:$0xf] }
 0xc93   :  { %v9766_v48 = vld [vmem:[#allocation16 + $0xd8] sm:$0xf0] }
 0xc94   :  { %v9769_v42 = vor.u32 %v11037_v53, %v9766_v48  ;;  %v10100_v53 = vld [vmem:[#allocation16 + $0x328] sm:$0xf] }
 0xc95   :  { %6766 = vmatpush.bf16.msra.mxu2 %v9753_v43  ;;  %v9958_v43 = vld [vmem:[#allocation16 + $0x258] sm:$0xf0]  ;;  %v11127_v48 = vld [vmem:[#allocation16 + $0x364] sm:$0xf0] }
 0xc96   :  { %6753 = vmatpush.bf16.msra.mxu1 %v9749_v41  ;;  %v9957_v41 = vor.u32 %v11093_v47, %v9956_v24 }
 0xc98   :  { %v12854_v3 = vld [vmem:[#allocation1 + $0x1] ss:$9 sm:$0xff] }
 0xc99   :  { %8269 = vst [vmem:[#allocation1] sm:$0xff] %v12848_v28 }
 0xd0b   :  { %v5580_v46 = vpop.f32.mrf.mxu2 }
 0xd0c   :  { %v5581_v40 = vadd.f32 %v5580_v46, %v5514_v23  ;;  %v9676_v23 = vld [vmem:[#allocation16] sm:$0xf] }
 0xd0d   :  { %v11026_v46 = vld [vmem:[#allocation16 + $0x3c] sm:$0xf0] }
 0xd0e   :  { %v5585_v10 = vrot.slane %v5581_v40, 1  ;;  %v12834_v55 = vadd.f32 %v11460_v54, %v5581_v40  ;;  %v11018_v40 = vld [vmem:[#allocation16 + $0x4] sm:$0xf] }
 0xd10   :  { %v12836_v1 = vadd.f32 %v11460_v54, %v5585_v10  ;;  %v5590_v51 = vsel %vm5589_vm15, %v12834_v55, 0.0  ;;  %v5596_v20 = vmul.f32 %v12834_v55, %v12834_v55  ;;  %v9677_v10 = vor.u32 %v11026_v46, %v9676_v23  ;;  %v9678_v54 = vld [vmem:[#allocation16 + $0x40] sm:$0xf0] }
 0xd11   :  { %5591 = vadd.xlane.f32.xlu0 %v5590_v51  ;;  %v9684_v51 = vld [vmem:[#allocation16 + $0x8] sm:$0xf]  ;;  %v9961_v23 = vor.u32 %v11085_v0, %v9958_v43  ;;  %v11029_v43 = vld [vmem:[#allocation16 + $0x54] sm:$0xf0] }
 0xd12   :  { %v5593_v25 = vsel %vm5589_vm15, %v12836_v1, 0.0  ;;  %v5597_v31 = vmul.f32 %v12836_v1, %v12836_v1  ;;  %v5598_v45 = vsel %vm5589_vm15, %v5596_v20, 0.0  ;;  %v9686_v20 = vld [vmem:[#allocation16 + $0x48] sm:$0xf0]  ;;  %6728 = vmatpush.bf16.msra.mxu3 %v9677_v10  ;;  %v9884_v10 = vld [vmem:[#allocation16 + $0x190] sm:$0xf] }
 0xd13   :  { %v5582_v14 = vpop.f32.mrf.mxu2  ;;  %5594 = vadd.xlane.f32.xlu2 %v5593_v25  ;;  %v11027_v25 = vld [vmem:[#allocation16 + $0x44] sm:$0xf0] }
 0xd14   :  { %v5601_v2 = vsel %vm5589_vm15, %v5597_v31, 0.0  ;;  %v9681_v31 = vor.u32 %v11018_v40, %v9678_v54  ;;  %v9685_v14 = vor.u32 %v11027_v25, %v9684_v51  ;;  %v11076_v54 = vld [vmem:[#allocation16 + $0x1cc] sm:$0xf0]  ;;  %v11068_v51 = vld [vmem:[#allocation16 + $0x194] sm:$0xf] }
 0xd15   :  { %5602 = vadd.xlane.f32.xlu1 %v5601_v2  ;;  %v11019_v2 = vld [vmem:[#allocation16 + $0xc] sm:$0xf] }
 0xd16   :  { %v9689_v35 = vor.u32 %v11019_v2, %v9686_v20  ;;  %6741 = vmatpush.bf16.msra.mxu0 %v9681_v31  ;;  %6754 = vmatpush.bf16.msra.mxu1 %v9685_v14  ;;  %v9885_v31 = vor.u32 %v11076_v54, %v9884_v10  ;;  %v9886_v14 = vld [vmem:[#allocation16 + $0x1d0] sm:$0xf0]  ;;  %v9892_v2 = vld [vmem:[#allocation16 + $0x198] sm:$0xf] }
 0xd18   :  { %6767 = vmatpush.bf16.msra.mxu2 %v9689_v35  ;;  %v11077_v35 = vld [vmem:[#allocation16 + $0x1d4] sm:$0xf0] }
 0xd19   :  { %v9893_v30 = vor.u32 %v11077_v35, %v9892_v2 }
 0xd1a   :  { %6786 = vmatpush.bf16.msrb.mxu0 %v10145_v32  ;;  %6799 = vmatpush.bf16.msrb.mxu1 %v10149_v6  ;;  %v9820_v6 = vld [vmem:[#allocation16 + $0x110] sm:$0xf] }
 0xd1b   :  { %5599 = vadd.xlane.f32.xlu2 %v5598_v45  ;;  %v10140_v45 = vld [vmem:[#allocation16 + $0x390] sm:$0xf]  ;;  %v9821_v17 = vor.u32 %v11060_v52, %v9820_v6 }
 0xd1c   :  { %v10141_v22 = vor.u32 %v11140_v49, %v10140_v45  ;;  %6812 = vmatpush.bf16.msrb.mxu2 %v10153_v61  ;;  %v9889_v45 = vor.u32 %v11068_v51, %v9886_v14  ;;  %v11069_v49 = vld [vmem:[#allocation16 + $0x19c] sm:$0xf] }
 0xd1d   :  { %v9897_v5 = vor.u32 %v11069_v49, %v9894_v59 }
 0xd1e   :  { %6773 = vmatpush.bf16.msrb.mxu3 %v10141_v22  ;;  %6787 = vmatpush.bf16.msrb.mxu0 %v10081_v8  ;;  %v9830_v8 = vld [vmem:[#allocation16 + $0x158] sm:$0xf0] }
 0xd1f   :  { %6800 = vmatpush.bf16.msrb.mxu1 %v10085_v56  ;;  %v9833_v16 = vor.u32 %v11053_v26, %v9830_v8  ;;  %v10158_v8 = vld [vmem:[#allocation16 + $0x3e0] sm:$0xf0] }
 0xd20   :  { %6813 = vmatpush.bf16.msrb.mxu2 %v10089_v63  ;;  %v9756_v63 = vld [vmem:[#allocation16 + $0x90] sm:$0xf] }
 0xd21   :  { %v9757_v58 = vor.u32 %v11044_v13, %v9756_v63  ;;  %v10166_v63 = vld [vmem:[#allocation16 + $0x3e8] sm:$0xf0] }
 0xd22   :  { %6774 = vmatpush.bf16.msrb.mxu3 %v10077_v39  ;;  %6788 = vmatpush.bf16.msrb.mxu0 %v10017_v19  ;;  %v11061_v39 = vld [vmem:[#allocation16 + $0x154] sm:$0xf0]  ;;  %v9761_v19 = vor.u32 %v11036_v7, %v9758_v4 }
 0xd23   :  { %6801 = vmatpush.bf16.msrb.mxu1 %v10021_v34  ;;  %v9829_v12 = vor.u32 %v11061_v39, %v9828_v57  ;;  %v11045_v34 = vld [vmem:[#allocation16 + $0xd4] sm:$0xf0] }
 0xd24   :  { %6814 = vmatpush.bf16.msrb.mxu2 %v10025_v27  ;;  %v9765_v38 = vor.u32 %v11045_v34, %v9764_v36  ;;  %v10094_v34 = vld [vmem:[#allocation16 + $0x360] sm:$0xf0] }
 0xd26   :  { %6775 = vmatpush.bf16.msrb.mxu3 %v10013_v60  ;;  %6789 = vmatpush.bf16.msrb.mxu0 %v9953_v29  ;;  %v9694_v29 = vld [vmem:[#allocation16 + $0x50] sm:$0xf0] }
 0xd27   :  { %6802 = vmatpush.bf16.msrb.mxu1 %v9957_v41  ;;  %v9700_v41 = vld [vmem:[#allocation16 + $0x18] sm:$0xf]  ;;  %v9697_v0 = vor.u32 %v11020_v21, %v9694_v29  ;;  %v11110_v21 = vld [vmem:[#allocation16 + $0x2dc] sm:$0xf0]  ;;  %v11102_v29 = vld [vmem:[#allocation16 + $0x2a4] sm:$0xf] }
 0xd28   :  { %6815 = vmatpush.bf16.msrb.mxu2 %v9961_v23  ;;  %v11021_v23 = vld [vmem:[#allocation16 + $0x1c] sm:$0xf]  ;;  %v9701_v10 = vor.u32 %v11029_v43, %v9700_v41  ;;  %v10030_v41 = vld [vmem:[#allocation16 + $0x2e0] sm:$0xf0]  ;;  %v11111_v43 = vld [vmem:[#allocation16 + $0x2e4] sm:$0xf0] }
 0xd2a   :  { %6776 = vmatpush.bf16.msrb.mxu3 %v9949_v9  ;;  %6790 = vmatpush.bf16.msrb.mxu0 %v9889_v45  ;;  %v11028_v9 = vld [vmem:[#allocation16 + $0x4c] sm:$0xf0] }
 0xd2b   :  { %6803 = vmatpush.bf16.msrb.mxu1 %v9893_v30  ;;  %v9693_v47 = vor.u32 %v11028_v9, %v9692_v18  ;;  %v10028_v9 = vld [vmem:[#allocation16 + $0x2a0] sm:$0xf] }
 0xd2c   :  { %6816 = vmatpush.bf16.msrb.mxu2 %v9897_v5 }
 0xd2e   :  { %6777 = vmatpush.bf16.msrb.mxu3 %v9885_v31  ;;  %6791 = vmatpush.bf16.msrb.mxu0 %v9825_v44 }
 0xd2f   :  { %6804 = vmatpush.bf16.msrb.mxu1 %v9829_v12  ;;  %v10156_v12 = vld [vmem:[#allocation16 + $0x3a0] sm:$0xf] }
 0xd30   :  { %6817 = vmatpush.bf16.msrb.mxu2 %v9833_v16  ;;  %v11143_v16 = vld [vmem:[#allocation16 + $0x3e4] sm:$0xf0] }
 0xd32   :  { %6778 = vmatpush.bf16.msrb.mxu3 %v9821_v17  ;;  %6792 = vmatpush.bf16.msrb.mxu0 %v9761_v19  ;;  %v11118_v19 = vld [vmem:[#allocation16 + $0x324] sm:$0xf] }
 0xd33   :  { %6805 = vmatpush.bf16.msrb.mxu1 %v9765_v38  ;;  %v10102_v38 = vld [vmem:[#allocation16 + $0x368] sm:$0xf0]  ;;  %v10097_v18 = vor.u32 %v11118_v19, %v10094_v34  ;;  %v11038_v19 = vld [vmem:[#allocation16 + $0xa4] sm:$0xf] }
 0xd34   :  { %6818 = vmatpush.bf16.msrb.mxu2 %v9769_v42  ;;  %v9774_v34 = vld [vmem:[#allocation16 + $0xe0] sm:$0xf0] }
 0xd36   :  { %6779 = vmatpush.bf16.msrb.mxu3 %v9757_v58  ;;  %6793 = vmatpush.bf16.msrb.mxu0 %v9697_v0  ;;  %v11126_v58 = vld [vmem:[#allocation16 + $0x35c] sm:$0xf0]  ;;  %v10036_v0 = vld [vmem:[#allocation16 + $0x2a8] sm:$0xf] }
 0xd37   :  { %6806 = vmatpush.bf16.msrb.mxu1 %v9701_v10  ;;  %v10033_v10 = vor.u32 %v11102_v29, %v10030_v41 }
 0xd3a   :  { %6780 = vmatpush.bf16.msrb.mxu3 %v9693_v47 }
 0xd84   :  { %v5592_v46 = vpop.xlane.xlu0 %5591 }
 0xd85   :  { %v12859_v62 = vmul.f32 0.009259259, %v5592_v46  ;;  %v9702_v46 = vld [vmem:[#allocation16 + $0x58] sm:$0xf0] }
 0xd86   :  { %v5595_v40 = vpop.xlane.xlu2 %5594  ;;  %v9705_v54 = vor.u32 %v11021_v23, %v9702_v46  ;;  %v11103_v23 = vld [vmem:[#allocation16 + $0x2ac] sm:$0xf] }
 0xd87   :  { %v12857_v25 = vmul.f32 0.009259259, %v5595_v40  ;;  %v5608_v15 = vmul.f32 %v12859_v62, %v12859_v62  ;;  %v5612_v33 = vsub.f32 %v12834_v55, %v12859_v62  ;;  %v11142_v55 = vld [vmem:[#allocation16 + $0x3dc] sm:$0xf0]  ;;  %v11134_v62 = vld [vmem:[#allocation16 + $0x3a4] sm:$0xf] }
 0xd88   :  { %v5603_v20 = vpop.xlane.xlu1 %5602  ;;  %6819 = vmatpush.bf16.msrb.mxu2 %v9705_v54  ;;  %v10038_v46 = vld [vmem:[#allocation16 + $0x2e8] sm:$0xf0]  ;;  %v9964_v54 = vld [vmem:[#allocation16 + $0x220] sm:$0xf] }
 0xd89   :  { %v5609_v22 = vmul.f32 %v12857_v25, %v12857_v25  ;;  %v5607_v32 = vmul.f32 0.009259259, %v5603_v20  ;;  %v5613_v59 = vsub.f32 %v12836_v1, %v12857_v25 }
 0xd8b   :  { %v5611_v61 = vsub.f32 %v5607_v32, %v5609_v22 }
 0xd8d   :  { %v5615_v56 = vadd.f32 1e-05, %v5611_v61 }
 0xd8e   :  { %v5600_v50 = vpop.xlane.xlu2 %5599 }
 0xd8f   :  { %11449 = vrsqrt.f32 %v5615_v56  ;;  %v5606_v60 = vmul.f32 0.009259259, %v5600_v50  ;;  %vm5632_vm1 = vweird.f32 %v5615_v56  ;;  %v11135_v50 = vld [vmem:[#allocation16 + $0x3ac] sm:$0xf] }
 0xd90   :  { %v10169_v36 = vor.u32 %v11135_v50, %v10166_v63  ;;  %v11063_v50 = vld [vmem:[#allocation16 + $0x164] sm:$0xf0]  ;;  %v11055_v63 = vld [vmem:[#allocation16 + $0x12c] sm:$0xf] }
 0xd91   :  { %v5610_v27 = vsub.f32 %v5606_v60, %v5608_v15  ;;  %v10157_v15 = vor.u32 %v11142_v55, %v10156_v12  ;;  %v10092_v60 = vld [vmem:[#allocation16 + $0x320] sm:$0xf] }
 0xd92   :  { %v10093_v42 = vor.u32 %v11126_v58, %v10092_v60  ;;  %v9836_v55 = vld [vmem:[#allocation16 + $0x120] sm:$0xf] }
 0xd93   :  { %v5614_v24 = vadd.f32 1e-05, %v5610_v27  ;;  %v11119_v27 = vld [vmem:[#allocation16 + $0x32c] sm:$0xf]  ;;  %v9772_v60 = vld [vmem:[#allocation16 + $0xa0] sm:$0xf] }
 0xd94   :  { %v10105_v47 = vor.u32 %v11119_v27, %v10102_v38  ;;  %v11046_v58 = vld [vmem:[#allocation16 + $0xdc] sm:$0xf0]  ;;  %v11039_v27 = vld [vmem:[#allocation16 + $0xac] sm:$0xf] }
 0xd95   :  { %v11450_v40 = vpop.eup %11449  ;;  %11451 = vrsqrt.f32 %v5614_v24  ;;  %vm5622_vm4 = vweird.f32 %v5614_v24  ;;  %v9782_v38 = vld [vmem:[#allocation16 + $0xe8] sm:$0xf0] }
 0xd96   :  { %v5627_v51 = vmul.f32 %v11450_v40, %v5615_v56  ;;  %vm5633_vm0 = vweird.f32 %v11450_v40  ;;  %v10164_v56 = vld [vmem:[#allocation16 + $0x3a8] sm:$0xf]  ;;  %v9785_v41 = vor.u32 %v11039_v27, %v9782_v38  ;;  %v11089_v27 = vld [vmem:[#allocation16 + $0x23c] sm:$0xf] }
 0xd97   :  { %vm5634_vm2 = vmor %vm5632_vm1, %vm5633_vm0  ;;  %v10165_v4 = vor.u32 %v11143_v16, %v10164_v56  ;;  %v9838_v56 = vld [vmem:[#allocation16 + $0x160] sm:$0xf0]  ;;  %v9844_v16 = vld [vmem:[#allocation16 + $0x128] sm:$0xf]  ;;  %vm6986_vm0 = vcmask 1046528   ;;  %vm6988_vm1 = vcmask 1046533  }
 0xd98   :  { %v5628_v31 = vmul.f32 %v11450_v40, %v5627_v51  ;;  %v11094_v51 = vld [vmem:[#allocation16 + $0x25c] sm:$0xf0]  ;;  %v9990_v38 = vld [vmem:[#allocation16 + $0x278] sm:$0xf0] }
 0xd9a   :  { %v5629_v14 = vmul.f32 0.5, %v5628_v31  ;;  %v10037_v31 = vor.u32 %v11111_v43, %v10036_v0  ;;  %v9716_v0 = vld [vmem:[#allocation16 + $0x28] sm:$0xf] }
 0xd9b   :  { %v11452_v2 = vpop.eup %11451  ;;  %v11031_v43 = vld [vmem:[#allocation16 + $0x64] sm:$0xf0] }
 0xd9c   :  { %v5630_v20 = vsub.f32 1.5, %v5629_v14  ;;  %v5617_v45 = vmul.f32 %v11452_v2, %v5614_v24  ;;  %vm5623_vm3 = vweird.f32 %v11452_v2  ;;  %v10101_v24 = vor.u32 %v11127_v48, %v10100_v53  ;;  %v9780_v53 = vld [vmem:[#allocation16 + $0xa8] sm:$0xf] }
 0xd9d   :  { %vm5624_vm5 = vmor %vm5622_vm4, %vm5623_vm3  ;;  %v10041_v14 = vor.u32 %v11103_v23, %v10038_v46  ;;  %v11047_v48 = vld [vmem:[#allocation16 + $0xe4] sm:$0xf0]  ;;  %v11023_v23 = vld [vmem:[#allocation16 + $0x2c] sm:$0xf]  ;;  %vm6990_vm3 = vcmask 1044481  }
 0xd9e   :  { %v5631_v35 = vmul.f32 %v11450_v40, %v5630_v20  ;;  %v5618_v49 = vmul.f32 %v11452_v2, %v5617_v45  ;;  %v9966_v20 = vld [vmem:[#allocation16 + $0x260] sm:$0xf0]  ;;  %v9972_v45 = vld [vmem:[#allocation16 + $0x228] sm:$0xf]  ;;  %v9781_v29 = vor.u32 %v11047_v48, %v9780_v53  ;;  %v9718_v46 = vld [vmem:[#allocation16 + $0x68] sm:$0xf0] }
 0xd9f   :  { %v9988_v53 = vld [vmem:[#allocation16 + $0x238] sm:$0xf] }
 0xda0   :  { %v5635_v22 = vsel %vm5634_vm2, %v11450_v40, %v5631_v35  ;;  %v5619_v32 = vmul.f32 0.5, %v5618_v49  ;;  %v10029_v40 = vor.u32 %v11110_v21, %v10028_v9  ;;  %v11095_v35 = vld [vmem:[#allocation16 + $0x264] sm:$0xf0]  ;;  %v11087_v49 = vld [vmem:[#allocation16 + $0x22c] sm:$0xf]  ;;  %v9777_v9 = vor.u32 %v11038_v19, %v9774_v34 }
 0xda1   :  { %v5637_v30 = vmul.f32 %v5635_v22, %v5613_v59  ;;  %v9974_v59 = vld [vmem:[#allocation16 + $0x268] sm:$0xf0]  ;;  %v9965_v22 = vor.u32 %v11094_v51, %v9964_v54  ;;  %v11030_v21 = vld [vmem:[#allocation16 + $0x5c] sm:$0xf0]  ;;  %v11136_v54 = vld [vmem:[#allocation16 + $0x3b4] sm:$0xf] }
 0xda2   :  { %v5620_v5 = vsub.f32 1.5, %v5619_v32  ;;  %v10174_v51 = vld [vmem:[#allocation16 + $0x3f0] sm:$0xf0]  ;;  %v11097_v48 = vld [vmem:[#allocation16 + $0x274] sm:$0xf0]  ;;  %vm6970_vm2 = vcmask 1043456  }
 0xda3   :  { %v5639_v6 = vmul.f32 %v5637_v30, %v12848_v28  ;;  %v9900_v30 = vld [vmem:[#allocation16 + $0x1a0] sm:$0xf]  ;;  %v11088_v19 = vld [vmem:[#allocation16 + $0x234] sm:$0xf] }
 0xda4   :  { %v5621_v52 = vmul.f32 %v11452_v2, %v5620_v5  ;;  %v11078_v5 = vld [vmem:[#allocation16 + $0x1dc] sm:$0xf0]  ;;  %v9982_v34 = vld [vmem:[#allocation16 + $0x270] sm:$0xf0] }
 0xda5   :  { %v12871_v61 = vadd.f32 %v12854_v3, %v5639_v6  ;;  %v9973_v6 = vor.u32 %v11095_v35, %v9972_v45  ;;  %v11137_v45 = vld [vmem:[#allocation16 + $0x3bc] sm:$0xf] }
 0xda6   :  { %v5625_v17 = vsel %vm5624_vm5, %v11452_v2, %v5621_v52  ;;  %v11086_v2 = vld [vmem:[#allocation16 + $0x224] sm:$0xf]  ;;  %v9977_v52 = vor.u32 %v11087_v49, %v9974_v59  ;;  %v10182_v35 = vld [vmem:[#allocation16 + $0x3f8] sm:$0xf0]  ;;  %v9717_v49 = vor.u32 %v11031_v43, %v9716_v0  ;;  %v9721_v59 = vor.u32 %v11023_v23, %v9718_v46  ;;  %v9924_v0 = vld [vmem:[#allocation16 + $0x1b8] sm:$0xf] }
 0xda7   :  { %v6038_v1 = vpack.c.bf16 %v12871_v61, %v12871_v61  ;;  %v5636_v25 = vmul.f32 %v5625_v17, %v5612_v33  ;;  %v9969_v32 = vor.u32 %v11086_v2, %v9966_v20  ;;  %v11070_v33 = vld [vmem:[#allocation16 + $0x1a4] sm:$0xf]  ;;  %v11145_v20 = vld [vmem:[#allocation16 + $0x3f4] sm:$0xf0]  ;;  %v11073_v23 = vld [vmem:[#allocation16 + $0x1bc] sm:$0xf] }
 0xda8   :  { %v9902_v17 = vld [vmem:[#allocation16 + $0x1e0] sm:$0xf0]  ;;  %v11081_v43 = vld [vmem:[#allocation16 + $0x1f4] sm:$0xf0]  ;;  %v9926_v46 = vld [vmem:[#allocation16 + $0x1f8] sm:$0xf0] }
 0xda9   :  { %v5638_v11 = vmul.f32 %v5636_v25, %v12848_v28  ;;  %v6076_v57 = vunpack.c.l.b16 %v6038_v1  ;;  %v9908_v1 = vld [vmem:[#allocation16 + $0x1a8] sm:$0xf]  ;;  %v9905_v12 = vor.u32 %v11070_v33, %v9902_v17  ;;  %v11120_v33 = vld [vmem:[#allocation16 + $0x334] sm:$0xf] }
 0xdaa   :  { %v11079_v25 = vld [vmem:[#allocation16 + $0x1e4] sm:$0xf0]  ;;  %v10110_v17 = vld [vmem:[#allocation16 + $0x370] sm:$0xf0] }
 0xdab   :  { %v12877_v39 = vadd.f32 %v12851_v37, %v5638_v11  ;;  %v6077_v3 = vrot.slane %v6076_v57, 7  ;;  %v10161_v37 = vor.u32 %v11134_v62, %v10158_v8  ;;  %v11071_v11 = vld [vmem:[#allocation16 + $0x1ac] sm:$0xf]  ;;  %v11062_v62 = vld [vmem:[#allocation16 + $0x15c] sm:$0xf0] }
 0xdac   :  { %v9910_v57 = vld [vmem:[#allocation16 + $0x1e8] sm:$0xf0]  ;;  %v11054_v8 = vld [vmem:[#allocation16 + $0x124] sm:$0xf] }
 0xdad   :  { %v6037_v44 = vpack.c.bf16 %v12877_v39, %v12877_v39 }
 0xdaf   :  { %v6075_v26 = vunpack.c.l.b16 %v6037_v44  ;;  %v9901_v44 = vor.u32 %v11078_v5, %v9900_v30  ;;  %v10108_v30 = vld [vmem:[#allocation16 + $0x330] sm:$0xf] }
 0xdb0   :  { %v11128_v5 = vld [vmem:[#allocation16 + $0x36c] sm:$0xf0] }
 0xdb1   :  { %v6078_v13 = vsel %vm4138_vm7, %v6077_v3, %v6075_v26  ;;  %v9909_v3 = vor.u32 %v11079_v25, %v9908_v1  ;;  %v9913_v26 = vor.u32 %v11071_v11, %v9910_v57  ;;  %v10116_v1 = vld [vmem:[#allocation16 + $0x338] sm:$0xf]  ;;  %v11121_v11 = vld [vmem:[#allocation16 + $0x33c] sm:$0xf] }
 0xdb2   :  { %v12882_v7 = vpack.c.b16 %v6078_v13, %v6078_v13  ;;  %v9846_v13 = vld [vmem:[#allocation16 + $0x168] sm:$0xf0]  ;;  %v11129_v25 = vld [vmem:[#allocation16 + $0x374] sm:$0xf0]  ;;  %v10118_v57 = vld [vmem:[#allocation16 + $0x378] sm:$0xf0] }
 0xdb4   :  { %6729 = vmatmul.bf16.vlgmr.msra.gmra.mxu3 %v12882_v7  ;;  %6742 = vmatmul.bf16.vlgmr.msra.gmra.mxu0 %v12882_v7 }
 0xdb5   :  { %6755 = vmatmul.bf16.vlgmr.msra.gmra.mxu1 %v12882_v7  ;;  %6768 = vmatmul.bf16.vlgmr.msra.gmra.mxu2 %v12882_v7 }
 0xdb6   :  { %6825 = vmatpush.bf16.msra.mxu3 %v10157_v15  ;;  %6838 = vmatpush.bf16.msra.mxu0 %v10161_v37  ;;  %v9837_v15 = vor.u32 %v11062_v62, %v9836_v55  ;;  %v9841_v37 = vor.u32 %v11054_v8, %v9838_v56  ;;  %v10044_v55 = vld [vmem:[#allocation16 + $0x2b0] sm:$0xf]  ;;  %v11104_v8 = vld [vmem:[#allocation16 + $0x2b4] sm:$0xf] }
 0xdb7   :  { %6851 = vmatpush.bf16.msra.mxu1 %v10165_v4  ;;  %6864 = vmatpush.bf16.msra.mxu2 %v10169_v36  ;;  %v9845_v4 = vor.u32 %v11063_v50, %v9844_v16  ;;  %v9849_v36 = vor.u32 %v11055_v63, %v9846_v13  ;;  %v11112_v62 = vld [vmem:[#allocation16 + $0x2ec] sm:$0xf0]  ;;  %v10046_v56 = vld [vmem:[#allocation16 + $0x2f0] sm:$0xf0]  ;;  %v10052_v16 = vld [vmem:[#allocation16 + $0x2b8] sm:$0xf] }
 0xdb8   :  { %v11113_v50 = vld [vmem:[#allocation16 + $0x2f4] sm:$0xf0]  ;;  %v11105_v63 = vld [vmem:[#allocation16 + $0x2bc] sm:$0xf] }
 0xdb9   :  { %v10054_v13 = vld [vmem:[#allocation16 + $0x2f8] sm:$0xf0] }
 0xdba   :  { %6826 = vmatpush.bf16.msra.mxu3 %v10093_v42  ;;  %6839 = vmatpush.bf16.msra.mxu0 %v10097_v18  ;;  %v9708_v42 = vld [vmem:[#allocation16 + $0x20] sm:$0xf]  ;;  %v9773_v18 = vor.u32 %v11046_v58, %v9772_v60  ;;  %v9980_v60 = vld [vmem:[#allocation16 + $0x230] sm:$0xf] }
 0xdbb   :  { %6852 = vmatpush.bf16.msra.mxu1 %v10101_v24  ;;  %6865 = vmatpush.bf16.msra.mxu2 %v10105_v47  ;;  %v11022_v24 = vld [vmem:[#allocation16 + $0x24] sm:$0xf]  ;;  %v11096_v58 = vld [vmem:[#allocation16 + $0x26c] sm:$0xf0] }
 0xdbc   :  { %v9710_v47 = vld [vmem:[#allocation16 + $0x60] sm:$0xf0] }
 0xdbd   :  { %v9713_v2 = vor.u32 %v11022_v24, %v9710_v47  ;;  %v9989_v24 = vor.u32 %v11097_v48, %v9988_v53  ;;  %v9993_v47 = vor.u32 %v11089_v27, %v9990_v38  ;;  %v11152_v53 = vld [vmem:[#allocation17 + $0x30] sm:$0xff] }
 0xdbe   :  { %6827 = vmatpush.bf16.msra.mxu3 %v10029_v40  ;;  %6840 = vmatpush.bf16.msra.mxu0 %v10033_v10  ;;  %v10172_v40 = vld [vmem:[#allocation16 + $0x3b0] sm:$0xf] }
 0xdbf   :  { %6853 = vmatpush.bf16.msra.mxu1 %v10037_v31  ;;  %6866 = vmatpush.bf16.msra.mxu2 %v10041_v14  ;;  %v11144_v10 = vld [vmem:[#allocation16 + $0x3ec] sm:$0xf0]  ;;  %v10180_v31 = vld [vmem:[#allocation16 + $0x3b8] sm:$0xf]  ;;  %v9709_v14 = vor.u32 %v11030_v21, %v9708_v42  ;;  %v9981_v42 = vor.u32 %v11096_v58, %v9980_v60 }
 0xdc0   :  { %v11080_v21 = vld [vmem:[#allocation16 + $0x1ec] sm:$0xf0] }
 0xdc1   :  { %v11160_v48 = vld [vmem:[#allocation17 + $0x70] sm:$0xff] }
 0xdc2   :  { %6828 = vmatpush.bf16.msra.mxu3 %v9965_v22  ;;  %6841 = vmatpush.bf16.msra.mxu0 %v9969_v32  ;;  %v10173_v22 = vor.u32 %v11144_v10, %v10172_v40  ;;  %v10177_v32 = vor.u32 %v11136_v54, %v10174_v51  ;;  %v9852_v54 = vld [vmem:[#allocation16 + $0x130] sm:$0xf] }
 0xdc3   :  { %6854 = vmatpush.bf16.msra.mxu1 %v9973_v6  ;;  %6867 = vmatpush.bf16.msra.mxu2 %v9977_v52  ;;  %v10181_v6 = vor.u32 %v11145_v20, %v10180_v31  ;;  %v10185_v52 = vor.u32 %v11137_v45, %v10182_v35  ;;  %v11064_v51 = vld [vmem:[#allocation16 + $0x16c] sm:$0xf0]  ;;  %v9925_v31 = vor.u32 %v11081_v43, %v9924_v0  ;;  %v9854_v20 = vld [vmem:[#allocation16 + $0x170] sm:$0xf0]  ;;  %v9860_v45 = vld [vmem:[#allocation16 + $0x138] sm:$0xf] }
 0xdc4   :  { %6781 = vmatmul.bf16.vlgmr.msrb.gmra.mxu3 %v12882_v7  ;;  %6794 = vmatmul.bf16.vlgmr.msrb.gmra.mxu0 %v12882_v7  ;;  %v11065_v35 = vld [vmem:[#allocation16 + $0x174] sm:$0xf0]  ;;  %v11168_v27 = vld [vmem:[#allocation17 + $0xb0] sm:$0xff] }
 0xdc5   :  { %6807 = vmatmul.bf16.vlgmr.msrb.gmra.mxu1 %v12882_v7  ;;  %6820 = vmatmul.bf16.vlgmr.msrb.gmra.mxu2 %v12882_v7  ;;  %v11176_v38 = vld [vmem:[#allocation17 + $0xf0] sm:$0xff]  ;;  %v11157_v0 = vld [vmem:[#allocation17 + $0x58] sm:$0xff] }
 0xdc6   :  { %6829 = vmatpush.bf16.msra.mxu3 %v9901_v44  ;;  %6842 = vmatpush.bf16.msra.mxu0 %v9905_v12  ;;  %v10109_v44 = vor.u32 %v11128_v5, %v10108_v30  ;;  %v10113_v12 = vor.u32 %v11120_v33, %v10110_v17  ;;  %v9788_v30 = vld [vmem:[#allocation16 + $0xb0] sm:$0xf]  ;;  %v11040_v33 = vld [vmem:[#allocation16 + $0xb4] sm:$0xf]  ;;  %v11165_v43 = vld [vmem:[#allocation17 + $0x98] sm:$0xff] }
 0xdc7   :  { %6855 = vmatpush.bf16.msra.mxu1 %v9909_v3  ;;  %6868 = vmatpush.bf16.msra.mxu2 %v9913_v26  ;;  %v10117_v3 = vor.u32 %v11129_v25, %v10116_v1  ;;  %v10121_v26 = vor.u32 %v11121_v11, %v10118_v57  ;;  %v11048_v5 = vld [vmem:[#allocation16 + $0xec] sm:$0xf0]  ;;  %v9790_v17 = vld [vmem:[#allocation16 + $0xf0] sm:$0xf0]  ;;  %v9796_v1 = vld [vmem:[#allocation16 + $0xb8] sm:$0xf] }
 0xdc8   :  { %v11049_v25 = vld [vmem:[#allocation16 + $0xf4] sm:$0xf0]  ;;  %v11041_v11 = vld [vmem:[#allocation16 + $0xbc] sm:$0xf] }
 0xdc9   :  { %v9798_v57 = vld [vmem:[#allocation16 + $0xf8] sm:$0xf0] }
 0xdca   :  { %6830 = vmatpush.bf16.msra.mxu3 %v9837_v15  ;;  %6843 = vmatpush.bf16.msra.mxu0 %v9841_v37  ;;  %v10045_v15 = vor.u32 %v11112_v62, %v10044_v55  ;;  %v10049_v37 = vor.u32 %v11104_v8, %v10046_v56  ;;  %v9724_v55 = vld [vmem:[#allocation16 + $0x30] sm:$0xf]  ;;  %v11024_v8 = vld [vmem:[#allocation16 + $0x34] sm:$0xf] }
 0xdcb   :  { %6856 = vmatpush.bf16.msra.mxu1 %v9845_v4  ;;  %6869 = vmatpush.bf16.msra.mxu2 %v9849_v36  ;;  %v10053_v4 = vor.u32 %v11113_v50, %v10052_v16  ;;  %v10057_v36 = vor.u32 %v11105_v63, %v10054_v13  ;;  %v11032_v62 = vld [vmem:[#allocation16 + $0x6c] sm:$0xf0]  ;;  %v9726_v56 = vld [vmem:[#allocation16 + $0x70] sm:$0xf0]  ;;  %v9732_v16 = vld [vmem:[#allocation16 + $0x38] sm:$0xf] }
 0xdcc   :  { %v11033_v50 = vld [vmem:[#allocation16 + $0x74] sm:$0xf0]  ;;  %v11025_v63 = vld [vmem:[#allocation16 + $0x3c] sm:$0xf] }
 0xdcd   :  { %v9734_v13 = vld [vmem:[#allocation16 + $0x78] sm:$0xf0]  ;;  %v9733_v60 = vor.u32 %v11033_v50, %v9732_v16 }
 0xdce   :  { %6831 = vmatpush.bf16.msra.mxu3 %v9773_v18  ;;  %6844 = vmatpush.bf16.msra.mxu0 %v9777_v9  ;;  %v9985_v18 = vor.u32 %v11088_v19, %v9982_v34  ;;  %v9916_v9 = vld [vmem:[#allocation16 + $0x1b0] sm:$0xf]  ;;  %v9737_v58 = vor.u32 %v11025_v63, %v9734_v13  ;;  %v11169_v19 = vld [vmem:[#allocation17 + $0xb8] sm:$0xff] }
 0xdcf   :  { %6857 = vmatpush.bf16.msra.mxu1 %v9781_v29  ;;  %6870 = vmatpush.bf16.msra.mxu2 %v9785_v41  ;;  %v11072_v29 = vld [vmem:[#allocation16 + $0x1b4] sm:$0xf]  ;;  %v9917_v40 = vor.u32 %v11080_v21, %v9916_v9  ;;  %v11177_v34 = vld [vmem:[#allocation17 + $0xf8] sm:$0xff]  ;;  %v11167_v9 = vld [vmem:[#allocation17 + $0xa8] sm:$0xff] }
 0xdd0   :  { %v9918_v41 = vld [vmem:[#allocation16 + $0x1f0] sm:$0xf0]  ;;  %v11175_v21 = vld [vmem:[#allocation17 + $0xe8] sm:$0xff]  ;;  %v11205_v16 = vld [vmem:[#allocation17 + $0x1d8] sm:$0xff] }
 0xdd1   :  { %v9921_v10 = vor.u32 %v11072_v29, %v9918_v41  ;;  %v11166_v29 = vld [vmem:[#allocation17 + $0xa0] sm:$0xff]  ;;  %v11149_v41 = vld [vmem:[#allocation17 + $0x18] sm:$0xff]  ;;  %v11180_v63 = vld [vmem:[#allocation17 + $0x110] sm:$0xff] }
 0xdd2   :  { %6832 = vmatpush.bf16.msra.mxu3 %v9709_v14  ;;  %6845 = vmatpush.bf16.msra.mxu0 %v9713_v2  ;;  %v9929_v14 = vor.u32 %v11073_v23, %v9926_v46  ;;  %v11056_v2 = vld [vmem:[#allocation16 + $0x134] sm:$0xf]  ;;  %v11173_v23 = vld [vmem:[#allocation17 + $0xd8] sm:$0xff] }
 0xdd3   :  { %6858 = vmatpush.bf16.msra.mxu1 %v9717_v49  ;;  %6871 = vmatpush.bf16.msra.mxu2 %v9721_v59  ;;  %v11057_v49 = vld [vmem:[#allocation16 + $0x13c] sm:$0xf]  ;;  %v11148_v46 = vld [vmem:[#allocation17 + $0x10] sm:$0xff] }
 0xdd4   :  { %v9862_v59 = vld [vmem:[#allocation16 + $0x178] sm:$0xf0]  ;;  %v11188_v13 = vld [vmem:[#allocation17 + $0x150] sm:$0xff] }
 0xdd5   :  { %6833 = vmatmul.bf16.vlgmr.msra.gmra.mxu3 %v12882_v7  ;;  %6846 = vmatmul.bf16.vlgmr.msra.gmra.mxu0 %v12882_v7 }
 0xdd6   :  { %6877 = vmatpush.bf16.msrb.mxu3 %v10173_v22  ;;  %6890 = vmatpush.bf16.msrb.mxu0 %v10177_v32  ;;  %v9853_v22 = vor.u32 %v11064_v51, %v9852_v54  ;;  %v9857_v32 = vor.u32 %v11056_v2, %v9854_v20  ;;  %v11172_v54 = vld [vmem:[#allocation17 + $0xd0] sm:$0xff]  ;;  %v11147_v51 = vld [vmem:[#allocation17 + $0x8] sm:$0xff]  ;;  %v11146_v20 = vld [vmem:[#allocation17] sm:$0xff] }
 0xdd7   :  { %6903 = vmatpush.bf16.msrb.mxu1 %v10181_v6  ;;  %6916 = vmatpush.bf16.msrb.mxu2 %v10185_v52  ;;  %v9861_v6 = vor.u32 %v11065_v35, %v9860_v45  ;;  %v9865_v52 = vor.u32 %v11057_v49, %v9862_v59  ;;  %v11171_v2 = vld [vmem:[#allocation17 + $0xc8] sm:$0xff]  ;;  %v11154_v45 = vld [vmem:[#allocation17 + $0x40] sm:$0xff]  ;;  %v11185_v59 = vld [vmem:[#allocation17 + $0x138] sm:$0xff] }
 0xdd8   :  { %6859 = vmatmul.bf16.vlgmr.msra.gmra.mxu1 %v12882_v7  ;;  %6872 = vmatmul.bf16.vlgmr.msra.gmra.mxu2 %v12882_v7  ;;  %v11162_v35 = vld [vmem:[#allocation17 + $0x80] sm:$0xff] }
 0xdd9   :  { %v11170_v49 = vld [vmem:[#allocation17 + $0xc0] sm:$0xff] }
 0xdda   :  { %6878 = vmatpush.bf16.msrb.mxu3 %v10109_v44  ;;  %6891 = vmatpush.bf16.msrb.mxu0 %v10113_v12  ;;  %v9789_v44 = vor.u32 %v11048_v5, %v9788_v30  ;;  %v9793_v12 = vor.u32 %v11040_v33, %v9790_v17  ;;  %v11209_v30 = vld [vmem:[#allocation17 + $0x1f8] sm:$0xff]  ;;  %v11184_v5 = vld [vmem:[#allocation17 + $0x130] sm:$0xff]  ;;  %v11183_v17 = vld [vmem:[#allocation17 + $0x128] sm:$0xff] }
 0xddb   :  { %6904 = vmatpush.bf16.msrb.mxu1 %v10117_v3  ;;  %6917 = vmatpush.bf16.msrb.mxu2 %v10121_v26  ;;  %v9797_v3 = vor.u32 %v11049_v25, %v9796_v1  ;;  %v9801_v26 = vor.u32 %v11041_v11, %v9798_v57  ;;  %v11208_v33 = vld [vmem:[#allocation17 + $0x1f0] sm:$0xff]  ;;  %v11191_v1 = vld [vmem:[#allocation17 + $0x168] sm:$0xff]  ;;  %v11182_v57 = vld [vmem:[#allocation17 + $0x120] sm:$0xff] }
 0xddc   :  { %v11199_v25 = vld [vmem:[#allocation17 + $0x1a8] sm:$0xff] }
 0xddd   :  { %v11207_v11 = vld [vmem:[#allocation17 + $0x1e8] sm:$0xff] }
 0xdde   :  { %6879 = vmatpush.bf16.msrb.mxu3 %v10045_v15  ;;  %6892 = vmatpush.bf16.msrb.mxu0 %v10049_v37  ;;  %v9725_v15 = vor.u32 %v11032_v62, %v9724_v55  ;;  %v9729_v37 = vor.u32 %v11024_v8, %v9726_v56  ;;  %v11206_v55 = vld [vmem:[#allocation17 + $0x1e0] sm:$0xff]  ;;  %v11189_v8 = vld [vmem:[#allocation17 + $0x158] sm:$0xff] }
 0xddf   :  { %6905 = vmatpush.bf16.msrb.mxu1 %v10053_v4  ;;  %6918 = vmatpush.bf16.msrb.mxu2 %v10057_v36  ;;  %v11153_v4 = vld [vmem:[#allocation17 + $0x38] sm:$0xff] }
 0xde0   :  { %v11161_v36 = vld [vmem:[#allocation17 + $0x78] sm:$0xff] }
 0xde1   :  { %v11197_v56 = vld [vmem:[#allocation17 + $0x198] sm:$0xff] }
 0xde2   :  { %6880 = vmatpush.bf16.msrb.mxu3 %v9981_v42  ;;  %6893 = vmatpush.bf16.msrb.mxu0 %v9985_v18  ;;  %v11151_v42 = vld [vmem:[#allocation17 + $0x28] sm:$0xff] }
 0xde3   :  { %6906 = vmatpush.bf16.msrb.mxu1 %v9989_v24  ;;  %6919 = vmatpush.bf16.msrb.mxu2 %v9993_v47  ;;  %v11159_v18 = vld [vmem:[#allocation17 + $0x68] sm:$0xff]  ;;  %v11150_v24 = vld [vmem:[#allocation17 + $0x20] sm:$0xff] }
 0xde4   :  { %v11158_v47 = vld [vmem:[#allocation17 + $0x60] sm:$0xff] }
 0xde6   :  { %6881 = vmatpush.bf16.msrb.mxu3 %v9917_v40  ;;  %6894 = vmatpush.bf16.msrb.mxu0 %v9921_v10  ;;  %v11156_v40 = vld [vmem:[#allocation17 + $0x50] sm:$0xff] }
 0xde7   :  { %6907 = vmatpush.bf16.msrb.mxu1 %v9925_v31  ;;  %6920 = vmatpush.bf16.msrb.mxu2 %v9929_v14  ;;  %v11164_v10 = vld [vmem:[#allocation17 + $0x90] sm:$0xff]  ;;  %v11155_v31 = vld [vmem:[#allocation17 + $0x48] sm:$0xff] }
 0xde8   :  { %v11163_v14 = vld [vmem:[#allocation17 + $0x88] sm:$0xff] }
 0xdea   :  { %6882 = vmatpush.bf16.msrb.mxu3 %v9853_v22  ;;  %6895 = vmatpush.bf16.msrb.mxu0 %v9857_v32  ;;  %v11193_v22 = vld [vmem:[#allocation17 + $0x178] sm:$0xff] }
 0xdeb   :  { %6908 = vmatpush.bf16.msrb.mxu1 %v9861_v6  ;;  %6921 = vmatpush.bf16.msrb.mxu2 %v9865_v52  ;;  %v11201_v32 = vld [vmem:[#allocation17 + $0x1b8] sm:$0xff]  ;;  %v11192_v6 = vld [vmem:[#allocation17 + $0x170] sm:$0xff] }
 0xdec   :  { %v11200_v52 = vld [vmem:[#allocation17 + $0x1b0] sm:$0xff] }
 0xdee   :  { %6883 = vmatpush.bf16.msrb.mxu3 %v9789_v44  ;;  %6896 = vmatpush.bf16.msrb.mxu0 %v9793_v12  ;;  %v11190_v44 = vld [vmem:[#allocation17 + $0x160] sm:$0xff] }
 0xdef   :  { %6909 = vmatpush.bf16.msrb.mxu1 %v9797_v3  ;;  %6922 = vmatpush.bf16.msrb.mxu2 %v9801_v26  ;;  %v11198_v12 = vld [vmem:[#allocation17 + $0x1a0] sm:$0xff]  ;;  %v11181_v26 = vld [vmem:[#allocation17 + $0x118] sm:$0xff] }
 0xdf2   :  { %6884 = vmatpush.bf16.msrb.mxu3 %v9725_v15  ;;  %6897 = vmatpush.bf16.msrb.mxu0 %v9729_v37  ;;  %v11196_v15 = vld [vmem:[#allocation17 + $0x190] sm:$0xff] }
 0xdf3   :  { %6910 = vmatpush.bf16.msrb.mxu1 %v9733_v60  ;;  %6923 = vmatpush.bf16.msrb.mxu2 %v9737_v58  ;;  %v11204_v60 = vld [vmem:[#allocation17 + $0x1d0] sm:$0xff] }
 0xdf5   :  { %6885 = vmatmul.bf16.vlgmr.msrb.gmra.mxu3 %v12882_v7  ;;  %6898 = vmatmul.bf16.vlgmr.msrb.gmra.mxu0 %v12882_v7 }
 0xdf6   :  { %8008 = vmatpush.bf16.msra.mxu3 %v11153_v4  ;;  %8021 = vmatpush.bf16.msra.mxu0 %v11161_v36  ;;  %v11179_v36 = vld [vmem:[#allocation17 + $0x108] sm:$0xff] }
 0xdf7   :  { %6911 = vmatmul.bf16.vlgmr.msrb.gmra.mxu1 %v12882_v7  ;;  %6924 = vmatmul.bf16.vlgmr.msrb.gmra.mxu2 %v12882_v7  ;;  %v11174_v7 = vld [vmem:[#allocation17 + $0xe0] sm:$0xff] }
 0xdf8   :  { %8034 = vmatpush.bf16.msra.mxu1 %v11169_v19  ;;  %8047 = vmatpush.bf16.msra.mxu2 %v11177_v34  ;;  %v11187_v19 = vld [vmem:[#allocation17 + $0x148] sm:$0xff] }
 0xdf9   :  { %v11195_v34 = vld [vmem:[#allocation17 + $0x188] sm:$0xff] }
 0xdfa   :  { %8009 = vmatpush.bf16.msra.mxu3 %v11152_v53  ;;  %8022 = vmatpush.bf16.msra.mxu0 %v11160_v48  ;;  %v11203_v53 = vld [vmem:[#allocation17 + $0x1c8] sm:$0xff]  ;;  %v5778_v48 = vld [vmem:[%s13050_s15] sm:$0xff] }
 0xdfc   :  { %8035 = vmatpush.bf16.msra.mxu1 %v11168_v27  ;;  %8048 = vmatpush.bf16.msra.mxu2 %v11176_v38  ;;  %v6044_v27 = vperm.slane %v5778_v48, 3 }
 0xdfe   :  { %8010 = vmatpush.bf16.msra.mxu3 %v11151_v42  ;;  %8023 = vmatpush.bf16.msra.mxu0 %v11159_v18  ;;  %v11178_v42 = vld [vmem:[#allocation17 + $0x100] sm:$0xff] }
 0xdff   :  { %v11186_v18 = vld [vmem:[#allocation17 + $0x140] sm:$0xff] }
 0xe00   :  { %8036 = vmatpush.bf16.msra.mxu1 %v11167_v9  ;;  %8049 = vmatpush.bf16.msra.mxu2 %v11175_v21  ;;  %v11194_v9 = vld [vmem:[#allocation17 + $0x180] sm:$0xff] }
 0xe02   :  { %8011 = vmatpush.bf16.msra.mxu3 %v11150_v24  ;;  %8024 = vmatpush.bf16.msra.mxu0 %v11158_v47  ;;  %v11202_v24 = vld [vmem:[#allocation17 + $0x1c0] sm:$0xff]  ;;  %v6043_v47 = vperm.slane %v5778_v48, 2 }
 0xe04   :  { %8037 = vmatpush.bf16.msra.mxu1 %v11166_v29  ;;  %8050 = vmatpush.bf16.msra.mxu2 %v11174_v7  ;;  %v6042_v7 = vperm.slane %v5778_v48, 1 }
 0xe06   :  { %8012 = vmatpush.bf16.msra.mxu3 %v11149_v41  ;;  %8025 = vmatpush.bf16.msra.mxu0 %v11157_v0  ;;  %v6046_v41 = vperm.slane %v5778_v48, 5 }
 0xe08   :  { %8038 = vmatpush.bf16.msra.mxu1 %v11165_v43  ;;  %8051 = vmatpush.bf16.msra.mxu2 %v11173_v23  ;;  %v6047_v23 = vperm.slane %v5778_v48, 6 }
 0xe0a   :  { %8013 = vmatpush.bf16.msra.mxu3 %v11148_v46  ;;  %8026 = vmatpush.bf16.msra.mxu0 %v11156_v40  ;;  %v6045_v46 = vperm.slane %v5778_v48, 4 }
 0xe0c   :  { %8039 = vmatpush.bf16.msra.mxu1 %v11164_v10  ;;  %8052 = vmatpush.bf16.msra.mxu2 %v11172_v54  ;;  %v6041_v10 = vperm.slane %v5778_v48, 0  ;;  %v6048_v54 = vperm.slane %v5778_v48, 7 }
 0xe0e   :  { %8014 = vmatpush.bf16.msra.mxu3 %v11147_v51  ;;  %8027 = vmatpush.bf16.msra.mxu0 %v11155_v31 }
 0xe10   :  { %8040 = vmatpush.bf16.msra.mxu1 %v11163_v14  ;;  %8053 = vmatpush.bf16.msra.mxu2 %v11171_v2 }
 0xe12   :  { %8015 = vmatpush.bf16.msra.mxu3 %v11146_v20  ;;  %8028 = vmatpush.bf16.msra.mxu0 %v11154_v45 }
 0xe14   :  { %8041 = vmatpush.bf16.msra.mxu1 %v11162_v35  ;;  %8054 = vmatpush.bf16.msra.mxu2 %v11170_v49 }
 0xe16   :  { %8060 = vmatpush.bf16.msrb.mxu3 %v11185_v59  ;;  %8073 = vmatpush.bf16.msrb.mxu0 %v11193_v22 }
 0xe18   :  { %8086 = vmatpush.bf16.msrb.mxu1 %v11201_v32  ;;  %8099 = vmatpush.bf16.msrb.mxu2 %v11209_v30 }
 0xe1a   :  { %8061 = vmatpush.bf16.msrb.mxu3 %v11184_v5  ;;  %8074 = vmatpush.bf16.msrb.mxu0 %v11192_v6 }
 0xe1c   :  { %8087 = vmatpush.bf16.msrb.mxu1 %v11200_v52  ;;  %8100 = vmatpush.bf16.msrb.mxu2 %v11208_v33 }
 0xe1e   :  { %8062 = vmatpush.bf16.msrb.mxu3 %v11183_v17  ;;  %8075 = vmatpush.bf16.msrb.mxu0 %v11191_v1 }
 0xe20   :  { %8088 = vmatpush.bf16.msrb.mxu1 %v11199_v25  ;;  %8101 = vmatpush.bf16.msrb.mxu2 %v11207_v11 }
 0xe22   :  { %8063 = vmatpush.bf16.msrb.mxu3 %v11182_v57  ;;  %8076 = vmatpush.bf16.msrb.mxu0 %v11190_v44 }
 0xe24   :  { %8089 = vmatpush.bf16.msrb.mxu1 %v11198_v12  ;;  %8102 = vmatpush.bf16.msrb.mxu2 %v11206_v55 }
 0xe26   :  { %8064 = vmatpush.bf16.msrb.mxu3 %v11181_v26  ;;  %8077 = vmatpush.bf16.msrb.mxu0 %v11189_v8 }
 0xe28   :  { %8090 = vmatpush.bf16.msrb.mxu1 %v11197_v56  ;;  %8103 = vmatpush.bf16.msrb.mxu2 %v11205_v16 }
 0xe2a   :  { %8065 = vmatpush.bf16.msrb.mxu3 %v11180_v63  ;;  %8078 = vmatpush.bf16.msrb.mxu0 %v11188_v13 }
 0xe2c   :  { %8091 = vmatpush.bf16.msrb.mxu1 %v11196_v15  ;;  %8104 = vmatpush.bf16.msrb.mxu2 %v11204_v60 }
 0xe2e   :  { %8066 = vmatpush.bf16.msrb.mxu3 %v11179_v36  ;;  %8079 = vmatpush.bf16.msrb.mxu0 %v11187_v19 }
 0xe30   :  { %8092 = vmatpush.bf16.msrb.mxu1 %v11195_v34  ;;  %8105 = vmatpush.bf16.msrb.mxu2 %v11203_v53 }
 0xe31   :  { %v6743_v62 = vpop.f32.mrf.mxu0 }
 0xe32   :  { %v6756_v3 = vpop.f32.mrf.mxu1  ;;  %8067 = vmatpush.bf16.msrb.mxu3 %v11178_v42  ;;  %8080 = vmatpush.bf16.msrb.mxu0 %v11186_v18  ;;  %v6744_v51 = vadd.f32 %v6743_v62, %v6042_v7 }
 0xe33   :  { %v6757_v40 = vadd.f32 %v6756_v3, %v6043_v47 }
 0xe34   :  { %8093 = vmatpush.bf16.msrb.mxu1 %v11194_v9  ;;  %8106 = vmatpush.bf16.msrb.mxu2 %v11202_v24  ;;  %v6945_v30 = vrot.slane %v6744_v51, 7 }
 0xe35   :  { %v6946_v49 = vrot.slane %v6757_v40, 6 }
 0xe37   :  { %v6730_v50 = vpop.f32.mrf.mxu3 }
 0xe38   :  { %v6769_v37 = vpop.f32.mrf.mxu2  ;;  %v6731_v59 = vadd.f32 %v6730_v50, %v6041_v10 }
 0xe39   :  { %v6745_v58 = vpop.f32.mrf.mxu0  ;;  %v6770_v43 = vadd.f32 %v6769_v37, %v6044_v27 }
 0xe3a   :  { %v6758_v4 = vpop.f32.mrf.mxu1  ;;  %v6959_v44 = vsel %vm5589_vm15, %v6731_v59, %v6945_v30  ;;  %v6979_v12 = vsel %vm4138_vm7, %v6731_v59, %v6945_v30 }
 0xe3b   :  { %v6947_v14 = vrot.slane %v6770_v43, 5 }
 0xe3d   :  { %v6961_v33 = vsel %vm6960_vm6, %v6946_v49, %v6947_v14  ;;  %v6981_v17 = vsel %vm6980_vm9, %v6946_v49, %v6947_v14 }
 0xe3e   :  { %v6963_v3 = vsel %vm6962_vm8, %v6959_v44, %v6961_v33  ;;  %v6983_v26 = vsel %vm6982_vm10, %v6979_v12, %v6981_v17  ;;  %v11216_v44 = vld [vmem:[#allocation17 + $0x230] sm:$0xff] }
 0xe3f   :  { %v6732_v38 = vpop.f32.mrf.mxu3 }
 0xe40   :  { %v6771_v21 = vpop.f32.mrf.mxu2 }
 0xe41   :  { %v6795_v29 = vpop.f32.mrf.mxu0 }
 0xe42   :  { %v6808_v0 = vpop.f32.mrf.mxu1  ;;  %v6796_v31 = vadd.f32 %v6795_v29, %v6046_v41 }
 0xe43   :  { %v6809_v2 = vadd.f32 %v6808_v0, %v6047_v23 }
 0xe44   :  { %v6949_v5 = vrot.slane %v6796_v31, 3 }
 0xe45   :  { %v6950_v1 = vrot.slane %v6809_v2, 2 }
 0xe47   :  { %v6782_v20 = vpop.f32.mrf.mxu3 }
 0xe48   :  { %v6783_v45 = vadd.f32 %v6782_v20, %v6045_v46  ;;  %v6821_v35 = vpop.f32.mrf.mxu2 }
 0xe49   :  { %v6822_v22 = vadd.f32 %v6821_v35, %v6048_v54  ;;  %v6797_v32 = vpop.f32.mrf.mxu0 }
 0xe4a   :  { %v6948_v6 = vrot.slane %v6783_v45, 4  ;;  %v6810_v52 = vpop.f32.mrf.mxu1 }
 0xe4b   :  { %v6951_v25 = vrot.slane %v6822_v22, 1  ;;  %v11217_v22 = vld [vmem:[#allocation17 + $0x238] sm:$0xff] }
 0xe4c   :  { %v6965_v11 = vsel %vm6964_vm11, %v6948_v6, %v6949_v5  ;;  %v6985_v57 = vsel %vm6984_vm12, %v6948_v6, %v6949_v5  ;;  %v11225_v6 = vld [vmem:[#allocation17 + $0x278] sm:$0xff] }
 0xe4d   :  { %v6967_v55 = vsel %vm6966_vm13, %v6950_v1, %v6951_v25  ;;  %v6987_v62 = vsel %vm6986_vm0, %v6951_v25, %v6950_v1  ;;  %v11233_v52 = vld [vmem:[#allocation17 + $0x2b8] sm:$0xff] }
 0xe4e   :  { %v6969_v8 = vsel %vm6968_vm14, %v6965_v11, %v6967_v55  ;;  %v6989_v56 = vsel %vm6988_vm1, %v6985_v57, %v6987_v62 }
 0xe4f   :  { %v6971_v16 = vsel %vm6970_vm2, %v6963_v3, %v6969_v8  ;;  %v6991_v50 = vsel %vm6990_vm3, %v6983_v26, %v6989_v56  ;;  %v6784_v63 = vpop.f32.mrf.mxu3  ;;  %v11224_v3 = vld [vmem:[#allocation17 + $0x270] sm:$0xff] }
 0xe50   :  { %v6992_v13 = vrot.slane %v6991_v50, 1  ;;  %v12917_v15 = vmax.f32 %v6971_v16, 0.0  ;;  %v6823_v37 = vpop.f32.mrf.mxu2  ;;  %v11241_v50 = vld [vmem:[#allocation17 + $0x2f8] sm:$0xff] }
 0xe52   :  { %v12919_v60 = vmax.f32 %v6992_v13, 0.0  ;;  %v7013_v58 = vperm.slane %v12917_v15, 0  ;;  %v7014_v4 = vperm.slane %v12917_v15, 1  ;;  %v12923_v36 = vpop.f32.mrf.mxu0  ;;  %v7015_v19 = vperm.slane %v12917_v15, 2  ;;  %v11232_v13 = vld [vmem:[#allocation17 + $0x2b0] sm:$0xff] }
 0xe53   :  { %v7016_v7 = vperm.slane %v12917_v15, 3  ;;  %v7017_v12 = vperm.slane %v12917_v15, 4  ;;  %v7018_v55 = vperm.slane %v12917_v15, 5  ;;  %v7019_v8 = vperm.slane %v12917_v15, 6 }
 0xe54   :  { %v7029_v53 = vperm.slane %v12919_v60, 0  ;;  %v7030_v48 = vperm.slane %v12919_v60, 1  ;;  %v7077_v27 = vpack.c.bf16 %v7013_v58, %v7013_v58  ;;  %v7078_v38 = vpack.c.bf16 %v7014_v4, %v7014_v4 }
 0xe55   :  { %v12926_v34 = vpop.f32.mrf.mxu1  ;;  %v7031_v42 = vperm.slane %v12919_v60, 2  ;;  %v7079_v21 = vpack.c.bf16 %v7015_v19, %v7015_v19  ;;  %v7032_v41 = vperm.slane %v12919_v60, 3  ;;  %v7033_v31 = vperm.slane %v12919_v60, 4 }
 0xe56   :  { %v7093_v18 = vpack.c.bf16 %v7029_v53, %v7029_v53  ;;  %v7094_v9 = vpack.c.bf16 %v7030_v48, %v7030_v48  ;;  %v7144_v43 = vunpack.c.l.b16 %v7077_v27  ;;  %v7145_v23 = vunpack.c.l.b16 %v7078_v38  ;;  %v11215_v53 = vld [vmem:[#allocation17 + $0x228] sm:$0xff] }
 0xe57   :  { %v7095_v24 = vpack.c.bf16 %v7031_v42, %v7031_v42  ;;  %v7096_v51 = vpack.c.bf16 %v7032_v41, %v7032_v41  ;;  %v7146_v2 = vunpack.c.l.b16 %v7079_v21  ;;  %v7080_v59 = vpack.c.bf16 %v7016_v7, %v7016_v7  ;;  %v11240_v21 = vld [vmem:[#allocation17 + $0x2f0] sm:$0xff]  ;;  %v11214_v41 = vld [vmem:[#allocation17 + $0x220] sm:$0xff] }
 0xe58   :  { %v7160_v47 = vunpack.c.l.b16 %v7093_v18  ;;  %v7161_v29 = vunpack.c.l.b16 %v7094_v9  ;;  %v12933_v0 = vpop.f32.mrf.mxu3  ;;  %v7097_v1 = vpack.c.bf16 %v7033_v31, %v7033_v31  ;;  %v7034_v25 = vperm.slane %v12919_v60, 5  ;;  %v11223_v18 = vld [vmem:[#allocation17 + $0x268] sm:$0xff] }
 0xe59   :  { %v7162_v46 = vunpack.c.l.b16 %v7095_v24  ;;  %v7163_v17 = vunpack.c.l.b16 %v7096_v51  ;;  %v7147_v11 = vunpack.c.l.b16 %v7080_v59  ;;  %v7035_v56 = vperm.slane %v12919_v60, 6  ;;  %v11231_v24 = vld [vmem:[#allocation17 + $0x2a8] sm:$0xff]  ;;  %v11213_v59 = vld [vmem:[#allocation17 + $0x218] sm:$0xff] }
 0xe5a   :  { %v7176_v10 = vrot.slane %v7160_v47, 7  ;;  %v7178_v54 = vrot.slane %v7161_v29, 7  ;;  %v6849_v14 = vpop.f32.mrf.mxu0  ;;  %v7098_v26 = vpack.c.bf16 %v7034_v25, %v7034_v25  ;;  %v7164_v37 = vunpack.c.l.b16 %v7097_v1  ;;  %v11239_v31 = vld [vmem:[#allocation17 + $0x2e8] sm:$0xff] }
 0xe5b   :  { %v12935_v40 = vpop.f32.mrf.mxu2  ;;  %v7180_v20 = vrot.slane %v7162_v46, 7  ;;  %v7182_v57 = vrot.slane %v7163_v17, 7  ;;  %v7036_v58 = vperm.slane %v12919_v60, 7  ;;  %v7081_v48 = vpack.c.bf16 %v7017_v12, %v7017_v12  ;;  %v11230_v14 = vld [vmem:[#allocation17 + $0x2a0] sm:$0xff]  ;;  %v11229_v17 = vld [vmem:[#allocation17 + $0x298] sm:$0xff] }
 0xe5c   :  { %v7177_v35 = vsel %vm4138_vm7, %v7176_v10, %v7144_v43  ;;  %v7179_v49 = vsel %vm4138_vm7, %v7178_v54, %v7145_v23  ;;  %v7165_v19 = vunpack.c.l.b16 %v7098_v26  ;;  %v7082_v27 = vpack.c.bf16 %v7018_v55, %v7018_v55  ;;  %v11222_v54 = vld [vmem:[#allocation17 + $0x260] sm:$0xff] }
 0xe5d   :  { %v6862_v45 = vpop.f32.mrf.mxu1  ;;  %v7208_v32 = vpack.c.b16 %v7177_v35, %v7177_v35  ;;  %v7209_v30 = vpack.c.b16 %v7179_v49, %v7179_v49  ;;  %v7181_v5 = vsel %vm4138_vm7, %v7180_v20, %v7146_v2  ;;  %v7183_v16 = vsel %vm4138_vm7, %v7182_v57, %v7147_v11  ;;  %v5779_v35 = vld [vmem:[%s13050_s15 + $0x8] sm:$0xff]  ;;  %v11212_v57 = vld [vmem:[#allocation17 + $0x210] sm:$0xff]  ;;  %s11831_s15 = smov [#allocation23]  }
 0xe5e   :  { %v7210_v33 = vpack.c.b16 %v7181_v5, %v7181_v5  ;;  %v7211_v4 = vpack.c.b16 %v7183_v16, %v7183_v16  ;;  %v7099_v38 = vpack.c.bf16 %v7035_v56, %v7035_v56  ;;  %v7100_v42 = vpack.c.bf16 %v7036_v58, %v7036_v58  ;;  %v11221_v5 = vld [vmem:[#allocation17 + $0x258] sm:$0xff]  ;;  %v11228_v56 = vld [vmem:[#allocation17 + $0x290] sm:$0xff]  ;;  %v11211_v58 = vld [vmem:[#allocation17 + $0x208] sm:$0xff]  ;;  %s8340_s12 = sshll.u32 %s11831_s15, 4  ;;  %s8341_s12 = int_to_ptr.vmem [resolvable:$true] %s8340_s12 }
 0xe5f   :  { %8016 = vmatmul.bf16.vlgmr.msra.gmra.mxu3 %v7208_v32  ;;  %8029 = vmatmul.bf16.vlgmr.msra.gmra.mxu0 %v7209_v30  ;;  %v7083_v9 = vpack.c.bf16 %v7019_v8, %v7019_v8  ;;  %v7184_v47 = vrot.slane %v7164_v37, 7  ;;  %v7186_v29 = vrot.slane %v7165_v19, 7  ;;  %v7020_v60 = vperm.slane %v12917_v15, 7  ;;  %v11237_v8 = vld [vmem:[#allocation17 + $0x2d8] sm:$0xff] }
 0xe60   :  { %8042 = vmatmul.bf16.vlgmr.msra.gmra.mxu1 %v7210_v33  ;;  %8112 = vmatpush.bf16.msra.mxu3 %v11217_v22  ;;  %v6836_v62 = vpop.f32.mrf.mxu3  ;;  %v7166_v7 = vunpack.c.l.b16 %v7099_v38  ;;  %v7148_v43 = vunpack.c.l.b16 %v7081_v48  ;;  %v7149_v23 = vunpack.c.l.b16 %v7082_v27  ;;  %v7167_v10 = vunpack.c.l.b16 %v7100_v42  ;;  %v11236_v27 = vld [vmem:[#allocation17 + $0x2d0] sm:$0xff]  ;;  %v11227_v42 = vld [vmem:[#allocation17 + $0x288] sm:$0xff] }
 0xe61   :  { %8125 = vmatpush.bf16.msra.mxu0 %v11225_v6  ;;  %8138 = vmatpush.bf16.msra.mxu1 %v11233_v52  ;;  %v7150_v51 = vunpack.c.l.b16 %v7083_v9  ;;  %v7084_v45 = vpack.c.bf16 %v7020_v60, %v7020_v60  ;;  %v6052_v22 = vperm.slane %v5779_v35, 3  ;;  %v11238_v6 = vld [vmem:[#allocation17 + $0x2e0] sm:$0xff]  ;;  %v6051_v1 = vperm.slane %v5779_v35, 2 }
 0xe62   :  { %8055 = vmatmul.bf16.vlgmr.msra.gmra.mxu2 %v7211_v4  ;;  %v7188_v46 = vrot.slane %v7166_v7, 7  ;;  %v7185_v2 = vsel %vm4138_vm7, %v7184_v47, %v7148_v43  ;;  %v7187_v20 = vsel %vm4138_vm7, %v7186_v29, %v7149_v23  ;;  %v7190_v49 = vrot.slane %v7167_v10, 7  ;;  %v11218_v23 = vld [vmem:[#allocation17 + $0x240] sm:$0xff] }
 0xe63   :  { %v6875_v63 = vpop.f32.mrf.mxu2  ;;  %8151 = vmatpush.bf16.msra.mxu2 %v11241_v50  ;;  %v7212_v32 = vpack.c.b16 %v7185_v2, %v7185_v2  ;;  %v7213_v30 = vpack.c.b16 %v7187_v20, %v7187_v20  ;;  %v7151_v33 = vunpack.c.l.b16 %v7084_v45  ;;  %v6874_v12 = vadd.f32 %v12935_v40, %v6052_v22  ;;  %v11257_v45 = vld [vmem:[#allocation17 + $0x378] sm:$0xff] }
 0xe64   :  { %8113 = vmatpush.bf16.msra.mxu3 %v11216_v44  ;;  %v7189_v15 = vsel %vm4138_vm7, %v7188_v46, %v7150_v51  ;;  %v6050_v44 = vperm.slane %v5779_v35, 1  ;;  %v6054_v55 = vperm.slane %v5779_v35, 5  ;;  %v6055_v26 = vperm.slane %v5779_v35, 6  ;;  %v11249_v46 = vld [vmem:[#allocation17 + $0x338] sm:$0xff]  ;;  %v11235_v51 = vld [vmem:[#allocation17 + $0x2c8] sm:$0xff] }
 0xe65   :  { %8126 = vmatpush.bf16.msra.mxu0 %v11224_v3  ;;  %8139 = vmatpush.bf16.msra.mxu1 %v11232_v13  ;;  %v7214_v52 = vpack.c.b16 %v7189_v15, %v7189_v15  ;;  %v7191_v11 = vsel %vm4138_vm7, %v7190_v49, %v7151_v33  ;;  %v11220_v3 = vld [vmem:[#allocation17 + $0x250] sm:$0xff]  ;;  %v6861_v16 = vadd.f32 %v12926_v34, %v6051_v1  ;;  %v6049_v50 = vperm.slane %v5779_v35, 0  ;;  %v11265_v15 = vld [vmem:[#allocation17 + $0x3b8] sm:$0xff] }
 0xe66   :  { %v7215_v63 = vpack.c.b16 %v7191_v11, %v7191_v11  ;;  %v6053_v13 = vperm.slane %v5779_v35, 4  ;;  %v6056_v37 = vperm.slane %v5779_v35, 7  ;;  %v6848_v4 = vadd.f32 %v12923_v36, %v6050_v44  ;;  %v11210_v36 = vld [vmem:[#allocation17 + $0x200] sm:$0xff]  ;;  %v11273_v44 = vld [vmem:[#allocation17 + $0x3f8] sm:$0xff] }
 0xe67   :  { %8152 = vmatpush.bf16.msra.mxu2 %v11240_v21  ;;  %v6954_v40 = vrot.slane %v6874_v12, 5  ;;  %v6953_v34 = vrot.slane %v6861_v16, 6  ;;  %v11256_v12 = vld [vmem:[#allocation17 + $0x370] sm:$0xff] }
 0xe68   :  { %8114 = vmatpush.bf16.msra.mxu3 %v11215_v53  ;;  %v11219_v53 = vld [vmem:[#allocation17 + $0x248] sm:$0xff]  ;;  %v6952_v29 = vrot.slane %v6848_v4, 7 }
 0xe69   :  { %8127 = vmatpush.bf16.msra.mxu0 %v11223_v18  ;;  %8140 = vmatpush.bf16.msra.mxu1 %v11231_v24  ;;  %v6835_v18 = vadd.f32 %v12933_v0, %v6049_v50  ;;  %v6973_v7 = vsel %vm6960_vm6, %v6953_v34, %v6954_v40  ;;  %v6994_v10 = vsel %vm6980_vm9, %v6953_v34, %v6954_v40  ;;  %v11272_v50 = vld [vmem:[#allocation17 + $0x3f0] sm:$0xff] }
 0xe6b   :  { %8153 = vmatpush.bf16.msra.mxu2 %v11239_v31  ;;  %v11226_v31 = vld [vmem:[#allocation17 + $0x280] sm:$0xff]  ;;  %v6993_v35 = vsel %vm4138_vm7, %v6835_v18, %v6952_v29 }
 0xe6c   :  { %8115 = vmatpush.bf16.msra.mxu3 %v11214_v41 }
 0xe6d   :  { %8128 = vmatpush.bf16.msra.mxu0 %v11222_v54  ;;  %8141 = vmatpush.bf16.msra.mxu1 %v11230_v14  ;;  %v6972_v14 = vsel %vm5589_vm15, %v6835_v18, %v6952_v29  ;;  %v11262_v29 = vld [vmem:[#allocation17 + $0x3a0] sm:$0xff] }
 0xe6e   :  { %v6974_v49 = vsel %vm6962_vm8, %v6972_v14, %v6973_v7 }
 0xe6f   :  { %8068 = vmatmul.bf16.vlgmr.msrb.gmra.mxu3 %v7212_v32  ;;  %8081 = vmatmul.bf16.vlgmr.msrb.gmra.mxu0 %v7213_v30  ;;  %v6995_v32 = vsel %vm6982_vm10, %v6993_v35, %v6994_v10 }
 0xe70   :  { %8094 = vmatmul.bf16.vlgmr.msrb.gmra.mxu1 %v7214_v52  ;;  %8116 = vmatpush.bf16.msra.mxu3 %v11213_v59 }
 0xe71   :  { %8129 = vmatpush.bf16.msra.mxu0 %v11221_v5  ;;  %8154 = vmatpush.bf16.msra.mxu2 %v11238_v6  ;;  %v11248_v6 = vld [vmem:[#allocation17 + $0x330] sm:$0xff] }
 0xe72   :  { %v6899_v25 = vpop.f32.mrf.mxu0  ;;  %8142 = vmatpush.bf16.msra.mxu1 %v11229_v17  ;;  %8107 = vmatmul.bf16.vlgmr.msrb.gmra.mxu2 %v7215_v63  ;;  %v11234_v17 = vld [vmem:[#allocation17 + $0x2c0] sm:$0xff]  ;;  %v11255_v63 = vld [vmem:[#allocation17 + $0x368] sm:$0xff] }
 0xe73   :  { %v6900_v19 = vadd.f32 %v6899_v25, %v6054_v55  ;;  %v11264_v55 = vld [vmem:[#allocation17 + $0x3b0] sm:$0xff] }
 0xe74   :  { %v6912_v62 = vpop.f32.mrf.mxu1  ;;  %8117 = vmatpush.bf16.msra.mxu3 %v11212_v57 }
 0xe75   :  { %8130 = vmatpush.bf16.msra.mxu0 %v11220_v3  ;;  %v6913_v48 = vadd.f32 %v6912_v62, %v6055_v26  ;;  %8155 = vmatpush.bf16.msra.mxu2 %v11237_v8  ;;  %v6956_v60 = vrot.slane %v6900_v19, 3  ;;  %v11247_v3 = vld [vmem:[#allocation17 + $0x328] sm:$0xff] }
 0xe76   :  { %8143 = vmatpush.bf16.msra.mxu1 %v11228_v56 }
 0xe77   :  { %v6957_v54 = vrot.slane %v6913_v48, 2  ;;  %v11246_v48 = vld [vmem:[#allocation17 + $0x320] sm:$0xff] }
 0xe78   :  { %v6886_v38 = vpop.f32.mrf.mxu3  ;;  %8118 = vmatpush.bf16.msra.mxu3 %v11211_v58  ;;  %v11263_v58 = vld [vmem:[#allocation17 + $0x3a8] sm:$0xff] }
 0xe79   :  { %v6887_v9 = vadd.f32 %v6886_v38, %v6053_v13  ;;  %8131 = vmatpush.bf16.msra.mxu0 %v11219_v53  ;;  %8156 = vmatpush.bf16.msra.mxu2 %v11236_v27 }
 0xe7a   :  { %v6925_v21 = vpop.f32.mrf.mxu2  ;;  %v6901_v47 = vpop.f32.mrf.mxu0  ;;  %8144 = vmatpush.bf16.msra.mxu1 %v11227_v42 }
 0xe7b   :  { %v6926_v24 = vadd.f32 %v6925_v21, %v6056_v37  ;;  %v6955_v41 = vrot.slane %v6887_v9, 4  ;;  %v11271_v21 = vld [vmem:[#allocation17 + $0x3e8] sm:$0xff] }
 0xe7c   :  { %v6914_v43 = vpop.f32.mrf.mxu1  ;;  %8119 = vmatpush.bf16.msra.mxu3 %v11210_v36 }
 0xe7d   :  { %v6958_v0 = vrot.slane %v6926_v24, 1  ;;  %v6975_v2 = vsel %vm6964_vm11, %v6955_v41, %v6956_v60  ;;  %v6996_v20 = vsel %vm6984_vm12, %v6955_v41, %v6956_v60  ;;  %8132 = vmatpush.bf16.msra.mxu0 %v11218_v23  ;;  %8157 = vmatpush.bf16.msra.mxu2 %v11235_v51  ;;  %v11254_v24 = vld [vmem:[#allocation17 + $0x360] sm:$0xff] }
 0xe7e   :  { %8145 = vmatpush.bf16.msra.mxu1 %v11226_v31 }
 0xe7f   :  { %v6976_v59 = vsel %vm6966_vm13, %v6957_v54, %v6958_v0  ;;  %v6997_v22 = vsel %vm6986_vm0, %v6958_v0, %v6957_v54  ;;  %v11245_v54 = vld [vmem:[#allocation17 + $0x318] sm:$0xff] }
 0xe80   :  { %v6977_v30 = vsel %vm6968_vm14, %v6975_v2, %v6976_v59  ;;  %v6998_v5 = vsel %vm6988_vm1, %v6996_v20, %v6997_v22  ;;  %8164 = vmatpush.bf16.msrb.mxu3 %v11249_v46  ;;  %v6888_v1 = vpop.f32.mrf.mxu3  ;;  %v11270_v20 = vld [vmem:[#allocation17 + $0x3e0] sm:$0xff] }
 0xe81   :  { %v6978_v52 = vsel %vm6970_vm2, %v6974_v49, %v6977_v30  ;;  %v6999_v33 = vsel %vm6990_vm3, %v6995_v32, %v6998_v5  ;;  %8177 = vmatpush.bf16.msrb.mxu0 %v11257_v45  ;;  %8158 = vmatpush.bf16.msra.mxu2 %v11234_v17  ;;  %v11253_v30 = vld [vmem:[#allocation17 + $0x358] sm:$0xff] }
 0xe82   :  { %v7000_v25 = vrot.slane %v6999_v33, 1  ;;  %v12974_v11 = vmax.f32 %v6978_v52, 0.0  ;;  %v6927_v57 = vpop.f32.mrf.mxu2  ;;  %8190 = vmatpush.bf16.msrb.mxu1 %v11265_v15  ;;  %v11261_v52 = vld [vmem:[#allocation17 + $0x398] sm:$0xff]  ;;  %v11244_v33 = vld [vmem:[#allocation17 + $0x310] sm:$0xff] }
 0xe83   :  { %v11269_v57 = vld [vmem:[#allocation17 + $0x3d8] sm:$0xff] }
 0xe84   :  { %v12976_v62 = vmax.f32 %v7000_v25, 0.0  ;;  %8165 = vmatpush.bf16.msrb.mxu3 %v11248_v6  ;;  %v7021_v26 = vperm.slane %v12974_v11, 0  ;;  %v7022_v8 = vperm.slane %v12974_v11, 1  ;;  %v7023_v56 = vperm.slane %v12974_v11, 2 }
 0xe85   :  { %v7024_v16 = vperm.slane %v12974_v11, 3  ;;  %8203 = vmatpush.bf16.msrb.mxu2 %v11273_v44  ;;  %8178 = vmatpush.bf16.msrb.mxu0 %v11256_v12  ;;  %v7025_v44 = vperm.slane %v12974_v11, 4 }
 0xe86   :  { %v7037_v13 = vperm.slane %v12976_v62, 0  ;;  %v7038_v37 = vperm.slane %v12976_v62, 1  ;;  %8191 = vmatpush.bf16.msrb.mxu1 %v11264_v55  ;;  %v7085_v4 = vpack.c.bf16 %v7021_v26, %v7021_v26  ;;  %v7086_v40 = vpack.c.bf16 %v7022_v8, %v7022_v8  ;;  %v11252_v55 = vld [vmem:[#allocation17 + $0x350] sm:$0xff]  ;;  %v11243_v8 = vld [vmem:[#allocation17 + $0x308] sm:$0xff] }
 0xe87   :  { %v7039_v19 = vperm.slane %v12976_v62, 2  ;;  %v7040_v53 = vperm.slane %v12976_v62, 3  ;;  %v7087_v42 = vpack.c.bf16 %v7023_v56, %v7023_v56  ;;  %v7088_v18 = vpack.c.bf16 %v7024_v16, %v7024_v16  ;;  %v11260_v26 = vld [vmem:[#allocation17 + $0x390] sm:$0xff] }
 0xe88   :  { %8166 = vmatpush.bf16.msrb.mxu3 %v11247_v3  ;;  %v7101_v27 = vpack.c.bf16 %v7037_v13, %v7037_v13  ;;  %v7102_v38 = vpack.c.bf16 %v7038_v37, %v7038_v37  ;;  %v7152_v7 = vunpack.c.l.b16 %v7085_v4  ;;  %v7153_v60 = vunpack.c.l.b16 %v7086_v40  ;;  %v11251_v4 = vld [vmem:[#allocation17 + $0x348] sm:$0xff] }
 0xe89   :  { %v7103_v34 = vpack.c.bf16 %v7039_v19, %v7039_v19  ;;  %v7104_v9 = vpack.c.bf16 %v7040_v53, %v7040_v53  ;;  %8204 = vmatpush.bf16.msrb.mxu2 %v11272_v50  ;;  %8179 = vmatpush.bf16.msrb.mxu0 %v11255_v63  ;;  %v7154_v10 = vunpack.c.l.b16 %v7087_v42  ;;  %v7041_v0 = vperm.slane %v12976_v62, 4  ;;  %v11268_v63 = vld [vmem:[#allocation17 + $0x3d0] sm:$0xff]  ;;  %v11259_v19 = vld [vmem:[#allocation17 + $0x388] sm:$0xff]  ;;  %v11242_v53 = vld [vmem:[#allocation17 + $0x300] sm:$0xff] }
 0xe8a   :  { %v7168_v47 = vunpack.c.l.b16 %v7101_v27  ;;  %v7169_v36 = vunpack.c.l.b16 %v7102_v38  ;;  %8192 = vmatpush.bf16.msrb.mxu1 %v11263_v58  ;;  %v7155_v31 = vunpack.c.l.b16 %v7088_v18  ;;  %v7042_v2 = vperm.slane %v12976_v62, 5 }
 0xe8b   :  { %v7170_v41 = vunpack.c.l.b16 %v7103_v34  ;;  %v7171_v43 = vunpack.c.l.b16 %v7104_v9  ;;  %v7043_v35 = vperm.slane %v12976_v62, 6  ;;  %v7105_v17 = vpack.c.bf16 %v7041_v0, %v7041_v0  ;;  %v11267_v34 = vld [vmem:[#allocation17 + $0x3c8] sm:$0xff] }
 0xe8c   :  { %8167 = vmatpush.bf16.msrb.mxu3 %v11246_v48  ;;  %v7192_v23 = vrot.slane %v7168_v47, 7  ;;  %v7194_v46 = vrot.slane %v7169_v36, 7  ;;  %v7106_v1 = vpack.c.bf16 %v7042_v2, %v7042_v2  ;;  %v7044_v25 = vperm.slane %v12976_v62, 7 }
 0xe8d   :  { %v7196_v51 = vrot.slane %v7170_v41, 7  ;;  %v7198_v14 = vrot.slane %v7171_v43, 7  ;;  %8205 = vmatpush.bf16.msrb.mxu2 %v11271_v21  ;;  %8180 = vmatpush.bf16.msrb.mxu0 %v11254_v24  ;;  %v7107_v12 = vpack.c.bf16 %v7043_v35, %v7043_v35  ;;  %v7026_v3 = vperm.slane %v12974_v11, 5  ;;  %v11250_v24 = vld [vmem:[#allocation17 + $0x340] sm:$0xff] }
 0xe8e   :  { %v7193_v45 = vsel %vm4138_vm7, %v7192_v23, %v7152_v7  ;;  %v7195_v15 = vsel %vm4138_vm7, %v7194_v46, %v7153_v60  ;;  %8193 = vmatpush.bf16.msrb.mxu1 %v11262_v29  ;;  %v7172_v56 = vunpack.c.l.b16 %v7105_v17  ;;  %v7027_v16 = vperm.slane %v12974_v11, 6  ;;  %v11266_v41 = vld [vmem:[#allocation17 + $0x3c0] sm:$0xff] }
 0xe8f   :  { %v7216_v49 = vpack.c.b16 %v7193_v45, %v7193_v45  ;;  %v7217_v59 = vpack.c.b16 %v7195_v15, %v7195_v15  ;;  %v7197_v22 = vsel %vm4138_vm7, %v7196_v51, %v7154_v10  ;;  %v7199_v32 = vsel %vm4138_vm7, %v7198_v14, %v7155_v31 }
 0xe90   :  { %v7218_v5 = vpack.c.b16 %v7197_v22, %v7197_v22  ;;  %v7219_v6 = vpack.c.b16 %v7199_v32, %v7199_v32  ;;  %8168 = vmatpush.bf16.msrb.mxu3 %v11245_v54  ;;  %v7108_v50 = vpack.c.bf16 %v7044_v25, %v7044_v25  ;;  %v7173_v62 = vunpack.c.l.b16 %v7106_v1 }
 0xe91   :  { %8120 = vmatmul.bf16.vlgmr.msra.gmra.mxu3 %v7216_v49  ;;  %8133 = vmatmul.bf16.vlgmr.msra.gmra.mxu0 %v7217_v59  ;;  %v7089_v13 = vpack.c.bf16 %v7025_v44, %v7025_v44  ;;  %v7174_v37 = vunpack.c.l.b16 %v7107_v12  ;;  %v7028_v58 = vperm.slane %v12974_v11, 7  ;;  %v7090_v40 = vpack.c.bf16 %v7026_v3, %v7026_v3  ;;  %v11258_v11 = vld [vmem:[#allocation17 + $0x380] sm:$0xff] }
 0xe92   :  { %8206 = vmatpush.bf16.msrb.mxu2 %v11270_v20  ;;  %8146 = vmatmul.bf16.vlgmr.msra.gmra.mxu1 %v7218_v5  ;;  %v7200_v48 = vrot.slane %v7172_v56, 7  ;;  %v7091_v27 = vpack.c.bf16 %v7027_v16, %v7027_v16  ;;  %v7175_v38 = vunpack.c.l.b16 %v7108_v50  ;;  %v7202_v42 = vrot.slane %v7173_v62, 7 }
 0xe93   :  { %8159 = vmatmul.bf16.vlgmr.msra.gmra.mxu2 %v7219_v6  ;;  %8181 = vmatpush.bf16.msrb.mxu0 %v11253_v30  ;;  %v7156_v18 = vunpack.c.l.b16 %v7089_v13  ;;  %v7204_v9 = vrot.slane %v7174_v37, 7  ;;  %v7092_v21 = vpack.c.bf16 %v7028_v58, %v7028_v58  ;;  %v7157_v47 = vunpack.c.l.b16 %v7090_v40  ;;  %v11295_v30 = vld [vmem:[#allocation19] ss:$0 sm:$0xff] }
 0xe94   :  { %8194 = vmatpush.bf16.msrb.mxu1 %v11261_v52  ;;  %8169 = vmatpush.bf16.msrb.mxu3 %v11244_v33  ;;  %v7158_v29 = vunpack.c.l.b16 %v7091_v27  ;;  %v7206_v7 = vrot.slane %v7175_v38, 7 }
 0xe95   :  { %v7201_v36 = vsel %vm4138_vm7, %v7200_v48, %v7156_v18  ;;  %v7203_v60 = vsel %vm4138_vm7, %v7202_v42, %v7157_v47  ;;  %v7159_v23 = vunpack.c.l.b16 %v7092_v21 }
 0xe96   :  { %8207 = vmatpush.bf16.msrb.mxu2 %v11269_v57  ;;  %v7205_v43 = vsel %vm4138_vm7, %v7204_v9, %v7158_v29  ;;  %v7220_v46 = vpack.c.b16 %v7201_v36, %v7201_v36  ;;  %v7221_v10 = vpack.c.b16 %v7203_v60, %v7203_v60 }
 0xe97   :  { %8182 = vmatpush.bf16.msrb.mxu0 %v11252_v55  ;;  %v7207_v54 = vsel %vm4138_vm7, %v7206_v7, %v7159_v23  ;;  %v7222_v0 = vpack.c.b16 %v7205_v43, %v7205_v43 }
 0xe98   :  { %8195 = vmatpush.bf16.msrb.mxu1 %v11260_v26  ;;  %8170 = vmatpush.bf16.msrb.mxu3 %v11243_v8  ;;  %v7223_v51 = vpack.c.b16 %v7207_v54, %v7207_v54 }
 0xe9a   :  { %8208 = vmatpush.bf16.msrb.mxu2 %v11268_v63 }
 0xe9b   :  { %8183 = vmatpush.bf16.msrb.mxu0 %v11251_v4 }
 0xe9c   :  { %8196 = vmatpush.bf16.msrb.mxu1 %v11259_v19  ;;  %8171 = vmatpush.bf16.msrb.mxu3 %v11242_v53 }
 0xe9e   :  { %8209 = vmatpush.bf16.msrb.mxu2 %v11267_v34 }
 0xe9f   :  { %8184 = vmatpush.bf16.msrb.mxu0 %v11250_v24 }
 0xea0   :  { %8197 = vmatpush.bf16.msrb.mxu1 %v11258_v11 }
 0xea1   :  { %8172 = vmatmul.bf16.vlgmr.msrb.gmra.mxu3 %v7220_v46  ;;  %v13018_v46 = vld [vmem:[#allocation1 + $0x2] ss:$9 sm:$0xff] }
 0xea2   :  { %8210 = vmatpush.bf16.msrb.mxu2 %v11266_v41  ;;  %8185 = vmatmul.bf16.vlgmr.msrb.gmra.mxu0 %v7221_v10  ;;  %8272 = vst [vmem:[#allocation1] sm:$0xff] %v12848_v28 }
 0xea3   :  { %8198 = vmatmul.bf16.vlgmr.msrb.gmra.mxu1 %v7222_v0  ;;  %v8302_v0 = vld [vmem:[#allocation20 + $0x78] sm:$0xff] }
 0xea4   :  { %8314 = vmatpush.msra.mxu3 %v8302_v0 }
 0xea5   :  { %8211 = vmatmul.bf16.vlgmr.msrb.gmra.mxu2 %v7223_v51  ;;  %v8301_v51 = vld [vmem:[#allocation20 + $0x70] sm:$0xff] }
 0xea6   :  { %8315 = vmatpush.msra.mxu3 %v8301_v51 }
 0xea9   :  { %v13021_v10 = vld [vmem:[#allocation1 + $0x2] ss:$9 sm:$0xff] }
 0xeaa   :  { %8278 = vst [vmem:[#allocation1] sm:$0xff] %v12848_v28 }
 0xeb1   :  { %v13024_v54 = vld [vmem:[#allocation1 + $0x3] ss:$9 sm:$0xff] }
 0xeb2   :  { %8281 = vst [vmem:[#allocation1] sm:$0xff] %v12848_v28 }
 0xedc   :  { %v8030_v31 = vpop.f32.mrf.mxu0 }
 0xedd   :  { %v8043_v14 = vpop.f32.mrf.mxu1 }
 0xee2   :  { %v8017_v2 = vpop.f32.mrf.mxu3 }
 0xee3   :  { %v8018_v52 = vadd.f32 %v11295_v30, %v8017_v2  ;;  %v8297_v30 = vld [vmem:[#allocation20 + $0x50] sm:$0xff] }
 0xee4   :  { %v8032_v20 = vpop.f32.mrf.mxu0 }
 0xee5   :  { %v8045_v45 = vpop.f32.mrf.mxu1  ;;  %v8056_v15 = vpop.f32.mrf.mxu2  ;;  %v8031_v1 = vadd.f32 %v8030_v31, %v8018_v52  ;;  %v8295_v52 = vld [vmem:[#allocation20 + $0x40] sm:$0xff] }
 0xee7   :  { %v8044_v25 = vadd.f32 %v8043_v14, %v8031_v1  ;;  %v8300_v14 = vld [vmem:[#allocation20 + $0x68] sm:$0xff]  ;;  %v8294_v1 = vld [vmem:[#allocation20 + $0x38] sm:$0xff] }
 0xee8   :  { %8316 = vmatpush.msra.mxu3 %v8300_v14 }
 0xee9   :  { %v8057_v44 = vadd.f32 %v8056_v15, %v8044_v25  ;;  %v8299_v15 = vld [vmem:[#allocation20 + $0x60] sm:$0xff] }
 0xeea   :  { %v8019_v35 = vpop.f32.mrf.mxu3  ;;  %8317 = vmatpush.msra.mxu3 %v8299_v15 }
 0xeec   :  { %v8082_v49 = vpop.f32.mrf.mxu0 }
 0xeed   :  { %v8095_v59 = vpop.f32.mrf.mxu1  ;;  %v8058_v22 = vpop.f32.mrf.mxu2 }
 0xef2   :  { %v8069_v32 = vpop.f32.mrf.mxu3 }
 0xef3   :  { %v8070_v12 = vadd.f32 %v8069_v32, %v8057_v44 }
 0xef4   :  { %v8084_v5 = vpop.f32.mrf.mxu0 }
 0xef5   :  { %v8097_v6 = vpop.f32.mrf.mxu1  ;;  %v8108_v33 = vpop.f32.mrf.mxu2  ;;  %v8083_v55 = vadd.f32 %v8082_v49, %v8070_v12  ;;  %v8296_v5 = vld [vmem:[#allocation20 + $0x48] sm:$0xff] }
 0xef6   :  { %v8292_v12 = vld [vmem:[#allocation20 + $0x28] sm:$0xff] }
 0xef7   :  { %v8096_v8 = vadd.f32 %v8095_v59, %v8083_v55  ;;  %v8298_v59 = vld [vmem:[#allocation20 + $0x58] sm:$0xff] }
 0xef8   :  { %8318 = vmatpush.msra.mxu3 %v8298_v59 }
 0xef9   :  { %v8109_v16 = vadd.f32 %v8108_v33, %v8096_v8 }
 0xefa   :  { %v8071_v17 = vpop.f32.mrf.mxu3  ;;  %8319 = vmatpush.msra.mxu3 %v8297_v30 }
 0xefc   :  { %8320 = vmatpush.msra.mxu3 %v8296_v5 }
 0xefd   :  { %v8110_v57 = vpop.f32.mrf.mxu2 }
 0xefe   :  { %8321 = vmatpush.msra.mxu3 %v8295_v52  ;;  %v8293_v57 = vld [vmem:[#allocation20 + $0x30] sm:$0xff] }
 0xf00   :  { %8322 = vmatpush.msra.mxu3 %v8294_v1 }
 0xf02   :  { %8323 = vmatpush.msra.mxu3 %v8293_v57 }
 0xf04   :  { %8324 = vmatpush.msra.mxu3 %v8292_v12 }
 0xf0e   :  { %v8134_v3 = vpop.f32.mrf.mxu0 }
 0xf0f   :  { %v8147_v26 = vpop.f32.mrf.mxu1 }
 0xf14   :  { %v8121_v56 = vpop.f32.mrf.mxu3 }
 0xf15   :  { %v8122_v63 = vadd.f32 %v8121_v56, %v8109_v16  ;;  %v8290_v56 = vld [vmem:[#allocation20 + $0x18] sm:$0xff] }
 0xf16   :  { %v8160_v50 = vpop.f32.mrf.mxu2  ;;  %v8136_v62 = vpop.f32.mrf.mxu0 }
 0xf17   :  { %v8149_v13 = vpop.f32.mrf.mxu1  ;;  %v8135_v37 = vadd.f32 %v8134_v3, %v8122_v63 }
 0xf19   :  { %v8148_v40 = vadd.f32 %v8147_v26, %v8135_v37  ;;  %v8291_v26 = vld [vmem:[#allocation20 + $0x20] sm:$0xff]  ;;  %v8288_v37 = vld [vmem:[#allocation20 + $0x8] sm:$0xff] }
 0xf1a   :  { %8325 = vmatpush.msra.mxu3 %v8291_v26 }
 0xf1b   :  { %v8161_v48 = vadd.f32 %v8160_v50, %v8148_v40  ;;  %v8289_v50 = vld [vmem:[#allocation20 + $0x10] sm:$0xff]  ;;  %v8287_v40 = vld [vmem:[#allocation20] sm:$0xff] }
 0xf1c   :  { %v8123_v58 = vpop.f32.mrf.mxu3  ;;  %8326 = vmatpush.msra.mxu3 %v8290_v56 }
 0xf1e   :  { %v8162_v4 = vpop.f32.mrf.mxu2  ;;  %8327 = vmatpush.msra.mxu3 %v8289_v50 }
 0xf1f   :  { %v8186_v19 = vpop.f32.mrf.mxu0 }
 0xf20   :  { %v8199_v53 = vpop.f32.mrf.mxu1  ;;  %8328 = vmatpush.msra.mxu3 %v8288_v37 }
 0xf22   :  { %8329 = vmatpush.msra.mxu3 %v8287_v40 }
 0xf24   :  { %v8173_v27 = vpop.f32.mrf.mxu3 }
 0xf25   :  { %v8174_v38 = vadd.f32 %v8173_v27, %v8161_v48 }
 0xf27   :  { %v8187_v42 = vadd.f32 %v8186_v19, %v8174_v38  ;;  %v8188_v34 = vpop.f32.mrf.mxu0 }
 0xf28   :  { %v8212_v18 = vpop.f32.mrf.mxu2  ;;  %v8201_v9 = vpop.f32.mrf.mxu1 }
 0xf29   :  { %v8200_v21 = vadd.f32 %v8199_v53, %v8187_v42 }
 0xf2b   :  { %v8213_v24 = vadd.f32 %v8212_v18, %v8200_v21 }
 0xf2c   :  { %v8175_v47 = vpop.f32.mrf.mxu3 }
 0xf2d   :  { %v8217_v11 = vrot.slane %v8213_v24, 1  ;;  %v13003_v36 = vadd.f32 %v8213_v24, %v12877_v39  ;;  %v8282_v47 = vld [vmem:[#allocation1 + $0x3] ss:$9 sm:$0xff] }
 0xf2f   :  { %v13006_v29 = vadd.f32 %v8217_v11, %v12871_v61  ;;  %v8221_v7 = vsel %vm5589_vm15, %v13003_v36, 0.0  ;;  %v8227_v60 = vmul.f32 %v13003_v36, %v13003_v36 }
 0xf30   :  { %v8214_v41 = vpop.f32.mrf.mxu2  ;;  %8222 = vadd.xlane.f32.xlu0 %v8221_v7 }
 0xf31   :  { %v8229_v43 = vsel %vm5589_vm15, %v8227_v60, 0.0  ;;  %v8224_v23 = vsel %vm5589_vm15, %v13006_v29, 0.0  ;;  %v8228_v39 = vmul.f32 %v13006_v29, %v13006_v29  ;;  %v11296_v60 = vld [vmem:[#allocation22] ss:$0 sm:$0xff] }
 0xf32   :  { %8230 = vadd.xlane.f32.xlu2 %v8229_v43  ;;  %8225 = vadd.xlane.f32.xlu1 %v8224_v23 }
 0xf33   :  { %v8232_v61 = vsel %vm5589_vm15, %v8228_v39, 0.0 }
 0xf38   :  { %8233 = vadd.xlane.f32.xlu0 %v8232_v61 }
 0xfa3   :  { %v8223_v31 = vpop.xlane.xlu0 %8222 }
 0xfa4   :  { %v8235_v2 = vmul.f32 0.009259259, %v8223_v31 }
 0xfa5   :  { %v8231_v20 = vpop.xlane.xlu2 %8230  ;;  %v8226_v45 = vpop.xlane.xlu1 %8225 }
 0xfa6   :  { %v8239_v35 = vmul.f32 %v8235_v2, %v8235_v2  ;;  %v8237_v49 = vmul.f32 0.009259259, %v8231_v20  ;;  %v8236_v32 = vmul.f32 0.009259259, %v8226_v45  ;;  %v8243_v19 = vsub.f32 %v13003_v36, %v8235_v2 }
 0xfa8   :  { %v8241_v22 = vsub.f32 %v8237_v49, %v8239_v35  ;;  %v8240_v33 = vmul.f32 %v8236_v32, %v8236_v32  ;;  %v8244_v9 = vsub.f32 %v13006_v29, %v8236_v32 }
 0xfaa   :  { %v8245_v28 = vadd.f32 1e-05, %v8241_v22 }
 0xfab   :  { %v8234_v6 = vpop.xlane.xlu0 %8233 }
 0xfac   :  { %11453 = vrsqrt.f32 %v8245_v28  ;;  %v8238_v17 = vmul.f32 0.009259259, %v8234_v6  ;;  %vm8253_vm15 = vweird.f32 %v8245_v28 }
 0xfae   :  { %v8242_v25 = vsub.f32 %v8238_v17, %v8240_v33 }
 0xfb0   :  { %v8246_v44 = vadd.f32 1e-05, %v8242_v25 }
 0xfb2   :  { %v11454_v55 = vpop.eup %11453  ;;  %11455 = vrsqrt.f32 %v8246_v44  ;;  %vm8263_vm6 = vweird.f32 %v8246_v44 }
 0xfb3   :  { %v8248_v3 = vmul.f32 %v11454_v55, %v8245_v28  ;;  %vm8254_vm7 = vweird.f32 %v11454_v55 }
 0xfb4   :  { %vm8255_vm4 = vmor %vm8253_vm15, %vm8254_vm7 }
 0xfb5   :  { %v8249_v8 = vmul.f32 %v11454_v55, %v8248_v3 }
 0xfb7   :  { %v8250_v16 = vmul.f32 0.5, %v8249_v8 }
 0xfb8   :  { %v11456_v62 = vpop.eup %11455 }
 0xfb9   :  { %v8251_v63 = vsub.f32 1.5, %v8250_v16  ;;  %v8258_v13 = vmul.f32 %v11456_v62, %v8246_v44  ;;  %vm8264_vm5 = vweird.f32 %v11456_v62 }
 0xfba   :  { %vm8265_vm8 = vmor %vm8263_vm6, %vm8264_vm5 }
 0xfbb   :  { %v8252_v58 = vmul.f32 %v11454_v55, %v8251_v63  ;;  %v8259_v4 = vmul.f32 %v11456_v62, %v8258_v13 }
 0xfbd   :  { %v8256_v53 = vsel %vm8255_vm4, %v11454_v55, %v8252_v58  ;;  %v8260_v48 = vmul.f32 0.5, %v8259_v4 }
 0xfbe   :  { %v8267_v27 = vmul.f32 %v8256_v53, %v8243_v19 }
 0xfbf   :  { %v8261_v38 = vsub.f32 1.5, %v8260_v48 }
 0xfc0   :  { %v8276_v42 = vmul.f32 %v13018_v46, %v8267_v27 }
 0xfc1   :  { %v8262_v34 = vmul.f32 %v11456_v62, %v8261_v38 }
 0xfc2   :  { %v8285_v18 = vadd.f32 %v13024_v54, %v8276_v42 }
 0xfc3   :  { %v8266_v21 = vsel %vm8265_vm8, %v11456_v62, %v8262_v34 }
 0xfc4   :  { %8309 = vst [vmem:[#allocation1] ss:$9 sm:$0xff] %v8285_v18  ;;  %v8268_v24 = vmul.f32 %v8266_v21, %v8244_v9 }
 0xfc6   :  { %v8277_v11 = vmul.f32 %v13021_v10, %v8268_v24 }
 0xfc8   :  { %v8286_v36 = vadd.f32 %v8282_v47, %v8277_v11 }
 0xfca   :  { %8311 = vst [vmem:[#allocation1 + $0x1] ss:$9 sm:$0xff] %v8286_v36 }
 0xfd1   :  { %v8312_v7 = vld [vmem:[#allocation1] sm:$0xff] }
 0xfd2   :  { %8330 = vmatmul.f32.vlgmr.msra.gmra.mxu3 %v8312_v7 }
0x1055   :  { %v8331_v41 = vpop.f32.mrf.mxu3 }
0x1056   :  { %v8332_v29 = vadd.f32 %v11296_v60, %v8331_v41 }
0x1058   :  { %8334 = vst [vmem:[#allocation23] sm:$0x3] %v8332_v29 }
0x1059   :  { %8345 = dma.vmem_to_hbm [thread:$0]  %s8341_s12, 32, %s8343_s14, [#allocation4]  }
0x105a   :  { %11811 = dma.done.wait [#allocation4], 32  }
0x105b   :  { %11812 = vsyncadd [#allocation4], 4294967264 }
0x105c   :  { %8350 = vsyncpa [#allocation3], 1 }
0x105d   :  { %8351 = vsyncpa [#allocation6], 1 }
0x105e   :  { %8352 = vsyncpa [#allocation9], 1 }
0x105f   :  { %8353 = vsyncpa [#allocation12], 1 }
0x1060   :  { %8354 = vsyncpa [#allocation15], 1 }
0x1061   :  { %8355 = vsyncpa [#allocation18], 1 }
0x1062   :  { %8356 = vsyncpa [#allocation21], 1 }
0x1063   :  { %8357 = vsyncpa [#allocation4], 1 }

</bundles_post_ra>
